<compile_context>
chip_gen: v7x
topology: tpu7x:2x2x1
jax: 0.10.0
libtpu: 0.0.40
codegen_flags: <defaults>
</compile_context>

<pallas_src>
import jax
import jax.numpy as jnp
from jax.experimental import pallas as pl
from jax.experimental.pallas import tpu as pltpu


# ------------------------------ kernel factory --------------------------------

def _make_quake_kernel(tb, bh, bw, cin):
    """Fused Quake-block kernel for a batch chunk of `tb` images.

    All activations / patch matrices live in 2-D VMEM scratch with rows =
    flattened (image, y, x) and channels along lanes:
      xs   : (tb*bh*bw, 16*cin)        4x4 space-to-depth input
      pa   : (tb*ha*wa, 4*16*cin)      conv2A K-stacked patches
      a    : (tb*ha*wa, 32)            relu(conv2A)
      pb   : (tb*hb*wb, 16*32)         conv2B K-stacked patches
      halo : (tb*(hb+2)*(wb+2), 128)   zero-padded conv2C/D input
      pcd  : (tb*hb*wb, 9*128)         conv2C/D K-stacked patches
    conv2B/C/D channels are zero-padded to 128 (lane-dense everywhere).
    """
    ha, wa = bh - 1, bw - 1                          # conv2A output spatial
    hb, wb = (ha - 4) // 2 + 1, (wa - 4) // 2 + 1    # conv2B/C/D output spatial
    ph, pw = hb + 2, wb + 2                          # halo-padded spatial
    a_hw, b_hw, p_hw = ha * wa, hb * wb, ph * pw
    c16 = 16 * cin
    f32, bf16 = jnp.float32, jnp.bfloat16

    def kernel(xs_ref, wA_ref, bA_ref, wB_ref, bB_ref, wC_ref, bC_ref,
               wD_ref, bD_ref, out_ref,
               pa_ref, a_ref, pb_ref, act_ref, halo_ref, pcd_ref):

        # ---------- conv2A (8x8 s4 == 2x2 s1 over space-to-depth), ReLU ------
        # Patch assembly via static ref slices (no gather matmuls on the MXU).
        for di in range(2):
            for dj in range(2):
                col = (di * 2 + dj) * c16
                for n in range(tb):
                    for oy in range(ha):
                        src = n * bh * bw + (oy + di) * bw + dj
                        dst = n * a_hw + oy * wa
                        pa_ref[pl.ds(dst, wa), col:col + c16] = \
                            xs_ref[0, pl.ds(src, wa), :]
        a = jnp.dot(pa_ref[...].astype(bf16), wA_ref[...],
                    preferred_element_type=f32)
        a_ref[...] = jnp.maximum(a + bA_ref[...], 0.0)

        # ---------- conv2B (4x4 s2), ReLU -> skip_1 ---------------------------
        for ki in range(4):
            for kj in range(4):
                col = (ki * 4 + kj) * 32
                for n in range(tb):
                    for oy in range(hb):
                        src = n * a_hw + (2 * oy + ki) * wa + kj
                        dst = n * b_hw + oy * wb
                        pb_ref[pl.ds(dst, wb), col:col + 32] = \
                            a_ref[pl.ds(src, wb, 2), :]
        skip1 = jnp.dot(pb_ref[...].astype(bf16), wB_ref[...],
                        preferred_element_type=f32)
        skip1 = jnp.maximum(skip1 + bB_ref[...], 0.0)        # (tb*b_hw, 128)

        # ---------- helpers shared by the two 3x3 "same" convs ----------------
        def write_halo():        # act_ref -> interior of zero-padded halo_ref
            for n in range(tb):
                for y in range(hb):
                    src = n * b_hw + y * wb
                    dst = n * p_hw + (y + 1) * pw + 1
                    halo_ref[pl.ds(dst, wb), :] = act_ref[pl.ds(src, wb), :]

        def gather_3x3_patches():   # halo_ref -> pcd_ref (K-stacked)
            for ki in range(3):
                for kj in range(3):
                    col = (ki * 3 + kj) * 128
                    for n in range(tb):
                        for oy in range(hb):
                            src = n * p_hw + (oy + ki) * pw + kj
                            dst = n * b_hw + oy * wb
                            pcd_ref[pl.ds(dst, wb), col:col + 128] = \
                                halo_ref[pl.ds(src, wb), :]

        halo_ref[...] = jnp.zeros_like(halo_ref)   # border stays zero for C & D

        # ---------- conv2C (3x3 s1 p1); skip_2 = conv + skip_1 (all f32) ------
        act_ref[...] = skip1
        write_halo()
        gather_3x3_patches()
        skip2 = jnp.dot(pcd_ref[...], wC_ref[...],
                        preferred_element_type=f32) + bC_ref[...] + skip1

        # ---------- conv2D (3x3 s1 p1); out = ReLU(conv + skip_2) -------------
        act_ref[...] = jnp.maximum(skip2, 0.0)
        write_halo()
        gather_3x3_patches()
        out = jnp.dot(pcd_ref[...], wD_ref[...],
                      preferred_element_type=f32) + bD_ref[...] + skip2
        out_ref[0] = jnp.maximum(out, 0.0).astype(out_ref.dtype)

    return kernel


# ------------------------------ host wrappers ---------------------------------

def init_quake_params(key, in_channels, dtype=jnp.float32):
    """Deterministic parameter init; weights stored HWIO."""
    def conv_params(k, kh, kw, ci, co):
        kw_, kb_ = jax.random.split(k)
        bound = float(kh * kw * ci) ** -0.5
        w = jax.random.uniform(kw_, (kh, kw, ci, co), dtype, -bound, bound)
        b = jax.random.uniform(kb_, (co,), dtype, -bound, bound)
        return w, b

    kA, kB, kC, kD = jax.random.split(key, 4)
    wA, bA = conv_params(kA, 8, 8, in_channels, 32)
    wB, bB = conv_params(kB, 4, 4, 32, 64)
    wC, bC = conv_params(kC, 3, 3, 64, 64)
    wD, bD = conv_params(kD, 3, 3, 64, 64)
    return dict(wA=wA, bA=bA, wB=wB, bB=bB, wC=wC, bC=bC, wD=wD, bD=bD)


def prepare_kernel_params(params):
    """One-time weight rearrangement into K-stacked, lane-padded matrices."""
    cin = params["wA"].shape[2]
    # conv2A as a 2x2 conv over the 4x4 space-to-depth view, K-stacked, bf16.
    wA = params["wA"].reshape(2, 4, 2, 4, cin, 32).transpose(0, 2, 1, 3, 4, 5)
    wA = wA.reshape(4 * 16 * cin, 32).astype(jnp.bfloat16)
    # conv2B K-stacked (16*32, 64) with output channels zero-padded to 128.
    wB = params["wB"].reshape(16 * 32, 64).astype(jnp.float32)
    wB = jnp.pad(wB, ((0, 0), (0, 64))).astype(jnp.bfloat16)

    def pad_cd(w):       # conv2C/D: pad in/out channels 64 -> 128, keep f32.
        wp = jnp.zeros((3, 3, 128, 128), jnp.float32)
        wp = wp.at[:, :, :64, :64].set(w.astype(jnp.float32))
        return wp.reshape(9 * 128, 128)

    def pad_b(b):
        return jnp.pad(b.astype(jnp.float32), (0, 64)).reshape(1, 128)

    return dict(
        wA=wA, bA=params["bA"].astype(jnp.float32).reshape(1, 32),
        wB=wB, bB=pad_b(params["bB"]),
        wC=pad_cd(params["wC"]), bC=pad_b(params["bC"]),
        wD=pad_cd(params["wD"]), bD=pad_b(params["bD"]),
    )


def _pick_tb(n, a_hw, target_rows=256):
    """Largest divisor of n with tb*a_hw <= target (fills the MXU M dim)."""
    tb = 1
    for cand in range(1, n + 1):
        if n % cand == 0 and cand * a_hw <= max(target_rows, a_hw):
            tb = cand
    return tb


@jax.jit
def quake_block_forward(x_nchw, kparams):
    """Quake block forward.  x is NCHW; returns NCHW (N, 64, Hout, Wout)."""
    n, cin, h, w = x_nchw.shape
    assert h % 4 == 0 and w % 4 == 0 and h >= 20 and w >= 20, (h, w)
    bh, bw = h // 4, w // 4
    ha, wa = bh - 1, bw - 1                          # conv2A out
    assert ha >= 4 and wa >= 4, (ha, wa)
    hb, wb = (ha - 4) // 2 + 1, (wa - 4) // 2 + 1    # conv2B/C/D out
    a_hw, b_hw = ha * wa, hb * wb
    p_hw = (hb + 2) * (wb + 2)
    c16 = 16 * cin

    tb = _pick_tb(n, a_hw)
    nc = n // tb

    # NCHW -> NHWC -> 4x4 space-to-depth -> (chunks, tb*bh*bw, 16*cin).
    x = jnp.transpose(x_nchw, (0, 2, 3, 1)).astype(jnp.float32)
    xs = x.reshape(n, bh, 4, bw, 4, cin).transpose(0, 1, 3, 2, 4, 5)
    xs = xs.reshape(nc, tb * bh * bw, c16)

    kp = kparams
    args = (xs, kp["wA"], kp["bA"], kp["wB"], kp["bB"],
            kp["wC"], kp["bC"], kp["wD"], kp["bD"])

    def full_spec(a):
        zeros = (0,) * a.ndim
        return pl.BlockSpec(a.shape, lambda i: zeros)

    kernel = _make_quake_kernel(tb, bh, bw, cin)
    out = pl.pallas_call(
        kernel,
        out_shape=jax.ShapeDtypeStruct((nc, tb * b_hw, 128), jnp.float32),
        grid_spec=pltpu.PrefetchScalarGridSpec(
            num_scalar_prefetch=0,
            grid=(nc,),
            in_specs=[pl.BlockSpec((1, tb * bh * bw, c16), lambda i: (i, 0, 0))]
                    + [full_spec(a) for a in args[1:]],
            out_specs=pl.BlockSpec((1, tb * b_hw, 128), lambda i: (i, 0, 0)),
            scratch_shapes=[
                pltpu.VMEM((tb * a_hw, 4 * c16), jnp.float32),   # pa patches
                pltpu.VMEM((tb * a_hw, 32), jnp.float32),        # relu(convA)
                pltpu.VMEM((tb * b_hw, 16 * 32), jnp.float32),   # pb patches
                pltpu.VMEM((tb * b_hw, 128), jnp.float32),       # act (skip1/r2)
                pltpu.VMEM((tb * p_hw, 128), jnp.float32),       # zero halo
                pltpu.VMEM((tb * b_hw, 9 * 128), jnp.float32),   # pc/pd patches
            ]),
        compiler_params=pltpu.CompilerParams(
            dimension_semantics=("parallel",)),
    )(*args)

    out = out.reshape(n, hb, wb, 128)[..., :64]
    return jnp.transpose(out, (0, 3, 1, 2))          # NHWC -> NCHW


# ------------------------------ pure-JAX reference ----------------------------

def _conv_ref(x_nhwc, w_hwio, b, stride, padding):
    y = jax.lax.conv_general_dilated(
        x_nhwc, w_hwio, window_strides=(stride, stride),
        padding=[(padding, padding), (padding, padding)],
        dimension_numbers=("NHWC", "HWIO", "NHWC"))
    return y + b


def quake_block_ref(x_nchw, params):
    x = jnp.transpose(x_nchw, (0, 2, 3, 1))
    x = jax.nn.relu(_conv_ref(x, params["wA"], params["bA"], 4, 0))
    skip1 = jax.nn.relu(_conv_ref(x, params["wB"], params["bB"], 2, 0))
    x = _conv_ref(skip1, params["wC"], params["bC"], 1, 1)
    skip2 = x + skip1
    x = jax.nn.relu(skip2)
    x = _conv_ref(x, params["wD"], params["bD"], 1, 1)
    x = jax.nn.relu(x + skip2)
    return jnp.transpose(x, (0, 3, 1, 2))


# ----------------------------------- main --------------------------------------

if __name__ == "__main__":
    key = jax.random.PRNGKey(0)
    k_x, k_p = jax.random.split(key)

    # Small input consistent with the conv chain: 36 -> 8 -> 3 spatial.
    N, C, H, W = 2, 4, 36, 36
    x = jax.random.normal(k_x, (N, C, H, W), jnp.float32)
    params = init_quake_params(k_p, C)
    kparams = prepare_kernel_params(params)

    out = jax.block_until_ready(quake_block_forward(x, kparams))
    ref = jax.block_until_ready(quake_block_ref(x, params))

    assert out.shape == (N, 64, 3, 3), out.shape
    max_err = float(jnp.max(jnp.abs(out - ref)))
    # conv2A/2B use bf16 MXU inputs (f32 accumulation); conv2C/2D are f32.
    assert jnp.allclose(out, ref, atol=3e-2, rtol=3e-2), max_err

    print("KERNEL_OK")
</pallas_src>

<mosaic_0001>
module attributes {stable_mosaic.version = 11 : i64} {
  func.func @kernel(%arg0: i32, %arg1: memref<1x162x64xf32, #tpu.memory_space<vmem>>, %arg2: memref<256x32xbf16, #tpu.memory_space<vmem>>, %arg3: memref<1x32xf32, #tpu.memory_space<vmem>>, %arg4: memref<512x128xbf16, #tpu.memory_space<vmem>>, %arg5: memref<1x128xf32, #tpu.memory_space<vmem>>, %arg6: memref<1152x128xf32, #tpu.memory_space<vmem>>, %arg7: memref<1x128xf32, #tpu.memory_space<vmem>>, %arg8: memref<1152x128xf32, #tpu.memory_space<vmem>>, %arg9: memref<1x128xf32, #tpu.memory_space<vmem>>, %arg10: memref<1x18x128xf32, #tpu.memory_space<vmem>>, %arg11: memref<128x256xf32, #tpu.memory_space<vmem>>, %arg12: memref<128x32xf32, #tpu.memory_space<vmem>>, %arg13: memref<18x512xf32, #tpu.memory_space<vmem>>, %arg14: memref<18x128xf32, #tpu.memory_space<vmem>>, %arg15: memref<50x128xf32, #tpu.memory_space<vmem>>, %arg16: memref<18x1152xf32, #tpu.memory_space<vmem>>) attributes {dimension_semantics = [#tpu.dimension_semantics<parallel>], iteration_bounds = array<i64: 1>, scalar_prefetch = 0 : i64, scratch_operands = 6 : i64, tpu.core_type = #tpu.core_type<tc>, window_params = [{transform_indices = @transform_0, window_bounds = array<i64: 1, 162, 64>}, {pipeline_mode = #tpu.pipeline_mode<synchronous>, transform_indices = @transform_1, window_bounds = array<i64: 256, 32>}, {pipeline_mode = #tpu.pipeline_mode<synchronous>, transform_indices = @transform_2, window_bounds = array<i64: 1, 32>}, {pipeline_mode = #tpu.pipeline_mode<synchronous>, transform_indices = @transform_3, window_bounds = array<i64: 512, 128>}, {pipeline_mode = #tpu.pipeline_mode<synchronous>, transform_indices = @transform_4, window_bounds = array<i64: 1, 128>}, {pipeline_mode = #tpu.pipeline_mode<synchronous>, transform_indices = @transform_5, window_bounds = array<i64: 1152, 128>}, {pipeline_mode = #tpu.pipeline_mode<synchronous>, transform_indices = @transform_6, window_bounds = array<i64: 1, 128>}, {pipeline_mode = #tpu.pipeline_mode<synchronous>, transform_indices = @transform_7, window_bounds = array<i64: 1152, 128>}, {pipeline_mode = #tpu.pipeline_mode<synchronous>, transform_indices = @transform_8, window_bounds = array<i64: 1, 128>}, {transform_indices = @transform_9, window_bounds = array<i64: 1, 18, 128>}]} {
    %c0 = arith.constant 0 : index
    %c0_0 = arith.constant 0 : index
    %c0_1 = arith.constant 0 : index
    %0 = vector.load %arg1[%c0, %c0_0, %c0_1] : memref<1x162x64xf32, #tpu.memory_space<vmem>>, vector<1x8x64xf32>
    %1 = vector.shape_cast %0 : vector<1x8x64xf32> to vector<8x64xf32>
    %c0_2 = arith.constant 0 : index
    %c0_3 = arith.constant 0 : index
    %2 = vector.load %arg11[%c0_2, %c0_3] : memref<128x256xf32, #tpu.memory_space<vmem>>, vector<8x64xf32>
    tpu.vector_store %arg11[%c0_2, %c0_3], %1 {strides = array<i32>} : memref<128x256xf32, #tpu.memory_space<vmem>>, vector<8x64xf32>,
    %c0_4 = arith.constant 0 : index
    %c9 = arith.constant 9 : index
    %c0_5 = arith.constant 0 : index
    %3 = vector.load %arg1[%c0_4, %c9, %c0_5] : memref<1x162x64xf32, #tpu.memory_space<vmem>>, vector<1x8x64xf32>
    %4 = vector.shape_cast %3 : vector<1x8x64xf32> to vector<8x64xf32>
    %c8 = arith.constant 8 : index
    %c0_6 = arith.constant 0 : index
    %5 = vector.load %arg11[%c8, %c0_6] : memref<128x256xf32, #tpu.memory_space<vmem>>, vector<8x64xf32>
    tpu.vector_store %arg11[%c8, %c0_6], %4 {strides = array<i32>} : memref<128x256xf32, #tpu.memory_space<vmem>>, vector<8x64xf32>,
    %c0_7 = arith.constant 0 : index
    %c18 = arith.constant 18 : index
    %c0_8 = arith.constant 0 : index
    %6 = vector.load %arg1[%c0_7, %c18, %c0_8] : memref<1x162x64xf32, #tpu.memory_space<vmem>>, vector<1x8x64xf32>
    %7 = vector.shape_cast %6 : vector<1x8x64xf32> to vector<8x64xf32>
    %c16 = arith.constant 16 : index
    %c0_9 = arith.constant 0 : index
    %8 = vector.load %arg11[%c16, %c0_9] : memref<128x256xf32, #tpu.memory_space<vmem>>, vector<8x64xf32>
    tpu.vector_store %arg11[%c16, %c0_9], %7 {strides = array<i32>} : memref<128x256xf32, #tpu.memory_space<vmem>>, vector<8x64xf32>,
    %c0_10 = arith.constant 0 : index
    %c27 = arith.constant 27 : index
    %c0_11 = arith.constant 0 : index
    %9 = vector.load %arg1[%c0_10, %c27, %c0_11] : memref<1x162x64xf32, #tpu.memory_space<vmem>>, vector<1x8x64xf32>
    %10 = vector.shape_cast %9 : vector<1x8x64xf32> to vector<8x64xf32>
    %c24 = arith.constant 24 : index
    %c0_12 = arith.constant 0 : index
    %11 = vector.load %arg11[%c24, %c0_12] : memref<128x256xf32, #tpu.memory_space<vmem>>, vector<8x64xf32>
    tpu.vector_store %arg11[%c24, %c0_12], %10 {strides = array<i32>} : memref<128x256xf32, #tpu.memory_space<vmem>>, vector<8x64xf32>,
    %c0_13 = arith.constant 0 : index
    %c36 = arith.constant 36 : index
    %c0_14 = arith.constant 0 : index
    %12 = vector.load %arg1[%c0_13, %c36, %c0_14] : memref<1x162x64xf32, #tpu.memory_space<vmem>>, vector<1x8x64xf32>
    %13 = vector.shape_cast %12 : vector<1x8x64xf32> to vector<8x64xf32>
    %c32 = arith.constant 32 : index
    %c0_15 = arith.constant 0 : index
    %14 = vector.load %arg11[%c32, %c0_15] : memref<128x256xf32, #tpu.memory_space<vmem>>, vector<8x64xf32>
    tpu.vector_store %arg11[%c32, %c0_15], %13 {strides = array<i32>} : memref<128x256xf32, #tpu.memory_space<vmem>>, vector<8x64xf32>,
    %c0_16 = arith.constant 0 : index
    %c45 = arith.constant 45 : index
    %c0_17 = arith.constant 0 : index
    %15 = vector.load %arg1[%c0_16, %c45, %c0_17] : memref<1x162x64xf32, #tpu.memory_space<vmem>>, vector<1x8x64xf32>
    %16 = vector.shape_cast %15 : vector<1x8x64xf32> to vector<8x64xf32>
    %c40 = arith.constant 40 : index
    %c0_18 = arith.constant 0 : index
    %17 = vector.load %arg11[%c40, %c0_18] : memref<128x256xf32, #tpu.memory_space<vmem>>, vector<8x64xf32>
    tpu.vector_store %arg11[%c40, %c0_18], %16 {strides = array<i32>} : memref<128x256xf32, #tpu.memory_space<vmem>>, vector<8x64xf32>,
    %c0_19 = arith.constant 0 : index
    %c54 = arith.constant 54 : index
    %c0_20 = arith.constant 0 : index
    %18 = vector.load %arg1[%c0_19, %c54, %c0_20] : memref<1x162x64xf32, #tpu.memory_space<vmem>>, vector<1x8x64xf32>
    %19 = vector.shape_cast %18 : vector<1x8x64xf32> to vector<8x64xf32>
    %c48 = arith.constant 48 : index
    %c0_21 = arith.constant 0 : index
    %20 = vector.load %arg11[%c48, %c0_21] : memref<128x256xf32, #tpu.memory_space<vmem>>, vector<8x64xf32>
    tpu.vector_store %arg11[%c48, %c0_21], %19 {strides = array<i32>} : memref<128x256xf32, #tpu.memory_space<vmem>>, vector<8x64xf32>,
    %c0_22 = arith.constant 0 : index
    %c63 = arith.constant 63 : index
    %c0_23 = arith.constant 0 : index
    %21 = vector.load %arg1[%c0_22, %c63, %c0_23] : memref<1x162x64xf32, #tpu.memory_space<vmem>>, vector<1x8x64xf32>
    %22 = vector.shape_cast %21 : vector<1x8x64xf32> to vector<8x64xf32>
    %c56 = arith.constant 56 : index
    %c0_24 = arith.constant 0 : index
    %23 = vector.load %arg11[%c56, %c0_24] : memref<128x256xf32, #tpu.memory_space<vmem>>, vector<8x64xf32>
    tpu.vector_store %arg11[%c56, %c0_24], %22 {strides = array<i32>} : memref<128x256xf32, #tpu.memory_space<vmem>>, vector<8x64xf32>,
    %c0_25 = arith.constant 0 : index
    %c81 = arith.constant 81 : index
    %c0_26 = arith.constant 0 : index
    %24 = vector.load %arg1[%c0_25, %c81, %c0_26] : memref<1x162x64xf32, #tpu.memory_space<vmem>>, vector<1x8x64xf32>
    %25 = vector.shape_cast %24 : vector<1x8x64xf32> to vector<8x64xf32>
    %c64 = arith.constant 64 : index
    %c0_27 = arith.constant 0 : index
    %26 = vector.load %arg11[%c64, %c0_27] : memref<128x256xf32, #tpu.memory_space<vmem>>, vector<8x64xf32>
    tpu.vector_store %arg11[%c64, %c0_27], %25 {strides = array<i32>} : memref<128x256xf32, #tpu.memory_space<vmem>>, vector<8x64xf32>,
    %c0_28 = arith.constant 0 : index
    %c90 = arith.constant 90 : index
    %c0_29 = arith.constant 0 : index
    %27 = vector.load %arg1[%c0_28, %c90, %c0_29] : memref<1x162x64xf32, #tpu.memory_space<vmem>>, vector<1x8x64xf32>
    %28 = vector.shape_cast %27 : vector<1x8x64xf32> to vector<8x64xf32>
    %c72 = arith.constant 72 : index
    %c0_30 = arith.constant 0 : index
    %29 = vector.load %arg11[%c72, %c0_30] : memref<128x256xf32, #tpu.memory_space<vmem>>, vector<8x64xf32>
    tpu.vector_store %arg11[%c72, %c0_30], %28 {strides = array<i32>} : memref<128x256xf32, #tpu.memory_space<vmem>>, vector<8x64xf32>,
    %c0_31 = arith.constant 0 : index
    %c99 = arith.constant 99 : index
    %c0_32 = arith.constant 0 : index
    %30 = vector.load %arg1[%c0_31, %c99, %c0_32] : memref<1x162x64xf32, #tpu.memory_space<vmem>>, vector<1x8x64xf32>
    %31 = vector.shape_cast %30 : vector<1x8x64xf32> to vector<8x64xf32>
    %c80 = arith.constant 80 : index
    %c0_33 = arith.constant 0 : index
    %32 = vector.load %arg11[%c80, %c0_33] : memref<128x256xf32, #tpu.memory_space<vmem>>, vector<8x64xf32>
    tpu.vector_store %arg11[%c80, %c0_33], %31 {strides = array<i32>} : memref<128x256xf32, #tpu.memory_space<vmem>>, vector<8x64xf32>,
    %c0_34 = arith.constant 0 : index
    %c108 = arith.constant 108 : index
    %c0_35 = arith.constant 0 : index
    %33 = vector.load %arg1[%c0_34, %c108, %c0_35] : memref<1x162x64xf32, #tpu.memory_space<vmem>>, vector<1x8x64xf32>
    %34 = vector.shape_cast %33 : vector<1x8x64xf32> to vector<8x64xf32>
    %c88 = arith.constant 88 : index
    %c0_36 = arith.constant 0 : index
    %35 = vector.load %arg11[%c88, %c0_36] : memref<128x256xf32, #tpu.memory_space<vmem>>, vector<8x64xf32>
    tpu.vector_store %arg11[%c88, %c0_36], %34 {strides = array<i32>} : memref<128x256xf32, #tpu.memory_space<vmem>>, vector<8x64xf32>,
    %c0_37 = arith.constant 0 : index
    %c117 = arith.constant 117 : index
    %c0_38 = arith.constant 0 : index
    %36 = vector.load %arg1[%c0_37, %c117, %c0_38] : memref<1x162x64xf32, #tpu.memory_space<vmem>>, vector<1x8x64xf32>
    %37 = vector.shape_cast %36 : vector<1x8x64xf32> to vector<8x64xf32>
    %c96 = arith.constant 96 : index
    %c0_39 = arith.constant 0 : index
    %38 = vector.load %arg11[%c96, %c0_39] : memref<128x256xf32, #tpu.memory_space<vmem>>, vector<8x64xf32>
    tpu.vector_store %arg11[%c96, %c0_39], %37 {strides = array<i32>} : memref<128x256xf32, #tpu.memory_space<vmem>>, vector<8x64xf32>,
    %c0_40 = arith.constant 0 : index
    %c126 = arith.constant 126 : index
    %c0_41 = arith.constant 0 : index
    %39 = vector.load %arg1[%c0_40, %c126, %c0_41] : memref<1x162x64xf32, #tpu.memory_space<vmem>>, vector<1x8x64xf32>
    %40 = vector.shape_cast %39 : vector<1x8x64xf32> to vector<8x64xf32>
    %c104 = arith.constant 104 : index
    %c0_42 = arith.constant 0 : index
    %41 = vector.load %arg11[%c104, %c0_42] : memref<128x256xf32, #tpu.memory_space<vmem>>, vector<8x64xf32>
    tpu.vector_store %arg11[%c104, %c0_42], %40 {strides = array<i32>} : memref<128x256xf32, #tpu.memory_space<vmem>>, vector<8x64xf32>,
    %c0_43 = arith.constant 0 : index
    %c135 = arith.constant 135 : index
    %c0_44 = arith.constant 0 : index
    %42 = vector.load %arg1[%c0_43, %c135, %c0_44] : memref<1x162x64xf32, #tpu.memory_space<vmem>>, vector<1x8x64xf32>
    %43 = vector.shape_cast %42 : vector<1x8x64xf32> to vector<8x64xf32>
    %c112 = arith.constant 112 : index
    %c0_45 = arith.constant 0 : index
    %44 = vector.load %arg11[%c112, %c0_45] : memref<128x256xf32, #tpu.memory_space<vmem>>, vector<8x64xf32>
    tpu.vector_store %arg11[%c112, %c0_45], %43 {strides = array<i32>} : memref<128x256xf32, #tpu.memory_space<vmem>>, vector<8x64xf32>,
    %c0_46 = arith.constant 0 : index
    %c144 = arith.constant 144 : index
    %c0_47 = arith.constant 0 : index
    %45 = vector.load %arg1[%c0_46, %c144, %c0_47] : memref<1x162x64xf32, #tpu.memory_space<vmem>>, vector<1x8x64xf32>
    %46 = vector.shape_cast %45 : vector<1x8x64xf32> to vector<8x64xf32>
    %c120 = arith.constant 120 : index
    %c0_48 = arith.constant 0 : index
    %47 = vector.load %arg11[%c120, %c0_48] : memref<128x256xf32, #tpu.memory_space<vmem>>, vector<8x64xf32>
    tpu.vector_store %arg11[%c120, %c0_48], %46 {strides = array<i32>} : memref<128x256xf32, #tpu.memory_space<vmem>>, vector<8x64xf32>,
    %c0_49 = arith.constant 0 : index
    %c1 = arith.constant 1 : index
    %c0_50 = arith.constant 0 : index
    %48 = vector.load %arg1[%c0_49, %c1, %c0_50] : memref<1x162x64xf32, #tpu.memory_space<vmem>>, vector<1x8x64xf32>
    %49 = vector.shape_cast %48 : vector<1x8x64xf32> to vector<8x64xf32>
    %c0_51 = arith.constant 0 : index
    %c64_52 = arith.constant 64 : index
    %50 = vector.load %arg11[%c0_51, %c64_52] : memref<128x256xf32, #tpu.memory_space<vmem>>, vector<8x64xf32>
    tpu.vector_store %arg11[%c0_51, %c64_52], %49 {strides = array<i32>} : memref<128x256xf32, #tpu.memory_space<vmem>>, vector<8x64xf32>,
    %c0_53 = arith.constant 0 : index
    %c10 = arith.constant 10 : index
    %c0_54 = arith.constant 0 : index
    %51 = vector.load %arg1[%c0_53, %c10, %c0_54] : memref<1x162x64xf32, #tpu.memory_space<vmem>>, vector<1x8x64xf32>
    %52 = vector.shape_cast %51 : vector<1x8x64xf32> to vector<8x64xf32>
    %c8_55 = arith.constant 8 : index
    %c64_56 = arith.constant 64 : index
    %53 = vector.load %arg11[%c8_55, %c64_56] : memref<128x256xf32, #tpu.memory_space<vmem>>, vector<8x64xf32>
    tpu.vector_store %arg11[%c8_55, %c64_56], %52 {strides = array<i32>} : memref<128x256xf32, #tpu.memory_space<vmem>>, vector<8x64xf32>,
    %c0_57 = arith.constant 0 : index
    %c19 = arith.constant 19 : index
    %c0_58 = arith.constant 0 : index
    %54 = vector.load %arg1[%c0_57, %c19, %c0_58] : memref<1x162x64xf32, #tpu.memory_space<vmem>>, vector<1x8x64xf32>
    %55 = vector.shape_cast %54 : vector<1x8x64xf32> to vector<8x64xf32>
    %c16_59 = arith.constant 16 : index
    %c64_60 = arith.constant 64 : index
    %56 = vector.load %arg11[%c16_59, %c64_60] : memref<128x256xf32, #tpu.memory_space<vmem>>, vector<8x64xf32>
    tpu.vector_store %arg11[%c16_59, %c64_60], %55 {strides = array<i32>} : memref<128x256xf32, #tpu.memory_space<vmem>>, vector<8x64xf32>,
    %c0_61 = arith.constant 0 : index
    %c28 = arith.constant 28 : index
    %c0_62 = arith.constant 0 : index
    %57 = vector.load %arg1[%c0_61, %c28, %c0_62] : memref<1x162x64xf32, #tpu.memory_space<vmem>>, vector<1x8x64xf32>
    %58 = vector.shape_cast %57 : vector<1x8x64xf32> to vector<8x64xf32>
    %c24_63 = arith.constant 24 : index
    %c64_64 = arith.constant 64 : index
    %59 = vector.load %arg11[%c24_63, %c64_64] : memref<128x256xf32, #tpu.memory_space<vmem>>, vector<8x64xf32>
    tpu.vector_store %arg11[%c24_63, %c64_64], %58 {strides = array<i32>} : memref<128x256xf32, #tpu.memory_space<vmem>>, vector<8x64xf32>,
    %c0_65 = arith.constant 0 : index
    %c37 = arith.constant 37 : index
    %c0_66 = arith.constant 0 : index
    %60 = vector.load %arg1[%c0_65, %c37, %c0_66] : memref<1x162x64xf32, #tpu.memory_space<vmem>>, vector<1x8x64xf32>
    %61 = vector.shape_cast %60 : vector<1x8x64xf32> to vector<8x64xf32>
    %c32_67 = arith.constant 32 : index
    %c64_68 = arith.constant 64 : index
    %62 = vector.load %arg11[%c32_67, %c64_68] : memref<128x256xf32, #tpu.memory_space<vmem>>, vector<8x64xf32>
    tpu.vector_store %arg11[%c32_67, %c64_68], %61 {strides = array<i32>} : memref<128x256xf32, #tpu.memory_space<vmem>>, vector<8x64xf32>,
    %c0_69 = arith.constant 0 : index
    %c46 = arith.constant 46 : index
    %c0_70 = arith.constant 0 : index
    %63 = vector.load %arg1[%c0_69, %c46, %c0_70] : memref<1x162x64xf32, #tpu.memory_space<vmem>>, vector<1x8x64xf32>
    %64 = vector.shape_cast %63 : vector<1x8x64xf32> to vector<8x64xf32>
    %c40_71 = arith.constant 40 : index
    %c64_72 = arith.constant 64 : index
    %65 = vector.load %arg11[%c40_71, %c64_72] : memref<128x256xf32, #tpu.memory_space<vmem>>, vector<8x64xf32>
    tpu.vector_store %arg11[%c40_71, %c64_72], %64 {strides = array<i32>} : memref<128x256xf32, #tpu.memory_space<vmem>>, vector<8x64xf32>,
    %c0_73 = arith.constant 0 : index
    %c55 = arith.constant 55 : index
    %c0_74 = arith.constant 0 : index
    %66 = vector.load %arg1[%c0_73, %c55, %c0_74] : memref<1x162x64xf32, #tpu.memory_space<vmem>>, vector<1x8x64xf32>
    %67 = vector.shape_cast %66 : vector<1x8x64xf32> to vector<8x64xf32>
    %c48_75 = arith.constant 48 : index
    %c64_76 = arith.constant 64 : index
    %68 = vector.load %arg11[%c48_75, %c64_76] : memref<128x256xf32, #tpu.memory_space<vmem>>, vector<8x64xf32>
    tpu.vector_store %arg11[%c48_75, %c64_76], %67 {strides = array<i32>} : memref<128x256xf32, #tpu.memory_space<vmem>>, vector<8x64xf32>,
    %c0_77 = arith.constant 0 : index
    %c64_78 = arith.constant 64 : index
    %c0_79 = arith.constant 0 : index
    %69 = vector.load %arg1[%c0_77, %c64_78, %c0_79] : memref<1x162x64xf32, #tpu.memory_space<vmem>>, vector<1x8x64xf32>
    %70 = vector.shape_cast %69 : vector<1x8x64xf32> to vector<8x64xf32>
    %c56_80 = arith.constant 56 : index
    %c64_81 = arith.constant 64 : index
    %71 = vector.load %arg11[%c56_80, %c64_81] : memref<128x256xf32, #tpu.memory_space<vmem>>, vector<8x64xf32>
    tpu.vector_store %arg11[%c56_80, %c64_81], %70 {strides = array<i32>} : memref<128x256xf32, #tpu.memory_space<vmem>>, vector<8x64xf32>,
    %c0_82 = arith.constant 0 : index
    %c82 = arith.constant 82 : index
    %c0_83 = arith.constant 0 : index
    %72 = vector.load %arg1[%c0_82, %c82, %c0_83] : memref<1x162x64xf32, #tpu.memory_space<vmem>>, vector<1x8x64xf32>
    %73 = vector.shape_cast %72 : vector<1x8x64xf32> to vector<8x64xf32>
    %c64_84 = arith.constant 64 : index
    %c64_85 = arith.constant 64 : index
    %74 = vector.load %arg11[%c64_84, %c64_85] : memref<128x256xf32, #tpu.memory_space<vmem>>, vector<8x64xf32>
    tpu.vector_store %arg11[%c64_84, %c64_85], %73 {strides = array<i32>} : memref<128x256xf32, #tpu.memory_space<vmem>>, vector<8x64xf32>,
    %c0_86 = arith.constant 0 : index
    %c91 = arith.constant 91 : index
    %c0_87 = arith.constant 0 : index
    %75 = vector.load %arg1[%c0_86, %c91, %c0_87] : memref<1x162x64xf32, #tpu.memory_space<vmem>>, vector<1x8x64xf32>
    %76 = vector.shape_cast %75 : vector<1x8x64xf32> to vector<8x64xf32>
    %c72_88 = arith.constant 72 : index
    %c64_89 = arith.constant 64 : index
    %77 = vector.load %arg11[%c72_88, %c64_89] : memref<128x256xf32, #tpu.memory_space<vmem>>, vector<8x64xf32>
    tpu.vector_store %arg11[%c72_88, %c64_89], %76 {strides = array<i32>} : memref<128x256xf32, #tpu.memory_space<vmem>>, vector<8x64xf32>,
    %c0_90 = arith.constant 0 : index
    %c100 = arith.constant 100 : index
    %c0_91 = arith.constant 0 : index
    %78 = vector.load %arg1[%c0_90, %c100, %c0_91] : memref<1x162x64xf32, #tpu.memory_space<vmem>>, vector<1x8x64xf32>
    %79 = vector.shape_cast %78 : vector<1x8x64xf32> to vector<8x64xf32>
    %c80_92 = arith.constant 80 : index
    %c64_93 = arith.constant 64 : index
    %80 = vector.load %arg11[%c80_92, %c64_93] : memref<128x256xf32, #tpu.memory_space<vmem>>, vector<8x64xf32>
    tpu.vector_store %arg11[%c80_92, %c64_93], %79 {strides = array<i32>} : memref<128x256xf32, #tpu.memory_space<vmem>>, vector<8x64xf32>,
    %c0_94 = arith.constant 0 : index
    %c109 = arith.constant 109 : index
    %c0_95 = arith.constant 0 : index
    %81 = vector.load %arg1[%c0_94, %c109, %c0_95] : memref<1x162x64xf32, #tpu.memory_space<vmem>>, vector<1x8x64xf32>
    %82 = vector.shape_cast %81 : vector<1x8x64xf32> to vector<8x64xf32>
    %c88_96 = arith.constant 88 : index
    %c64_97 = arith.constant 64 : index
    %83 = vector.load %arg11[%c88_96, %c64_97] : memref<128x256xf32, #tpu.memory_space<vmem>>, vector<8x64xf32>
    tpu.vector_store %arg11[%c88_96, %c64_97], %82 {strides = array<i32>} : memref<128x256xf32, #tpu.memory_space<vmem>>, vector<8x64xf32>,
    %c0_98 = arith.constant 0 : index
    %c118 = arith.constant 118 : index
    %c0_99 = arith.constant 0 : index
    %84 = vector.load %arg1[%c0_98, %c118, %c0_99] : memref<1x162x64xf32, #tpu.memory_space<vmem>>, vector<1x8x64xf32>
    %85 = vector.shape_cast %84 : vector<1x8x64xf32> to vector<8x64xf32>
    %c96_100 = arith.constant 96 : index
    %c64_101 = arith.constant 64 : index
    %86 = vector.load %arg11[%c96_100, %c64_101] : memref<128x256xf32, #tpu.memory_space<vmem>>, vector<8x64xf32>
    tpu.vector_store %arg11[%c96_100, %c64_101], %85 {strides = array<i32>} : memref<128x256xf32, #tpu.memory_space<vmem>>, vector<8x64xf32>,
    %c0_102 = arith.constant 0 : index
    %c127 = arith.constant 127 : index
    %c0_103 = arith.constant 0 : index
    %87 = vector.load %arg1[%c0_102, %c127, %c0_103] : memref<1x162x64xf32, #tpu.memory_space<vmem>>, vector<1x8x64xf32>
    %88 = vector.shape_cast %87 : vector<1x8x64xf32> to vector<8x64xf32>
    %c104_104 = arith.constant 104 : index
    %c64_105 = arith.constant 64 : index
    %89 = vector.load %arg11[%c104_104, %c64_105] : memref<128x256xf32, #tpu.memory_space<vmem>>, vector<8x64xf32>
    tpu.vector_store %arg11[%c104_104, %c64_105], %88 {strides = array<i32>} : memref<128x256xf32, #tpu.memory_space<vmem>>, vector<8x64xf32>,
    %c0_106 = arith.constant 0 : index
    %c136 = arith.constant 136 : index
    %c0_107 = arith.constant 0 : index
    %90 = vector.load %arg1[%c0_106, %c136, %c0_107] : memref<1x162x64xf32, #tpu.memory_space<vmem>>, vector<1x8x64xf32>
    %91 = vector.shape_cast %90 : vector<1x8x64xf32> to vector<8x64xf32>
    %c112_108 = arith.constant 112 : index
    %c64_109 = arith.constant 64 : index
    %92 = vector.load %arg11[%c112_108, %c64_109] : memref<128x256xf32, #tpu.memory_space<vmem>>, vector<8x64xf32>
    tpu.vector_store %arg11[%c112_108, %c64_109], %91 {strides = array<i32>} : memref<128x256xf32, #tpu.memory_space<vmem>>, vector<8x64xf32>,
    %c0_110 = arith.constant 0 : index
    %c145 = arith.constant 145 : index
    %c0_111 = arith.constant 0 : index
    %93 = vector.load %arg1[%c0_110, %c145, %c0_111] : memref<1x162x64xf32, #tpu.memory_space<vmem>>, vector<1x8x64xf32>
    %94 = vector.shape_cast %93 : vector<1x8x64xf32> to vector<8x64xf32>
    %c120_112 = arith.constant 120 : index
    %c64_113 = arith.constant 64 : index
    %95 = vector.load %arg11[%c120_112, %c64_113] : memref<128x256xf32, #tpu.memory_space<vmem>>, vector<8x64xf32>
    tpu.vector_store %arg11[%c120_112, %c64_113], %94 {strides = array<i32>} : memref<128x256xf32, #tpu.memory_space<vmem>>, vector<8x64xf32>,
    %c0_114 = arith.constant 0 : index
    %c9_115 = arith.constant 9 : index
    %c0_116 = arith.constant 0 : index
    %96 = vector.load %arg1[%c0_114, %c9_115, %c0_116] : memref<1x162x64xf32, #tpu.memory_space<vmem>>, vector<1x8x64xf32>
    %97 = vector.shape_cast %96 : vector<1x8x64xf32> to vector<8x64xf32>
    %c0_117 = arith.constant 0 : index
    %c128 = arith.constant 128 : index
    %98 = vector.load %arg11[%c0_117, %c128] : memref<128x256xf32, #tpu.memory_space<vmem>>, vector<8x64xf32>
    tpu.vector_store %arg11[%c0_117, %c128], %97 {strides = array<i32>} : memref<128x256xf32, #tpu.memory_space<vmem>>, vector<8x64xf32>,
    %c0_118 = arith.constant 0 : index
    %c18_119 = arith.constant 18 : index
    %c0_120 = arith.constant 0 : index
    %99 = vector.load %arg1[%c0_118, %c18_119, %c0_120] : memref<1x162x64xf32, #tpu.memory_space<vmem>>, vector<1x8x64xf32>
    %100 = vector.shape_cast %99 : vector<1x8x64xf32> to vector<8x64xf32>
    %c8_121 = arith.constant 8 : index
    %c128_122 = arith.constant 128 : index
    %101 = vector.load %arg11[%c8_121, %c128_122] : memref<128x256xf32, #tpu.memory_space<vmem>>, vector<8x64xf32>
    tpu.vector_store %arg11[%c8_121, %c128_122], %100 {strides = array<i32>} : memref<128x256xf32, #tpu.memory_space<vmem>>, vector<8x64xf32>,
    %c0_123 = arith.constant 0 : index
    %c27_124 = arith.constant 27 : index
    %c0_125 = arith.constant 0 : index
    %102 = vector.load %arg1[%c0_123, %c27_124, %c0_125] : memref<1x162x64xf32, #tpu.memory_space<vmem>>, vector<1x8x64xf32>
    %103 = vector.shape_cast %102 : vector<1x8x64xf32> to vector<8x64xf32>
    %c16_126 = arith.constant 16 : index
    %c128_127 = arith.constant 128 : index
    %104 = vector.load %arg11[%c16_126, %c128_127] : memref<128x256xf32, #tpu.memory_space<vmem>>, vector<8x64xf32>
    tpu.vector_store %arg11[%c16_126, %c128_127], %103 {strides = array<i32>} : memref<128x256xf32, #tpu.memory_space<vmem>>, vector<8x64xf32>,
    %c0_128 = arith.constant 0 : index
    %c36_129 = arith.constant 36 : index
    %c0_130 = arith.constant 0 : index
    %105 = vector.load %arg1[%c0_128, %c36_129, %c0_130] : memref<1x162x64xf32, #tpu.memory_space<vmem>>, vector<1x8x64xf32>
    %106 = vector.shape_cast %105 : vector<1x8x64xf32> to vector<8x64xf32>
    %c24_131 = arith.constant 24 : index
    %c128_132 = arith.constant 128 : index
    %107 = vector.load %arg11[%c24_131, %c128_132] : memref<128x256xf32, #tpu.memory_space<vmem>>, vector<8x64xf32>
    tpu.vector_store %arg11[%c24_131, %c128_132], %106 {strides = array<i32>} : memref<128x256xf32, #tpu.memory_space<vmem>>, vector<8x64xf32>,
    %c0_133 = arith.constant 0 : index
    %c45_134 = arith.constant 45 : index
    %c0_135 = arith.constant 0 : index
    %108 = vector.load %arg1[%c0_133, %c45_134, %c0_135] : memref<1x162x64xf32, #tpu.memory_space<vmem>>, vector<1x8x64xf32>
    %109 = vector.shape_cast %108 : vector<1x8x64xf32> to vector<8x64xf32>
    %c32_136 = arith.constant 32 : index
    %c128_137 = arith.constant 128 : index
    %110 = vector.load %arg11[%c32_136, %c128_137] : memref<128x256xf32, #tpu.memory_space<vmem>>, vector<8x64xf32>
    tpu.vector_store %arg11[%c32_136, %c128_137], %109 {strides = array<i32>} : memref<128x256xf32, #tpu.memory_space<vmem>>, vector<8x64xf32>,
    %c0_138 = arith.constant 0 : index
    %c54_139 = arith.constant 54 : index
    %c0_140 = arith.constant 0 : index
    %111 = vector.load %arg1[%c0_138, %c54_139, %c0_140] : memref<1x162x64xf32, #tpu.memory_space<vmem>>, vector<1x8x64xf32>
    %112 = vector.shape_cast %111 : vector<1x8x64xf32> to vector<8x64xf32>
    %c40_141 = arith.constant 40 : index
    %c128_142 = arith.constant 128 : index
    %113 = vector.load %arg11[%c40_141, %c128_142] : memref<128x256xf32, #tpu.memory_space<vmem>>, vector<8x64xf32>
    tpu.vector_store %arg11[%c40_141, %c128_142], %112 {strides = array<i32>} : memref<128x256xf32, #tpu.memory_space<vmem>>, vector<8x64xf32>,
    %c0_143 = arith.constant 0 : index
    %c63_144 = arith.constant 63 : index
    %c0_145 = arith.constant 0 : index
    %114 = vector.load %arg1[%c0_143, %c63_144, %c0_145] : memref<1x162x64xf32, #tpu.memory_space<vmem>>, vector<1x8x64xf32>
    %115 = vector.shape_cast %114 : vector<1x8x64xf32> to vector<8x64xf32>
    %c48_146 = arith.constant 48 : index
    %c128_147 = arith.constant 128 : index
    %116 = vector.load %arg11[%c48_146, %c128_147] : memref<128x256xf32, #tpu.memory_space<vmem>>, vector<8x64xf32>
    tpu.vector_store %arg11[%c48_146, %c128_147], %115 {strides = array<i32>} : memref<128x256xf32, #tpu.memory_space<vmem>>, vector<8x64xf32>,
    %c0_148 = arith.constant 0 : index
    %c72_149 = arith.constant 72 : index
    %c0_150 = arith.constant 0 : index
    %117 = vector.load %arg1[%c0_148, %c72_149, %c0_150] : memref<1x162x64xf32, #tpu.memory_space<vmem>>, vector<1x8x64xf32>
    %118 = vector.shape_cast %117 : vector<1x8x64xf32> to vector<8x64xf32>
    %c56_151 = arith.constant 56 : index
    %c128_152 = arith.constant 128 : index
    %119 = vector.load %arg11[%c56_151, %c128_152] : memref<128x256xf32, #tpu.memory_space<vmem>>, vector<8x64xf32>
    tpu.vector_store %arg11[%c56_151, %c128_152], %118 {strides = array<i32>} : memref<128x256xf32, #tpu.memory_space<vmem>>, vector<8x64xf32>,
    %c0_153 = arith.constant 0 : index
    %c90_154 = arith.constant 90 : index
    %c0_155 = arith.constant 0 : index
    %120 = vector.load %arg1[%c0_153, %c90_154, %c0_155] : memref<1x162x64xf32, #tpu.memory_space<vmem>>, vector<1x8x64xf32>
    %121 = vector.shape_cast %120 : vector<1x8x64xf32> to vector<8x64xf32>
    %c64_156 = arith.constant 64 : index
    %c128_157 = arith.constant 128 : index
    %122 = vector.load %arg11[%c64_156, %c128_157] : memref<128x256xf32, #tpu.memory_space<vmem>>, vector<8x64xf32>
    tpu.vector_store %arg11[%c64_156, %c128_157], %121 {strides = array<i32>} : memref<128x256xf32, #tpu.memory_space<vmem>>, vector<8x64xf32>,
    %c0_158 = arith.constant 0 : index
    %c99_159 = arith.constant 99 : index
    %c0_160 = arith.constant 0 : index
    %123 = vector.load %arg1[%c0_158, %c99_159, %c0_160] : memref<1x162x64xf32, #tpu.memory_space<vmem>>, vector<1x8x64xf32>
    %124 = vector.shape_cast %123 : vector<1x8x64xf32> to vector<8x64xf32>
    %c72_161 = arith.constant 72 : index
    %c128_162 = arith.constant 128 : index
    %125 = vector.load %arg11[%c72_161, %c128_162] : memref<128x256xf32, #tpu.memory_space<vmem>>, vector<8x64xf32>
    tpu.vector_store %arg11[%c72_161, %c128_162], %124 {strides = array<i32>} : memref<128x256xf32, #tpu.memory_space<vmem>>, vector<8x64xf32>,
    %c0_163 = arith.constant 0 : index
    %c108_164 = arith.constant 108 : index
    %c0_165 = arith.constant 0 : index
    %126 = vector.load %arg1[%c0_163, %c108_164, %c0_165] : memref<1x162x64xf32, #tpu.memory_space<vmem>>, vector<1x8x64xf32>
    %127 = vector.shape_cast %126 : vector<1x8x64xf32> to vector<8x64xf32>
    %c80_166 = arith.constant 80 : index
    %c128_167 = arith.constant 128 : index
    %128 = vector.load %arg11[%c80_166, %c128_167] : memref<128x256xf32, #tpu.memory_space<vmem>>, vector<8x64xf32>
    tpu.vector_store %arg11[%c80_166, %c128_167], %127 {strides = array<i32>} : memref<128x256xf32, #tpu.memory_space<vmem>>, vector<8x64xf32>,
    %c0_168 = arith.constant 0 : index
    %c117_169 = arith.constant 117 : index
    %c0_170 = arith.constant 0 : index
    %129 = vector.load %arg1[%c0_168, %c117_169, %c0_170] : memref<1x162x64xf32, #tpu.memory_space<vmem>>, vector<1x8x64xf32>
    %130 = vector.shape_cast %129 : vector<1x8x64xf32> to vector<8x64xf32>
    %c88_171 = arith.constant 88 : index
    %c128_172 = arith.constant 128 : index
    %131 = vector.load %arg11[%c88_171, %c128_172] : memref<128x256xf32, #tpu.memory_space<vmem>>, vector<8x64xf32>
    tpu.vector_store %arg11[%c88_171, %c128_172], %130 {strides = array<i32>} : memref<128x256xf32, #tpu.memory_space<vmem>>, vector<8x64xf32>,
    %c0_173 = arith.constant 0 : index
    %c126_174 = arith.constant 126 : index
    %c0_175 = arith.constant 0 : index
    %132 = vector.load %arg1[%c0_173, %c126_174, %c0_175] : memref<1x162x64xf32, #tpu.memory_space<vmem>>, vector<1x8x64xf32>
    %133 = vector.shape_cast %132 : vector<1x8x64xf32> to vector<8x64xf32>
    %c96_176 = arith.constant 96 : index
    %c128_177 = arith.constant 128 : index
    %134 = vector.load %arg11[%c96_176, %c128_177] : memref<128x256xf32, #tpu.memory_space<vmem>>, vector<8x64xf32>
    tpu.vector_store %arg11[%c96_176, %c128_177], %133 {strides = array<i32>} : memref<128x256xf32, #tpu.memory_space<vmem>>, vector<8x64xf32>,
    %c0_178 = arith.constant 0 : index
    %c135_179 = arith.constant 135 : index
    %c0_180 = arith.constant 0 : index
    %135 = vector.load %arg1[%c0_178, %c135_179, %c0_180] : memref<1x162x64xf32, #tpu.memory_space<vmem>>, vector<1x8x64xf32>
    %136 = vector.shape_cast %135 : vector<1x8x64xf32> to vector<8x64xf32>
    %c104_181 = arith.constant 104 : index
    %c128_182 = arith.constant 128 : index
    %137 = vector.load %arg11[%c104_181, %c128_182] : memref<128x256xf32, #tpu.memory_space<vmem>>, vector<8x64xf32>
    tpu.vector_store %arg11[%c104_181, %c128_182], %136 {strides = array<i32>} : memref<128x256xf32, #tpu.memory_space<vmem>>, vector<8x64xf32>,
    %c0_183 = arith.constant 0 : index
    %c144_184 = arith.constant 144 : index
    %c0_185 = arith.constant 0 : index
    %138 = vector.load %arg1[%c0_183, %c144_184, %c0_185] : memref<1x162x64xf32, #tpu.memory_space<vmem>>, vector<1x8x64xf32>
    %139 = vector.shape_cast %138 : vector<1x8x64xf32> to vector<8x64xf32>
    %c112_186 = arith.constant 112 : index
    %c128_187 = arith.constant 128 : index
    %140 = vector.load %arg11[%c112_186, %c128_187] : memref<128x256xf32, #tpu.memory_space<vmem>>, vector<8x64xf32>
    tpu.vector_store %arg11[%c112_186, %c128_187], %139 {strides = array<i32>} : memref<128x256xf32, #tpu.memory_space<vmem>>, vector<8x64xf32>,
    %c0_188 = arith.constant 0 : index
    %c153 = arith.constant 153 : index
    %c0_189 = arith.constant 0 : index
    %141 = vector.load %arg1[%c0_188, %c153, %c0_189] : memref<1x162x64xf32, #tpu.memory_space<vmem>>, vector<1x8x64xf32>
    %142 = vector.shape_cast %141 : vector<1x8x64xf32> to vector<8x64xf32>
    %c120_190 = arith.constant 120 : index
    %c128_191 = arith.constant 128 : index
    %143 = vector.load %arg11[%c120_190, %c128_191] : memref<128x256xf32, #tpu.memory_space<vmem>>, vector<8x64xf32>
    tpu.vector_store %arg11[%c120_190, %c128_191], %142 {strides = array<i32>} : memref<128x256xf32, #tpu.memory_space<vmem>>, vector<8x64xf32>,
    %c0_192 = arith.constant 0 : index
    %c10_193 = arith.constant 10 : index
    %c0_194 = arith.constant 0 : index
    %144 = vector.load %arg1[%c0_192, %c10_193, %c0_194] : memref<1x162x64xf32, #tpu.memory_space<vmem>>, vector<1x8x64xf32>
    %145 = vector.shape_cast %144 : vector<1x8x64xf32> to vector<8x64xf32>
    %c0_195 = arith.constant 0 : index
    %c192 = arith.constant 192 : index
    %146 = vector.load %arg11[%c0_195, %c192] : memref<128x256xf32, #tpu.memory_space<vmem>>, vector<8x64xf32>
    tpu.vector_store %arg11[%c0_195, %c192], %145 {strides = array<i32>} : memref<128x256xf32, #tpu.memory_space<vmem>>, vector<8x64xf32>,
    %c0_196 = arith.constant 0 : index
    %c19_197 = arith.constant 19 : index
    %c0_198 = arith.constant 0 : index
    %147 = vector.load %arg1[%c0_196, %c19_197, %c0_198] : memref<1x162x64xf32, #tpu.memory_space<vmem>>, vector<1x8x64xf32>
    %148 = vector.shape_cast %147 : vector<1x8x64xf32> to vector<8x64xf32>
    %c8_199 = arith.constant 8 : index
    %c192_200 = arith.constant 192 : index
    %149 = vector.load %arg11[%c8_199, %c192_200] : memref<128x256xf32, #tpu.memory_space<vmem>>, vector<8x64xf32>
    tpu.vector_store %arg11[%c8_199, %c192_200], %148 {strides = array<i32>} : memref<128x256xf32, #tpu.memory_space<vmem>>, vector<8x64xf32>,
    %c0_201 = arith.constant 0 : index
    %c28_202 = arith.constant 28 : index
    %c0_203 = arith.constant 0 : index
    %150 = vector.load %arg1[%c0_201, %c28_202, %c0_203] : memref<1x162x64xf32, #tpu.memory_space<vmem>>, vector<1x8x64xf32>
    %151 = vector.shape_cast %150 : vector<1x8x64xf32> to vector<8x64xf32>
    %c16_204 = arith.constant 16 : index
    %c192_205 = arith.constant 192 : index
    %152 = vector.load %arg11[%c16_204, %c192_205] : memref<128x256xf32, #tpu.memory_space<vmem>>, vector<8x64xf32>
    tpu.vector_store %arg11[%c16_204, %c192_205], %151 {strides = array<i32>} : memref<128x256xf32, #tpu.memory_space<vmem>>, vector<8x64xf32>,
    %c0_206 = arith.constant 0 : index
    %c37_207 = arith.constant 37 : index
    %c0_208 = arith.constant 0 : index
    %153 = vector.load %arg1[%c0_206, %c37_207, %c0_208] : memref<1x162x64xf32, #tpu.memory_space<vmem>>, vector<1x8x64xf32>
    %154 = vector.shape_cast %153 : vector<1x8x64xf32> to vector<8x64xf32>
    %c24_209 = arith.constant 24 : index
    %c192_210 = arith.constant 192 : index
    %155 = vector.load %arg11[%c24_209, %c192_210] : memref<128x256xf32, #tpu.memory_space<vmem>>, vector<8x64xf32>
    tpu.vector_store %arg11[%c24_209, %c192_210], %154 {strides = array<i32>} : memref<128x256xf32, #tpu.memory_space<vmem>>, vector<8x64xf32>,
    %c0_211 = arith.constant 0 : index
    %c46_212 = arith.constant 46 : index
    %c0_213 = arith.constant 0 : index
    %156 = vector.load %arg1[%c0_211, %c46_212, %c0_213] : memref<1x162x64xf32, #tpu.memory_space<vmem>>, vector<1x8x64xf32>
    %157 = vector.shape_cast %156 : vector<1x8x64xf32> to vector<8x64xf32>
    %c32_214 = arith.constant 32 : index
    %c192_215 = arith.constant 192 : index
    %158 = vector.load %arg11[%c32_214, %c192_215] : memref<128x256xf32, #tpu.memory_space<vmem>>, vector<8x64xf32>
    tpu.vector_store %arg11[%c32_214, %c192_215], %157 {strides = array<i32>} : memref<128x256xf32, #tpu.memory_space<vmem>>, vector<8x64xf32>,
    %c0_216 = arith.constant 0 : index
    %c55_217 = arith.constant 55 : index
    %c0_218 = arith.constant 0 : index
    %159 = vector.load %arg1[%c0_216, %c55_217, %c0_218] : memref<1x162x64xf32, #tpu.memory_space<vmem>>, vector<1x8x64xf32>
    %160 = vector.shape_cast %159 : vector<1x8x64xf32> to vector<8x64xf32>
    %c40_219 = arith.constant 40 : index
    %c192_220 = arith.constant 192 : index
    %161 = vector.load %arg11[%c40_219, %c192_220] : memref<128x256xf32, #tpu.memory_space<vmem>>, vector<8x64xf32>
    tpu.vector_store %arg11[%c40_219, %c192_220], %160 {strides = array<i32>} : memref<128x256xf32, #tpu.memory_space<vmem>>, vector<8x64xf32>,
    %c0_221 = arith.constant 0 : index
    %c64_222 = arith.constant 64 : index
    %c0_223 = arith.constant 0 : index
    %162 = vector.load %arg1[%c0_221, %c64_222, %c0_223] : memref<1x162x64xf32, #tpu.memory_space<vmem>>, vector<1x8x64xf32>
    %163 = vector.shape_cast %162 : vector<1x8x64xf32> to vector<8x64xf32>
    %c48_224 = arith.constant 48 : index
    %c192_225 = arith.constant 192 : index
    %164 = vector.load %arg11[%c48_224, %c192_225] : memref<128x256xf32, #tpu.memory_space<vmem>>, vector<8x64xf32>
    tpu.vector_store %arg11[%c48_224, %c192_225], %163 {strides = array<i32>} : memref<128x256xf32, #tpu.memory_space<vmem>>, vector<8x64xf32>,
    %c0_226 = arith.constant 0 : index
    %c73 = arith.constant 73 : index
    %c0_227 = arith.constant 0 : index
    %165 = vector.load %arg1[%c0_226, %c73, %c0_227] : memref<1x162x64xf32, #tpu.memory_space<vmem>>, vector<1x8x64xf32>
    %166 = vector.shape_cast %165 : vector<1x8x64xf32> to vector<8x64xf32>
    %c56_228 = arith.constant 56 : index
    %c192_229 = arith.constant 192 : index
    %167 = vector.load %arg11[%c56_228, %c192_229] : memref<128x256xf32, #tpu.memory_space<vmem>>, vector<8x64xf32>
    tpu.vector_store %arg11[%c56_228, %c192_229], %166 {strides = array<i32>} : memref<128x256xf32, #tpu.memory_space<vmem>>, vector<8x64xf32>,
    %c0_230 = arith.constant 0 : index
    %c91_231 = arith.constant 91 : index
    %c0_232 = arith.constant 0 : index
    %168 = vector.load %arg1[%c0_230, %c91_231, %c0_232] : memref<1x162x64xf32, #tpu.memory_space<vmem>>, vector<1x8x64xf32>
    %169 = vector.shape_cast %168 : vector<1x8x64xf32> to vector<8x64xf32>
    %c64_233 = arith.constant 64 : index
    %c192_234 = arith.constant 192 : index
    %170 = vector.load %arg11[%c64_233, %c192_234] : memref<128x256xf32, #tpu.memory_space<vmem>>, vector<8x64xf32>
    tpu.vector_store %arg11[%c64_233, %c192_234], %169 {strides = array<i32>} : memref<128x256xf32, #tpu.memory_space<vmem>>, vector<8x64xf32>,
    %c0_235 = arith.constant 0 : index
    %c100_236 = arith.constant 100 : index
    %c0_237 = arith.constant 0 : index
    %171 = vector.load %arg1[%c0_235, %c100_236, %c0_237] : memref<1x162x64xf32, #tpu.memory_space<vmem>>, vector<1x8x64xf32>
    %172 = vector.shape_cast %171 : vector<1x8x64xf32> to vector<8x64xf32>
    %c72_238 = arith.constant 72 : index
    %c192_239 = arith.constant 192 : index
    %173 = vector.load %arg11[%c72_238, %c192_239] : memref<128x256xf32, #tpu.memory_space<vmem>>, vector<8x64xf32>
    tpu.vector_store %arg11[%c72_238, %c192_239], %172 {strides = array<i32>} : memref<128x256xf32, #tpu.memory_space<vmem>>, vector<8x64xf32>,
    %c0_240 = arith.constant 0 : index
    %c109_241 = arith.constant 109 : index
    %c0_242 = arith.constant 0 : index
    %174 = vector.load %arg1[%c0_240, %c109_241, %c0_242] : memref<1x162x64xf32, #tpu.memory_space<vmem>>, vector<1x8x64xf32>
    %175 = vector.shape_cast %174 : vector<1x8x64xf32> to vector<8x64xf32>
    %c80_243 = arith.constant 80 : index
    %c192_244 = arith.constant 192 : index
    %176 = vector.load %arg11[%c80_243, %c192_244] : memref<128x256xf32, #tpu.memory_space<vmem>>, vector<8x64xf32>
    tpu.vector_store %arg11[%c80_243, %c192_244], %175 {strides = array<i32>} : memref<128x256xf32, #tpu.memory_space<vmem>>, vector<8x64xf32>,
    %c0_245 = arith.constant 0 : index
    %c118_246 = arith.constant 118 : index
    %c0_247 = arith.constant 0 : index
    %177 = vector.load %arg1[%c0_245, %c118_246, %c0_247] : memref<1x162x64xf32, #tpu.memory_space<vmem>>, vector<1x8x64xf32>
    %178 = vector.shape_cast %177 : vector<1x8x64xf32> to vector<8x64xf32>
    %c88_248 = arith.constant 88 : index
    %c192_249 = arith.constant 192 : index
    %179 = vector.load %arg11[%c88_248, %c192_249] : memref<128x256xf32, #tpu.memory_space<vmem>>, vector<8x64xf32>
    tpu.vector_store %arg11[%c88_248, %c192_249], %178 {strides = array<i32>} : memref<128x256xf32, #tpu.memory_space<vmem>>, vector<8x64xf32>,
    %c0_250 = arith.constant 0 : index
    %c127_251 = arith.constant 127 : index
    %c0_252 = arith.constant 0 : index
    %180 = vector.load %arg1[%c0_250, %c127_251, %c0_252] : memref<1x162x64xf32, #tpu.memory_space<vmem>>, vector<1x8x64xf32>
    %181 = vector.shape_cast %180 : vector<1x8x64xf32> to vector<8x64xf32>
    %c96_253 = arith.constant 96 : index
    %c192_254 = arith.constant 192 : index
    %182 = vector.load %arg11[%c96_253, %c192_254] : memref<128x256xf32, #tpu.memory_space<vmem>>, vector<8x64xf32>
    tpu.vector_store %arg11[%c96_253, %c192_254], %181 {strides = array<i32>} : memref<128x256xf32, #tpu.memory_space<vmem>>, vector<8x64xf32>,
    %c0_255 = arith.constant 0 : index
    %c136_256 = arith.constant 136 : index
    %c0_257 = arith.constant 0 : index
    %183 = vector.load %arg1[%c0_255, %c136_256, %c0_257] : memref<1x162x64xf32, #tpu.memory_space<vmem>>, vector<1x8x64xf32>
    %184 = vector.shape_cast %183 : vector<1x8x64xf32> to vector<8x64xf32>
    %c104_258 = arith.constant 104 : index
    %c192_259 = arith.constant 192 : index
    %185 = vector.load %arg11[%c104_258, %c192_259] : memref<128x256xf32, #tpu.memory_space<vmem>>, vector<8x64xf32>
    tpu.vector_store %arg11[%c104_258, %c192_259], %184 {strides = array<i32>} : memref<128x256xf32, #tpu.memory_space<vmem>>, vector<8x64xf32>,
    %c0_260 = arith.constant 0 : index
    %c145_261 = arith.constant 145 : index
    %c0_262 = arith.constant 0 : index
    %186 = vector.load %arg1[%c0_260, %c145_261, %c0_262] : memref<1x162x64xf32, #tpu.memory_space<vmem>>, vector<1x8x64xf32>
    %187 = vector.shape_cast %186 : vector<1x8x64xf32> to vector<8x64xf32>
    %c112_263 = arith.constant 112 : index
    %c192_264 = arith.constant 192 : index
    %188 = vector.load %arg11[%c112_263, %c192_264] : memref<128x256xf32, #tpu.memory_space<vmem>>, vector<8x64xf32>
    tpu.vector_store %arg11[%c112_263, %c192_264], %187 {strides = array<i32>} : memref<128x256xf32, #tpu.memory_space<vmem>>, vector<8x64xf32>,
    %c0_265 = arith.constant 0 : index
    %c154 = arith.constant 154 : index
    %c0_266 = arith.constant 0 : index
    %189 = vector.load %arg1[%c0_265, %c154, %c0_266] : memref<1x162x64xf32, #tpu.memory_space<vmem>>, vector<1x8x64xf32>
    %190 = vector.shape_cast %189 : vector<1x8x64xf32> to vector<8x64xf32>
    %c120_267 = arith.constant 120 : index
    %c192_268 = arith.constant 192 : index
    %191 = vector.load %arg11[%c120_267, %c192_268] : memref<128x256xf32, #tpu.memory_space<vmem>>, vector<8x64xf32>
    tpu.vector_store %arg11[%c120_267, %c192_268], %190 {strides = array<i32>} : memref<128x256xf32, #tpu.memory_space<vmem>>, vector<8x64xf32>,
    %c0_269 = arith.constant 0 : index
    %c0_270 = arith.constant 0 : index
    %192 = vector.load %arg11[%c0_269, %c0_270] : memref<128x256xf32, #tpu.memory_space<vmem>>, vector<128x256xf32>
    %193 = arith.truncf %192 : vector<128x256xf32> to vector<128x256xbf16>
    %c0_271 = arith.constant 0 : index
    %c0_272 = arith.constant 0 : index
    %194 = vector.load %arg2[%c0_271, %c0_272] : memref<256x32xbf16, #tpu.memory_space<vmem>>, vector<256x32xbf16>
    %cst = arith.constant dense<0.000000e+00> : vector<128x32xf32>
    %195 = tpu.matmul %193, %194, %cst {dimension_numbers = #tpu.dot_dimension_numbers<[1], [0], [0], [1], [0, 0, 1, 1], [], []>} : vector<128x256xbf16>, vector<256x32xbf16>, vector<128x32xf32> -> vector<128x32xf32>
    %c0_273 = arith.constant 0 : index
    %c0_274 = arith.constant 0 : index
    %196 = vector.load %arg3[%c0_273, %c0_274] : memref<1x32xf32, #tpu.memory_space<vmem>>, vector<1x32xf32>
    %197 = vector.broadcast %196 : vector<1x32xf32> to vector<128x32xf32>
    %198 = arith.addf %195, %197 : vector<128x32xf32>
    %cst_275 = arith.constant 0.000000e+00 : f32
    %199 = vector.broadcast %cst_275 : f32 to vector<128x32xf32>
    %200 = arith.maximumf %198, %199 : vector<128x32xf32>
    %c0_276 = arith.constant 0 : index
    %c0_277 = arith.constant 0 : index
    %201 = vector.load %arg12[%c0_276, %c0_277] : memref<128x32xf32, #tpu.memory_space<vmem>>, vector<128x32xf32>
    tpu.vector_store %arg12[%c0_276, %c0_277], %200 {strides = array<i32>} : memref<128x32xf32, #tpu.memory_space<vmem>>, vector<128x32xf32>,
    %c0_278 = arith.constant 0 : index
    %c0_279 = arith.constant 0 : index
    %202 = tpu.strided_load %arg12[%c0_278, %c0_279] {strides = array<i32: 2, 1>} : memref<128x32xf32, #tpu.memory_space<vmem>>, vector<3x32xf32>
    %c0_280 = arith.constant 0 : index
    %c0_281 = arith.constant 0 : index
    %203 = vector.load %arg13[%c0_280, %c0_281] : memref<18x512xf32, #tpu.memory_space<vmem>>, vector<3x32xf32>
    tpu.vector_store %arg13[%c0_280, %c0_281], %202 {strides = array<i32>} : memref<18x512xf32, #tpu.memory_space<vmem>>, vector<3x32xf32>,
    %c16_282 = arith.constant 16 : index
    %c0_283 = arith.constant 0 : index
    %204 = tpu.strided_load %arg12[%c16_282, %c0_283] {strides = array<i32: 2, 1>} : memref<128x32xf32, #tpu.memory_space<vmem>>, vector<3x32xf32>
    %c3 = arith.constant 3 : index
    %c0_284 = arith.constant 0 : index
    %205 = vector.load %arg13[%c3, %c0_284] : memref<18x512xf32, #tpu.memory_space<vmem>>, vector<3x32xf32>
    tpu.vector_store %arg13[%c3, %c0_284], %204 {strides = array<i32>} : memref<18x512xf32, #tpu.memory_space<vmem>>, vector<3x32xf32>,
    %c32_285 = arith.constant 32 : index
    %c0_286 = arith.constant 0 : index
    %206 = tpu.strided_load %arg12[%c32_285, %c0_286] {strides = array<i32: 2, 1>} : memref<128x32xf32, #tpu.memory_space<vmem>>, vector<3x32xf32>
    %c6 = arith.constant 6 : index
    %c0_287 = arith.constant 0 : index
    %207 = vector.load %arg13[%c6, %c0_287] : memref<18x512xf32, #tpu.memory_space<vmem>>, vector<3x32xf32>
    tpu.vector_store %arg13[%c6, %c0_287], %206 {strides = array<i32>} : memref<18x512xf32, #tpu.memory_space<vmem>>, vector<3x32xf32>,
    %c64_288 = arith.constant 64 : index
    %c0_289 = arith.constant 0 : index
    %208 = tpu.strided_load %arg12[%c64_288, %c0_289] {strides = array<i32: 2, 1>} : memref<128x32xf32, #tpu.memory_space<vmem>>, vector<3x32xf32>
    %c9_290 = arith.constant 9 : index
    %c0_291 = arith.constant 0 : index
    %209 = vector.load %arg13[%c9_290, %c0_291] : memref<18x512xf32, #tpu.memory_space<vmem>>, vector<3x32xf32>
    tpu.vector_store %arg13[%c9_290, %c0_291], %208 {strides = array<i32>} : memref<18x512xf32, #tpu.memory_space<vmem>>, vector<3x32xf32>,
    %c80_292 = arith.constant 80 : index
    %c0_293 = arith.constant 0 : index
    %210 = tpu.strided_load %arg12[%c80_292, %c0_293] {strides = array<i32: 2, 1>} : memref<128x32xf32, #tpu.memory_space<vmem>>, vector<3x32xf32>
    %c12 = arith.constant 12 : index
    %c0_294 = arith.constant 0 : index
    %211 = vector.load %arg13[%c12, %c0_294] : memref<18x512xf32, #tpu.memory_space<vmem>>, vector<3x32xf32>
    tpu.vector_store %arg13[%c12, %c0_294], %210 {strides = array<i32>} : memref<18x512xf32, #tpu.memory_space<vmem>>, vector<3x32xf32>,
    %c96_295 = arith.constant 96 : index
    %c0_296 = arith.constant 0 : index
    %212 = tpu.strided_load %arg12[%c96_295, %c0_296] {strides = array<i32: 2, 1>} : memref<128x32xf32, #tpu.memory_space<vmem>>, vector<3x32xf32>
    %c15 = arith.constant 15 : index
    %c0_297 = arith.constant 0 : index
    %213 = vector.load %arg13[%c15, %c0_297] : memref<18x512xf32, #tpu.memory_space<vmem>>, vector<3x32xf32>
    tpu.vector_store %arg13[%c15, %c0_297], %212 {strides = array<i32>} : memref<18x512xf32, #tpu.memory_space<vmem>>, vector<3x32xf32>,
    %c1_298 = arith.constant 1 : index
    %c0_299 = arith.constant 0 : index
    %214 = tpu.strided_load %arg12[%c1_298, %c0_299] {strides = array<i32: 2, 1>} : memref<128x32xf32, #tpu.memory_space<vmem>>, vector<3x32xf32>
    %c0_300 = arith.constant 0 : index
    %c32_301 = arith.constant 32 : index
    %215 = vector.load %arg13[%c0_300, %c32_301] : memref<18x512xf32, #tpu.memory_space<vmem>>, vector<3x32xf32>
    tpu.vector_store %arg13[%c0_300, %c32_301], %214 {strides = array<i32>} : memref<18x512xf32, #tpu.memory_space<vmem>>, vector<3x32xf32>,
    %c17 = arith.constant 17 : index
    %c0_302 = arith.constant 0 : index
    %216 = tpu.strided_load %arg12[%c17, %c0_302] {strides = array<i32: 2, 1>} : memref<128x32xf32, #tpu.memory_space<vmem>>, vector<3x32xf32>
    %c3_303 = arith.constant 3 : index
    %c32_304 = arith.constant 32 : index
    %217 = vector.load %arg13[%c3_303, %c32_304] : memref<18x512xf32, #tpu.memory_space<vmem>>, vector<3x32xf32>
    tpu.vector_store %arg13[%c3_303, %c32_304], %216 {strides = array<i32>} : memref<18x512xf32, #tpu.memory_space<vmem>>, vector<3x32xf32>,
    %c33 = arith.constant 33 : index
    %c0_305 = arith.constant 0 : index
    %218 = tpu.strided_load %arg12[%c33, %c0_305] {strides = array<i32: 2, 1>} : memref<128x32xf32, #tpu.memory_space<vmem>>, vector<3x32xf32>
    %c6_306 = arith.constant 6 : index
    %c32_307 = arith.constant 32 : index
    %219 = vector.load %arg13[%c6_306, %c32_307] : memref<18x512xf32, #tpu.memory_space<vmem>>, vector<3x32xf32>
    tpu.vector_store %arg13[%c6_306, %c32_307], %218 {strides = array<i32>} : memref<18x512xf32, #tpu.memory_space<vmem>>, vector<3x32xf32>,
    %c65 = arith.constant 65 : index
    %c0_308 = arith.constant 0 : index
    %220 = tpu.strided_load %arg12[%c65, %c0_308] {strides = array<i32: 2, 1>} : memref<128x32xf32, #tpu.memory_space<vmem>>, vector<3x32xf32>
    %c9_309 = arith.constant 9 : index
    %c32_310 = arith.constant 32 : index
    %221 = vector.load %arg13[%c9_309, %c32_310] : memref<18x512xf32, #tpu.memory_space<vmem>>, vector<3x32xf32>
    tpu.vector_store %arg13[%c9_309, %c32_310], %220 {strides = array<i32>} : memref<18x512xf32, #tpu.memory_space<vmem>>, vector<3x32xf32>,
    %c81_311 = arith.constant 81 : index
    %c0_312 = arith.constant 0 : index
    %222 = tpu.strided_load %arg12[%c81_311, %c0_312] {strides = array<i32: 2, 1>} : memref<128x32xf32, #tpu.memory_space<vmem>>, vector<3x32xf32>
    %c12_313 = arith.constant 12 : index
    %c32_314 = arith.constant 32 : index
    %223 = vector.load %arg13[%c12_313, %c32_314] : memref<18x512xf32, #tpu.memory_space<vmem>>, vector<3x32xf32>
    tpu.vector_store %arg13[%c12_313, %c32_314], %222 {strides = array<i32>} : memref<18x512xf32, #tpu.memory_space<vmem>>, vector<3x32xf32>,
    %c97 = arith.constant 97 : index
    %c0_315 = arith.constant 0 : index
    %224 = tpu.strided_load %arg12[%c97, %c0_315] {strides = array<i32: 2, 1>} : memref<128x32xf32, #tpu.memory_space<vmem>>, vector<3x32xf32>
    %c15_316 = arith.constant 15 : index
    %c32_317 = arith.constant 32 : index
    %225 = vector.load %arg13[%c15_316, %c32_317] : memref<18x512xf32, #tpu.memory_space<vmem>>, vector<3x32xf32>
    tpu.vector_store %arg13[%c15_316, %c32_317], %224 {strides = array<i32>} : memref<18x512xf32, #tpu.memory_space<vmem>>, vector<3x32xf32>,
    %c2 = arith.constant 2 : index
    %c0_318 = arith.constant 0 : index
    %226 = tpu.strided_load %arg12[%c2, %c0_318] {strides = array<i32: 2, 1>} : memref<128x32xf32, #tpu.memory_space<vmem>>, vector<3x32xf32>
    %c0_319 = arith.constant 0 : index
    %c64_320 = arith.constant 64 : index
    %227 = vector.load %arg13[%c0_319, %c64_320] : memref<18x512xf32, #tpu.memory_space<vmem>>, vector<3x32xf32>
    tpu.vector_store %arg13[%c0_319, %c64_320], %226 {strides = array<i32>} : memref<18x512xf32, #tpu.memory_space<vmem>>, vector<3x32xf32>,
    %c18_321 = arith.constant 18 : index
    %c0_322 = arith.constant 0 : index
    %228 = tpu.strided_load %arg12[%c18_321, %c0_322] {strides = array<i32: 2, 1>} : memref<128x32xf32, #tpu.memory_space<vmem>>, vector<3x32xf32>
    %c3_323 = arith.constant 3 : index
    %c64_324 = arith.constant 64 : index
    %229 = vector.load %arg13[%c3_323, %c64_324] : memref<18x512xf32, #tpu.memory_space<vmem>>, vector<3x32xf32>
    tpu.vector_store %arg13[%c3_323, %c64_324], %228 {strides = array<i32>} : memref<18x512xf32, #tpu.memory_space<vmem>>, vector<3x32xf32>,
    %c34 = arith.constant 34 : index
    %c0_325 = arith.constant 0 : index
    %230 = tpu.strided_load %arg12[%c34, %c0_325] {strides = array<i32: 2, 1>} : memref<128x32xf32, #tpu.memory_space<vmem>>, vector<3x32xf32>
    %c6_326 = arith.constant 6 : index
    %c64_327 = arith.constant 64 : index
    %231 = vector.load %arg13[%c6_326, %c64_327] : memref<18x512xf32, #tpu.memory_space<vmem>>, vector<3x32xf32>
    tpu.vector_store %arg13[%c6_326, %c64_327], %230 {strides = array<i32>} : memref<18x512xf32, #tpu.memory_space<vmem>>, vector<3x32xf32>,
    %c66 = arith.constant 66 : index
    %c0_328 = arith.constant 0 : index
    %232 = tpu.strided_load %arg12[%c66, %c0_328] {strides = array<i32: 2, 1>} : memref<128x32xf32, #tpu.memory_space<vmem>>, vector<3x32xf32>
    %c9_329 = arith.constant 9 : index
    %c64_330 = arith.constant 64 : index
    %233 = vector.load %arg13[%c9_329, %c64_330] : memref<18x512xf32, #tpu.memory_space<vmem>>, vector<3x32xf32>
    tpu.vector_store %arg13[%c9_329, %c64_330], %232 {strides = array<i32>} : memref<18x512xf32, #tpu.memory_space<vmem>>, vector<3x32xf32>,
    %c82_331 = arith.constant 82 : index
    %c0_332 = arith.constant 0 : index
    %234 = tpu.strided_load %arg12[%c82_331, %c0_332] {strides = array<i32: 2, 1>} : memref<128x32xf32, #tpu.memory_space<vmem>>, vector<3x32xf32>
    %c12_333 = arith.constant 12 : index
    %c64_334 = arith.constant 64 : index
    %235 = vector.load %arg13[%c12_333, %c64_334] : memref<18x512xf32, #tpu.memory_space<vmem>>, vector<3x32xf32>
    tpu.vector_store %arg13[%c12_333, %c64_334], %234 {strides = array<i32>} : memref<18x512xf32, #tpu.memory_space<vmem>>, vector<3x32xf32>,
    %c98 = arith.constant 98 : index
    %c0_335 = arith.constant 0 : index
    %236 = tpu.strided_load %arg12[%c98, %c0_335] {strides = array<i32: 2, 1>} : memref<128x32xf32, #tpu.memory_space<vmem>>, vector<3x32xf32>
    %c15_336 = arith.constant 15 : index
    %c64_337 = arith.constant 64 : index
    %237 = vector.load %arg13[%c15_336, %c64_337] : memref<18x512xf32, #tpu.memory_space<vmem>>, vector<3x32xf32>
    tpu.vector_store %arg13[%c15_336, %c64_337], %236 {strides = array<i32>} : memref<18x512xf32, #tpu.memory_space<vmem>>, vector<3x32xf32>,
    %c3_338 = arith.constant 3 : index
    %c0_339 = arith.constant 0 : index
    %238 = tpu.strided_load %arg12[%c3_338, %c0_339] {strides = array<i32: 2, 1>} : memref<128x32xf32, #tpu.memory_space<vmem>>, vector<3x32xf32>
    %c0_340 = arith.constant 0 : index
    %c96_341 = arith.constant 96 : index
    %239 = vector.load %arg13[%c0_340, %c96_341] : memref<18x512xf32, #tpu.memory_space<vmem>>, vector<3x32xf32>
    tpu.vector_store %arg13[%c0_340, %c96_341], %238 {strides = array<i32>} : memref<18x512xf32, #tpu.memory_space<vmem>>, vector<3x32xf32>,
    %c19_342 = arith.constant 19 : index
    %c0_343 = arith.constant 0 : index
    %240 = tpu.strided_load %arg12[%c19_342, %c0_343] {strides = array<i32: 2, 1>} : memref<128x32xf32, #tpu.memory_space<vmem>>, vector<3x32xf32>
    %c3_344 = arith.constant 3 : index
    %c96_345 = arith.constant 96 : index
    %241 = vector.load %arg13[%c3_344, %c96_345] : memref<18x512xf32, #tpu.memory_space<vmem>>, vector<3x32xf32>
    tpu.vector_store %arg13[%c3_344, %c96_345], %240 {strides = array<i32>} : memref<18x512xf32, #tpu.memory_space<vmem>>, vector<3x32xf32>,
    %c35 = arith.constant 35 : index
    %c0_346 = arith.constant 0 : index
    %242 = tpu.strided_load %arg12[%c35, %c0_346] {strides = array<i32: 2, 1>} : memref<128x32xf32, #tpu.memory_space<vmem>>, vector<3x32xf32>
    %c6_347 = arith.constant 6 : index
    %c96_348 = arith.constant 96 : index
    %243 = vector.load %arg13[%c6_347, %c96_348] : memref<18x512xf32, #tpu.memory_space<vmem>>, vector<3x32xf32>
    tpu.vector_store %arg13[%c6_347, %c96_348], %242 {strides = array<i32>} : memref<18x512xf32, #tpu.memory_space<vmem>>, vector<3x32xf32>,
    %c67 = arith.constant 67 : index
    %c0_349 = arith.constant 0 : index
    %244 = tpu.strided_load %arg12[%c67, %c0_349] {strides = array<i32: 2, 1>} : memref<128x32xf32, #tpu.memory_space<vmem>>, vector<3x32xf32>
    %c9_350 = arith.constant 9 : index
    %c96_351 = arith.constant 96 : index
    %245 = vector.load %arg13[%c9_350, %c96_351] : memref<18x512xf32, #tpu.memory_space<vmem>>, vector<3x32xf32>
    tpu.vector_store %arg13[%c9_350, %c96_351], %244 {strides = array<i32>} : memref<18x512xf32, #tpu.memory_space<vmem>>, vector<3x32xf32>,
    %c83 = arith.constant 83 : index
    %c0_352 = arith.constant 0 : index
    %246 = tpu.strided_load %arg12[%c83, %c0_352] {strides = array<i32: 2, 1>} : memref<128x32xf32, #tpu.memory_space<vmem>>, vector<3x32xf32>
    %c12_353 = arith.constant 12 : index
    %c96_354 = arith.constant 96 : index
    %247 = vector.load %arg13[%c12_353, %c96_354] : memref<18x512xf32, #tpu.memory_space<vmem>>, vector<3x32xf32>
    tpu.vector_store %arg13[%c12_353, %c96_354], %246 {strides = array<i32>} : memref<18x512xf32, #tpu.memory_space<vmem>>, vector<3x32xf32>,
    %c99_355 = arith.constant 99 : index
    %c0_356 = arith.constant 0 : index
    %248 = tpu.strided_load %arg12[%c99_355, %c0_356] {strides = array<i32: 2, 1>} : memref<128x32xf32, #tpu.memory_space<vmem>>, vector<3x32xf32>
    %c15_357 = arith.constant 15 : index
    %c96_358 = arith.constant 96 : index
    %249 = vector.load %arg13[%c15_357, %c96_358] : memref<18x512xf32, #tpu.memory_space<vmem>>, vector<3x32xf32>
    tpu.vector_store %arg13[%c15_357, %c96_358], %248 {strides = array<i32>} : memref<18x512xf32, #tpu.memory_space<vmem>>, vector<3x32xf32>,
    %c8_359 = arith.constant 8 : index
    %c0_360 = arith.constant 0 : index
    %250 = tpu.strided_load %arg12[%c8_359, %c0_360] {strides = array<i32: 2, 1>} : memref<128x32xf32, #tpu.memory_space<vmem>>, vector<3x32xf32>
    %c0_361 = arith.constant 0 : index
    %c128_362 = arith.constant 128 : index
    %251 = vector.load %arg13[%c0_361, %c128_362] : memref<18x512xf32, #tpu.memory_space<vmem>>, vector<3x32xf32>
    tpu.vector_store %arg13[%c0_361, %c128_362], %250 {strides = array<i32>} : memref<18x512xf32, #tpu.memory_space<vmem>>, vector<3x32xf32>,
    %c24_363 = arith.constant 24 : index
    %c0_364 = arith.constant 0 : index
    %252 = tpu.strided_load %arg12[%c24_363, %c0_364] {strides = array<i32: 2, 1>} : memref<128x32xf32, #tpu.memory_space<vmem>>, vector<3x32xf32>
    %c3_365 = arith.constant 3 : index
    %c128_366 = arith.constant 128 : index
    %253 = vector.load %arg13[%c3_365, %c128_366] : memref<18x512xf32, #tpu.memory_space<vmem>>, vector<3x32xf32>
    tpu.vector_store %arg13[%c3_365, %c128_366], %252 {strides = array<i32>} : memref<18x512xf32, #tpu.memory_space<vmem>>, vector<3x32xf32>,
    %c40_367 = arith.constant 40 : index
    %c0_368 = arith.constant 0 : index
    %254 = tpu.strided_load %arg12[%c40_367, %c0_368] {strides = array<i32: 2, 1>} : memref<128x32xf32, #tpu.memory_space<vmem>>, vector<3x32xf32>
    %c6_369 = arith.constant 6 : index
    %c128_370 = arith.constant 128 : index
    %255 = vector.load %arg13[%c6_369, %c128_370] : memref<18x512xf32, #tpu.memory_space<vmem>>, vector<3x32xf32>
    tpu.vector_store %arg13[%c6_369, %c128_370], %254 {strides = array<i32>} : memref<18x512xf32, #tpu.memory_space<vmem>>, vector<3x32xf32>,
    %c72_371 = arith.constant 72 : index
    %c0_372 = arith.constant 0 : index
    %256 = tpu.strided_load %arg12[%c72_371, %c0_372] {strides = array<i32: 2, 1>} : memref<128x32xf32, #tpu.memory_space<vmem>>, vector<3x32xf32>
    %c9_373 = arith.constant 9 : index
    %c128_374 = arith.constant 128 : index
    %257 = vector.load %arg13[%c9_373, %c128_374] : memref<18x512xf32, #tpu.memory_space<vmem>>, vector<3x32xf32>
    tpu.vector_store %arg13[%c9_373, %c128_374], %256 {strides = array<i32>} : memref<18x512xf32, #tpu.memory_space<vmem>>, vector<3x32xf32>,
    %c88_375 = arith.constant 88 : index
    %c0_376 = arith.constant 0 : index
    %258 = tpu.strided_load %arg12[%c88_375, %c0_376] {strides = array<i32: 2, 1>} : memref<128x32xf32, #tpu.memory_space<vmem>>, vector<3x32xf32>
    %c12_377 = arith.constant 12 : index
    %c128_378 = arith.constant 128 : index
    %259 = vector.load %arg13[%c12_377, %c128_378] : memref<18x512xf32, #tpu.memory_space<vmem>>, vector<3x32xf32>
    tpu.vector_store %arg13[%c12_377, %c128_378], %258 {strides = array<i32>} : memref<18x512xf32, #tpu.memory_space<vmem>>, vector<3x32xf32>,
    %c104_379 = arith.constant 104 : index
    %c0_380 = arith.constant 0 : index
    %260 = tpu.strided_load %arg12[%c104_379, %c0_380] {strides = array<i32: 2, 1>} : memref<128x32xf32, #tpu.memory_space<vmem>>, vector<3x32xf32>
    %c15_381 = arith.constant 15 : index
    %c128_382 = arith.constant 128 : index
    %261 = vector.load %arg13[%c15_381, %c128_382] : memref<18x512xf32, #tpu.memory_space<vmem>>, vector<3x32xf32>
    tpu.vector_store %arg13[%c15_381, %c128_382], %260 {strides = array<i32>} : memref<18x512xf32, #tpu.memory_space<vmem>>, vector<3x32xf32>,
    %c9_383 = arith.constant 9 : index
    %c0_384 = arith.constant 0 : index
    %262 = tpu.strided_load %arg12[%c9_383, %c0_384] {strides = array<i32: 2, 1>} : memref<128x32xf32, #tpu.memory_space<vmem>>, vector<3x32xf32>
    %c0_385 = arith.constant 0 : index
    %c160 = arith.constant 160 : index
    %263 = vector.load %arg13[%c0_385, %c160] : memref<18x512xf32, #tpu.memory_space<vmem>>, vector<3x32xf32>
    tpu.vector_store %arg13[%c0_385, %c160], %262 {strides = array<i32>} : memref<18x512xf32, #tpu.memory_space<vmem>>, vector<3x32xf32>,
    %c25 = arith.constant 25 : index
    %c0_386 = arith.constant 0 : index
    %264 = tpu.strided_load %arg12[%c25, %c0_386] {strides = array<i32: 2, 1>} : memref<128x32xf32, #tpu.memory_space<vmem>>, vector<3x32xf32>
    %c3_387 = arith.constant 3 : index
    %c160_388 = arith.constant 160 : index
    %265 = vector.load %arg13[%c3_387, %c160_388] : memref<18x512xf32, #tpu.memory_space<vmem>>, vector<3x32xf32>
    tpu.vector_store %arg13[%c3_387, %c160_388], %264 {strides = array<i32>} : memref<18x512xf32, #tpu.memory_space<vmem>>, vector<3x32xf32>,
    %c41 = arith.constant 41 : index
    %c0_389 = arith.constant 0 : index
    %266 = tpu.strided_load %arg12[%c41, %c0_389] {strides = array<i32: 2, 1>} : memref<128x32xf32, #tpu.memory_space<vmem>>, vector<3x32xf32>
    %c6_390 = arith.constant 6 : index
    %c160_391 = arith.constant 160 : index
    %267 = vector.load %arg13[%c6_390, %c160_391] : memref<18x512xf32, #tpu.memory_space<vmem>>, vector<3x32xf32>
    tpu.vector_store %arg13[%c6_390, %c160_391], %266 {strides = array<i32>} : memref<18x512xf32, #tpu.memory_space<vmem>>, vector<3x32xf32>,
    %c73_392 = arith.constant 73 : index
    %c0_393 = arith.constant 0 : index
    %268 = tpu.strided_load %arg12[%c73_392, %c0_393] {strides = array<i32: 2, 1>} : memref<128x32xf32, #tpu.memory_space<vmem>>, vector<3x32xf32>
    %c9_394 = arith.constant 9 : index
    %c160_395 = arith.constant 160 : index
    %269 = vector.load %arg13[%c9_394, %c160_395] : memref<18x512xf32, #tpu.memory_space<vmem>>, vector<3x32xf32>
    tpu.vector_store %arg13[%c9_394, %c160_395], %268 {strides = array<i32>} : memref<18x512xf32, #tpu.memory_space<vmem>>, vector<3x32xf32>,
    %c89 = arith.constant 89 : index
    %c0_396 = arith.constant 0 : index
    %270 = tpu.strided_load %arg12[%c89, %c0_396] {strides = array<i32: 2, 1>} : memref<128x32xf32, #tpu.memory_space<vmem>>, vector<3x32xf32>
    %c12_397 = arith.constant 12 : index
    %c160_398 = arith.constant 160 : index
    %271 = vector.load %arg13[%c12_397, %c160_398] : memref<18x512xf32, #tpu.memory_space<vmem>>, vector<3x32xf32>
    tpu.vector_store %arg13[%c12_397, %c160_398], %270 {strides = array<i32>} : memref<18x512xf32, #tpu.memory_space<vmem>>, vector<3x32xf32>,
    %c105 = arith.constant 105 : index
    %c0_399 = arith.constant 0 : index
    %272 = tpu.strided_load %arg12[%c105, %c0_399] {strides = array<i32: 2, 1>} : memref<128x32xf32, #tpu.memory_space<vmem>>, vector<3x32xf32>
    %c15_400 = arith.constant 15 : index
    %c160_401 = arith.constant 160 : index
    %273 = vector.load %arg13[%c15_400, %c160_401] : memref<18x512xf32, #tpu.memory_space<vmem>>, vector<3x32xf32>
    tpu.vector_store %arg13[%c15_400, %c160_401], %272 {strides = array<i32>} : memref<18x512xf32, #tpu.memory_space<vmem>>, vector<3x32xf32>,
    %c10_402 = arith.constant 10 : index
    %c0_403 = arith.constant 0 : index
    %274 = tpu.strided_load %arg12[%c10_402, %c0_403] {strides = array<i32: 2, 1>} : memref<128x32xf32, #tpu.memory_space<vmem>>, vector<3x32xf32>
    %c0_404 = arith.constant 0 : index
    %c192_405 = arith.constant 192 : index
    %275 = vector.load %arg13[%c0_404, %c192_405] : memref<18x512xf32, #tpu.memory_space<vmem>>, vector<3x32xf32>
    tpu.vector_store %arg13[%c0_404, %c192_405], %274 {strides = array<i32>} : memref<18x512xf32, #tpu.memory_space<vmem>>, vector<3x32xf32>,
    %c26 = arith.constant 26 : index
    %c0_406 = arith.constant 0 : index
    %276 = tpu.strided_load %arg12[%c26, %c0_406] {strides = array<i32: 2, 1>} : memref<128x32xf32, #tpu.memory_space<vmem>>, vector<3x32xf32>
    %c3_407 = arith.constant 3 : index
    %c192_408 = arith.constant 192 : index
    %277 = vector.load %arg13[%c3_407, %c192_408] : memref<18x512xf32, #tpu.memory_space<vmem>>, vector<3x32xf32>
    tpu.vector_store %arg13[%c3_407, %c192_408], %276 {strides = array<i32>} : memref<18x512xf32, #tpu.memory_space<vmem>>, vector<3x32xf32>,
    %c42 = arith.constant 42 : index
    %c0_409 = arith.constant 0 : index
    %278 = tpu.strided_load %arg12[%c42, %c0_409] {strides = array<i32: 2, 1>} : memref<128x32xf32, #tpu.memory_space<vmem>>, vector<3x32xf32>
    %c6_410 = arith.constant 6 : index
    %c192_411 = arith.constant 192 : index
    %279 = vector.load %arg13[%c6_410, %c192_411] : memref<18x512xf32, #tpu.memory_space<vmem>>, vector<3x32xf32>
    tpu.vector_store %arg13[%c6_410, %c192_411], %278 {strides = array<i32>} : memref<18x512xf32, #tpu.memory_space<vmem>>, vector<3x32xf32>,
    %c74 = arith.constant 74 : index
    %c0_412 = arith.constant 0 : index
    %280 = tpu.strided_load %arg12[%c74, %c0_412] {strides = array<i32: 2, 1>} : memref<128x32xf32, #tpu.memory_space<vmem>>, vector<3x32xf32>
    %c9_413 = arith.constant 9 : index
    %c192_414 = arith.constant 192 : index
    %281 = vector.load %arg13[%c9_413, %c192_414] : memref<18x512xf32, #tpu.memory_space<vmem>>, vector<3x32xf32>
    tpu.vector_store %arg13[%c9_413, %c192_414], %280 {strides = array<i32>} : memref<18x512xf32, #tpu.memory_space<vmem>>, vector<3x32xf32>,
    %c90_415 = arith.constant 90 : index
    %c0_416 = arith.constant 0 : index
    %282 = tpu.strided_load %arg12[%c90_415, %c0_416] {strides = array<i32: 2, 1>} : memref<128x32xf32, #tpu.memory_space<vmem>>, vector<3x32xf32>
    %c12_417 = arith.constant 12 : index
    %c192_418 = arith.constant 192 : index
    %283 = vector.load %arg13[%c12_417, %c192_418] : memref<18x512xf32, #tpu.memory_space<vmem>>, vector<3x32xf32>
    tpu.vector_store %arg13[%c12_417, %c192_418], %282 {strides = array<i32>} : memref<18x512xf32, #tpu.memory_space<vmem>>, vector<3x32xf32>,
    %c106 = arith.constant 106 : index
    %c0_419 = arith.constant 0 : index
    %284 = tpu.strided_load %arg12[%c106, %c0_419] {strides = array<i32: 2, 1>} : memref<128x32xf32, #tpu.memory_space<vmem>>, vector<3x32xf32>
    %c15_420 = arith.constant 15 : index
    %c192_421 = arith.constant 192 : index
    %285 = vector.load %arg13[%c15_420, %c192_421] : memref<18x512xf32, #tpu.memory_space<vmem>>, vector<3x32xf32>
    tpu.vector_store %arg13[%c15_420, %c192_421], %284 {strides = array<i32>} : memref<18x512xf32, #tpu.memory_space<vmem>>, vector<3x32xf32>,
    %c11 = arith.constant 11 : index
    %c0_422 = arith.constant 0 : index
    %286 = tpu.strided_load %arg12[%c11, %c0_422] {strides = array<i32: 2, 1>} : memref<128x32xf32, #tpu.memory_space<vmem>>, vector<3x32xf32>
    %c0_423 = arith.constant 0 : index
    %c224 = arith.constant 224 : index
    %287 = vector.load %arg13[%c0_423, %c224] : memref<18x512xf32, #tpu.memory_space<vmem>>, vector<3x32xf32>
    tpu.vector_store %arg13[%c0_423, %c224], %286 {strides = array<i32>} : memref<18x512xf32, #tpu.memory_space<vmem>>, vector<3x32xf32>,
    %c27_424 = arith.constant 27 : index
    %c0_425 = arith.constant 0 : index
    %288 = tpu.strided_load %arg12[%c27_424, %c0_425] {strides = array<i32: 2, 1>} : memref<128x32xf32, #tpu.memory_space<vmem>>, vector<3x32xf32>
    %c3_426 = arith.constant 3 : index
    %c224_427 = arith.constant 224 : index
    %289 = vector.load %arg13[%c3_426, %c224_427] : memref<18x512xf32, #tpu.memory_space<vmem>>, vector<3x32xf32>
    tpu.vector_store %arg13[%c3_426, %c224_427], %288 {strides = array<i32>} : memref<18x512xf32, #tpu.memory_space<vmem>>, vector<3x32xf32>,
    %c43 = arith.constant 43 : index
    %c0_428 = arith.constant 0 : index
    %290 = tpu.strided_load %arg12[%c43, %c0_428] {strides = array<i32: 2, 1>} : memref<128x32xf32, #tpu.memory_space<vmem>>, vector<3x32xf32>
    %c6_429 = arith.constant 6 : index
    %c224_430 = arith.constant 224 : index
    %291 = vector.load %arg13[%c6_429, %c224_430] : memref<18x512xf32, #tpu.memory_space<vmem>>, vector<3x32xf32>
    tpu.vector_store %arg13[%c6_429, %c224_430], %290 {strides = array<i32>} : memref<18x512xf32, #tpu.memory_space<vmem>>, vector<3x32xf32>,
    %c75 = arith.constant 75 : index
    %c0_431 = arith.constant 0 : index
    %292 = tpu.strided_load %arg12[%c75, %c0_431] {strides = array<i32: 2, 1>} : memref<128x32xf32, #tpu.memory_space<vmem>>, vector<3x32xf32>
    %c9_432 = arith.constant 9 : index
    %c224_433 = arith.constant 224 : index
    %293 = vector.load %arg13[%c9_432, %c224_433] : memref<18x512xf32, #tpu.memory_space<vmem>>, vector<3x32xf32>
    tpu.vector_store %arg13[%c9_432, %c224_433], %292 {strides = array<i32>} : memref<18x512xf32, #tpu.memory_space<vmem>>, vector<3x32xf32>,
    %c91_434 = arith.constant 91 : index
    %c0_435 = arith.constant 0 : index
    %294 = tpu.strided_load %arg12[%c91_434, %c0_435] {strides = array<i32: 2, 1>} : memref<128x32xf32, #tpu.memory_space<vmem>>, vector<3x32xf32>
    %c12_436 = arith.constant 12 : index
    %c224_437 = arith.constant 224 : index
    %295 = vector.load %arg13[%c12_436, %c224_437] : memref<18x512xf32, #tpu.memory_space<vmem>>, vector<3x32xf32>
    tpu.vector_store %arg13[%c12_436, %c224_437], %294 {strides = array<i32>} : memref<18x512xf32, #tpu.memory_space<vmem>>, vector<3x32xf32>,
    %c107 = arith.constant 107 : index
    %c0_438 = arith.constant 0 : index
    %296 = tpu.strided_load %arg12[%c107, %c0_438] {strides = array<i32: 2, 1>} : memref<128x32xf32, #tpu.memory_space<vmem>>, vector<3x32xf32>
    %c15_439 = arith.constant 15 : index
    %c224_440 = arith.constant 224 : index
    %297 = vector.load %arg13[%c15_439, %c224_440] : memref<18x512xf32, #tpu.memory_space<vmem>>, vector<3x32xf32>
    tpu.vector_store %arg13[%c15_439, %c224_440], %296 {strides = array<i32>} : memref<18x512xf32, #tpu.memory_space<vmem>>, vector<3x32xf32>,
    %c16_441 = arith.constant 16 : index
    %c0_442 = arith.constant 0 : index
    %298 = tpu.strided_load %arg12[%c16_441, %c0_442] {strides = array<i32: 2, 1>} : memref<128x32xf32, #tpu.memory_space<vmem>>, vector<3x32xf32>
    %c0_443 = arith.constant 0 : index
    %c256 = arith.constant 256 : index
    %299 = vector.load %arg13[%c0_443, %c256] : memref<18x512xf32, #tpu.memory_space<vmem>>, vector<3x32xf32>
    tpu.vector_store %arg13[%c0_443, %c256], %298 {strides = array<i32>} : memref<18x512xf32, #tpu.memory_space<vmem>>, vector<3x32xf32>,
    %c32_444 = arith.constant 32 : index
    %c0_445 = arith.constant 0 : index
    %300 = tpu.strided_load %arg12[%c32_444, %c0_445] {strides = array<i32: 2, 1>} : memref<128x32xf32, #tpu.memory_space<vmem>>, vector<3x32xf32>
    %c3_446 = arith.constant 3 : index
    %c256_447 = arith.constant 256 : index
    %301 = vector.load %arg13[%c3_446, %c256_447] : memref<18x512xf32, #tpu.memory_space<vmem>>, vector<3x32xf32>
    tpu.vector_store %arg13[%c3_446, %c256_447], %300 {strides = array<i32>} : memref<18x512xf32, #tpu.memory_space<vmem>>, vector<3x32xf32>,
    %c48_448 = arith.constant 48 : index
    %c0_449 = arith.constant 0 : index
    %302 = tpu.strided_load %arg12[%c48_448, %c0_449] {strides = array<i32: 2, 1>} : memref<128x32xf32, #tpu.memory_space<vmem>>, vector<3x32xf32>
    %c6_450 = arith.constant 6 : index
    %c256_451 = arith.constant 256 : index
    %303 = vector.load %arg13[%c6_450, %c256_451] : memref<18x512xf32, #tpu.memory_space<vmem>>, vector<3x32xf32>
    tpu.vector_store %arg13[%c6_450, %c256_451], %302 {strides = array<i32>} : memref<18x512xf32, #tpu.memory_space<vmem>>, vector<3x32xf32>,
    %c80_452 = arith.constant 80 : index
    %c0_453 = arith.constant 0 : index
    %304 = tpu.strided_load %arg12[%c80_452, %c0_453] {strides = array<i32: 2, 1>} : memref<128x32xf32, #tpu.memory_space<vmem>>, vector<3x32xf32>
    %c9_454 = arith.constant 9 : index
    %c256_455 = arith.constant 256 : index
    %305 = vector.load %arg13[%c9_454, %c256_455] : memref<18x512xf32, #tpu.memory_space<vmem>>, vector<3x32xf32>
    tpu.vector_store %arg13[%c9_454, %c256_455], %304 {strides = array<i32>} : memref<18x512xf32, #tpu.memory_space<vmem>>, vector<3x32xf32>,
    %c96_456 = arith.constant 96 : index
    %c0_457 = arith.constant 0 : index
    %306 = tpu.strided_load %arg12[%c96_456, %c0_457] {strides = array<i32: 2, 1>} : memref<128x32xf32, #tpu.memory_space<vmem>>, vector<3x32xf32>
    %c12_458 = arith.constant 12 : index
    %c256_459 = arith.constant 256 : index
    %307 = vector.load %arg13[%c12_458, %c256_459] : memref<18x512xf32, #tpu.memory_space<vmem>>, vector<3x32xf32>
    tpu.vector_store %arg13[%c12_458, %c256_459], %306 {strides = array<i32>} : memref<18x512xf32, #tpu.memory_space<vmem>>, vector<3x32xf32>,
    %c112_460 = arith.constant 112 : index
    %c0_461 = arith.constant 0 : index
    %308 = tpu.strided_load %arg12[%c112_460, %c0_461] {strides = array<i32: 2, 1>} : memref<128x32xf32, #tpu.memory_space<vmem>>, vector<3x32xf32>
    %c15_462 = arith.constant 15 : index
    %c256_463 = arith.constant 256 : index
    %309 = vector.load %arg13[%c15_462, %c256_463] : memref<18x512xf32, #tpu.memory_space<vmem>>, vector<3x32xf32>
    tpu.vector_store %arg13[%c15_462, %c256_463], %308 {strides = array<i32>} : memref<18x512xf32, #tpu.memory_space<vmem>>, vector<3x32xf32>,
    %c17_464 = arith.constant 17 : index
    %c0_465 = arith.constant 0 : index
    %310 = tpu.strided_load %arg12[%c17_464, %c0_465] {strides = array<i32: 2, 1>} : memref<128x32xf32, #tpu.memory_space<vmem>>, vector<3x32xf32>
    %c0_466 = arith.constant 0 : index
    %c288 = arith.constant 288 : index
    %311 = vector.load %arg13[%c0_466, %c288] : memref<18x512xf32, #tpu.memory_space<vmem>>, vector<3x32xf32>
    tpu.vector_store %arg13[%c0_466, %c288], %310 {strides = array<i32>} : memref<18x512xf32, #tpu.memory_space<vmem>>, vector<3x32xf32>,
    %c33_467 = arith.constant 33 : index
    %c0_468 = arith.constant 0 : index
    %312 = tpu.strided_load %arg12[%c33_467, %c0_468] {strides = array<i32: 2, 1>} : memref<128x32xf32, #tpu.memory_space<vmem>>, vector<3x32xf32>
    %c3_469 = arith.constant 3 : index
    %c288_470 = arith.constant 288 : index
    %313 = vector.load %arg13[%c3_469, %c288_470] : memref<18x512xf32, #tpu.memory_space<vmem>>, vector<3x32xf32>
    tpu.vector_store %arg13[%c3_469, %c288_470], %312 {strides = array<i32>} : memref<18x512xf32, #tpu.memory_space<vmem>>, vector<3x32xf32>,
    %c49 = arith.constant 49 : index
    %c0_471 = arith.constant 0 : index
    %314 = tpu.strided_load %arg12[%c49, %c0_471] {strides = array<i32: 2, 1>} : memref<128x32xf32, #tpu.memory_space<vmem>>, vector<3x32xf32>
    %c6_472 = arith.constant 6 : index
    %c288_473 = arith.constant 288 : index
    %315 = vector.load %arg13[%c6_472, %c288_473] : memref<18x512xf32, #tpu.memory_space<vmem>>, vector<3x32xf32>
    tpu.vector_store %arg13[%c6_472, %c288_473], %314 {strides = array<i32>} : memref<18x512xf32, #tpu.memory_space<vmem>>, vector<3x32xf32>,
    %c81_474 = arith.constant 81 : index
    %c0_475 = arith.constant 0 : index
    %316 = tpu.strided_load %arg12[%c81_474, %c0_475] {strides = array<i32: 2, 1>} : memref<128x32xf32, #tpu.memory_space<vmem>>, vector<3x32xf32>
    %c9_476 = arith.constant 9 : index
    %c288_477 = arith.constant 288 : index
    %317 = vector.load %arg13[%c9_476, %c288_477] : memref<18x512xf32, #tpu.memory_space<vmem>>, vector<3x32xf32>
    tpu.vector_store %arg13[%c9_476, %c288_477], %316 {strides = array<i32>} : memref<18x512xf32, #tpu.memory_space<vmem>>, vector<3x32xf32>,
    %c97_478 = arith.constant 97 : index
    %c0_479 = arith.constant 0 : index
    %318 = tpu.strided_load %arg12[%c97_478, %c0_479] {strides = array<i32: 2, 1>} : memref<128x32xf32, #tpu.memory_space<vmem>>, vector<3x32xf32>
    %c12_480 = arith.constant 12 : index
    %c288_481 = arith.constant 288 : index
    %319 = vector.load %arg13[%c12_480, %c288_481] : memref<18x512xf32, #tpu.memory_space<vmem>>, vector<3x32xf32>
    tpu.vector_store %arg13[%c12_480, %c288_481], %318 {strides = array<i32>} : memref<18x512xf32, #tpu.memory_space<vmem>>, vector<3x32xf32>,
    %c113 = arith.constant 113 : index
    %c0_482 = arith.constant 0 : index
    %320 = tpu.strided_load %arg12[%c113, %c0_482] {strides = array<i32: 2, 1>} : memref<128x32xf32, #tpu.memory_space<vmem>>, vector<3x32xf32>
    %c15_483 = arith.constant 15 : index
    %c288_484 = arith.constant 288 : index
    %321 = vector.load %arg13[%c15_483, %c288_484] : memref<18x512xf32, #tpu.memory_space<vmem>>, vector<3x32xf32>
    tpu.vector_store %arg13[%c15_483, %c288_484], %320 {strides = array<i32>} : memref<18x512xf32, #tpu.memory_space<vmem>>, vector<3x32xf32>,
    %c18_485 = arith.constant 18 : index
    %c0_486 = arith.constant 0 : index
    %322 = tpu.strided_load %arg12[%c18_485, %c0_486] {strides = array<i32: 2, 1>} : memref<128x32xf32, #tpu.memory_space<vmem>>, vector<3x32xf32>
    %c0_487 = arith.constant 0 : index
    %c320 = arith.constant 320 : index
    %323 = vector.load %arg13[%c0_487, %c320] : memref<18x512xf32, #tpu.memory_space<vmem>>, vector<3x32xf32>
    tpu.vector_store %arg13[%c0_487, %c320], %322 {strides = array<i32>} : memref<18x512xf32, #tpu.memory_space<vmem>>, vector<3x32xf32>,
    %c34_488 = arith.constant 34 : index
    %c0_489 = arith.constant 0 : index
    %324 = tpu.strided_load %arg12[%c34_488, %c0_489] {strides = array<i32: 2, 1>} : memref<128x32xf32, #tpu.memory_space<vmem>>, vector<3x32xf32>
    %c3_490 = arith.constant 3 : index
    %c320_491 = arith.constant 320 : index
    %325 = vector.load %arg13[%c3_490, %c320_491] : memref<18x512xf32, #tpu.memory_space<vmem>>, vector<3x32xf32>
    tpu.vector_store %arg13[%c3_490, %c320_491], %324 {strides = array<i32>} : memref<18x512xf32, #tpu.memory_space<vmem>>, vector<3x32xf32>,
    %c50 = arith.constant 50 : index
    %c0_492 = arith.constant 0 : index
    %326 = tpu.strided_load %arg12[%c50, %c0_492] {strides = array<i32: 2, 1>} : memref<128x32xf32, #tpu.memory_space<vmem>>, vector<3x32xf32>
    %c6_493 = arith.constant 6 : index
    %c320_494 = arith.constant 320 : index
    %327 = vector.load %arg13[%c6_493, %c320_494] : memref<18x512xf32, #tpu.memory_space<vmem>>, vector<3x32xf32>
    tpu.vector_store %arg13[%c6_493, %c320_494], %326 {strides = array<i32>} : memref<18x512xf32, #tpu.memory_space<vmem>>, vector<3x32xf32>,
    %c82_495 = arith.constant 82 : index
    %c0_496 = arith.constant 0 : index
    %328 = tpu.strided_load %arg12[%c82_495, %c0_496] {strides = array<i32: 2, 1>} : memref<128x32xf32, #tpu.memory_space<vmem>>, vector<3x32xf32>
    %c9_497 = arith.constant 9 : index
    %c320_498 = arith.constant 320 : index
    %329 = vector.load %arg13[%c9_497, %c320_498] : memref<18x512xf32, #tpu.memory_space<vmem>>, vector<3x32xf32>
    tpu.vector_store %arg13[%c9_497, %c320_498], %328 {strides = array<i32>} : memref<18x512xf32, #tpu.memory_space<vmem>>, vector<3x32xf32>,
    %c98_499 = arith.constant 98 : index
    %c0_500 = arith.constant 0 : index
    %330 = tpu.strided_load %arg12[%c98_499, %c0_500] {strides = array<i32: 2, 1>} : memref<128x32xf32, #tpu.memory_space<vmem>>, vector<3x32xf32>
    %c12_501 = arith.constant 12 : index
    %c320_502 = arith.constant 320 : index
    %331 = vector.load %arg13[%c12_501, %c320_502] : memref<18x512xf32, #tpu.memory_space<vmem>>, vector<3x32xf32>
    tpu.vector_store %arg13[%c12_501, %c320_502], %330 {strides = array<i32>} : memref<18x512xf32, #tpu.memory_space<vmem>>, vector<3x32xf32>,
    %c114 = arith.constant 114 : index
    %c0_503 = arith.constant 0 : index
    %332 = tpu.strided_load %arg12[%c114, %c0_503] {strides = array<i32: 2, 1>} : memref<128x32xf32, #tpu.memory_space<vmem>>, vector<3x32xf32>
    %c15_504 = arith.constant 15 : index
    %c320_505 = arith.constant 320 : index
    %333 = vector.load %arg13[%c15_504, %c320_505] : memref<18x512xf32, #tpu.memory_space<vmem>>, vector<3x32xf32>
    tpu.vector_store %arg13[%c15_504, %c320_505], %332 {strides = array<i32>} : memref<18x512xf32, #tpu.memory_space<vmem>>, vector<3x32xf32>,
    %c19_506 = arith.constant 19 : index
    %c0_507 = arith.constant 0 : index
    %334 = tpu.strided_load %arg12[%c19_506, %c0_507] {strides = array<i32: 2, 1>} : memref<128x32xf32, #tpu.memory_space<vmem>>, vector<3x32xf32>
    %c0_508 = arith.constant 0 : index
    %c352 = arith.constant 352 : index
    %335 = vector.load %arg13[%c0_508, %c352] : memref<18x512xf32, #tpu.memory_space<vmem>>, vector<3x32xf32>
    tpu.vector_store %arg13[%c0_508, %c352], %334 {strides = array<i32>} : memref<18x512xf32, #tpu.memory_space<vmem>>, vector<3x32xf32>,
    %c35_509 = arith.constant 35 : index
    %c0_510 = arith.constant 0 : index
    %336 = tpu.strided_load %arg12[%c35_509, %c0_510] {strides = array<i32: 2, 1>} : memref<128x32xf32, #tpu.memory_space<vmem>>, vector<3x32xf32>
    %c3_511 = arith.constant 3 : index
    %c352_512 = arith.constant 352 : index
    %337 = vector.load %arg13[%c3_511, %c352_512] : memref<18x512xf32, #tpu.memory_space<vmem>>, vector<3x32xf32>
    tpu.vector_store %arg13[%c3_511, %c352_512], %336 {strides = array<i32>} : memref<18x512xf32, #tpu.memory_space<vmem>>, vector<3x32xf32>,
    %c51 = arith.constant 51 : index
    %c0_513 = arith.constant 0 : index
    %338 = tpu.strided_load %arg12[%c51, %c0_513] {strides = array<i32: 2, 1>} : memref<128x32xf32, #tpu.memory_space<vmem>>, vector<3x32xf32>
    %c6_514 = arith.constant 6 : index
    %c352_515 = arith.constant 352 : index
    %339 = vector.load %arg13[%c6_514, %c352_515] : memref<18x512xf32, #tpu.memory_space<vmem>>, vector<3x32xf32>
    tpu.vector_store %arg13[%c6_514, %c352_515], %338 {strides = array<i32>} : memref<18x512xf32, #tpu.memory_space<vmem>>, vector<3x32xf32>,
    %c83_516 = arith.constant 83 : index
    %c0_517 = arith.constant 0 : index
    %340 = tpu.strided_load %arg12[%c83_516, %c0_517] {strides = array<i32: 2, 1>} : memref<128x32xf32, #tpu.memory_space<vmem>>, vector<3x32xf32>
    %c9_518 = arith.constant 9 : index
    %c352_519 = arith.constant 352 : index
    %341 = vector.load %arg13[%c9_518, %c352_519] : memref<18x512xf32, #tpu.memory_space<vmem>>, vector<3x32xf32>
    tpu.vector_store %arg13[%c9_518, %c352_519], %340 {strides = array<i32>} : memref<18x512xf32, #tpu.memory_space<vmem>>, vector<3x32xf32>,
    %c99_520 = arith.constant 99 : index
    %c0_521 = arith.constant 0 : index
    %342 = tpu.strided_load %arg12[%c99_520, %c0_521] {strides = array<i32: 2, 1>} : memref<128x32xf32, #tpu.memory_space<vmem>>, vector<3x32xf32>
    %c12_522 = arith.constant 12 : index
    %c352_523 = arith.constant 352 : index
    %343 = vector.load %arg13[%c12_522, %c352_523] : memref<18x512xf32, #tpu.memory_space<vmem>>, vector<3x32xf32>
    tpu.vector_store %arg13[%c12_522, %c352_523], %342 {strides = array<i32>} : memref<18x512xf32, #tpu.memory_space<vmem>>, vector<3x32xf32>,
    %c115 = arith.constant 115 : index
    %c0_524 = arith.constant 0 : index
    %344 = tpu.strided_load %arg12[%c115, %c0_524] {strides = array<i32: 2, 1>} : memref<128x32xf32, #tpu.memory_space<vmem>>, vector<3x32xf32>
    %c15_525 = arith.constant 15 : index
    %c352_526 = arith.constant 352 : index
    %345 = vector.load %arg13[%c15_525, %c352_526] : memref<18x512xf32, #tpu.memory_space<vmem>>, vector<3x32xf32>
    tpu.vector_store %arg13[%c15_525, %c352_526], %344 {strides = array<i32>} : memref<18x512xf32, #tpu.memory_space<vmem>>, vector<3x32xf32>,
    %c24_527 = arith.constant 24 : index
    %c0_528 = arith.constant 0 : index
    %346 = tpu.strided_load %arg12[%c24_527, %c0_528] {strides = array<i32: 2, 1>} : memref<128x32xf32, #tpu.memory_space<vmem>>, vector<3x32xf32>
    %c0_529 = arith.constant 0 : index
    %c384 = arith.constant 384 : index
    %347 = vector.load %arg13[%c0_529, %c384] : memref<18x512xf32, #tpu.memory_space<vmem>>, vector<3x32xf32>
    tpu.vector_store %arg13[%c0_529, %c384], %346 {strides = array<i32>} : memref<18x512xf32, #tpu.memory_space<vmem>>, vector<3x32xf32>,
    %c40_530 = arith.constant 40 : index
    %c0_531 = arith.constant 0 : index
    %348 = tpu.strided_load %arg12[%c40_530, %c0_531] {strides = array<i32: 2, 1>} : memref<128x32xf32, #tpu.memory_space<vmem>>, vector<3x32xf32>
    %c3_532 = arith.constant 3 : index
    %c384_533 = arith.constant 384 : index
    %349 = vector.load %arg13[%c3_532, %c384_533] : memref<18x512xf32, #tpu.memory_space<vmem>>, vector<3x32xf32>
    tpu.vector_store %arg13[%c3_532, %c384_533], %348 {strides = array<i32>} : memref<18x512xf32, #tpu.memory_space<vmem>>, vector<3x32xf32>,
    %c56_534 = arith.constant 56 : index
    %c0_535 = arith.constant 0 : index
    %350 = tpu.strided_load %arg12[%c56_534, %c0_535] {strides = array<i32: 2, 1>} : memref<128x32xf32, #tpu.memory_space<vmem>>, vector<3x32xf32>
    %c6_536 = arith.constant 6 : index
    %c384_537 = arith.constant 384 : index
    %351 = vector.load %arg13[%c6_536, %c384_537] : memref<18x512xf32, #tpu.memory_space<vmem>>, vector<3x32xf32>
    tpu.vector_store %arg13[%c6_536, %c384_537], %350 {strides = array<i32>} : memref<18x512xf32, #tpu.memory_space<vmem>>, vector<3x32xf32>,
    %c88_538 = arith.constant 88 : index
    %c0_539 = arith.constant 0 : index
    %352 = tpu.strided_load %arg12[%c88_538, %c0_539] {strides = array<i32: 2, 1>} : memref<128x32xf32, #tpu.memory_space<vmem>>, vector<3x32xf32>
    %c9_540 = arith.constant 9 : index
    %c384_541 = arith.constant 384 : index
    %353 = vector.load %arg13[%c9_540, %c384_541] : memref<18x512xf32, #tpu.memory_space<vmem>>, vector<3x32xf32>
    tpu.vector_store %arg13[%c9_540, %c384_541], %352 {strides = array<i32>} : memref<18x512xf32, #tpu.memory_space<vmem>>, vector<3x32xf32>,
    %c104_542 = arith.constant 104 : index
    %c0_543 = arith.constant 0 : index
    %354 = tpu.strided_load %arg12[%c104_542, %c0_543] {strides = array<i32: 2, 1>} : memref<128x32xf32, #tpu.memory_space<vmem>>, vector<3x32xf32>
    %c12_544 = arith.constant 12 : index
    %c384_545 = arith.constant 384 : index
    %355 = vector.load %arg13[%c12_544, %c384_545] : memref<18x512xf32, #tpu.memory_space<vmem>>, vector<3x32xf32>
    tpu.vector_store %arg13[%c12_544, %c384_545], %354 {strides = array<i32>} : memref<18x512xf32, #tpu.memory_space<vmem>>, vector<3x32xf32>,
    %c120_546 = arith.constant 120 : index
    %c0_547 = arith.constant 0 : index
    %356 = tpu.strided_load %arg12[%c120_546, %c0_547] {strides = array<i32: 2, 1>} : memref<128x32xf32, #tpu.memory_space<vmem>>, vector<3x32xf32>
    %c15_548 = arith.constant 15 : index
    %c384_549 = arith.constant 384 : index
    %357 = vector.load %arg13[%c15_548, %c384_549] : memref<18x512xf32, #tpu.memory_space<vmem>>, vector<3x32xf32>
    tpu.vector_store %arg13[%c15_548, %c384_549], %356 {strides = array<i32>} : memref<18x512xf32, #tpu.memory_space<vmem>>, vector<3x32xf32>,
    %c25_550 = arith.constant 25 : index
    %c0_551 = arith.constant 0 : index
    %358 = tpu.strided_load %arg12[%c25_550, %c0_551] {strides = array<i32: 2, 1>} : memref<128x32xf32, #tpu.memory_space<vmem>>, vector<3x32xf32>
    %c0_552 = arith.constant 0 : index
    %c416 = arith.constant 416 : index
    %359 = vector.load %arg13[%c0_552, %c416] : memref<18x512xf32, #tpu.memory_space<vmem>>, vector<3x32xf32>
    tpu.vector_store %arg13[%c0_552, %c416], %358 {strides = array<i32>} : memref<18x512xf32, #tpu.memory_space<vmem>>, vector<3x32xf32>,
    %c41_553 = arith.constant 41 : index
    %c0_554 = arith.constant 0 : index
    %360 = tpu.strided_load %arg12[%c41_553, %c0_554] {strides = array<i32: 2, 1>} : memref<128x32xf32, #tpu.memory_space<vmem>>, vector<3x32xf32>
    %c3_555 = arith.constant 3 : index
    %c416_556 = arith.constant 416 : index
    %361 = vector.load %arg13[%c3_555, %c416_556] : memref<18x512xf32, #tpu.memory_space<vmem>>, vector<3x32xf32>
    tpu.vector_store %arg13[%c3_555, %c416_556], %360 {strides = array<i32>} : memref<18x512xf32, #tpu.memory_space<vmem>>, vector<3x32xf32>,
    %c57 = arith.constant 57 : index
    %c0_557 = arith.constant 0 : index
    %362 = tpu.strided_load %arg12[%c57, %c0_557] {strides = array<i32: 2, 1>} : memref<128x32xf32, #tpu.memory_space<vmem>>, vector<3x32xf32>
    %c6_558 = arith.constant 6 : index
    %c416_559 = arith.constant 416 : index
    %363 = vector.load %arg13[%c6_558, %c416_559] : memref<18x512xf32, #tpu.memory_space<vmem>>, vector<3x32xf32>
    tpu.vector_store %arg13[%c6_558, %c416_559], %362 {strides = array<i32>} : memref<18x512xf32, #tpu.memory_space<vmem>>, vector<3x32xf32>,
    %c89_560 = arith.constant 89 : index
    %c0_561 = arith.constant 0 : index
    %364 = tpu.strided_load %arg12[%c89_560, %c0_561] {strides = array<i32: 2, 1>} : memref<128x32xf32, #tpu.memory_space<vmem>>, vector<3x32xf32>
    %c9_562 = arith.constant 9 : index
    %c416_563 = arith.constant 416 : index
    %365 = vector.load %arg13[%c9_562, %c416_563] : memref<18x512xf32, #tpu.memory_space<vmem>>, vector<3x32xf32>
    tpu.vector_store %arg13[%c9_562, %c416_563], %364 {strides = array<i32>} : memref<18x512xf32, #tpu.memory_space<vmem>>, vector<3x32xf32>,
    %c105_564 = arith.constant 105 : index
    %c0_565 = arith.constant 0 : index
    %366 = tpu.strided_load %arg12[%c105_564, %c0_565] {strides = array<i32: 2, 1>} : memref<128x32xf32, #tpu.memory_space<vmem>>, vector<3x32xf32>
    %c12_566 = arith.constant 12 : index
    %c416_567 = arith.constant 416 : index
    %367 = vector.load %arg13[%c12_566, %c416_567] : memref<18x512xf32, #tpu.memory_space<vmem>>, vector<3x32xf32>
    tpu.vector_store %arg13[%c12_566, %c416_567], %366 {strides = array<i32>} : memref<18x512xf32, #tpu.memory_space<vmem>>, vector<3x32xf32>,
    %c121 = arith.constant 121 : index
    %c0_568 = arith.constant 0 : index
    %368 = tpu.strided_load %arg12[%c121, %c0_568] {strides = array<i32: 2, 1>} : memref<128x32xf32, #tpu.memory_space<vmem>>, vector<3x32xf32>
    %c15_569 = arith.constant 15 : index
    %c416_570 = arith.constant 416 : index
    %369 = vector.load %arg13[%c15_569, %c416_570] : memref<18x512xf32, #tpu.memory_space<vmem>>, vector<3x32xf32>
    tpu.vector_store %arg13[%c15_569, %c416_570], %368 {strides = array<i32>} : memref<18x512xf32, #tpu.memory_space<vmem>>, vector<3x32xf32>,
    %c26_571 = arith.constant 26 : index
    %c0_572 = arith.constant 0 : index
    %370 = tpu.strided_load %arg12[%c26_571, %c0_572] {strides = array<i32: 2, 1>} : memref<128x32xf32, #tpu.memory_space<vmem>>, vector<3x32xf32>
    %c0_573 = arith.constant 0 : index
    %c448 = arith.constant 448 : index
    %371 = vector.load %arg13[%c0_573, %c448] : memref<18x512xf32, #tpu.memory_space<vmem>>, vector<3x32xf32>
    tpu.vector_store %arg13[%c0_573, %c448], %370 {strides = array<i32>} : memref<18x512xf32, #tpu.memory_space<vmem>>, vector<3x32xf32>,
    %c42_574 = arith.constant 42 : index
    %c0_575 = arith.constant 0 : index
    %372 = tpu.strided_load %arg12[%c42_574, %c0_575] {strides = array<i32: 2, 1>} : memref<128x32xf32, #tpu.memory_space<vmem>>, vector<3x32xf32>
    %c3_576 = arith.constant 3 : index
    %c448_577 = arith.constant 448 : index
    %373 = vector.load %arg13[%c3_576, %c448_577] : memref<18x512xf32, #tpu.memory_space<vmem>>, vector<3x32xf32>
    tpu.vector_store %arg13[%c3_576, %c448_577], %372 {strides = array<i32>} : memref<18x512xf32, #tpu.memory_space<vmem>>, vector<3x32xf32>,
    %c58 = arith.constant 58 : index
    %c0_578 = arith.constant 0 : index
    %374 = tpu.strided_load %arg12[%c58, %c0_578] {strides = array<i32: 2, 1>} : memref<128x32xf32, #tpu.memory_space<vmem>>, vector<3x32xf32>
    %c6_579 = arith.constant 6 : index
    %c448_580 = arith.constant 448 : index
    %375 = vector.load %arg13[%c6_579, %c448_580] : memref<18x512xf32, #tpu.memory_space<vmem>>, vector<3x32xf32>
    tpu.vector_store %arg13[%c6_579, %c448_580], %374 {strides = array<i32>} : memref<18x512xf32, #tpu.memory_space<vmem>>, vector<3x32xf32>,
    %c90_581 = arith.constant 90 : index
    %c0_582 = arith.constant 0 : index
    %376 = tpu.strided_load %arg12[%c90_581, %c0_582] {strides = array<i32: 2, 1>} : memref<128x32xf32, #tpu.memory_space<vmem>>, vector<3x32xf32>
    %c9_583 = arith.constant 9 : index
    %c448_584 = arith.constant 448 : index
    %377 = vector.load %arg13[%c9_583, %c448_584] : memref<18x512xf32, #tpu.memory_space<vmem>>, vector<3x32xf32>
    tpu.vector_store %arg13[%c9_583, %c448_584], %376 {strides = array<i32>} : memref<18x512xf32, #tpu.memory_space<vmem>>, vector<3x32xf32>,
    %c106_585 = arith.constant 106 : index
    %c0_586 = arith.constant 0 : index
    %378 = tpu.strided_load %arg12[%c106_585, %c0_586] {strides = array<i32: 2, 1>} : memref<128x32xf32, #tpu.memory_space<vmem>>, vector<3x32xf32>
    %c12_587 = arith.constant 12 : index
    %c448_588 = arith.constant 448 : index
    %379 = vector.load %arg13[%c12_587, %c448_588] : memref<18x512xf32, #tpu.memory_space<vmem>>, vector<3x32xf32>
    tpu.vector_store %arg13[%c12_587, %c448_588], %378 {strides = array<i32>} : memref<18x512xf32, #tpu.memory_space<vmem>>, vector<3x32xf32>,
    %c122 = arith.constant 122 : index
    %c0_589 = arith.constant 0 : index
    %380 = tpu.strided_load %arg12[%c122, %c0_589] {strides = array<i32: 2, 1>} : memref<128x32xf32, #tpu.memory_space<vmem>>, vector<3x32xf32>
    %c15_590 = arith.constant 15 : index
    %c448_591 = arith.constant 448 : index
    %381 = vector.load %arg13[%c15_590, %c448_591] : memref<18x512xf32, #tpu.memory_space<vmem>>, vector<3x32xf32>
    tpu.vector_store %arg13[%c15_590, %c448_591], %380 {strides = array<i32>} : memref<18x512xf32, #tpu.memory_space<vmem>>, vector<3x32xf32>,
    %c27_592 = arith.constant 27 : index
    %c0_593 = arith.constant 0 : index
    %382 = tpu.strided_load %arg12[%c27_592, %c0_593] {strides = array<i32: 2, 1>} : memref<128x32xf32, #tpu.memory_space<vmem>>, vector<3x32xf32>
    %c0_594 = arith.constant 0 : index
    %c480 = arith.constant 480 : index
    %383 = vector.load %arg13[%c0_594, %c480] : memref<18x512xf32, #tpu.memory_space<vmem>>, vector<3x32xf32>
    tpu.vector_store %arg13[%c0_594, %c480], %382 {strides = array<i32>} : memref<18x512xf32, #tpu.memory_space<vmem>>, vector<3x32xf32>,
    %c43_595 = arith.constant 43 : index
    %c0_596 = arith.constant 0 : index
    %384 = tpu.strided_load %arg12[%c43_595, %c0_596] {strides = array<i32: 2, 1>} : memref<128x32xf32, #tpu.memory_space<vmem>>, vector<3x32xf32>
    %c3_597 = arith.constant 3 : index
    %c480_598 = arith.constant 480 : index
    %385 = vector.load %arg13[%c3_597, %c480_598] : memref<18x512xf32, #tpu.memory_space<vmem>>, vector<3x32xf32>
    tpu.vector_store %arg13[%c3_597, %c480_598], %384 {strides = array<i32>} : memref<18x512xf32, #tpu.memory_space<vmem>>, vector<3x32xf32>,
    %c59 = arith.constant 59 : index
    %c0_599 = arith.constant 0 : index
    %386 = tpu.strided_load %arg12[%c59, %c0_599] {strides = array<i32: 2, 1>} : memref<128x32xf32, #tpu.memory_space<vmem>>, vector<3x32xf32>
    %c6_600 = arith.constant 6 : index
    %c480_601 = arith.constant 480 : index
    %387 = vector.load %arg13[%c6_600, %c480_601] : memref<18x512xf32, #tpu.memory_space<vmem>>, vector<3x32xf32>
    tpu.vector_store %arg13[%c6_600, %c480_601], %386 {strides = array<i32>} : memref<18x512xf32, #tpu.memory_space<vmem>>, vector<3x32xf32>,
    %c91_602 = arith.constant 91 : index
    %c0_603 = arith.constant 0 : index
    %388 = tpu.strided_load %arg12[%c91_602, %c0_603] {strides = array<i32: 2, 1>} : memref<128x32xf32, #tpu.memory_space<vmem>>, vector<3x32xf32>
    %c9_604 = arith.constant 9 : index
    %c480_605 = arith.constant 480 : index
    %389 = vector.load %arg13[%c9_604, %c480_605] : memref<18x512xf32, #tpu.memory_space<vmem>>, vector<3x32xf32>
    tpu.vector_store %arg13[%c9_604, %c480_605], %388 {strides = array<i32>} : memref<18x512xf32, #tpu.memory_space<vmem>>, vector<3x32xf32>,
    %c107_606 = arith.constant 107 : index
    %c0_607 = arith.constant 0 : index
    %390 = tpu.strided_load %arg12[%c107_606, %c0_607] {strides = array<i32: 2, 1>} : memref<128x32xf32, #tpu.memory_space<vmem>>, vector<3x32xf32>
    %c12_608 = arith.constant 12 : index
    %c480_609 = arith.constant 480 : index
    %391 = vector.load %arg13[%c12_608, %c480_609] : memref<18x512xf32, #tpu.memory_space<vmem>>, vector<3x32xf32>
    tpu.vector_store %arg13[%c12_608, %c480_609], %390 {strides = array<i32>} : memref<18x512xf32, #tpu.memory_space<vmem>>, vector<3x32xf32>,
    %c123 = arith.constant 123 : index
    %c0_610 = arith.constant 0 : index
    %392 = tpu.strided_load %arg12[%c123, %c0_610] {strides = array<i32: 2, 1>} : memref<128x32xf32, #tpu.memory_space<vmem>>, vector<3x32xf32>
    %c15_611 = arith.constant 15 : index
    %c480_612 = arith.constant 480 : index
    %393 = vector.load %arg13[%c15_611, %c480_612] : memref<18x512xf32, #tpu.memory_space<vmem>>, vector<3x32xf32>
    tpu.vector_store %arg13[%c15_611, %c480_612], %392 {strides = array<i32>} : memref<18x512xf32, #tpu.memory_space<vmem>>, vector<3x32xf32>,
    %c0_613 = arith.constant 0 : index
    %c0_614 = arith.constant 0 : index
    %394 = vector.load %arg13[%c0_613, %c0_614] : memref<18x512xf32, #tpu.memory_space<vmem>>, vector<18x512xf32>
    %395 = arith.truncf %394 : vector<18x512xf32> to vector<18x512xbf16>
    %c0_615 = arith.constant 0 : index
    %c0_616 = arith.constant 0 : index
    %396 = vector.load %arg4[%c0_615, %c0_616] : memref<512x128xbf16, #tpu.memory_space<vmem>>, vector<512x128xbf16>
    %cst_617 = arith.constant dense<0.000000e+00> : vector<18x128xf32>
    %397 = tpu.matmul %395, %396, %cst_617 {dimension_numbers = #tpu.dot_dimension_numbers<[1], [0], [0], [1], [0, 0, 1, 1], [], []>} : vector<18x512xbf16>, vector<512x128xbf16>, vector<18x128xf32> -> vector<18x128xf32>
    %c0_618 = arith.constant 0 : index
    %c0_619 = arith.constant 0 : index
    %398 = vector.load %arg5[%c0_618, %c0_619] : memref<1x128xf32, #tpu.memory_space<vmem>>, vector<1x128xf32>
    %399 = vector.broadcast %398 : vector<1x128xf32> to vector<18x128xf32>
    %400 = arith.addf %397, %399 : vector<18x128xf32>
    %cst_620 = arith.constant 0.000000e+00 : f32
    %401 = vector.broadcast %cst_620 : f32 to vector<18x128xf32>
    %402 = arith.maximumf %400, %401 : vector<18x128xf32>
    %cst_621 = arith.constant 0.000000e+00 : f32
    %403 = vector.broadcast %cst_621 : f32 to vector<50x128xf32>
    %c0_622 = arith.constant 0 : index
    %c0_623 = arith.constant 0 : index
    %404 = vector.load %arg15[%c0_622, %c0_623] : memref<50x128xf32, #tpu.memory_space<vmem>>, vector<50x128xf32>
    tpu.vector_store %arg15[%c0_622, %c0_623], %403 {strides = array<i32>} : memref<50x128xf32, #tpu.memory_space<vmem>>, vector<50x128xf32>,
    %c0_624 = arith.constant 0 : index
    %c0_625 = arith.constant 0 : index
    %405 = vector.load %arg14[%c0_624, %c0_625] : memref<18x128xf32, #tpu.memory_space<vmem>>, vector<18x128xf32>
    tpu.vector_store %arg14[%c0_624, %c0_625], %402 {strides = array<i32>} : memref<18x128xf32, #tpu.memory_space<vmem>>, vector<18x128xf32>,
    %c0_626 = arith.constant 0 : index
    %c0_627 = arith.constant 0 : index
    %406 = vector.load %arg14[%c0_626, %c0_627] : memref<18x128xf32, #tpu.memory_space<vmem>>, vector<3x128xf32>
    %c6_628 = arith.constant 6 : index
    %c0_629 = arith.constant 0 : index
    %407 = vector.load %arg15[%c6_628, %c0_629] : memref<50x128xf32, #tpu.memory_space<vmem>>, vector<3x128xf32>
    tpu.vector_store %arg15[%c6_628, %c0_629], %406 {strides = array<i32>} : memref<50x128xf32, #tpu.memory_space<vmem>>, vector<3x128xf32>,
    %c3_630 = arith.constant 3 : index
    %c0_631 = arith.constant 0 : index
    %408 = vector.load %arg14[%c3_630, %c0_631] : memref<18x128xf32, #tpu.memory_space<vmem>>, vector<3x128xf32>
    %c11_632 = arith.constant 11 : index
    %c0_633 = arith.constant 0 : index
    %409 = vector.load %arg15[%c11_632, %c0_633] : memref<50x128xf32, #tpu.memory_space<vmem>>, vector<3x128xf32>
    tpu.vector_store %arg15[%c11_632, %c0_633], %408 {strides = array<i32>} : memref<50x128xf32, #tpu.memory_space<vmem>>, vector<3x128xf32>,
    %c6_634 = arith.constant 6 : index
    %c0_635 = arith.constant 0 : index
    %410 = vector.load %arg14[%c6_634, %c0_635] : memref<18x128xf32, #tpu.memory_space<vmem>>, vector<3x128xf32>
    %c16_636 = arith.constant 16 : index
    %c0_637 = arith.constant 0 : index
    %411 = vector.load %arg15[%c16_636, %c0_637] : memref<50x128xf32, #tpu.memory_space<vmem>>, vector<3x128xf32>
    tpu.vector_store %arg15[%c16_636, %c0_637], %410 {strides = array<i32>} : memref<50x128xf32, #tpu.memory_space<vmem>>, vector<3x128xf32>,
    %c9_638 = arith.constant 9 : index
    %c0_639 = arith.constant 0 : index
    %412 = vector.load %arg14[%c9_638, %c0_639] : memref<18x128xf32, #tpu.memory_space<vmem>>, vector<3x128xf32>
    %c31 = arith.constant 31 : index
    %c0_640 = arith.constant 0 : index
    %413 = vector.load %arg15[%c31, %c0_640] : memref<50x128xf32, #tpu.memory_space<vmem>>, vector<3x128xf32>
    tpu.vector_store %arg15[%c31, %c0_640], %412 {strides = array<i32>} : memref<50x128xf32, #tpu.memory_space<vmem>>, vector<3x128xf32>,
    %c12_641 = arith.constant 12 : index
    %c0_642 = arith.constant 0 : index
    %414 = vector.load %arg14[%c12_641, %c0_642] : memref<18x128xf32, #tpu.memory_space<vmem>>, vector<3x128xf32>
    %c36_643 = arith.constant 36 : index
    %c0_644 = arith.constant 0 : index
    %415 = vector.load %arg15[%c36_643, %c0_644] : memref<50x128xf32, #tpu.memory_space<vmem>>, vector<3x128xf32>
    tpu.vector_store %arg15[%c36_643, %c0_644], %414 {strides = array<i32>} : memref<50x128xf32, #tpu.memory_space<vmem>>, vector<3x128xf32>,
    %c15_645 = arith.constant 15 : index
    %c0_646 = arith.constant 0 : index
    %416 = vector.load %arg14[%c15_645, %c0_646] : memref<18x128xf32, #tpu.memory_space<vmem>>, vector<3x128xf32>
    %c41_647 = arith.constant 41 : index
    %c0_648 = arith.constant 0 : index
    %417 = vector.load %arg15[%c41_647, %c0_648] : memref<50x128xf32, #tpu.memory_space<vmem>>, vector<3x128xf32>
    tpu.vector_store %arg15[%c41_647, %c0_648], %416 {strides = array<i32>} : memref<50x128xf32, #tpu.memory_space<vmem>>, vector<3x128xf32>,
    %c0_649 = arith.constant 0 : index
    %c0_650 = arith.constant 0 : index
    %418 = vector.load %arg15[%c0_649, %c0_650] : memref<50x128xf32, #tpu.memory_space<vmem>>, vector<3x128xf32>
    %c0_651 = arith.constant 0 : index
    %c0_652 = arith.constant 0 : index
    %419 = vector.load %arg16[%c0_651, %c0_652] : memref<18x1152xf32, #tpu.memory_space<vmem>>, vector<3x128xf32>
    tpu.vector_store %arg16[%c0_651, %c0_652], %418 {strides = array<i32>} : memref<18x1152xf32, #tpu.memory_space<vmem>>, vector<3x128xf32>,
    %c5 = arith.constant 5 : index
    %c0_653 = arith.constant 0 : index
    %420 = vector.load %arg15[%c5, %c0_653] : memref<50x128xf32, #tpu.memory_space<vmem>>, vector<3x128xf32>
    %c3_654 = arith.constant 3 : index
    %c0_655 = arith.constant 0 : index
    %421 = vector.load %arg16[%c3_654, %c0_655] : memref<18x1152xf32, #tpu.memory_space<vmem>>, vector<3x128xf32>
    tpu.vector_store %arg16[%c3_654, %c0_655], %420 {strides = array<i32>} : memref<18x1152xf32, #tpu.memory_space<vmem>>, vector<3x128xf32>,
    %c10_656 = arith.constant 10 : index
    %c0_657 = arith.constant 0 : index
    %422 = vector.load %arg15[%c10_656, %c0_657] : memref<50x128xf32, #tpu.memory_space<vmem>>, vector<3x128xf32>
    %c6_658 = arith.constant 6 : index
    %c0_659 = arith.constant 0 : index
    %423 = vector.load %arg16[%c6_658, %c0_659] : memref<18x1152xf32, #tpu.memory_space<vmem>>, vector<3x128xf32>
    tpu.vector_store %arg16[%c6_658, %c0_659], %422 {strides = array<i32>} : memref<18x1152xf32, #tpu.memory_space<vmem>>, vector<3x128xf32>,
    %c25_660 = arith.constant 25 : index
    %c0_661 = arith.constant 0 : index
    %424 = vector.load %arg15[%c25_660, %c0_661] : memref<50x128xf32, #tpu.memory_space<vmem>>, vector<3x128xf32>
    %c9_662 = arith.constant 9 : index
    %c0_663 = arith.constant 0 : index
    %425 = vector.load %arg16[%c9_662, %c0_663] : memref<18x1152xf32, #tpu.memory_space<vmem>>, vector<3x128xf32>
    tpu.vector_store %arg16[%c9_662, %c0_663], %424 {strides = array<i32>} : memref<18x1152xf32, #tpu.memory_space<vmem>>, vector<3x128xf32>,
    %c30 = arith.constant 30 : index
    %c0_664 = arith.constant 0 : index
    %426 = vector.load %arg15[%c30, %c0_664] : memref<50x128xf32, #tpu.memory_space<vmem>>, vector<3x128xf32>
    %c12_665 = arith.constant 12 : index
    %c0_666 = arith.constant 0 : index
    %427 = vector.load %arg16[%c12_665, %c0_666] : memref<18x1152xf32, #tpu.memory_space<vmem>>, vector<3x128xf32>
    tpu.vector_store %arg16[%c12_665, %c0_666], %426 {strides = array<i32>} : memref<18x1152xf32, #tpu.memory_space<vmem>>, vector<3x128xf32>,
    %c35_667 = arith.constant 35 : index
    %c0_668 = arith.constant 0 : index
    %428 = vector.load %arg15[%c35_667, %c0_668] : memref<50x128xf32, #tpu.memory_space<vmem>>, vector<3x128xf32>
    %c15_669 = arith.constant 15 : index
    %c0_670 = arith.constant 0 : index
    %429 = vector.load %arg16[%c15_669, %c0_670] : memref<18x1152xf32, #tpu.memory_space<vmem>>, vector<3x128xf32>
    tpu.vector_store %arg16[%c15_669, %c0_670], %428 {strides = array<i32>} : memref<18x1152xf32, #tpu.memory_space<vmem>>, vector<3x128xf32>,
    %c1_671 = arith.constant 1 : index
    %c0_672 = arith.constant 0 : index
    %430 = vector.load %arg15[%c1_671, %c0_672] : memref<50x128xf32, #tpu.memory_space<vmem>>, vector<3x128xf32>
    %c0_673 = arith.constant 0 : index
    %c128_674 = arith.constant 128 : index
    %431 = vector.load %arg16[%c0_673, %c128_674] : memref<18x1152xf32, #tpu.memory_space<vmem>>, vector<3x128xf32>
    tpu.vector_store %arg16[%c0_673, %c128_674], %430 {strides = array<i32>} : memref<18x1152xf32, #tpu.memory_space<vmem>>, vector<3x128xf32>,
    %c6_675 = arith.constant 6 : index
    %c0_676 = arith.constant 0 : index
    %432 = vector.load %arg15[%c6_675, %c0_676] : memref<50x128xf32, #tpu.memory_space<vmem>>, vector<3x128xf32>
    %c3_677 = arith.constant 3 : index
    %c128_678 = arith.constant 128 : index
    %433 = vector.load %arg16[%c3_677, %c128_678] : memref<18x1152xf32, #tpu.memory_space<vmem>>, vector<3x128xf32>
    tpu.vector_store %arg16[%c3_677, %c128_678], %432 {strides = array<i32>} : memref<18x1152xf32, #tpu.memory_space<vmem>>, vector<3x128xf32>,
    %c11_679 = arith.constant 11 : index
    %c0_680 = arith.constant 0 : index
    %434 = vector.load %arg15[%c11_679, %c0_680] : memref<50x128xf32, #tpu.memory_space<vmem>>, vector<3x128xf32>
    %c6_681 = arith.constant 6 : index
    %c128_682 = arith.constant 128 : index
    %435 = vector.load %arg16[%c6_681, %c128_682] : memref<18x1152xf32, #tpu.memory_space<vmem>>, vector<3x128xf32>
    tpu.vector_store %arg16[%c6_681, %c128_682], %434 {strides = array<i32>} : memref<18x1152xf32, #tpu.memory_space<vmem>>, vector<3x128xf32>,
    %c26_683 = arith.constant 26 : index
    %c0_684 = arith.constant 0 : index
    %436 = vector.load %arg15[%c26_683, %c0_684] : memref<50x128xf32, #tpu.memory_space<vmem>>, vector<3x128xf32>
    %c9_685 = arith.constant 9 : index
    %c128_686 = arith.constant 128 : index
    %437 = vector.load %arg16[%c9_685, %c128_686] : memref<18x1152xf32, #tpu.memory_space<vmem>>, vector<3x128xf32>
    tpu.vector_store %arg16[%c9_685, %c128_686], %436 {strides = array<i32>} : memref<18x1152xf32, #tpu.memory_space<vmem>>, vector<3x128xf32>,
    %c31_687 = arith.constant 31 : index
    %c0_688 = arith.constant 0 : index
    %438 = vector.load %arg15[%c31_687, %c0_688] : memref<50x128xf32, #tpu.memory_space<vmem>>, vector<3x128xf32>
    %c12_689 = arith.constant 12 : index
    %c128_690 = arith.constant 128 : index
    %439 = vector.load %arg16[%c12_689, %c128_690] : memref<18x1152xf32, #tpu.memory_space<vmem>>, vector<3x128xf32>
    tpu.vector_store %arg16[%c12_689, %c128_690], %438 {strides = array<i32>} : memref<18x1152xf32, #tpu.memory_space<vmem>>, vector<3x128xf32>,
    %c36_691 = arith.constant 36 : index
    %c0_692 = arith.constant 0 : index
    %440 = vector.load %arg15[%c36_691, %c0_692] : memref<50x128xf32, #tpu.memory_space<vmem>>, vector<3x128xf32>
    %c15_693 = arith.constant 15 : index
    %c128_694 = arith.constant 128 : index
    %441 = vector.load %arg16[%c15_693, %c128_694] : memref<18x1152xf32, #tpu.memory_space<vmem>>, vector<3x128xf32>
    tpu.vector_store %arg16[%c15_693, %c128_694], %440 {strides = array<i32>} : memref<18x1152xf32, #tpu.memory_space<vmem>>, vector<3x128xf32>,
    %c2_695 = arith.constant 2 : index
    %c0_696 = arith.constant 0 : index
    %442 = vector.load %arg15[%c2_695, %c0_696] : memref<50x128xf32, #tpu.memory_space<vmem>>, vector<3x128xf32>
    %c0_697 = arith.constant 0 : index
    %c256_698 = arith.constant 256 : index
    %443 = vector.load %arg16[%c0_697, %c256_698] : memref<18x1152xf32, #tpu.memory_space<vmem>>, vector<3x128xf32>
    tpu.vector_store %arg16[%c0_697, %c256_698], %442 {strides = array<i32>} : memref<18x1152xf32, #tpu.memory_space<vmem>>, vector<3x128xf32>,
    %c7 = arith.constant 7 : index
    %c0_699 = arith.constant 0 : index
    %444 = vector.load %arg15[%c7, %c0_699] : memref<50x128xf32, #tpu.memory_space<vmem>>, vector<3x128xf32>
    %c3_700 = arith.constant 3 : index
    %c256_701 = arith.constant 256 : index
    %445 = vector.load %arg16[%c3_700, %c256_701] : memref<18x1152xf32, #tpu.memory_space<vmem>>, vector<3x128xf32>
    tpu.vector_store %arg16[%c3_700, %c256_701], %444 {strides = array<i32>} : memref<18x1152xf32, #tpu.memory_space<vmem>>, vector<3x128xf32>,
    %c12_702 = arith.constant 12 : index
    %c0_703 = arith.constant 0 : index
    %446 = vector.load %arg15[%c12_702, %c0_703] : memref<50x128xf32, #tpu.memory_space<vmem>>, vector<3x128xf32>
    %c6_704 = arith.constant 6 : index
    %c256_705 = arith.constant 256 : index
    %447 = vector.load %arg16[%c6_704, %c256_705] : memref<18x1152xf32, #tpu.memory_space<vmem>>, vector<3x128xf32>
    tpu.vector_store %arg16[%c6_704, %c256_705], %446 {strides = array<i32>} : memref<18x1152xf32, #tpu.memory_space<vmem>>, vector<3x128xf32>,
    %c27_706 = arith.constant 27 : index
    %c0_707 = arith.constant 0 : index
    %448 = vector.load %arg15[%c27_706, %c0_707] : memref<50x128xf32, #tpu.memory_space<vmem>>, vector<3x128xf32>
    %c9_708 = arith.constant 9 : index
    %c256_709 = arith.constant 256 : index
    %449 = vector.load %arg16[%c9_708, %c256_709] : memref<18x1152xf32, #tpu.memory_space<vmem>>, vector<3x128xf32>
    tpu.vector_store %arg16[%c9_708, %c256_709], %448 {strides = array<i32>} : memref<18x1152xf32, #tpu.memory_space<vmem>>, vector<3x128xf32>,
    %c32_710 = arith.constant 32 : index
    %c0_711 = arith.constant 0 : index
    %450 = vector.load %arg15[%c32_710, %c0_711] : memref<50x128xf32, #tpu.memory_space<vmem>>, vector<3x128xf32>
    %c12_712 = arith.constant 12 : index
    %c256_713 = arith.constant 256 : index
    %451 = vector.load %arg16[%c12_712, %c256_713] : memref<18x1152xf32, #tpu.memory_space<vmem>>, vector<3x128xf32>
    tpu.vector_store %arg16[%c12_712, %c256_713], %450 {strides = array<i32>} : memref<18x1152xf32, #tpu.memory_space<vmem>>, vector<3x128xf32>,
    %c37_714 = arith.constant 37 : index
    %c0_715 = arith.constant 0 : index
    %452 = vector.load %arg15[%c37_714, %c0_715] : memref<50x128xf32, #tpu.memory_space<vmem>>, vector<3x128xf32>
    %c15_716 = arith.constant 15 : index
    %c256_717 = arith.constant 256 : index
    %453 = vector.load %arg16[%c15_716, %c256_717] : memref<18x1152xf32, #tpu.memory_space<vmem>>, vector<3x128xf32>
    tpu.vector_store %arg16[%c15_716, %c256_717], %452 {strides = array<i32>} : memref<18x1152xf32, #tpu.memory_space<vmem>>, vector<3x128xf32>,
    %c5_718 = arith.constant 5 : index
    %c0_719 = arith.constant 0 : index
    %454 = vector.load %arg15[%c5_718, %c0_719] : memref<50x128xf32, #tpu.memory_space<vmem>>, vector<3x128xf32>
    %c0_720 = arith.constant 0 : index
    %c384_721 = arith.constant 384 : index
    %455 = vector.load %arg16[%c0_720, %c384_721] : memref<18x1152xf32, #tpu.memory_space<vmem>>, vector<3x128xf32>
    tpu.vector_store %arg16[%c0_720, %c384_721], %454 {strides = array<i32>} : memref<18x1152xf32, #tpu.memory_space<vmem>>, vector<3x128xf32>,
    %c10_722 = arith.constant 10 : index
    %c0_723 = arith.constant 0 : index
    %456 = vector.load %arg15[%c10_722, %c0_723] : memref<50x128xf32, #tpu.memory_space<vmem>>, vector<3x128xf32>
    %c3_724 = arith.constant 3 : index
    %c384_725 = arith.constant 384 : index
    %457 = vector.load %arg16[%c3_724, %c384_725] : memref<18x1152xf32, #tpu.memory_space<vmem>>, vector<3x128xf32>
    tpu.vector_store %arg16[%c3_724, %c384_725], %456 {strides = array<i32>} : memref<18x1152xf32, #tpu.memory_space<vmem>>, vector<3x128xf32>,
    %c15_726 = arith.constant 15 : index
    %c0_727 = arith.constant 0 : index
    %458 = vector.load %arg15[%c15_726, %c0_727] : memref<50x128xf32, #tpu.memory_space<vmem>>, vector<3x128xf32>
    %c6_728 = arith.constant 6 : index
    %c384_729 = arith.constant 384 : index
    %459 = vector.load %arg16[%c6_728, %c384_729] : memref<18x1152xf32, #tpu.memory_space<vmem>>, vector<3x128xf32>
    tpu.vector_store %arg16[%c6_728, %c384_729], %458 {strides = array<i32>} : memref<18x1152xf32, #tpu.memory_space<vmem>>, vector<3x128xf32>,
    %c30_730 = arith.constant 30 : index
    %c0_731 = arith.constant 0 : index
    %460 = vector.load %arg15[%c30_730, %c0_731] : memref<50x128xf32, #tpu.memory_space<vmem>>, vector<3x128xf32>
    %c9_732 = arith.constant 9 : index
    %c384_733 = arith.constant 384 : index
    %461 = vector.load %arg16[%c9_732, %c384_733] : memref<18x1152xf32, #tpu.memory_space<vmem>>, vector<3x128xf32>
    tpu.vector_store %arg16[%c9_732, %c384_733], %460 {strides = array<i32>} : memref<18x1152xf32, #tpu.memory_space<vmem>>, vector<3x128xf32>,
    %c35_734 = arith.constant 35 : index
    %c0_735 = arith.constant 0 : index
    %462 = vector.load %arg15[%c35_734, %c0_735] : memref<50x128xf32, #tpu.memory_space<vmem>>, vector<3x128xf32>
    %c12_736 = arith.constant 12 : index
    %c384_737 = arith.constant 384 : index
    %463 = vector.load %arg16[%c12_736, %c384_737] : memref<18x1152xf32, #tpu.memory_space<vmem>>, vector<3x128xf32>
    tpu.vector_store %arg16[%c12_736, %c384_737], %462 {strides = array<i32>} : memref<18x1152xf32, #tpu.memory_space<vmem>>, vector<3x128xf32>,
    %c40_738 = arith.constant 40 : index
    %c0_739 = arith.constant 0 : index
    %464 = vector.load %arg15[%c40_738, %c0_739] : memref<50x128xf32, #tpu.memory_space<vmem>>, vector<3x128xf32>
    %c15_740 = arith.constant 15 : index
    %c384_741 = arith.constant 384 : index
    %465 = vector.load %arg16[%c15_740, %c384_741] : memref<18x1152xf32, #tpu.memory_space<vmem>>, vector<3x128xf32>
    tpu.vector_store %arg16[%c15_740, %c384_741], %464 {strides = array<i32>} : memref<18x1152xf32, #tpu.memory_space<vmem>>, vector<3x128xf32>,
    %c6_742 = arith.constant 6 : index
    %c0_743 = arith.constant 0 : index
    %466 = vector.load %arg15[%c6_742, %c0_743] : memref<50x128xf32, #tpu.memory_space<vmem>>, vector<3x128xf32>
    %c0_744 = arith.constant 0 : index
    %c512 = arith.constant 512 : index
    %467 = vector.load %arg16[%c0_744, %c512] : memref<18x1152xf32, #tpu.memory_space<vmem>>, vector<3x128xf32>
    tpu.vector_store %arg16[%c0_744, %c512], %466 {strides = array<i32>} : memref<18x1152xf32, #tpu.memory_space<vmem>>, vector<3x128xf32>,
    %c11_745 = arith.constant 11 : index
    %c0_746 = arith.constant 0 : index
    %468 = vector.load %arg15[%c11_745, %c0_746] : memref<50x128xf32, #tpu.memory_space<vmem>>, vector<3x128xf32>
    %c3_747 = arith.constant 3 : index
    %c512_748 = arith.constant 512 : index
    %469 = vector.load %arg16[%c3_747, %c512_748] : memref<18x1152xf32, #tpu.memory_space<vmem>>, vector<3x128xf32>
    tpu.vector_store %arg16[%c3_747, %c512_748], %468 {strides = array<i32>} : memref<18x1152xf32, #tpu.memory_space<vmem>>, vector<3x128xf32>,
    %c16_749 = arith.constant 16 : index
    %c0_750 = arith.constant 0 : index
    %470 = vector.load %arg15[%c16_749, %c0_750] : memref<50x128xf32, #tpu.memory_space<vmem>>, vector<3x128xf32>
    %c6_751 = arith.constant 6 : index
    %c512_752 = arith.constant 512 : index
    %471 = vector.load %arg16[%c6_751, %c512_752] : memref<18x1152xf32, #tpu.memory_space<vmem>>, vector<3x128xf32>
    tpu.vector_store %arg16[%c6_751, %c512_752], %470 {strides = array<i32>} : memref<18x1152xf32, #tpu.memory_space<vmem>>, vector<3x128xf32>,
    %c31_753 = arith.constant 31 : index
    %c0_754 = arith.constant 0 : index
    %472 = vector.load %arg15[%c31_753, %c0_754] : memref<50x128xf32, #tpu.memory_space<vmem>>, vector<3x128xf32>
    %c9_755 = arith.constant 9 : index
    %c512_756 = arith.constant 512 : index
    %473 = vector.load %arg16[%c9_755, %c512_756] : memref<18x1152xf32, #tpu.memory_space<vmem>>, vector<3x128xf32>
    tpu.vector_store %arg16[%c9_755, %c512_756], %472 {strides = array<i32>} : memref<18x1152xf32, #tpu.memory_space<vmem>>, vector<3x128xf32>,
    %c36_757 = arith.constant 36 : index
    %c0_758 = arith.constant 0 : index
    %474 = vector.load %arg15[%c36_757, %c0_758] : memref<50x128xf32, #tpu.memory_space<vmem>>, vector<3x128xf32>
    %c12_759 = arith.constant 12 : index
    %c512_760 = arith.constant 512 : index
    %475 = vector.load %arg16[%c12_759, %c512_760] : memref<18x1152xf32, #tpu.memory_space<vmem>>, vector<3x128xf32>
    tpu.vector_store %arg16[%c12_759, %c512_760], %474 {strides = array<i32>} : memref<18x1152xf32, #tpu.memory_space<vmem>>, vector<3x128xf32>,
    %c41_761 = arith.constant 41 : index
    %c0_762 = arith.constant 0 : index
    %476 = vector.load %arg15[%c41_761, %c0_762] : memref<50x128xf32, #tpu.memory_space<vmem>>, vector<3x128xf32>
    %c15_763 = arith.constant 15 : index
    %c512_764 = arith.constant 512 : index
    %477 = vector.load %arg16[%c15_763, %c512_764] : memref<18x1152xf32, #tpu.memory_space<vmem>>, vector<3x128xf32>
    tpu.vector_store %arg16[%c15_763, %c512_764], %476 {strides = array<i32>} : memref<18x1152xf32, #tpu.memory_space<vmem>>, vector<3x128xf32>,
    %c7_765 = arith.constant 7 : index
    %c0_766 = arith.constant 0 : index
    %478 = vector.load %arg15[%c7_765, %c0_766] : memref<50x128xf32, #tpu.memory_space<vmem>>, vector<3x128xf32>
    %c0_767 = arith.constant 0 : index
    %c640 = arith.constant 640 : index
    %479 = vector.load %arg16[%c0_767, %c640] : memref<18x1152xf32, #tpu.memory_space<vmem>>, vector<3x128xf32>
    tpu.vector_store %arg16[%c0_767, %c640], %478 {strides = array<i32>} : memref<18x1152xf32, #tpu.memory_space<vmem>>, vector<3x128xf32>,
    %c12_768 = arith.constant 12 : index
    %c0_769 = arith.constant 0 : index
    %480 = vector.load %arg15[%c12_768, %c0_769] : memref<50x128xf32, #tpu.memory_space<vmem>>, vector<3x128xf32>
    %c3_770 = arith.constant 3 : index
    %c640_771 = arith.constant 640 : index
    %481 = vector.load %arg16[%c3_770, %c640_771] : memref<18x1152xf32, #tpu.memory_space<vmem>>, vector<3x128xf32>
    tpu.vector_store %arg16[%c3_770, %c640_771], %480 {strides = array<i32>} : memref<18x1152xf32, #tpu.memory_space<vmem>>, vector<3x128xf32>,
    %c17_772 = arith.constant 17 : index
    %c0_773 = arith.constant 0 : index
    %482 = vector.load %arg15[%c17_772, %c0_773] : memref<50x128xf32, #tpu.memory_space<vmem>>, vector<3x128xf32>
    %c6_774 = arith.constant 6 : index
    %c640_775 = arith.constant 640 : index
    %483 = vector.load %arg16[%c6_774, %c640_775] : memref<18x1152xf32, #tpu.memory_space<vmem>>, vector<3x128xf32>
    tpu.vector_store %arg16[%c6_774, %c640_775], %482 {strides = array<i32>} : memref<18x1152xf32, #tpu.memory_space<vmem>>, vector<3x128xf32>,
    %c32_776 = arith.constant 32 : index
    %c0_777 = arith.constant 0 : index
    %484 = vector.load %arg15[%c32_776, %c0_777] : memref<50x128xf32, #tpu.memory_space<vmem>>, vector<3x128xf32>
    %c9_778 = arith.constant 9 : index
    %c640_779 = arith.constant 640 : index
    %485 = vector.load %arg16[%c9_778, %c640_779] : memref<18x1152xf32, #tpu.memory_space<vmem>>, vector<3x128xf32>
    tpu.vector_store %arg16[%c9_778, %c640_779], %484 {strides = array<i32>} : memref<18x1152xf32, #tpu.memory_space<vmem>>, vector<3x128xf32>,
    %c37_780 = arith.constant 37 : index
    %c0_781 = arith.constant 0 : index
    %486 = vector.load %arg15[%c37_780, %c0_781] : memref<50x128xf32, #tpu.memory_space<vmem>>, vector<3x128xf32>
    %c12_782 = arith.constant 12 : index
    %c640_783 = arith.constant 640 : index
    %487 = vector.load %arg16[%c12_782, %c640_783] : memref<18x1152xf32, #tpu.memory_space<vmem>>, vector<3x128xf32>
    tpu.vector_store %arg16[%c12_782, %c640_783], %486 {strides = array<i32>} : memref<18x1152xf32, #tpu.memory_space<vmem>>, vector<3x128xf32>,
    %c42_784 = arith.constant 42 : index
    %c0_785 = arith.constant 0 : index
    %488 = vector.load %arg15[%c42_784, %c0_785] : memref<50x128xf32, #tpu.memory_space<vmem>>, vector<3x128xf32>
    %c15_786 = arith.constant 15 : index
    %c640_787 = arith.constant 640 : index
    %489 = vector.load %arg16[%c15_786, %c640_787] : memref<18x1152xf32, #tpu.memory_space<vmem>>, vector<3x128xf32>
    tpu.vector_store %arg16[%c15_786, %c640_787], %488 {strides = array<i32>} : memref<18x1152xf32, #tpu.memory_space<vmem>>, vector<3x128xf32>,
    %c10_788 = arith.constant 10 : index
    %c0_789 = arith.constant 0 : index
    %490 = vector.load %arg15[%c10_788, %c0_789] : memref<50x128xf32, #tpu.memory_space<vmem>>, vector<3x128xf32>
    %c0_790 = arith.constant 0 : index
    %c768 = arith.constant 768 : index
    %491 = vector.load %arg16[%c0_790, %c768] : memref<18x1152xf32, #tpu.memory_space<vmem>>, vector<3x128xf32>
    tpu.vector_store %arg16[%c0_790, %c768], %490 {strides = array<i32>} : memref<18x1152xf32, #tpu.memory_space<vmem>>, vector<3x128xf32>,
    %c15_791 = arith.constant 15 : index
    %c0_792 = arith.constant 0 : index
    %492 = vector.load %arg15[%c15_791, %c0_792] : memref<50x128xf32, #tpu.memory_space<vmem>>, vector<3x128xf32>
    %c3_793 = arith.constant 3 : index
    %c768_794 = arith.constant 768 : index
    %493 = vector.load %arg16[%c3_793, %c768_794] : memref<18x1152xf32, #tpu.memory_space<vmem>>, vector<3x128xf32>
    tpu.vector_store %arg16[%c3_793, %c768_794], %492 {strides = array<i32>} : memref<18x1152xf32, #tpu.memory_space<vmem>>, vector<3x128xf32>,
    %c20 = arith.constant 20 : index
    %c0_795 = arith.constant 0 : index
    %494 = vector.load %arg15[%c20, %c0_795] : memref<50x128xf32, #tpu.memory_space<vmem>>, vector<3x128xf32>
    %c6_796 = arith.constant 6 : index
    %c768_797 = arith.constant 768 : index
    %495 = vector.load %arg16[%c6_796, %c768_797] : memref<18x1152xf32, #tpu.memory_space<vmem>>, vector<3x128xf32>
    tpu.vector_store %arg16[%c6_796, %c768_797], %494 {strides = array<i32>} : memref<18x1152xf32, #tpu.memory_space<vmem>>, vector<3x128xf32>,
    %c35_798 = arith.constant 35 : index
    %c0_799 = arith.constant 0 : index
    %496 = vector.load %arg15[%c35_798, %c0_799] : memref<50x128xf32, #tpu.memory_space<vmem>>, vector<3x128xf32>
    %c9_800 = arith.constant 9 : index
    %c768_801 = arith.constant 768 : index
    %497 = vector.load %arg16[%c9_800, %c768_801] : memref<18x1152xf32, #tpu.memory_space<vmem>>, vector<3x128xf32>
    tpu.vector_store %arg16[%c9_800, %c768_801], %496 {strides = array<i32>} : memref<18x1152xf32, #tpu.memory_space<vmem>>, vector<3x128xf32>,
    %c40_802 = arith.constant 40 : index
    %c0_803 = arith.constant 0 : index
    %498 = vector.load %arg15[%c40_802, %c0_803] : memref<50x128xf32, #tpu.memory_space<vmem>>, vector<3x128xf32>
    %c12_804 = arith.constant 12 : index
    %c768_805 = arith.constant 768 : index
    %499 = vector.load %arg16[%c12_804, %c768_805] : memref<18x1152xf32, #tpu.memory_space<vmem>>, vector<3x128xf32>
    tpu.vector_store %arg16[%c12_804, %c768_805], %498 {strides = array<i32>} : memref<18x1152xf32, #tpu.memory_space<vmem>>, vector<3x128xf32>,
    %c45_806 = arith.constant 45 : index
    %c0_807 = arith.constant 0 : index
    %500 = vector.load %arg15[%c45_806, %c0_807] : memref<50x128xf32, #tpu.memory_space<vmem>>, vector<3x128xf32>
    %c15_808 = arith.constant 15 : index
    %c768_809 = arith.constant 768 : index
    %501 = vector.load %arg16[%c15_808, %c768_809] : memref<18x1152xf32, #tpu.memory_space<vmem>>, vector<3x128xf32>
    tpu.vector_store %arg16[%c15_808, %c768_809], %500 {strides = array<i32>} : memref<18x1152xf32, #tpu.memory_space<vmem>>, vector<3x128xf32>,
    %c11_810 = arith.constant 11 : index
    %c0_811 = arith.constant 0 : index
    %502 = vector.load %arg15[%c11_810, %c0_811] : memref<50x128xf32, #tpu.memory_space<vmem>>, vector<3x128xf32>
    %c0_812 = arith.constant 0 : index
    %c896 = arith.constant 896 : index
    %503 = vector.load %arg16[%c0_812, %c896] : memref<18x1152xf32, #tpu.memory_space<vmem>>, vector<3x128xf32>
    tpu.vector_store %arg16[%c0_812, %c896], %502 {strides = array<i32>} : memref<18x1152xf32, #tpu.memory_space<vmem>>, vector<3x128xf32>,
    %c16_813 = arith.constant 16 : index
    %c0_814 = arith.constant 0 : index
    %504 = vector.load %arg15[%c16_813, %c0_814] : memref<50x128xf32, #tpu.memory_space<vmem>>, vector<3x128xf32>
    %c3_815 = arith.constant 3 : index
    %c896_816 = arith.constant 896 : index
    %505 = vector.load %arg16[%c3_815, %c896_816] : memref<18x1152xf32, #tpu.memory_space<vmem>>, vector<3x128xf32>
    tpu.vector_store %arg16[%c3_815, %c896_816], %504 {strides = array<i32>} : memref<18x1152xf32, #tpu.memory_space<vmem>>, vector<3x128xf32>,
    %c21 = arith.constant 21 : index
    %c0_817 = arith.constant 0 : index
    %506 = vector.load %arg15[%c21, %c0_817] : memref<50x128xf32, #tpu.memory_space<vmem>>, vector<3x128xf32>
    %c6_818 = arith.constant 6 : index
    %c896_819 = arith.constant 896 : index
    %507 = vector.load %arg16[%c6_818, %c896_819] : memref<18x1152xf32, #tpu.memory_space<vmem>>, vector<3x128xf32>
    tpu.vector_store %arg16[%c6_818, %c896_819], %506 {strides = array<i32>} : memref<18x1152xf32, #tpu.memory_space<vmem>>, vector<3x128xf32>,
    %c36_820 = arith.constant 36 : index
    %c0_821 = arith.constant 0 : index
    %508 = vector.load %arg15[%c36_820, %c0_821] : memref<50x128xf32, #tpu.memory_space<vmem>>, vector<3x128xf32>
    %c9_822 = arith.constant 9 : index
    %c896_823 = arith.constant 896 : index
    %509 = vector.load %arg16[%c9_822, %c896_823] : memref<18x1152xf32, #tpu.memory_space<vmem>>, vector<3x128xf32>
    tpu.vector_store %arg16[%c9_822, %c896_823], %508 {strides = array<i32>} : memref<18x1152xf32, #tpu.memory_space<vmem>>, vector<3x128xf32>,
    %c41_824 = arith.constant 41 : index
    %c0_825 = arith.constant 0 : index
    %510 = vector.load %arg15[%c41_824, %c0_825] : memref<50x128xf32, #tpu.memory_space<vmem>>, vector<3x128xf32>
    %c12_826 = arith.constant 12 : index
    %c896_827 = arith.constant 896 : index
    %511 = vector.load %arg16[%c12_826, %c896_827] : memref<18x1152xf32, #tpu.memory_space<vmem>>, vector<3x128xf32>
    tpu.vector_store %arg16[%c12_826, %c896_827], %510 {strides = array<i32>} : memref<18x1152xf32, #tpu.memory_space<vmem>>, vector<3x128xf32>,
    %c46_828 = arith.constant 46 : index
    %c0_829 = arith.constant 0 : index
    %512 = vector.load %arg15[%c46_828, %c0_829] : memref<50x128xf32, #tpu.memory_space<vmem>>, vector<3x128xf32>
    %c15_830 = arith.constant 15 : index
    %c896_831 = arith.constant 896 : index
    %513 = vector.load %arg16[%c15_830, %c896_831] : memref<18x1152xf32, #tpu.memory_space<vmem>>, vector<3x128xf32>
    tpu.vector_store %arg16[%c15_830, %c896_831], %512 {strides = array<i32>} : memref<18x1152xf32, #tpu.memory_space<vmem>>, vector<3x128xf32>,
    %c12_832 = arith.constant 12 : index
    %c0_833 = arith.constant 0 : index
    %514 = vector.load %arg15[%c12_832, %c0_833] : memref<50x128xf32, #tpu.memory_space<vmem>>, vector<3x128xf32>
    %c0_834 = arith.constant 0 : index
    %c1024 = arith.constant 1024 : index
    %515 = vector.load %arg16[%c0_834, %c1024] : memref<18x1152xf32, #tpu.memory_space<vmem>>, vector<3x128xf32>
    tpu.vector_store %arg16[%c0_834, %c1024], %514 {strides = array<i32>} : memref<18x1152xf32, #tpu.memory_space<vmem>>, vector<3x128xf32>,
    %c17_835 = arith.constant 17 : index
    %c0_836 = arith.constant 0 : index
    %516 = vector.load %arg15[%c17_835, %c0_836] : memref<50x128xf32, #tpu.memory_space<vmem>>, vector<3x128xf32>
    %c3_837 = arith.constant 3 : index
    %c1024_838 = arith.constant 1024 : index
    %517 = vector.load %arg16[%c3_837, %c1024_838] : memref<18x1152xf32, #tpu.memory_space<vmem>>, vector<3x128xf32>
    tpu.vector_store %arg16[%c3_837, %c1024_838], %516 {strides = array<i32>} : memref<18x1152xf32, #tpu.memory_space<vmem>>, vector<3x128xf32>,
    %c22 = arith.constant 22 : index
    %c0_839 = arith.constant 0 : index
    %518 = vector.load %arg15[%c22, %c0_839] : memref<50x128xf32, #tpu.memory_space<vmem>>, vector<3x128xf32>
    %c6_840 = arith.constant 6 : index
    %c1024_841 = arith.constant 1024 : index
    %519 = vector.load %arg16[%c6_840, %c1024_841] : memref<18x1152xf32, #tpu.memory_space<vmem>>, vector<3x128xf32>
    tpu.vector_store %arg16[%c6_840, %c1024_841], %518 {strides = array<i32>} : memref<18x1152xf32, #tpu.memory_space<vmem>>, vector<3x128xf32>,
    %c37_842 = arith.constant 37 : index
    %c0_843 = arith.constant 0 : index
    %520 = vector.load %arg15[%c37_842, %c0_843] : memref<50x128xf32, #tpu.memory_space<vmem>>, vector<3x128xf32>
    %c9_844 = arith.constant 9 : index
    %c1024_845 = arith.constant 1024 : index
    %521 = vector.load %arg16[%c9_844, %c1024_845] : memref<18x1152xf32, #tpu.memory_space<vmem>>, vector<3x128xf32>
    tpu.vector_store %arg16[%c9_844, %c1024_845], %520 {strides = array<i32>} : memref<18x1152xf32, #tpu.memory_space<vmem>>, vector<3x128xf32>,
    %c42_846 = arith.constant 42 : index
    %c0_847 = arith.constant 0 : index
    %522 = vector.load %arg15[%c42_846, %c0_847] : memref<50x128xf32, #tpu.memory_space<vmem>>, vector<3x128xf32>
    %c12_848 = arith.constant 12 : index
    %c1024_849 = arith.constant 1024 : index
    %523 = vector.load %arg16[%c12_848, %c1024_849] : memref<18x1152xf32, #tpu.memory_space<vmem>>, vector<3x128xf32>
    tpu.vector_store %arg16[%c12_848, %c1024_849], %522 {strides = array<i32>} : memref<18x1152xf32, #tpu.memory_space<vmem>>, vector<3x128xf32>,
    %c47 = arith.constant 47 : index
    %c0_850 = arith.constant 0 : index
    %524 = vector.load %arg15[%c47, %c0_850] : memref<50x128xf32, #tpu.memory_space<vmem>>, vector<3x128xf32>
    %c15_851 = arith.constant 15 : index
    %c1024_852 = arith.constant 1024 : index
    %525 = vector.load %arg16[%c15_851, %c1024_852] : memref<18x1152xf32, #tpu.memory_space<vmem>>, vector<3x128xf32>
    tpu.vector_store %arg16[%c15_851, %c1024_852], %524 {strides = array<i32>} : memref<18x1152xf32, #tpu.memory_space<vmem>>, vector<3x128xf32>,
    %c0_853 = arith.constant 0 : index
    %c0_854 = arith.constant 0 : index
    %526 = vector.load %arg16[%c0_853, %c0_854] : memref<18x1152xf32, #tpu.memory_space<vmem>>, vector<18x1152xf32>
    %c0_855 = arith.constant 0 : index
    %c0_856 = arith.constant 0 : index
    %527 = vector.load %arg6[%c0_855, %c0_856] : memref<1152x128xf32, #tpu.memory_space<vmem>>, vector<1152x128xf32>
    %cst_857 = arith.constant dense<0.000000e+00> : vector<18x128xf32>
    %528 = tpu.matmul %526, %527, %cst_857 {dimension_numbers = #tpu.dot_dimension_numbers<[1], [0], [0], [1], [0, 0, 1, 1], [], []>} : vector<18x1152xf32>, vector<1152x128xf32>, vector<18x128xf32> -> vector<18x128xf32>
    %c0_858 = arith.constant 0 : index
    %c0_859 = arith.constant 0 : index
    %529 = vector.load %arg7[%c0_858, %c0_859] : memref<1x128xf32, #tpu.memory_space<vmem>>, vector<1x128xf32>
    %530 = vector.broadcast %529 : vector<1x128xf32> to vector<18x128xf32>
    %531 = arith.addf %528, %530 : vector<18x128xf32>
    %532 = arith.addf %531, %402 : vector<18x128xf32>
    %cst_860 = arith.constant 0.000000e+00 : f32
    %533 = vector.broadcast %cst_860 : f32 to vector<18x128xf32>
    %534 = arith.maximumf %532, %533 : vector<18x128xf32>
    %c0_861 = arith.constant 0 : index
    %c0_862 = arith.constant 0 : index
    %535 = vector.load %arg14[%c0_861, %c0_862] : memref<18x128xf32, #tpu.memory_space<vmem>>, vector<18x128xf32>
    tpu.vector_store %arg14[%c0_861, %c0_862], %534 {strides = array<i32>} : memref<18x128xf32, #tpu.memory_space<vmem>>, vector<18x128xf32>,
    %c0_863 = arith.constant 0 : index
    %c0_864 = arith.constant 0 : index
    %536 = vector.load %arg14[%c0_863, %c0_864] : memref<18x128xf32, #tpu.memory_space<vmem>>, vector<3x128xf32>
    %c6_865 = arith.constant 6 : index
    %c0_866 = arith.constant 0 : index
    %537 = vector.load %arg15[%c6_865, %c0_866] : memref<50x128xf32, #tpu.memory_space<vmem>>, vector<3x128xf32>
    tpu.vector_store %arg15[%c6_865, %c0_866], %536 {strides = array<i32>} : memref<50x128xf32, #tpu.memory_space<vmem>>, vector<3x128xf32>,
    %c3_867 = arith.constant 3 : index
    %c0_868 = arith.constant 0 : index
    %538 = vector.load %arg14[%c3_867, %c0_868] : memref<18x128xf32, #tpu.memory_space<vmem>>, vector<3x128xf32>
    %c11_869 = arith.constant 11 : index
    %c0_870 = arith.constant 0 : index
    %539 = vector.load %arg15[%c11_869, %c0_870] : memref<50x128xf32, #tpu.memory_space<vmem>>, vector<3x128xf32>
    tpu.vector_store %arg15[%c11_869, %c0_870], %538 {strides = array<i32>} : memref<50x128xf32, #tpu.memory_space<vmem>>, vector<3x128xf32>,
    %c6_871 = arith.constant 6 : index
    %c0_872 = arith.constant 0 : index
    %540 = vector.load %arg14[%c6_871, %c0_872] : memref<18x128xf32, #tpu.memory_space<vmem>>, vector<3x128xf32>
    %c16_873 = arith.constant 16 : index
    %c0_874 = arith.constant 0 : index
    %541 = vector.load %arg15[%c16_873, %c0_874] : memref<50x128xf32, #tpu.memory_space<vmem>>, vector<3x128xf32>
    tpu.vector_store %arg15[%c16_873, %c0_874], %540 {strides = array<i32>} : memref<50x128xf32, #tpu.memory_space<vmem>>, vector<3x128xf32>,
    %c9_875 = arith.constant 9 : index
    %c0_876 = arith.constant 0 : index
    %542 = vector.load %arg14[%c9_875, %c0_876] : memref<18x128xf32, #tpu.memory_space<vmem>>, vector<3x128xf32>
    %c31_877 = arith.constant 31 : index
    %c0_878 = arith.constant 0 : index
    %543 = vector.load %arg15[%c31_877, %c0_878] : memref<50x128xf32, #tpu.memory_space<vmem>>, vector<3x128xf32>
    tpu.vector_store %arg15[%c31_877, %c0_878], %542 {strides = array<i32>} : memref<50x128xf32, #tpu.memory_space<vmem>>, vector<3x128xf32>,
    %c12_879 = arith.constant 12 : index
    %c0_880 = arith.constant 0 : index
    %544 = vector.load %arg14[%c12_879, %c0_880] : memref<18x128xf32, #tpu.memory_space<vmem>>, vector<3x128xf32>
    %c36_881 = arith.constant 36 : index
    %c0_882 = arith.constant 0 : index
    %545 = vector.load %arg15[%c36_881, %c0_882] : memref<50x128xf32, #tpu.memory_space<vmem>>, vector<3x128xf32>
    tpu.vector_store %arg15[%c36_881, %c0_882], %544 {strides = array<i32>} : memref<50x128xf32, #tpu.memory_space<vmem>>, vector<3x128xf32>,
    %c15_883 = arith.constant 15 : index
    %c0_884 = arith.constant 0 : index
    %546 = vector.load %arg14[%c15_883, %c0_884] : memref<18x128xf32, #tpu.memory_space<vmem>>, vector<3x128xf32>
    %c41_885 = arith.constant 41 : index
    %c0_886 = arith.constant 0 : index
    %547 = vector.load %arg15[%c41_885, %c0_886] : memref<50x128xf32, #tpu.memory_space<vmem>>, vector<3x128xf32>
    tpu.vector_store %arg15[%c41_885, %c0_886], %546 {strides = array<i32>} : memref<50x128xf32, #tpu.memory_space<vmem>>, vector<3x128xf32>,
    %c0_887 = arith.constant 0 : index
    %c0_888 = arith.constant 0 : index
    %548 = vector.load %arg15[%c0_887, %c0_888] : memref<50x128xf32, #tpu.memory_space<vmem>>, vector<3x128xf32>
    %c0_889 = arith.constant 0 : index
    %c0_890 = arith.constant 0 : index
    %549 = vector.load %arg16[%c0_889, %c0_890] : memref<18x1152xf32, #tpu.memory_space<vmem>>, vector<3x128xf32>
    tpu.vector_store %arg16[%c0_889, %c0_890], %548 {strides = array<i32>} : memref<18x1152xf32, #tpu.memory_space<vmem>>, vector<3x128xf32>,
    %c5_891 = arith.constant 5 : index
    %c0_892 = arith.constant 0 : index
    %550 = vector.load %arg15[%c5_891, %c0_892] : memref<50x128xf32, #tpu.memory_space<vmem>>, vector<3x128xf32>
    %c3_893 = arith.constant 3 : index
    %c0_894 = arith.constant 0 : index
    %551 = vector.load %arg16[%c3_893, %c0_894] : memref<18x1152xf32, #tpu.memory_space<vmem>>, vector<3x128xf32>
    tpu.vector_store %arg16[%c3_893, %c0_894], %550 {strides = array<i32>} : memref<18x1152xf32, #tpu.memory_space<vmem>>, vector<3x128xf32>,
    %c10_895 = arith.constant 10 : index
    %c0_896 = arith.constant 0 : index
    %552 = vector.load %arg15[%c10_895, %c0_896] : memref<50x128xf32, #tpu.memory_space<vmem>>, vector<3x128xf32>
    %c6_897 = arith.constant 6 : index
    %c0_898 = arith.constant 0 : index
    %553 = vector.load %arg16[%c6_897, %c0_898] : memref<18x1152xf32, #tpu.memory_space<vmem>>, vector<3x128xf32>
    tpu.vector_store %arg16[%c6_897, %c0_898], %552 {strides = array<i32>} : memref<18x1152xf32, #tpu.memory_space<vmem>>, vector<3x128xf32>,
    %c25_899 = arith.constant 25 : index
    %c0_900 = arith.constant 0 : index
    %554 = vector.load %arg15[%c25_899, %c0_900] : memref<50x128xf32, #tpu.memory_space<vmem>>, vector<3x128xf32>
    %c9_901 = arith.constant 9 : index
    %c0_902 = arith.constant 0 : index
    %555 = vector.load %arg16[%c9_901, %c0_902] : memref<18x1152xf32, #tpu.memory_space<vmem>>, vector<3x128xf32>
    tpu.vector_store %arg16[%c9_901, %c0_902], %554 {strides = array<i32>} : memref<18x1152xf32, #tpu.memory_space<vmem>>, vector<3x128xf32>,
    %c30_903 = arith.constant 30 : index
    %c0_904 = arith.constant 0 : index
    %556 = vector.load %arg15[%c30_903, %c0_904] : memref<50x128xf32, #tpu.memory_space<vmem>>, vector<3x128xf32>
    %c12_905 = arith.constant 12 : index
    %c0_906 = arith.constant 0 : index
    %557 = vector.load %arg16[%c12_905, %c0_906] : memref<18x1152xf32, #tpu.memory_space<vmem>>, vector<3x128xf32>
    tpu.vector_store %arg16[%c12_905, %c0_906], %556 {strides = array<i32>} : memref<18x1152xf32, #tpu.memory_space<vmem>>, vector<3x128xf32>,
    %c35_907 = arith.constant 35 : index
    %c0_908 = arith.constant 0 : index
    %558 = vector.load %arg15[%c35_907, %c0_908] : memref<50x128xf32, #tpu.memory_space<vmem>>, vector<3x128xf32>
    %c15_909 = arith.constant 15 : index
    %c0_910 = arith.constant 0 : index
    %559 = vector.load %arg16[%c15_909, %c0_910] : memref<18x1152xf32, #tpu.memory_space<vmem>>, vector<3x128xf32>
    tpu.vector_store %arg16[%c15_909, %c0_910], %558 {strides = array<i32>} : memref<18x1152xf32, #tpu.memory_space<vmem>>, vector<3x128xf32>,
    %c1_911 = arith.constant 1 : index
    %c0_912 = arith.constant 0 : index
    %560 = vector.load %arg15[%c1_911, %c0_912] : memref<50x128xf32, #tpu.memory_space<vmem>>, vector<3x128xf32>
    %c0_913 = arith.constant 0 : index
    %c128_914 = arith.constant 128 : index
    %561 = vector.load %arg16[%c0_913, %c128_914] : memref<18x1152xf32, #tpu.memory_space<vmem>>, vector<3x128xf32>
    tpu.vector_store %arg16[%c0_913, %c128_914], %560 {strides = array<i32>} : memref<18x1152xf32, #tpu.memory_space<vmem>>, vector<3x128xf32>,
    %c6_915 = arith.constant 6 : index
    %c0_916 = arith.constant 0 : index
    %562 = vector.load %arg15[%c6_915, %c0_916] : memref<50x128xf32, #tpu.memory_space<vmem>>, vector<3x128xf32>
    %c3_917 = arith.constant 3 : index
    %c128_918 = arith.constant 128 : index
    %563 = vector.load %arg16[%c3_917, %c128_918] : memref<18x1152xf32, #tpu.memory_space<vmem>>, vector<3x128xf32>
    tpu.vector_store %arg16[%c3_917, %c128_918], %562 {strides = array<i32>} : memref<18x1152xf32, #tpu.memory_space<vmem>>, vector<3x128xf32>,
    %c11_919 = arith.constant 11 : index
    %c0_920 = arith.constant 0 : index
    %564 = vector.load %arg15[%c11_919, %c0_920] : memref<50x128xf32, #tpu.memory_space<vmem>>, vector<3x128xf32>
    %c6_921 = arith.constant 6 : index
    %c128_922 = arith.constant 128 : index
    %565 = vector.load %arg16[%c6_921, %c128_922] : memref<18x1152xf32, #tpu.memory_space<vmem>>, vector<3x128xf32>
    tpu.vector_store %arg16[%c6_921, %c128_922], %564 {strides = array<i32>} : memref<18x1152xf32, #tpu.memory_space<vmem>>, vector<3x128xf32>,
    %c26_923 = arith.constant 26 : index
    %c0_924 = arith.constant 0 : index
    %566 = vector.load %arg15[%c26_923, %c0_924] : memref<50x128xf32, #tpu.memory_space<vmem>>, vector<3x128xf32>
    %c9_925 = arith.constant 9 : index
    %c128_926 = arith.constant 128 : index
    %567 = vector.load %arg16[%c9_925, %c128_926] : memref<18x1152xf32, #tpu.memory_space<vmem>>, vector<3x128xf32>
    tpu.vector_store %arg16[%c9_925, %c128_926], %566 {strides = array<i32>} : memref<18x1152xf32, #tpu.memory_space<vmem>>, vector<3x128xf32>,
    %c31_927 = arith.constant 31 : index
    %c0_928 = arith.constant 0 : index
    %568 = vector.load %arg15[%c31_927, %c0_928] : memref<50x128xf32, #tpu.memory_space<vmem>>, vector<3x128xf32>
    %c12_929 = arith.constant 12 : index
    %c128_930 = arith.constant 128 : index
    %569 = vector.load %arg16[%c12_929, %c128_930] : memref<18x1152xf32, #tpu.memory_space<vmem>>, vector<3x128xf32>
    tpu.vector_store %arg16[%c12_929, %c128_930], %568 {strides = array<i32>} : memref<18x1152xf32, #tpu.memory_space<vmem>>, vector<3x128xf32>,
    %c36_931 = arith.constant 36 : index
    %c0_932 = arith.constant 0 : index
    %570 = vector.load %arg15[%c36_931, %c0_932] : memref<50x128xf32, #tpu.memory_space<vmem>>, vector<3x128xf32>
    %c15_933 = arith.constant 15 : index
    %c128_934 = arith.constant 128 : index
    %571 = vector.load %arg16[%c15_933, %c128_934] : memref<18x1152xf32, #tpu.memory_space<vmem>>, vector<3x128xf32>
    tpu.vector_store %arg16[%c15_933, %c128_934], %570 {strides = array<i32>} : memref<18x1152xf32, #tpu.memory_space<vmem>>, vector<3x128xf32>,
    %c2_935 = arith.constant 2 : index
    %c0_936 = arith.constant 0 : index
    %572 = vector.load %arg15[%c2_935, %c0_936] : memref<50x128xf32, #tpu.memory_space<vmem>>, vector<3x128xf32>
    %c0_937 = arith.constant 0 : index
    %c256_938 = arith.constant 256 : index
    %573 = vector.load %arg16[%c0_937, %c256_938] : memref<18x1152xf32, #tpu.memory_space<vmem>>, vector<3x128xf32>
    tpu.vector_store %arg16[%c0_937, %c256_938], %572 {strides = array<i32>} : memref<18x1152xf32, #tpu.memory_space<vmem>>, vector<3x128xf32>,
    %c7_939 = arith.constant 7 : index
    %c0_940 = arith.constant 0 : index
    %574 = vector.load %arg15[%c7_939, %c0_940] : memref<50x128xf32, #tpu.memory_space<vmem>>, vector<3x128xf32>
    %c3_941 = arith.constant 3 : index
    %c256_942 = arith.constant 256 : index
    %575 = vector.load %arg16[%c3_941, %c256_942] : memref<18x1152xf32, #tpu.memory_space<vmem>>, vector<3x128xf32>
    tpu.vector_store %arg16[%c3_941, %c256_942], %574 {strides = array<i32>} : memref<18x1152xf32, #tpu.memory_space<vmem>>, vector<3x128xf32>,
    %c12_943 = arith.constant 12 : index
    %c0_944 = arith.constant 0 : index
    %576 = vector.load %arg15[%c12_943, %c0_944] : memref<50x128xf32, #tpu.memory_space<vmem>>, vector<3x128xf32>
    %c6_945 = arith.constant 6 : index
    %c256_946 = arith.constant 256 : index
    %577 = vector.load %arg16[%c6_945, %c256_946] : memref<18x1152xf32, #tpu.memory_space<vmem>>, vector<3x128xf32>
    tpu.vector_store %arg16[%c6_945, %c256_946], %576 {strides = array<i32>} : memref<18x1152xf32, #tpu.memory_space<vmem>>, vector<3x128xf32>,
    %c27_947 = arith.constant 27 : index
    %c0_948 = arith.constant 0 : index
    %578 = vector.load %arg15[%c27_947, %c0_948] : memref<50x128xf32, #tpu.memory_space<vmem>>, vector<3x128xf32>
    %c9_949 = arith.constant 9 : index
    %c256_950 = arith.constant 256 : index
    %579 = vector.load %arg16[%c9_949, %c256_950] : memref<18x1152xf32, #tpu.memory_space<vmem>>, vector<3x128xf32>
    tpu.vector_store %arg16[%c9_949, %c256_950], %578 {strides = array<i32>} : memref<18x1152xf32, #tpu.memory_space<vmem>>, vector<3x128xf32>,
    %c32_951 = arith.constant 32 : index
    %c0_952 = arith.constant 0 : index
    %580 = vector.load %arg15[%c32_951, %c0_952] : memref<50x128xf32, #tpu.memory_space<vmem>>, vector<3x128xf32>
    %c12_953 = arith.constant 12 : index
    %c256_954 = arith.constant 256 : index
    %581 = vector.load %arg16[%c12_953, %c256_954] : memref<18x1152xf32, #tpu.memory_space<vmem>>, vector<3x128xf32>
    tpu.vector_store %arg16[%c12_953, %c256_954], %580 {strides = array<i32>} : memref<18x1152xf32, #tpu.memory_space<vmem>>, vector<3x128xf32>,
    %c37_955 = arith.constant 37 : index
    %c0_956 = arith.constant 0 : index
    %582 = vector.load %arg15[%c37_955, %c0_956] : memref<50x128xf32, #tpu.memory_space<vmem>>, vector<3x128xf32>
    %c15_957 = arith.constant 15 : index
    %c256_958 = arith.constant 256 : index
    %583 = vector.load %arg16[%c15_957, %c256_958] : memref<18x1152xf32, #tpu.memory_space<vmem>>, vector<3x128xf32>
    tpu.vector_store %arg16[%c15_957, %c256_958], %582 {strides = array<i32>} : memref<18x1152xf32, #tpu.memory_space<vmem>>, vector<3x128xf32>,
    %c5_959 = arith.constant 5 : index
    %c0_960 = arith.constant 0 : index
    %584 = vector.load %arg15[%c5_959, %c0_960] : memref<50x128xf32, #tpu.memory_space<vmem>>, vector<3x128xf32>
    %c0_961 = arith.constant 0 : index
    %c384_962 = arith.constant 384 : index
    %585 = vector.load %arg16[%c0_961, %c384_962] : memref<18x1152xf32, #tpu.memory_space<vmem>>, vector<3x128xf32>
    tpu.vector_store %arg16[%c0_961, %c384_962], %584 {strides = array<i32>} : memref<18x1152xf32, #tpu.memory_space<vmem>>, vector<3x128xf32>,
    %c10_963 = arith.constant 10 : index
    %c0_964 = arith.constant 0 : index
    %586 = vector.load %arg15[%c10_963, %c0_964] : memref<50x128xf32, #tpu.memory_space<vmem>>, vector<3x128xf32>
    %c3_965 = arith.constant 3 : index
    %c384_966 = arith.constant 384 : index
    %587 = vector.load %arg16[%c3_965, %c384_966] : memref<18x1152xf32, #tpu.memory_space<vmem>>, vector<3x128xf32>
    tpu.vector_store %arg16[%c3_965, %c384_966], %586 {strides = array<i32>} : memref<18x1152xf32, #tpu.memory_space<vmem>>, vector<3x128xf32>,
    %c15_967 = arith.constant 15 : index
    %c0_968 = arith.constant 0 : index
    %588 = vector.load %arg15[%c15_967, %c0_968] : memref<50x128xf32, #tpu.memory_space<vmem>>, vector<3x128xf32>
    %c6_969 = arith.constant 6 : index
    %c384_970 = arith.constant 384 : index
    %589 = vector.load %arg16[%c6_969, %c384_970] : memref<18x1152xf32, #tpu.memory_space<vmem>>, vector<3x128xf32>
    tpu.vector_store %arg16[%c6_969, %c384_970], %588 {strides = array<i32>} : memref<18x1152xf32, #tpu.memory_space<vmem>>, vector<3x128xf32>,
    %c30_971 = arith.constant 30 : index
    %c0_972 = arith.constant 0 : index
    %590 = vector.load %arg15[%c30_971, %c0_972] : memref<50x128xf32, #tpu.memory_space<vmem>>, vector<3x128xf32>
    %c9_973 = arith.constant 9 : index
    %c384_974 = arith.constant 384 : index
    %591 = vector.load %arg16[%c9_973, %c384_974] : memref<18x1152xf32, #tpu.memory_space<vmem>>, vector<3x128xf32>
    tpu.vector_store %arg16[%c9_973, %c384_974], %590 {strides = array<i32>} : memref<18x1152xf32, #tpu.memory_space<vmem>>, vector<3x128xf32>,
    %c35_975 = arith.constant 35 : index
    %c0_976 = arith.constant 0 : index
    %592 = vector.load %arg15[%c35_975, %c0_976] : memref<50x128xf32, #tpu.memory_space<vmem>>, vector<3x128xf32>
    %c12_977 = arith.constant 12 : index
    %c384_978 = arith.constant 384 : index
    %593 = vector.load %arg16[%c12_977, %c384_978] : memref<18x1152xf32, #tpu.memory_space<vmem>>, vector<3x128xf32>
    tpu.vector_store %arg16[%c12_977, %c384_978], %592 {strides = array<i32>} : memref<18x1152xf32, #tpu.memory_space<vmem>>, vector<3x128xf32>,
    %c40_979 = arith.constant 40 : index
    %c0_980 = arith.constant 0 : index
    %594 = vector.load %arg15[%c40_979, %c0_980] : memref<50x128xf32, #tpu.memory_space<vmem>>, vector<3x128xf32>
    %c15_981 = arith.constant 15 : index
    %c384_982 = arith.constant 384 : index
    %595 = vector.load %arg16[%c15_981, %c384_982] : memref<18x1152xf32, #tpu.memory_space<vmem>>, vector<3x128xf32>
    tpu.vector_store %arg16[%c15_981, %c384_982], %594 {strides = array<i32>} : memref<18x1152xf32, #tpu.memory_space<vmem>>, vector<3x128xf32>,
    %c6_983 = arith.constant 6 : index
    %c0_984 = arith.constant 0 : index
    %596 = vector.load %arg15[%c6_983, %c0_984] : memref<50x128xf32, #tpu.memory_space<vmem>>, vector<3x128xf32>
    %c0_985 = arith.constant 0 : index
    %c512_986 = arith.constant 512 : index
    %597 = vector.load %arg16[%c0_985, %c512_986] : memref<18x1152xf32, #tpu.memory_space<vmem>>, vector<3x128xf32>
    tpu.vector_store %arg16[%c0_985, %c512_986], %596 {strides = array<i32>} : memref<18x1152xf32, #tpu.memory_space<vmem>>, vector<3x128xf32>,
    %c11_987 = arith.constant 11 : index
    %c0_988 = arith.constant 0 : index
    %598 = vector.load %arg15[%c11_987, %c0_988] : memref<50x128xf32, #tpu.memory_space<vmem>>, vector<3x128xf32>
    %c3_989 = arith.constant 3 : index
    %c512_990 = arith.constant 512 : index
    %599 = vector.load %arg16[%c3_989, %c512_990] : memref<18x1152xf32, #tpu.memory_space<vmem>>, vector<3x128xf32>
    tpu.vector_store %arg16[%c3_989, %c512_990], %598 {strides = array<i32>} : memref<18x1152xf32, #tpu.memory_space<vmem>>, vector<3x128xf32>,
    %c16_991 = arith.constant 16 : index
    %c0_992 = arith.constant 0 : index
    %600 = vector.load %arg15[%c16_991, %c0_992] : memref<50x128xf32, #tpu.memory_space<vmem>>, vector<3x128xf32>
    %c6_993 = arith.constant 6 : index
    %c512_994 = arith.constant 512 : index
    %601 = vector.load %arg16[%c6_993, %c512_994] : memref<18x1152xf32, #tpu.memory_space<vmem>>, vector<3x128xf32>
    tpu.vector_store %arg16[%c6_993, %c512_994], %600 {strides = array<i32>} : memref<18x1152xf32, #tpu.memory_space<vmem>>, vector<3x128xf32>,
    %c31_995 = arith.constant 31 : index
    %c0_996 = arith.constant 0 : index
    %602 = vector.load %arg15[%c31_995, %c0_996] : memref<50x128xf32, #tpu.memory_space<vmem>>, vector<3x128xf32>
    %c9_997 = arith.constant 9 : index
    %c512_998 = arith.constant 512 : index
    %603 = vector.load %arg16[%c9_997, %c512_998] : memref<18x1152xf32, #tpu.memory_space<vmem>>, vector<3x128xf32>
    tpu.vector_store %arg16[%c9_997, %c512_998], %602 {strides = array<i32>} : memref<18x1152xf32, #tpu.memory_space<vmem>>, vector<3x128xf32>,
    %c36_999 = arith.constant 36 : index
    %c0_1000 = arith.constant 0 : index
    %604 = vector.load %arg15[%c36_999, %c0_1000] : memref<50x128xf32, #tpu.memory_space<vmem>>, vector<3x128xf32>
    %c12_1001 = arith.constant 12 : index
    %c512_1002 = arith.constant 512 : index
    %605 = vector.load %arg16[%c12_1001, %c512_1002] : memref<18x1152xf32, #tpu.memory_space<vmem>>, vector<3x128xf32>
    tpu.vector_store %arg16[%c12_1001, %c512_1002], %604 {strides = array<i32>} : memref<18x1152xf32, #tpu.memory_space<vmem>>, vector<3x128xf32>,
    %c41_1003 = arith.constant 41 : index
    %c0_1004 = arith.constant 0 : index
    %606 = vector.load %arg15[%c41_1003, %c0_1004] : memref<50x128xf32, #tpu.memory_space<vmem>>, vector<3x128xf32>
    %c15_1005 = arith.constant 15 : index
    %c512_1006 = arith.constant 512 : index
    %607 = vector.load %arg16[%c15_1005, %c512_1006] : memref<18x1152xf32, #tpu.memory_space<vmem>>, vector<3x128xf32>
    tpu.vector_store %arg16[%c15_1005, %c512_1006], %606 {strides = array<i32>} : memref<18x1152xf32, #tpu.memory_space<vmem>>, vector<3x128xf32>,
    %c7_1007 = arith.constant 7 : index
    %c0_1008 = arith.constant 0 : index
    %608 = vector.load %arg15[%c7_1007, %c0_1008] : memref<50x128xf32, #tpu.memory_space<vmem>>, vector<3x128xf32>
    %c0_1009 = arith.constant 0 : index
    %c640_1010 = arith.constant 640 : index
    %609 = vector.load %arg16[%c0_1009, %c640_1010] : memref<18x1152xf32, #tpu.memory_space<vmem>>, vector<3x128xf32>
    tpu.vector_store %arg16[%c0_1009, %c640_1010], %608 {strides = array<i32>} : memref<18x1152xf32, #tpu.memory_space<vmem>>, vector<3x128xf32>,
    %c12_1011 = arith.constant 12 : index
    %c0_1012 = arith.constant 0 : index
    %610 = vector.load %arg15[%c12_1011, %c0_1012] : memref<50x128xf32, #tpu.memory_space<vmem>>, vector<3x128xf32>
    %c3_1013 = arith.constant 3 : index
    %c640_1014 = arith.constant 640 : index
    %611 = vector.load %arg16[%c3_1013, %c640_1014] : memref<18x1152xf32, #tpu.memory_space<vmem>>, vector<3x128xf32>
    tpu.vector_store %arg16[%c3_1013, %c640_1014], %610 {strides = array<i32>} : memref<18x1152xf32, #tpu.memory_space<vmem>>, vector<3x128xf32>,
    %c17_1015 = arith.constant 17 : index
    %c0_1016 = arith.constant 0 : index
    %612 = vector.load %arg15[%c17_1015, %c0_1016] : memref<50x128xf32, #tpu.memory_space<vmem>>, vector<3x128xf32>
    %c6_1017 = arith.constant 6 : index
    %c640_1018 = arith.constant 640 : index
    %613 = vector.load %arg16[%c6_1017, %c640_1018] : memref<18x1152xf32, #tpu.memory_space<vmem>>, vector<3x128xf32>
    tpu.vector_store %arg16[%c6_1017, %c640_1018], %612 {strides = array<i32>} : memref<18x1152xf32, #tpu.memory_space<vmem>>, vector<3x128xf32>,
    %c32_1019 = arith.constant 32 : index
    %c0_1020 = arith.constant 0 : index
    %614 = vector.load %arg15[%c32_1019, %c0_1020] : memref<50x128xf32, #tpu.memory_space<vmem>>, vector<3x128xf32>
    %c9_1021 = arith.constant 9 : index
    %c640_1022 = arith.constant 640 : index
    %615 = vector.load %arg16[%c9_1021, %c640_1022] : memref<18x1152xf32, #tpu.memory_space<vmem>>, vector<3x128xf32>
    tpu.vector_store %arg16[%c9_1021, %c640_1022], %614 {strides = array<i32>} : memref<18x1152xf32, #tpu.memory_space<vmem>>, vector<3x128xf32>,
    %c37_1023 = arith.constant 37 : index
    %c0_1024 = arith.constant 0 : index
    %616 = vector.load %arg15[%c37_1023, %c0_1024] : memref<50x128xf32, #tpu.memory_space<vmem>>, vector<3x128xf32>
    %c12_1025 = arith.constant 12 : index
    %c640_1026 = arith.constant 640 : index
    %617 = vector.load %arg16[%c12_1025, %c640_1026] : memref<18x1152xf32, #tpu.memory_space<vmem>>, vector<3x128xf32>
    tpu.vector_store %arg16[%c12_1025, %c640_1026], %616 {strides = array<i32>} : memref<18x1152xf32, #tpu.memory_space<vmem>>, vector<3x128xf32>,
    %c42_1027 = arith.constant 42 : index
    %c0_1028 = arith.constant 0 : index
    %618 = vector.load %arg15[%c42_1027, %c0_1028] : memref<50x128xf32, #tpu.memory_space<vmem>>, vector<3x128xf32>
    %c15_1029 = arith.constant 15 : index
    %c640_1030 = arith.constant 640 : index
    %619 = vector.load %arg16[%c15_1029, %c640_1030] : memref<18x1152xf32, #tpu.memory_space<vmem>>, vector<3x128xf32>
    tpu.vector_store %arg16[%c15_1029, %c640_1030], %618 {strides = array<i32>} : memref<18x1152xf32, #tpu.memory_space<vmem>>, vector<3x128xf32>,
    %c10_1031 = arith.constant 10 : index
    %c0_1032 = arith.constant 0 : index
    %620 = vector.load %arg15[%c10_1031, %c0_1032] : memref<50x128xf32, #tpu.memory_space<vmem>>, vector<3x128xf32>
    %c0_1033 = arith.constant 0 : index
    %c768_1034 = arith.constant 768 : index
    %621 = vector.load %arg16[%c0_1033, %c768_1034] : memref<18x1152xf32, #tpu.memory_space<vmem>>, vector<3x128xf32>
    tpu.vector_store %arg16[%c0_1033, %c768_1034], %620 {strides = array<i32>} : memref<18x1152xf32, #tpu.memory_space<vmem>>, vector<3x128xf32>,
    %c15_1035 = arith.constant 15 : index
    %c0_1036 = arith.constant 0 : index
    %622 = vector.load %arg15[%c15_1035, %c0_1036] : memref<50x128xf32, #tpu.memory_space<vmem>>, vector<3x128xf32>
    %c3_1037 = arith.constant 3 : index
    %c768_1038 = arith.constant 768 : index
    %623 = vector.load %arg16[%c3_1037, %c768_1038] : memref<18x1152xf32, #tpu.memory_space<vmem>>, vector<3x128xf32>
    tpu.vector_store %arg16[%c3_1037, %c768_1038], %622 {strides = array<i32>} : memref<18x1152xf32, #tpu.memory_space<vmem>>, vector<3x128xf32>,
    %c20_1039 = arith.constant 20 : index
    %c0_1040 = arith.constant 0 : index
    %624 = vector.load %arg15[%c20_1039, %c0_1040] : memref<50x128xf32, #tpu.memory_space<vmem>>, vector<3x128xf32>
    %c6_1041 = arith.constant 6 : index
    %c768_1042 = arith.constant 768 : index
    %625 = vector.load %arg16[%c6_1041, %c768_1042] : memref<18x1152xf32, #tpu.memory_space<vmem>>, vector<3x128xf32>
    tpu.vector_store %arg16[%c6_1041, %c768_1042], %624 {strides = array<i32>} : memref<18x1152xf32, #tpu.memory_space<vmem>>, vector<3x128xf32>,
    %c35_1043 = arith.constant 35 : index
    %c0_1044 = arith.constant 0 : index
    %626 = vector.load %arg15[%c35_1043, %c0_1044] : memref<50x128xf32, #tpu.memory_space<vmem>>, vector<3x128xf32>
    %c9_1045 = arith.constant 9 : index
    %c768_1046 = arith.constant 768 : index
    %627 = vector.load %arg16[%c9_1045, %c768_1046] : memref<18x1152xf32, #tpu.memory_space<vmem>>, vector<3x128xf32>
    tpu.vector_store %arg16[%c9_1045, %c768_1046], %626 {strides = array<i32>} : memref<18x1152xf32, #tpu.memory_space<vmem>>, vector<3x128xf32>,
    %c40_1047 = arith.constant 40 : index
    %c0_1048 = arith.constant 0 : index
    %628 = vector.load %arg15[%c40_1047, %c0_1048] : memref<50x128xf32, #tpu.memory_space<vmem>>, vector<3x128xf32>
    %c12_1049 = arith.constant 12 : index
    %c768_1050 = arith.constant 768 : index
    %629 = vector.load %arg16[%c12_1049, %c768_1050] : memref<18x1152xf32, #tpu.memory_space<vmem>>, vector<3x128xf32>
    tpu.vector_store %arg16[%c12_1049, %c768_1050], %628 {strides = array<i32>} : memref<18x1152xf32, #tpu.memory_space<vmem>>, vector<3x128xf32>,
    %c45_1051 = arith.constant 45 : index
    %c0_1052 = arith.constant 0 : index
    %630 = vector.load %arg15[%c45_1051, %c0_1052] : memref<50x128xf32, #tpu.memory_space<vmem>>, vector<3x128xf32>
    %c15_1053 = arith.constant 15 : index
    %c768_1054 = arith.constant 768 : index
    %631 = vector.load %arg16[%c15_1053, %c768_1054] : memref<18x1152xf32, #tpu.memory_space<vmem>>, vector<3x128xf32>
    tpu.vector_store %arg16[%c15_1053, %c768_1054], %630 {strides = array<i32>} : memref<18x1152xf32, #tpu.memory_space<vmem>>, vector<3x128xf32>,
    %c11_1055 = arith.constant 11 : index
    %c0_1056 = arith.constant 0 : index
    %632 = vector.load %arg15[%c11_1055, %c0_1056] : memref<50x128xf32, #tpu.memory_space<vmem>>, vector<3x128xf32>
    %c0_1057 = arith.constant 0 : index
    %c896_1058 = arith.constant 896 : index
    %633 = vector.load %arg16[%c0_1057, %c896_1058] : memref<18x1152xf32, #tpu.memory_space<vmem>>, vector<3x128xf32>
    tpu.vector_store %arg16[%c0_1057, %c896_1058], %632 {strides = array<i32>} : memref<18x1152xf32, #tpu.memory_space<vmem>>, vector<3x128xf32>,
    %c16_1059 = arith.constant 16 : index
    %c0_1060 = arith.constant 0 : index
    %634 = vector.load %arg15[%c16_1059, %c0_1060] : memref<50x128xf32, #tpu.memory_space<vmem>>, vector<3x128xf32>
    %c3_1061 = arith.constant 3 : index
    %c896_1062 = arith.constant 896 : index
    %635 = vector.load %arg16[%c3_1061, %c896_1062] : memref<18x1152xf32, #tpu.memory_space<vmem>>, vector<3x128xf32>
    tpu.vector_store %arg16[%c3_1061, %c896_1062], %634 {strides = array<i32>} : memref<18x1152xf32, #tpu.memory_space<vmem>>, vector<3x128xf32>,
    %c21_1063 = arith.constant 21 : index
    %c0_1064 = arith.constant 0 : index
    %636 = vector.load %arg15[%c21_1063, %c0_1064] : memref<50x128xf32, #tpu.memory_space<vmem>>, vector<3x128xf32>
    %c6_1065 = arith.constant 6 : index
    %c896_1066 = arith.constant 896 : index
    %637 = vector.load %arg16[%c6_1065, %c896_1066] : memref<18x1152xf32, #tpu.memory_space<vmem>>, vector<3x128xf32>
    tpu.vector_store %arg16[%c6_1065, %c896_1066], %636 {strides = array<i32>} : memref<18x1152xf32, #tpu.memory_space<vmem>>, vector<3x128xf32>,
    %c36_1067 = arith.constant 36 : index
    %c0_1068 = arith.constant 0 : index
    %638 = vector.load %arg15[%c36_1067, %c0_1068] : memref<50x128xf32, #tpu.memory_space<vmem>>, vector<3x128xf32>
    %c9_1069 = arith.constant 9 : index
    %c896_1070 = arith.constant 896 : index
    %639 = vector.load %arg16[%c9_1069, %c896_1070] : memref<18x1152xf32, #tpu.memory_space<vmem>>, vector<3x128xf32>
    tpu.vector_store %arg16[%c9_1069, %c896_1070], %638 {strides = array<i32>} : memref<18x1152xf32, #tpu.memory_space<vmem>>, vector<3x128xf32>,
    %c41_1071 = arith.constant 41 : index
    %c0_1072 = arith.constant 0 : index
    %640 = vector.load %arg15[%c41_1071, %c0_1072] : memref<50x128xf32, #tpu.memory_space<vmem>>, vector<3x128xf32>
    %c12_1073 = arith.constant 12 : index
    %c896_1074 = arith.constant 896 : index
    %641 = vector.load %arg16[%c12_1073, %c896_1074] : memref<18x1152xf32, #tpu.memory_space<vmem>>, vector<3x128xf32>
    tpu.vector_store %arg16[%c12_1073, %c896_1074], %640 {strides = array<i32>} : memref<18x1152xf32, #tpu.memory_space<vmem>>, vector<3x128xf32>,
    %c46_1075 = arith.constant 46 : index
    %c0_1076 = arith.constant 0 : index
    %642 = vector.load %arg15[%c46_1075, %c0_1076] : memref<50x128xf32, #tpu.memory_space<vmem>>, vector<3x128xf32>
    %c15_1077 = arith.constant 15 : index
    %c896_1078 = arith.constant 896 : index
    %643 = vector.load %arg16[%c15_1077, %c896_1078] : memref<18x1152xf32, #tpu.memory_space<vmem>>, vector<3x128xf32>
    tpu.vector_store %arg16[%c15_1077, %c896_1078], %642 {strides = array<i32>} : memref<18x1152xf32, #tpu.memory_space<vmem>>, vector<3x128xf32>,
    %c12_1079 = arith.constant 12 : index
    %c0_1080 = arith.constant 0 : index
    %644 = vector.load %arg15[%c12_1079, %c0_1080] : memref<50x128xf32, #tpu.memory_space<vmem>>, vector<3x128xf32>
    %c0_1081 = arith.constant 0 : index
    %c1024_1082 = arith.constant 1024 : index
    %645 = vector.load %arg16[%c0_1081, %c1024_1082] : memref<18x1152xf32, #tpu.memory_space<vmem>>, vector<3x128xf32>
    tpu.vector_store %arg16[%c0_1081, %c1024_1082], %644 {strides = array<i32>} : memref<18x1152xf32, #tpu.memory_space<vmem>>, vector<3x128xf32>,
    %c17_1083 = arith.constant 17 : index
    %c0_1084 = arith.constant 0 : index
    %646 = vector.load %arg15[%c17_1083, %c0_1084] : memref<50x128xf32, #tpu.memory_space<vmem>>, vector<3x128xf32>
    %c3_1085 = arith.constant 3 : index
    %c1024_1086 = arith.constant 1024 : index
    %647 = vector.load %arg16[%c3_1085, %c1024_1086] : memref<18x1152xf32, #tpu.memory_space<vmem>>, vector<3x128xf32>
    tpu.vector_store %arg16[%c3_1085, %c1024_1086], %646 {strides = array<i32>} : memref<18x1152xf32, #tpu.memory_space<vmem>>, vector<3x128xf32>,
    %c22_1087 = arith.constant 22 : index
    %c0_1088 = arith.constant 0 : index
    %648 = vector.load %arg15[%c22_1087, %c0_1088] : memref<50x128xf32, #tpu.memory_space<vmem>>, vector<3x128xf32>
    %c6_1089 = arith.constant 6 : index
    %c1024_1090 = arith.constant 1024 : index
    %649 = vector.load %arg16[%c6_1089, %c1024_1090] : memref<18x1152xf32, #tpu.memory_space<vmem>>, vector<3x128xf32>
    tpu.vector_store %arg16[%c6_1089, %c1024_1090], %648 {strides = array<i32>} : memref<18x1152xf32, #tpu.memory_space<vmem>>, vector<3x128xf32>,
    %c37_1091 = arith.constant 37 : index
    %c0_1092 = arith.constant 0 : index
    %650 = vector.load %arg15[%c37_1091, %c0_1092] : memref<50x128xf32, #tpu.memory_space<vmem>>, vector<3x128xf32>
    %c9_1093 = arith.constant 9 : index
    %c1024_1094 = arith.constant 1024 : index
    %651 = vector.load %arg16[%c9_1093, %c1024_1094] : memref<18x1152xf32, #tpu.memory_space<vmem>>, vector<3x128xf32>
    tpu.vector_store %arg16[%c9_1093, %c1024_1094], %650 {strides = array<i32>} : memref<18x1152xf32, #tpu.memory_space<vmem>>, vector<3x128xf32>,
    %c42_1095 = arith.constant 42 : index
    %c0_1096 = arith.constant 0 : index
    %652 = vector.load %arg15[%c42_1095, %c0_1096] : memref<50x128xf32, #tpu.memory_space<vmem>>, vector<3x128xf32>
    %c12_1097 = arith.constant 12 : index
    %c1024_1098 = arith.constant 1024 : index
    %653 = vector.load %arg16[%c12_1097, %c1024_1098] : memref<18x1152xf32, #tpu.memory_space<vmem>>, vector<3x128xf32>
    tpu.vector_store %arg16[%c12_1097, %c1024_1098], %652 {strides = array<i32>} : memref<18x1152xf32, #tpu.memory_space<vmem>>, vector<3x128xf32>,
    %c47_1099 = arith.constant 47 : index
    %c0_1100 = arith.constant 0 : index
    %654 = vector.load %arg15[%c47_1099, %c0_1100] : memref<50x128xf32, #tpu.memory_space<vmem>>, vector<3x128xf32>
    %c15_1101 = arith.constant 15 : index
    %c1024_1102 = arith.constant 1024 : index
    %655 = vector.load %arg16[%c15_1101, %c1024_1102] : memref<18x1152xf32, #tpu.memory_space<vmem>>, vector<3x128xf32>
    tpu.vector_store %arg16[%c15_1101, %c1024_1102], %654 {strides = array<i32>} : memref<18x1152xf32, #tpu.memory_space<vmem>>, vector<3x128xf32>,
    %c0_1103 = arith.constant 0 : index
    %c0_1104 = arith.constant 0 : index
    %656 = vector.load %arg16[%c0_1103, %c0_1104] : memref<18x1152xf32, #tpu.memory_space<vmem>>, vector<18x1152xf32>
    %c0_1105 = arith.constant 0 : index
    %c0_1106 = arith.constant 0 : index
    %657 = vector.load %arg8[%c0_1105, %c0_1106] : memref<1152x128xf32, #tpu.memory_space<vmem>>, vector<1152x128xf32>
    %cst_1107 = arith.constant dense<0.000000e+00> : vector<18x128xf32>
    %658 = tpu.matmul %656, %657, %cst_1107 {dimension_numbers = #tpu.dot_dimension_numbers<[1], [0], [0], [1], [0, 0, 1, 1], [], []>} : vector<18x1152xf32>, vector<1152x128xf32>, vector<18x128xf32> -> vector<18x128xf32>
    %c0_1108 = arith.constant 0 : index
    %c0_1109 = arith.constant 0 : index
    %659 = vector.load %arg9[%c0_1108, %c0_1109] : memref<1x128xf32, #tpu.memory_space<vmem>>, vector<1x128xf32>
    %660 = vector.broadcast %659 : vector<1x128xf32> to vector<18x128xf32>
    %661 = arith.addf %658, %660 : vector<18x128xf32>
    %662 = arith.addf %661, %532 : vector<18x128xf32>
    %cst_1110 = arith.constant 0.000000e+00 : f32
    %663 = vector.broadcast %cst_1110 : f32 to vector<18x128xf32>
    %664 = arith.maximumf %662, %663 : vector<18x128xf32>
    %c0_1111 = arith.constant 0 : index
    %c0_1112 = arith.constant 0 : index
    %c0_1113 = arith.constant 0 : index
    %665 = vector.load %arg10[%c0_1111, %c0_1112, %c0_1113] : memref<1x18x128xf32, #tpu.memory_space<vmem>>, vector<1x18x128xf32>
    %666 = vector.shape_cast %665 : vector<1x18x128xf32> to vector<18x128xf32>
    %667 = vector.shape_cast %664 : vector<18x128xf32> to vector<1x18x128xf32>
    tpu.vector_store %arg10[%c0_1111, %c0_1112, %c0_1113], %667 {strides = array<i32>} : memref<1x18x128xf32, #tpu.memory_space<vmem>>, vector<1x18x128xf32>,
    return
  }
  func.func @transform_0(%arg0: i32) -> (i32, i32, i32) {
    %c0_i32 = arith.constant 0 : i32
    %c0_i32_0 = arith.constant 0 : i32
    %c0_i32_1 = arith.constant 0 : i32
    return %arg0, %c0_i32, %c0_i32_0 : i32, i32, i32
  }
  func.func @transform_1(%arg0: i32) -> (i32, i32) {
    %c0_i32 = arith.constant 0 : i32
    %c0_i32_0 = arith.constant 0 : i32
    %c0_i32_1 = arith.constant 0 : i32
    return %c0_i32, %c0_i32_0 : i32, i32
  }
  func.func @transform_2(%arg0: i32) -> (i32, i32) {
    %c0_i32 = arith.constant 0 : i32
    %c0_i32_0 = arith.constant 0 : i32
    %c0_i32_1 = arith.constant 0 : i32
    return %c0_i32, %c0_i32_0 : i32, i32
  }
  func.func @transform_3(%arg0: i32) -> (i32, i32) {
    %c0_i32 = arith.constant 0 : i32
    %c0_i32_0 = arith.constant 0 : i32
    %c0_i32_1 = arith.constant 0 : i32
    return %c0_i32, %c0_i32_0 : i32, i32
  }
  func.func @transform_4(%arg0: i32) -> (i32, i32) {
    %c0_i32 = arith.constant 0 : i32
    %c0_i32_0 = arith.constant 0 : i32
    %c0_i32_1 = arith.constant 0 : i32
    return %c0_i32, %c0_i32_0 : i32, i32
  }
  func.func @transform_5(%arg0: i32) -> (i32, i32) {
    %c0_i32 = arith.constant 0 : i32
    %c0_i32_0 = arith.constant 0 : i32
    %c0_i32_1 = arith.constant 0 : i32
    return %c0_i32, %c0_i32_0 : i32, i32
  }
  func.func @transform_6(%arg0: i32) -> (i32, i32) {
    %c0_i32 = arith.constant 0 : i32
    %c0_i32_0 = arith.constant 0 : i32
    %c0_i32_1 = arith.constant 0 : i32
    return %c0_i32, %c0_i32_0 : i32, i32
  }
  func.func @transform_7(%arg0: i32) -> (i32, i32) {
    %c0_i32 = arith.constant 0 : i32
    %c0_i32_0 = arith.constant 0 : i32
    %c0_i32_1 = arith.constant 0 : i32
    return %c0_i32, %c0_i32_0 : i32, i32
  }
  func.func @transform_8(%arg0: i32) -> (i32, i32) {
    %c0_i32 = arith.constant 0 : i32
    %c0_i32_0 = arith.constant 0 : i32
    %c0_i32_1 = arith.constant 0 : i32
    return %c0_i32, %c0_i32_0 : i32, i32
  }
  func.func @transform_9(%arg0: i32) -> (i32, i32, i32) {
    %c0_i32 = arith.constant 0 : i32
    %c0_i32_0 = arith.constant 0 : i32
    %c0_i32_1 = arith.constant 0 : i32
    return %arg0, %c0_i32, %c0_i32_0 : i32, i32, i32
  }
}

</mosaic_0001>

<bundles_post_ra>
// kernel: quake_block_forward.1
= control target key start
LH: loop header
LB: loop body
LE: loop exit
PB: predicated region body
PF: predicated region fallthrough
CT: control target
= control target key end

     0   :  { %s4427_s13 = smov 64   ;;  %vm34_vm0 = vcmask 523264   ;;  %vm71_vm1 = vcmask 1048064   ;;  %vm587_vm2 = vcmask 261120   ;;  %vm605_vm3 = vcmask 256000   ;;  %s6252_s0 = inlined_call_operand.vmem [shape: f32[1,162,64], index: 0, kind: input, shape index: {}]   ;;  %s6253_s1 = inlined_call_operand.vmem [shape: bf16[256,32], index: 1, kind: input, shape index: {}]   ;;  %s6254_s2 = inlined_call_operand.vmem [shape: f32[1,32], index: 2, kind: input, shape index: {}]   ;;  %s6255_s3 = inlined_call_operand.vmem [shape: bf16[512,128], index: 3, kind: input, shape index: {}]   ;;  %s6256_s5 = inlined_call_operand.vmem [shape: f32[1152,128], index: 5, kind: input, shape index: {}]   ;;  %s6257_s4 = inlined_call_operand.vmem [shape: f32[1,128], index: 4, kind: input, shape index: {}]   ;;  %s6258_s7 = inlined_call_operand.vmem [shape: f32[1152,128], index: 7, kind: input, shape index: {}]   ;;  %s6259_s6 = inlined_call_operand.vmem [shape: f32[1,128], index: 6, kind: input, shape index: {}]   ;;  %s6260_s8 = inlined_call_operand.vmem [shape: f32[1,128], index: 8, kind: input, shape index: {}]   ;;  %s6261_s9 = inlined_call_operand.vmem [shape: f32[1,18,128], index: 9, kind: output, shape index: {}]  }
   0x1   :  { %v195_v0 = vld [vmem:[%s6252_s0 + $0xa] sm:$0xff]  ;;  %v66_v1 = vld [vmem:[%s6252_s0 + $0x1] sm:$0xff]  ;;  %v201_v2 = vld [vmem:[%s6252_s0 + $0x13] sm:$0xff]  ;;  %vm612_vm4 = vcmask 259075   ;;  %vm619_vm5 = vcmask 261126   ;;  %vm621_vm6 = vcmask 253952  }
   0x2   :  { %197 = vrot.lane.b32.xlu0 %v195_v0, %s4427_s13  ;;  %68 = vrot.lane.b32.xlu1 %v66_v1, %s4427_s13  ;;  %v207_v3 = vld [vmem:[%s6252_s0 + $0x1c] sm:$0xff]  ;;  %v213_v4 = vld [vmem:[%s6252_s0 + $0x25] sm:$0xff]  ;;  %vm628_vm7 = vcmask 257025   ;;  %vm635_vm8 = vcmask 260100   ;;  %vm642_vm9 = vcmask 261127   ;;  %vm644_vm10 = vcmask 254976  }
   0x3   :  { %v4377_v5 = vld [vmem:[%s6253_s1 + $0x40] sm:$0xff]   ;;  %v4379_v7 = vld [vmem:[%s6253_s1 + $0x48] sm:$0xff]   ;;  %v4381_v9 = vld [vmem:[%s6253_s1 + $0x50] sm:$0xff]   ;;  %vm652_vm11 = vcmask 518400   ;;  %vm709_vm12 = vcmask 780800   ;;  %vm766_vm13 = vcmask 1043200  }
   0x4   :  { %v4378_v6 = vld [vmem:[%s6253_s1] sm:$0xff]   ;;  %3499 = vmatprep.subr.bf16.mxu0 %v4377_v5  ;;  %v4380_v8 = vld [vmem:[%s6253_s1 + $0x8] sm:$0xff]   ;;  %v225_v11 = vld [vmem:[%s6252_s0 + $0x37] sm:$0xff]  ;;  %vm661_vm14 = vcmask 521475   ;;  %vm718_vm15 = vcmask 783875  }
   0x5   :  { %3500 = vmatpush3.bf16.msra.mxu0 %v4378_v6  ;;  %v219_v10 = vld [vmem:[%s6252_s0 + $0x2e] sm:$0xff]  ;;  %v4383_v13 = vld [vmem:[%s6253_s1 + $0x58] sm:$0xff]   ;;  %v33_v15 = vld [vmem:[%s6252_s0] sm:$0xff] }
   0x6   :  { %203 = vrot.lane.b32.xlu0 %v201_v2, %s4427_s13  ;;  %75 = vrot.lane.b32.xlu1 %v195_v0, %s4427_s13  ;;  %v4382_v12 = vld [vmem:[%s6253_s1 + $0x10] sm:$0xff]   ;;  %35 = vst.msk [vmem:[#allocation2] sm:$0xff] %vm34_vm0, %v33_v15  ;;  %v4384_v16 = vld [vmem:[%s6253_s1 + $0x18] sm:$0xff]  }
   0x7   :  { %3501 = vmatprep.subr.bf16.mxu0 %v4379_v7  ;;  %v163_v14 = vld [vmem:[%s6252_s0 + $0x9] sm:$0xff]  ;;  %v165_v17 = vld [vmem:[%s6252_s0 + $0x12] sm:$0xff]  ;;  %v4385_v18 = vld [vmem:[%s6253_s1 + $0x60] sm:$0xff]  }
   0x8   :  { %164 = vst.msk [vmem:[#allocation2 + $0x8] sm:$0xff] %vm34_vm0, %v163_v14  ;;  %37 = vst.msk [vmem:[#allocation2 + $0x10] sm:$0xff] %vm34_vm0, %v163_v14  ;;  %v231_v19 = vld [vmem:[%s6252_s0 + $0x40] sm:$0xff]  ;;  %v237_v20 = vld [vmem:[%s6252_s0 + $0x49] sm:$0xff] }
   0x9   :  { %3502 = vmatpush3.bf16.msra.mxu0 %v4380_v8  ;;  %166 = vst.msk [vmem:[#allocation2 + $0x18] sm:$0xff] %vm34_vm0, %v165_v17  ;;  %39 = vst.msk [vmem:[#allocation2 + $0x20] sm:$0xff] %vm34_vm0, %v165_v17  ;;  %v4386_v21 = vld [vmem:[%s6253_s1 + $0x20] sm:$0xff]   ;;  %v4387_v24 = vld [vmem:[%s6253_s1 + $0x68] sm:$0xff]  }
   0xa   :  { %209 = vrot.lane.b32.xlu0 %v207_v3, %s4427_s13  ;;  %215 = vrot.lane.b32.xlu1 %v213_v4, %s4427_s13  ;;  %v167_v22 = vld [vmem:[%s6252_s0 + $0x1b] sm:$0xff]  ;;  %v169_v23 = vld [vmem:[%s6252_s0 + $0x24] sm:$0xff] }
   0xb   :  { %3503 = vmatprep.subr.bf16.mxu0 %v4381_v9  ;;  %168 = vst.msk [vmem:[#allocation2 + $0x28] sm:$0xff] %vm34_vm0, %v167_v22  ;;  %170 = vst.msk [vmem:[#allocation2 + $0x38] sm:$0xff] %vm34_vm0, %v169_v23  ;;  %v4388_v25 = vld [vmem:[%s6253_s1 + $0x28] sm:$0xff]   ;;  %v4389_v26 = vld [vmem:[%s6253_s1 + $0x70] sm:$0xff]  }
   0xc   :  { %41 = vst.msk [vmem:[#allocation2 + $0x30] sm:$0xff] %vm34_vm0, %v167_v22  ;;  %43 = vst.msk [vmem:[#allocation2 + $0x40] sm:$0xff] %vm34_vm0, %v169_v23  ;;  %v171_v27 = vld [vmem:[%s6252_s0 + $0x2d] sm:$0xff]  ;;  %v173_v28 = vld [vmem:[%s6252_s0 + $0x36] sm:$0xff] }
   0xd   :  { %3504 = vmatpush3.bf16.msra.mxu0 %v4382_v12  ;;  %v175_v29 = vld [vmem:[%s6252_s0 + $0x3f] sm:$0xff]  ;;  %172 = vst.msk [vmem:[#allocation2 + $0x48] sm:$0xff] %vm34_vm0, %v171_v27  ;;  %174 = vst.msk [vmem:[#allocation2 + $0x58] sm:$0xff] %vm34_vm0, %v173_v28  ;;  %v177_v30 = vld [vmem:[%s6252_s0 + $0x48] sm:$0xff] }
   0xe   :  { %81 = vrot.lane.b32.xlu0 %v201_v2, %s4427_s13  ;;  %87 = vrot.lane.b32.xlu1 %v207_v3, %s4427_s13  ;;  %45 = vst.msk [vmem:[#allocation2 + $0x50] sm:$0xff] %vm34_vm0, %v171_v27  ;;  %176 = vst.msk [vmem:[#allocation2 + $0x68] sm:$0xff] %vm34_vm0, %v175_v29  ;;  %v179_v31 = vld [vmem:[%s6252_s0 + $0x5a] sm:$0xff]  ;;  %v181_v32 = vld [vmem:[%s6252_s0 + $0x63] sm:$0xff] }
   0xf   :  { %3505 = vmatprep.subr.bf16.mxu0 %v4383_v13  ;;  %47 = vst.msk [vmem:[#allocation2 + $0x60] sm:$0xff] %vm34_vm0, %v173_v28  ;;  %49 = vst.msk [vmem:[#allocation2 + $0x70] sm:$0xff] %vm34_vm0, %v175_v29  ;;  %v50_v33 = vld [vmem:[%s6252_s0 + $0x51] sm:$0xff]  ;;  %v243_v34 = vld [vmem:[%s6252_s0 + $0x5b] sm:$0xff] }
  0x10   :  { %178 = vst.msk [vmem:[#allocation2 + $0x78] sm:$0xff] %vm34_vm0, %v177_v30  ;;  %180 = vst.msk [vmem:[#allocation2 + $0x88] sm:$0xff] %vm34_vm0, %v179_v31  ;;  %v249_v35 = vld [vmem:[%s6252_s0 + $0x64] sm:$0xff]  ;;  %v4390_v36 = vld [vmem:[%s6253_s1 + $0x30] sm:$0xff]  }
  0x11   :  { %3506 = vmatpush3.bf16.msra.mxu0 %v4384_v16  ;;  %182 = vst.msk [vmem:[#allocation2 + $0x98] sm:$0xff] %vm34_vm0, %v181_v32  ;;  %53 = vst.msk [vmem:[#allocation2 + $0x90] sm:$0xff] %vm34_vm0, %v179_v31  ;;  %v4391_v37 = vld [vmem:[%s6253_s1 + $0x78] sm:$0xff]   ;;  %v183_v40 = vld [vmem:[%s6252_s0 + $0x6c] sm:$0xff] }
  0x12   :  { %221 = vrot.lane.b32.xlu0 %v219_v10, %s4427_s13  ;;  %227 = vrot.lane.b32.xlu1 %v225_v11, %s4427_s13  ;;  %55 = vst.msk [vmem:[#allocation2 + $0xa0] sm:$0xff] %vm34_vm0, %v181_v32  ;;  %51 = vst.msk [vmem:[#allocation2 + $0x80] sm:$0xff] %vm34_vm0, %v50_v33  ;;  %v115_v38 = vld [vmem:[%s6252_s0 + $0x52] sm:$0xff]  ;;  %v187_v44 = vld [vmem:[%s6252_s0 + $0x7e] sm:$0xff] }
  0x13   :  { %3507 = vmatprep.subr.bf16.mxu0 %v4385_v18  ;;  %v4392_v39 = vld [vmem:[%s6253_s1 + $0x38] sm:$0xff]   ;;  %184 = vst.msk [vmem:[#allocation2 + $0xa8] sm:$0xff] %vm34_vm0, %v183_v40  ;;  %57 = vst.msk [vmem:[#allocation2 + $0xb0] sm:$0xff] %vm34_vm0, %v183_v40  ;;  %v255_v42 = vld [vmem:[%s6252_s0 + $0x6d] sm:$0xff]  ;;  %s4429_s1 = smov 96  }
  0x14   :  { %v185_v41 = vld [vmem:[%s6252_s0 + $0x75] sm:$0xff]  ;;  %v189_v45 = vld [vmem:[%s6252_s0 + $0x87] sm:$0xff]  ;;  %188 = vst.msk [vmem:[#allocation2 + $0xc8] sm:$0xff] %vm34_vm0, %v187_v44  ;;  %61 = vst.msk [vmem:[#allocation2 + $0xd0] sm:$0xff] %vm34_vm0, %v187_v44 }
  0x15   :  { %3508 = vmatpush3.bf16.msra.mxu0 %v4386_v21  ;;  %186 = vst.msk [vmem:[#allocation2 + $0xb8] sm:$0xff] %vm34_vm0, %v185_v41  ;;  %59 = vst.msk [vmem:[#allocation2 + $0xc0] sm:$0xff] %vm34_vm0, %v185_v41  ;;  %v261_v43 = vld [vmem:[%s6252_s0 + $0x76] sm:$0xff]  ;;  %v267_v46 = vld [vmem:[%s6252_s0 + $0x7f] sm:$0xff] }
  0x16   :  { %93 = vrot.lane.b32.xlu0 %v213_v4, %s4427_s13  ;;  %99 = vrot.lane.b32.xlu1 %v219_v10, %s4427_s13  ;;  %190 = vst.msk [vmem:[#allocation2 + $0xd8] sm:$0xff] %vm34_vm0, %v189_v45  ;;  %63 = vst.msk [vmem:[#allocation2 + $0xe0] sm:$0xff] %vm34_vm0, %v189_v45  ;;  %v273_v47 = vld [vmem:[%s6252_s0 + $0x88] sm:$0xff]  ;;  %v191_v48 = vld [vmem:[%s6252_s0 + $0x90] sm:$0xff] }
  0x17   :  { %3509 = vmatprep.subr.bf16.mxu0 %v4387_v24  ;;  %v193_v49 = vld [vmem:[%s6252_s0 + $0x99] sm:$0xff]  ;;  %192 = vst.msk [vmem:[#allocation2 + $0xe8] sm:$0xff] %vm34_vm0, %v191_v48  ;;  %65 = vst.msk [vmem:[#allocation2 + $0xf0] sm:$0xff] %vm34_vm0, %v191_v48  ;;  %v279_v50 = vld [vmem:[%s6252_s0 + $0x91] sm:$0xff] }
  0x18   :  { %194 = vst.msk [vmem:[#allocation2 + $0xf8] sm:$0xff] %vm34_vm0, %v193_v49  ;;  %v285_v51 = vld [vmem:[%s6252_s0 + $0x9a] sm:$0xff]  ;;  %vm775_vm0 = vcmask 1046275  }
  0x19   :  { %3510 = vmatpush3.bf16.msra.mxu0 %v4388_v25 }
  0x1a   :  { %233 = vrot.lane.b32.xlu0 %v231_v19, %s4427_s13  ;;  %239 = vrot.lane.b32.xlu1 %v237_v20, %s4427_s13 }
  0x1b   :  { %3511 = vmatprep.subr.bf16.mxu0 %v4389_v26 }
  0x1d   :  { %3512 = vmatpush3.bf16.msra.mxu0 %v4390_v36 }
  0x1e   :  { %105 = vrot.lane.b32.xlu0 %v225_v11, %s4427_s13  ;;  %111 = vrot.lane.b32.xlu1 %v231_v19, %s4427_s13 }
  0x1f   :  { %3513 = vmatprep.subr.bf16.mxu0 %v4391_v37 }
  0x21   :  { %3514 = vmatpush3.bf16.msra.mxu0 %v4392_v39 }
  0x22   :  { %245 = vrot.lane.b32.xlu0 %v243_v34, %s4427_s13  ;;  %251 = vrot.lane.b32.xlu1 %v249_v35, %s4427_s13 }
  0x26   :  { %117 = vrot.lane.b32.xlu0 %v115_v38, %s4427_s13  ;;  %123 = vrot.lane.b32.xlu1 %v243_v34, %s4427_s13 }
  0x2a   :  { %257 = vrot.lane.b32.xlu0 %v255_v42, %s4427_s13  ;;  %263 = vrot.lane.b32.xlu1 %v261_v43, %s4427_s13 }
  0x2e   :  { %129 = vrot.lane.b32.xlu0 %v249_v35, %s4427_s13  ;;  %135 = vrot.lane.b32.xlu1 %v255_v42, %s4427_s13 }
  0x32   :  { %269 = vrot.lane.b32.xlu0 %v267_v46, %s4427_s13  ;;  %275 = vrot.lane.b32.xlu1 %v273_v47, %s4427_s13 }
  0x36   :  { %141 = vrot.lane.b32.xlu0 %v261_v43, %s4427_s13  ;;  %147 = vrot.lane.b32.xlu1 %v267_v46, %s4427_s13 }
  0x3a   :  { %281 = vrot.lane.b32.xlu0 %v279_v50, %s4427_s13  ;;  %287 = vrot.lane.b32.xlu1 %v285_v51, %s4427_s13 }
  0x3e   :  { %153 = vrot.lane.b32.xlu0 %v273_v47, %s4427_s13  ;;  %159 = vrot.lane.b32.xlu1 %v279_v50, %s4427_s13 }
  0x74   :  { %v198_v52 = vpop.permute.xlu0 %197  ;;  %v69_v53 = vpop.permute.xlu1 %68 }
  0x75   :  { %200 = vst.msk [vmem:[#allocation2 + $0x8] sm:$0xff] %vm71_vm1, %v198_v52  ;;  %72 = vst.msk [vmem:[#allocation2] sm:$0xff] %vm71_vm1, %v69_v53 }
  0x78   :  { %v204_v54 = vpop.permute.xlu0 %203  ;;  %v76_v55 = vpop.permute.xlu1 %75 }
  0x79   :  { %206 = vst.msk [vmem:[#allocation2 + $0x18] sm:$0xff] %vm71_vm1, %v204_v54  ;;  %78 = vst.msk [vmem:[#allocation2 + $0x10] sm:$0xff] %vm71_vm1, %v76_v55 }
  0x7c   :  { %v210_v56 = vpop.permute.xlu0 %209  ;;  %v216_v57 = vpop.permute.xlu1 %215  ;;  %v292_v58 = vld [vmem:[#allocation2 + $0x8] sm:$0xff]  ;;  %v291_v62 = vld [vmem:[#allocation2] sm:$0xff] }
  0x7d   :  { %212 = vst.msk [vmem:[#allocation2 + $0x28] sm:$0xff] %vm71_vm1, %v210_v56  ;;  %218 = vst.msk [vmem:[#allocation2 + $0x38] sm:$0xff] %vm71_vm1, %v216_v57 }
  0x80   :  { %v82_v59 = vpop.permute.xlu0 %81  ;;  %v88_v60 = vpop.permute.xlu1 %87  ;;  %v294_v61 = vld [vmem:[#allocation2 + $0x18] sm:$0xff]  ;;  %v293_v63 = vld [vmem:[#allocation2 + $0x10] sm:$0xff] }
  0x81   :  { %84 = vst.msk [vmem:[#allocation2 + $0x20] sm:$0xff] %vm71_vm1, %v82_v59  ;;  %90 = vst.msk [vmem:[#allocation2 + $0x30] sm:$0xff] %vm71_vm1, %v88_v60  ;;  %v324_v0 = vpack.c.bf16 %v294_v61, %v292_v58  ;;  %v323_v1 = vpack.c.bf16 %v293_v63, %v291_v62 }
  0x83   :  { %506 = vmatprep.mubr.bf16.mxu0 %v324_v0 }
  0x84   :  { %507 = vmatmul.mubr.bf16.vlgmr.msra.gmra.mrb[0].mxu0 %v323_v1  ;;  %v296_v2 = vld [vmem:[#allocation2 + $0x28] sm:$0xff]  ;;  %v298_v3 = vld [vmem:[#allocation2 + $0x38] sm:$0xff]  ;;  %v222_v4 = vpop.permute.xlu0 %221  ;;  %v228_v5 = vpop.permute.xlu1 %227 }
  0x85   :  { %v326_v6 = vpack.c.bf16 %v298_v3, %v296_v2  ;;  %224 = vst.msk [vmem:[#allocation2 + $0x48] sm:$0xff] %vm71_vm1, %v222_v4  ;;  %230 = vst.msk [vmem:[#allocation2 + $0x58] sm:$0xff] %vm71_vm1, %v228_v5  ;;  %v4738_v5 = vld [vmem:[%s6254_s2] ss:$0 sm:$0xff]  ;;  %s4428_s2 = smov 32  }
  0x87   :  { %514 = vmatprep.mubr.bf16.mxu0 %v326_v6 }
  0x88   :  { %v295_v7 = vld [vmem:[#allocation2 + $0x20] sm:$0xff]  ;;  %v297_v8 = vld [vmem:[#allocation2 + $0x30] sm:$0xff]  ;;  %v94_v9 = vpop.permute.xlu0 %93  ;;  %v100_v10 = vpop.permute.xlu1 %99 }
  0x89   :  { %v325_v11 = vpack.c.bf16 %v297_v8, %v295_v7  ;;  %96 = vst.msk [vmem:[#allocation2 + $0x40] sm:$0xff] %vm71_vm1, %v94_v9  ;;  %102 = vst.msk [vmem:[#allocation2 + $0x50] sm:$0xff] %vm71_vm1, %v100_v10 }
  0x8c   :  { %515 = vmatmul.mubr.bf16.gmra.mrb[4].mxu0 %v325_v11  ;;  %v234_v12 = vpop.permute.xlu0 %233  ;;  %v240_v13 = vpop.permute.xlu1 %239  ;;  %v300_v14 = vld [vmem:[#allocation2 + $0x48] sm:$0xff]  ;;  %v302_v15 = vld [vmem:[#allocation2 + $0x58] sm:$0xff] }
  0x8d   :  { %236 = vst.msk [vmem:[#allocation2 + $0x68] sm:$0xff] %vm71_vm1, %v234_v12  ;;  %242 = vst.msk [vmem:[#allocation2 + $0x78] sm:$0xff] %vm71_vm1, %v240_v13  ;;  %v328_v16 = vpack.c.bf16 %v302_v15, %v300_v14 }
  0x8f   :  { %522 = vmatprep.mubr.bf16.mxu0 %v328_v16 }
  0x90   :  { %v299_v17 = vld [vmem:[#allocation2 + $0x40] sm:$0xff]  ;;  %v301_v18 = vld [vmem:[#allocation2 + $0x50] sm:$0xff]  ;;  %v106_v19 = vpop.permute.xlu0 %105  ;;  %v112_v20 = vpop.permute.xlu1 %111 }
  0x91   :  { %v327_v21 = vpack.c.bf16 %v301_v18, %v299_v17  ;;  %108 = vst.msk [vmem:[#allocation2 + $0x60] sm:$0xff] %vm71_vm1, %v106_v19  ;;  %114 = vst.msk [vmem:[#allocation2 + $0x70] sm:$0xff] %vm71_vm1, %v112_v20 }
  0x94   :  { %523 = vmatmul.mubr.bf16.gmra.mrb[8].mxu0 %v327_v21  ;;  %v246_v22 = vpop.permute.xlu0 %245  ;;  %v252_v23 = vpop.permute.xlu1 %251  ;;  %v304_v24 = vld [vmem:[#allocation2 + $0x68] sm:$0xff]  ;;  %v306_v25 = vld [vmem:[#allocation2 + $0x78] sm:$0xff] }
  0x95   :  { %248 = vst.msk [vmem:[#allocation2 + $0x88] sm:$0xff] %vm71_vm1, %v246_v22  ;;  %254 = vst.msk [vmem:[#allocation2 + $0x98] sm:$0xff] %vm71_vm1, %v252_v23  ;;  %v330_v26 = vpack.c.bf16 %v306_v25, %v304_v24 }
  0x97   :  { %530 = vmatprep.mubr.bf16.mxu0 %v330_v26 }
  0x98   :  { %v118_v27 = vpop.permute.xlu0 %117  ;;  %v124_v28 = vpop.permute.xlu1 %123  ;;  %v303_v29 = vld [vmem:[#allocation2 + $0x60] sm:$0xff]  ;;  %v305_v30 = vld [vmem:[#allocation2 + $0x70] sm:$0xff] }
  0x99   :  { %120 = vst.msk [vmem:[#allocation2 + $0x80] sm:$0xff] %vm71_vm1, %v118_v27  ;;  %126 = vst.msk [vmem:[#allocation2 + $0x90] sm:$0xff] %vm71_vm1, %v124_v28  ;;  %v329_v31 = vpack.c.bf16 %v305_v30, %v303_v29 }
  0x9c   :  { %531 = vmatmul.mubr.bf16.gmra.mrb[12].mxu0 %v329_v31  ;;  %v308_v32 = vld [vmem:[#allocation2 + $0x88] sm:$0xff]  ;;  %v310_v33 = vld [vmem:[#allocation2 + $0x98] sm:$0xff]  ;;  %v258_v34 = vpop.permute.xlu0 %257  ;;  %v264_v35 = vpop.permute.xlu1 %263 }
  0x9d   :  { %v332_v36 = vpack.c.bf16 %v310_v33, %v308_v32  ;;  %260 = vst.msk [vmem:[#allocation2 + $0xa8] sm:$0xff] %vm71_vm1, %v258_v34  ;;  %266 = vst.msk [vmem:[#allocation2 + $0xb8] sm:$0xff] %vm71_vm1, %v264_v35 }
  0x9f   :  { %538 = vmatprep.mubr.bf16.mxu0 %v332_v36 }
  0xa0   :  { %v307_v37 = vld [vmem:[#allocation2 + $0x80] sm:$0xff]  ;;  %v309_v38 = vld [vmem:[#allocation2 + $0x90] sm:$0xff]  ;;  %v130_v39 = vpop.permute.xlu0 %129  ;;  %v136_v40 = vpop.permute.xlu1 %135 }
  0xa1   :  { %v331_v41 = vpack.c.bf16 %v309_v38, %v307_v37  ;;  %132 = vst.msk [vmem:[#allocation2 + $0xa0] sm:$0xff] %vm71_vm1, %v130_v39  ;;  %138 = vst.msk [vmem:[#allocation2 + $0xb0] sm:$0xff] %vm71_vm1, %v136_v40 }
  0xa4   :  { %539 = vmatmul.mubr.bf16.gmra.mrb[16].mxu0 %v331_v41  ;;  %v312_v42 = vld [vmem:[#allocation2 + $0xa8] sm:$0xff]  ;;  %v314_v43 = vld [vmem:[#allocation2 + $0xb8] sm:$0xff]  ;;  %v270_v44 = vpop.permute.xlu0 %269  ;;  %v276_v45 = vpop.permute.xlu1 %275 }
  0xa5   :  { %v334_v46 = vpack.c.bf16 %v314_v43, %v312_v42  ;;  %272 = vst.msk [vmem:[#allocation2 + $0xc8] sm:$0xff] %vm71_vm1, %v270_v44  ;;  %278 = vst.msk [vmem:[#allocation2 + $0xd8] sm:$0xff] %vm71_vm1, %v276_v45 }
  0xa7   :  { %546 = vmatprep.mubr.bf16.mxu0 %v334_v46 }
  0xa8   :  { %v311_v47 = vld [vmem:[#allocation2 + $0xa0] sm:$0xff]  ;;  %v313_v48 = vld [vmem:[#allocation2 + $0xb0] sm:$0xff]  ;;  %v142_v49 = vpop.permute.xlu0 %141  ;;  %v148_v50 = vpop.permute.xlu1 %147 }
  0xa9   :  { %v333_v51 = vpack.c.bf16 %v313_v48, %v311_v47  ;;  %144 = vst.msk [vmem:[#allocation2 + $0xc0] sm:$0xff] %vm71_vm1, %v142_v49  ;;  %150 = vst.msk [vmem:[#allocation2 + $0xd0] sm:$0xff] %vm71_vm1, %v148_v50 }
  0xac   :  { %547 = vmatmul.mubr.bf16.gmra.mrb[20].mxu0 %v333_v51  ;;  %v316_v52 = vld [vmem:[#allocation2 + $0xc8] sm:$0xff]  ;;  %v318_v53 = vld [vmem:[#allocation2 + $0xd8] sm:$0xff]  ;;  %v282_v54 = vpop.permute.xlu0 %281  ;;  %v288_v55 = vpop.permute.xlu1 %287 }
  0xad   :  { %v336_v56 = vpack.c.bf16 %v318_v53, %v316_v52  ;;  %284 = vst.msk [vmem:[#allocation2 + $0xe8] sm:$0xff] %vm71_vm1, %v282_v54  ;;  %290 = vst.msk [vmem:[#allocation2 + $0xf8] sm:$0xff] %vm71_vm1, %v288_v55 }
  0xaf   :  { %554 = vmatprep.mubr.bf16.mxu0 %v336_v56 }
  0xb0   :  { %v315_v57 = vld [vmem:[#allocation2 + $0xc0] sm:$0xff]  ;;  %v317_v58 = vld [vmem:[#allocation2 + $0xd0] sm:$0xff]  ;;  %v154_v59 = vpop.permute.xlu0 %153  ;;  %v160_v60 = vpop.permute.xlu1 %159 }
  0xb1   :  { %v335_v61 = vpack.c.bf16 %v317_v58, %v315_v57  ;;  %156 = vst.msk [vmem:[#allocation2 + $0xe0] sm:$0xff] %vm71_vm1, %v154_v59  ;;  %162 = vst.msk [vmem:[#allocation2 + $0xf0] sm:$0xff] %vm71_vm1, %v160_v60  ;;  %vm670_vm1 = vcmask 523526  }
  0xb4   :  { %555 = vmatmul.mubr.bf16.gmra.mrb[24].mxu0 %v335_v61  ;;  %v320_v62 = vld [vmem:[#allocation2 + $0xe8] sm:$0xff]  ;;  %v322_v63 = vld [vmem:[#allocation2 + $0xf8] sm:$0xff] }
  0xb5   :  { %v338_v0 = vpack.c.bf16 %v322_v63, %v320_v62 }
  0xb7   :  { %562 = vmatprep.mubr.bf16.mxu0 %v338_v0 }
  0xb8   :  { %v319_v1 = vld [vmem:[#allocation2 + $0xe0] sm:$0xff]  ;;  %v321_v2 = vld [vmem:[#allocation2 + $0xf0] sm:$0xff] }
  0xb9   :  { %v337_v3 = vpack.c.bf16 %v321_v2, %v319_v1 }
  0xbc   :  { %563 = vmatmul.mubr.bf16.gmra.mrb[28].mxu0 %v337_v3 }
 0x157   :  { %v3515_v4 = vpop.f32.mrb[0].mxu0 }
 0x158   :  { %v3516_v6 = vpop.f32.mrb[1].mxu0 }
 0x159   :  { %v3517_v7 = vadd.f32 %v3516_v6, %v3515_v4  ;;  %v3518_v8 = vpop.f32.mrb[2].mxu0 }
 0x15a   :  { %v3519_v9 = vpop.f32.mrb[3].mxu0 }
 0x15b   :  { %v509_v10 = vadd.f32 %v3517_v7, %v4738_v5  ;;  %v3520_v11 = vadd.f32 %v3519_v9, %v3518_v8 }
 0x15d   :  { %v571_v12 = vmax.f32 %v509_v10, 0.0  ;;  %v512_v13 = vadd.f32 %v3520_v11, %v4738_v5 }
 0x15f   :  { %588 = vst.msk [vmem:[#allocation3] sm:$0xff] %vm587_vm2, %v571_v12  ;;  %v572_v14 = vmax.f32 %v512_v13, 0.0  ;;  %v3521_v15 = vpop.f32.mrb[4].mxu0 }
 0x160   :  { %v3522_v16 = vpop.f32.mrb[5].mxu0 }
 0x161   :  { %589 = vst.msk [vmem:[#allocation3 + $0x8] sm:$0xff] %vm587_vm2, %v572_v14  ;;  %v3523_v17 = vadd.f32 %v3522_v16, %v3521_v15  ;;  %v3524_v18 = vpop.f32.mrb[6].mxu0 }
 0x162   :  { %v3525_v19 = vpop.f32.mrb[7].mxu0 }
 0x163   :  { %v517_v20 = vadd.f32 %v3523_v17, %v4738_v5  ;;  %v3526_v21 = vadd.f32 %v3525_v19, %v3524_v18 }
 0x165   :  { %v573_v22 = vmax.f32 %v517_v20, 0.0  ;;  %v520_v23 = vadd.f32 %v3526_v21, %v4738_v5 }
 0x166   :  { %v647_v24 = vld [vmem:[#allocation3 + $0x1] ss:$2 sm:$0x7]  ;;  %v704_v30 = vld [vmem:[#allocation3 + $0x2] ss:$2 sm:$0x7] }
 0x167   :  { %590 = vst.msk [vmem:[#allocation3 + $0x10] sm:$0xff] %vm587_vm2, %v573_v22  ;;  %v574_v25 = vmax.f32 %v520_v23, 0.0  ;;  %649 = vrot.lane.b32.xlu0 %v647_v24, %s4428_s2  ;;  %v3527_v26 = vpop.f32.mrb[8].mxu0  ;;  %v604_v34 = vld [vmem:[#allocation3] ss:$2 sm:$0x7] }
 0x168   :  { %v3528_v27 = vpop.f32.mrb[9].mxu0  ;;  %v818_v35 = vld [vmem:[#allocation3 + $0x8] ss:$2 sm:$0x7]  ;;  %606 = vst.msk [vmem:[#allocation4] sm:$0x7] %vm605_vm3, %v604_v34 }
 0x169   :  { %591 = vst.msk [vmem:[#allocation3 + $0x18] sm:$0xff] %vm587_vm2, %v574_v25  ;;  %v3529_v28 = vadd.f32 %v3528_v27, %v3527_v26  ;;  %v3530_v29 = vpop.f32.mrb[10].mxu0  ;;  %v761_v38 = vld [vmem:[#allocation3 + $0x3] ss:$2 sm:$0x7] }
 0x16a   :  { %v3531_v31 = vpop.f32.mrb[11].mxu0  ;;  %819 = vst.msk [vmem:[#allocation4 + $0x8] sm:$0x7] %vm605_vm3, %v818_v35  ;;  %v853_v45 = vld [vmem:[#allocation3 + $0x9] ss:$2 sm:$0x7] }
 0x16b   :  { %706 = vrot.lane.b32.xlu0 %v704_v30, %s4427_s13  ;;  %v525_v32 = vadd.f32 %v3529_v28, %v4738_v5  ;;  %v3532_v33 = vadd.f32 %v3531_v31, %v3530_v29  ;;  %v902_v53 = vld [vmem:[#allocation3 + $0xa] ss:$2 sm:$0x7]  ;;  %v951_v63 = vld [vmem:[#allocation3 + $0xb] ss:$2 sm:$0x7] }
 0x16d   :  { %v575_v36 = vmax.f32 %v525_v32, 0.0  ;;  %v528_v37 = vadd.f32 %v3532_v33, %v4738_v5 }
 0x16e   :  { %v655_v39 = vld [vmem:[#allocation3 + $0x11] ss:$2 sm:$0x7]  ;;  %v712_v42 = vld [vmem:[#allocation3 + $0x12] ss:$2 sm:$0x7] }
 0x16f   :  { %763 = vrot.lane.b32.xlu0 %v761_v38, %s4429_s1  ;;  %v657_v40 = vrot.slane %v655_v39, 5  ;;  %592 = vst.msk [vmem:[#allocation3 + $0x20] sm:$0xff] %vm587_vm2, %v575_v36  ;;  %v576_v41 = vmax.f32 %v528_v37, 0.0  ;;  %v3533_v43 = vpop.f32.mrb[12].mxu0  ;;  %v714_v48 = vrot.slane %v712_v42, 5 }
 0x170   :  { %v3534_v44 = vpop.f32.mrb[13].mxu0  ;;  %v769_v50 = vld [vmem:[#allocation3 + $0x13] ss:$2 sm:$0x7] }
 0x171   :  { %658 = vrot.lane.b32.xlu1 %v657_v40, %s4428_s2  ;;  %593 = vst.msk [vmem:[#allocation3 + $0x28] sm:$0xff] %vm587_vm2, %v576_v41  ;;  %v3535_v46 = vadd.f32 %v3534_v44, %v3533_v43  ;;  %v3536_v47 = vpop.f32.mrb[14].mxu0  ;;  %v771_v56 = vrot.slane %v769_v50, 5  ;;  %v860_v58 = vld [vmem:[#allocation3 + $0x19] ss:$2 sm:$0x7] }
 0x172   :  { %v3537_v49 = vpop.f32.mrb[15].mxu0  ;;  %v862_v1 = vrot.slane %v860_v58, 5  ;;  %v909_v4 = vld [vmem:[#allocation3 + $0x1a] ss:$2 sm:$0x7] }
 0x173   :  { %855 = vrot.lane.b32.xlu0 %v853_v45, %s4428_s2  ;;  %v533_v51 = vadd.f32 %v3535_v46, %v4738_v5  ;;  %v3538_v52 = vadd.f32 %v3537_v49, %v3536_v47  ;;  %v1030_v8 = vld [vmem:[#allocation3 + $0x11] ss:$2 sm:$0x7]  ;;  %v911_v9 = vrot.slane %v909_v4, 5 }
 0x174   :  { %v958_v12 = vld [vmem:[#allocation3 + $0x1b] ss:$2 sm:$0x7]  ;;  %v1075_v14 = vld [vmem:[#allocation3 + $0x12] ss:$2 sm:$0x7] }
 0x175   :  { %715 = vrot.lane.b32.xlu1 %v714_v48, %s4427_s13  ;;  %v577_v54 = vmax.f32 %v533_v51, 0.0  ;;  %v536_v55 = vadd.f32 %v3538_v52, %v4738_v5  ;;  %v960_v19 = vrot.slane %v958_v12, 5  ;;  %v1196_v25 = vld [vmem:[#allocation3 + $0x19] ss:$2 sm:$0x7] }
 0x176   :  { %v1036_v17 = vld [vmem:[#allocation3 + $0x21] ss:$2 sm:$0x7]  ;;  %v1081_v27 = vld [vmem:[#allocation3 + $0x22] ss:$2 sm:$0x7] }
 0x177   :  { %904 = vrot.lane.b32.xlu0 %v902_v53, %s4427_s13  ;;  %v3539_v57 = vpop.f32.mrb[16].mxu0  ;;  %594 = vst.msk [vmem:[#allocation3 + $0x30] sm:$0xff] %vm587_vm2, %v577_v54  ;;  %v578_v59 = vmax.f32 %v536_v55, 0.0  ;;  %v1038_v22 = vrot.slane %v1036_v17, 5  ;;  %v1083_v33 = vrot.slane %v1081_v27, 5 }
 0x178   :  { %v3540_v60 = vpop.f32.mrb[17].mxu0  ;;  %v1241_v30 = vld [vmem:[#allocation3 + $0x1a] ss:$2 sm:$0x7] }
 0x179   :  { %772 = vrot.lane.b32.xlu1 %v771_v56, %s4429_s1  ;;  %v3541_v61 = vadd.f32 %v3540_v60, %v3539_v57  ;;  %v3542_v62 = vpop.f32.mrb[18].mxu0  ;;  %595 = vst.msk [vmem:[#allocation3 + $0x38] sm:$0xff] %vm587_vm2, %v578_v59  ;;  %v1202_v35 = vld [vmem:[#allocation3 + $0x29] ss:$2 sm:$0x7] }
 0x17a   :  { %v3543_v0 = vpop.f32.mrb[19].mxu0  ;;  %v1286_v38 = vld [vmem:[#allocation3 + $0x1b] ss:$2 sm:$0x7]  ;;  %v1204_v44 = vrot.slane %v1202_v35, 5 }
 0x17b   :  { %953 = vrot.lane.b32.xlu0 %v951_v63, %s4429_s1  ;;  %v541_v2 = vadd.f32 %v3541_v61, %v4738_v5  ;;  %v3544_v3 = vadd.f32 %v3543_v0, %v3542_v62  ;;  %v608_v39 = vld [vmem:[#allocation3 + $0x10] ss:$2 sm:$0x7]  ;;  %v664_v40 = vld [vmem:[#allocation3 + $0x21] ss:$2 sm:$0x7] }
 0x17c   :  { %v610_v43 = vrot.slane %v608_v39, 5  ;;  %v1247_v46 = vld [vmem:[#allocation3 + $0x2a] ss:$2 sm:$0x7]  ;;  %v666_v49 = vrot.slane %v664_v40, 2 }
 0x17d   :  { %863 = vrot.lane.b32.xlu1 %v862_v1, %s4428_s2  ;;  %v579_v6 = vmax.f32 %v541_v2, 0.0  ;;  %v544_v7 = vadd.f32 %v3544_v3, %v4738_v5  ;;  %v721_v52 = vld [vmem:[#allocation3 + $0x22] ss:$2 sm:$0x7]  ;;  %v1249_v54 = vrot.slane %v1247_v46, 5 }
 0x17e   :  { %613 = vst.msk [vmem:[#allocation4] sm:$0x38] %vm612_vm4, %v610_v43  ;;  %v1292_v57 = vld [vmem:[#allocation3 + $0x2b] ss:$2 sm:$0x7]  ;;  %v723_v58 = vrot.slane %v721_v52, 2 }
 0x17f   :  { %1032 = vrot.lane.b32.xlu0 %v1030_v8, %s4428_s2  ;;  %596 = vst.msk [vmem:[#allocation3 + $0x40] sm:$0xff] %vm587_vm2, %v579_v6  ;;  %v580_v10 = vmax.f32 %v544_v7, 0.0  ;;  %v3545_v11 = vpop.f32.mrb[20].mxu0  ;;  %v778_v61 = vld [vmem:[#allocation3 + $0x23] ss:$2 sm:$0x7] }
 0x180   :  { %v3546_v13 = vpop.f32.mrb[21].mxu0  ;;  %v1294_v63 = vrot.slane %v1292_v57, 5  ;;  %v780_v1 = vrot.slane %v778_v61, 2  ;;  %v868_v3 = vld [vmem:[#allocation3 + $0x29] ss:$2 sm:$0x7] }
 0x181   :  { %912 = vrot.lane.b32.xlu1 %v911_v9, %s4427_s13  ;;  %597 = vst.msk [vmem:[#allocation3 + $0x48] sm:$0xff] %vm587_vm2, %v580_v10  ;;  %v3547_v15 = vadd.f32 %v3546_v13, %v3545_v11  ;;  %v3548_v16 = vpop.f32.mrb[22].mxu0  ;;  %v917_v6 = vld [vmem:[#allocation3 + $0x2a] ss:$2 sm:$0x7] }
 0x182   :  { %v3549_v18 = vpop.f32.mrb[23].mxu0  ;;  %v919_v9 = vrot.slane %v917_v6, 2  ;;  %v966_v10 = vld [vmem:[#allocation3 + $0x2b] ss:$2 sm:$0x7]  ;;  %v4394_v6 = vld [vmem:[%s6255_s3] sm:$0xff]  }
 0x183   :  { %1077 = vrot.lane.b32.xlu0 %v1075_v14, %s4427_s13  ;;  %v549_v20 = vadd.f32 %v3547_v15, %v4738_v5  ;;  %v3550_v21 = vadd.f32 %v3549_v18, %v3548_v16  ;;  %v968_v13 = vrot.slane %v966_v10, 2  ;;  %v1044_v14 = vld [vmem:[#allocation3 + $0x31] ss:$2 sm:$0x7] }
 0x184   :  { %v821_v16 = vld [vmem:[#allocation3 + $0x18] ss:$2 sm:$0x7]  ;;  %v1007_v46 = vld [vmem:[#allocation3 + $0x30] ss:$2 sm:$0x7] }
 0x185   :  { %961 = vrot.lane.b32.xlu1 %v960_v19, %s4429_s1  ;;  %v581_v23 = vmax.f32 %v549_v20, 0.0  ;;  %v552_v24 = vadd.f32 %v3550_v21, %v4738_v5  ;;  %v823_v18 = vrot.slane %v821_v16, 5  ;;  %v1046_v19 = vrot.slane %v1044_v14, 2  ;;  %v1089_v20 = vld [vmem:[#allocation3 + $0x32] ss:$2 sm:$0x7] }
 0x186   :  { %v675_v62 = vld [vmem:[#allocation3 + $0x41] ss:$2 sm:$0x7]  ;;  %v732_v4 = vld [vmem:[#allocation3 + $0x42] ss:$2 sm:$0x7] }
 0x187   :  { %1198 = vrot.lane.b32.xlu0 %v1196_v25, %s4428_s2  ;;  %598 = vst.msk [vmem:[#allocation3 + $0x50] sm:$0xff] %vm587_vm2, %v581_v23  ;;  %v582_v26 = vmax.f32 %v552_v24, 0.0  ;;  %v3551_v28 = vpop.f32.mrb[24].mxu0  ;;  %v677_v2 = vrot.slane %v675_v62, 7  ;;  %v734_v7 = vrot.slane %v732_v4, 7  ;;  %v1091_v23 = vrot.slane %v1089_v20, 2 }
 0x188   :  { %v3552_v29 = vpop.f32.mrb[25].mxu0  ;;  %v789_v8 = vld [vmem:[#allocation3 + $0x43] ss:$2 sm:$0x7]  ;;  %825 = vst.msk [vmem:[#allocation4 + $0x8] sm:$0x38] %vm612_vm4, %v823_v18 }
 0x189   :  { %1039 = vrot.lane.b32.xlu1 %v1038_v22, %s4428_s2  ;;  %599 = vst.msk [vmem:[#allocation3 + $0x58] sm:$0xff] %vm587_vm2, %v582_v26  ;;  %v3553_v31 = vadd.f32 %v3552_v29, %v3551_v28  ;;  %v3554_v32 = vpop.f32.mrb[26].mxu0  ;;  %v791_v11 = vrot.slane %v789_v8, 7  ;;  %v877_v12 = vld [vmem:[#allocation3 + $0x49] ss:$2 sm:$0x7] }
 0x18a   :  { %v3555_v34 = vpop.f32.mrb[27].mxu0  ;;  %v879_v15 = vrot.slane %v877_v12, 7  ;;  %v926_v17 = vld [vmem:[#allocation3 + $0x4a] ss:$2 sm:$0x7]  ;;  %v4397_v16 = vld [vmem:[%s6255_s3 + $0x50] sm:$0xff]  }
 0x18b   :  { %1243 = vrot.lane.b32.xlu0 %v1241_v30, %s4427_s13  ;;  %v557_v36 = vadd.f32 %v3553_v31, %v4738_v5  ;;  %v3556_v37 = vadd.f32 %v3555_v34, %v3554_v32  ;;  %v999_v21 = vld [vmem:[#allocation3 + $0x10] ss:$2 sm:$0x7]  ;;  %v928_v22 = vrot.slane %v926_v17, 7  ;;  %v4396_v12 = vld [vmem:[%s6255_s3 + $0x8] sm:$0xff]  }
 0x18c   :  { %1000 = vst.msk [vmem:[#allocation4 + $0x10] sm:$0x7] %vm605_vm3, %v999_v21  ;;  %v975_v24 = vld [vmem:[#allocation3 + $0x4b] ss:$2 sm:$0x7]  ;;  %v4398_v17 = vld [vmem:[%s6255_s3 + $0x10] sm:$0xff]  }
 0x18d   :  { %1084 = vrot.lane.b32.xlu1 %v1083_v33, %s4427_s13  ;;  %v583_v41 = vmax.f32 %v557_v36, 0.0  ;;  %v560_v42 = vadd.f32 %v3556_v37, %v4738_v5  ;;  %v1210_v25 = vld [vmem:[#allocation3 + $0x39] ss:$2 sm:$0x7]  ;;  %v977_v29 = vrot.slane %v975_v24, 7 }
 0x18e   :  { %v1165_v26 = vld [vmem:[#allocation3 + $0x18] ss:$2 sm:$0x7]  ;;  %v1052_v27 = vld [vmem:[#allocation3 + $0x51] ss:$2 sm:$0x7] }
 0x18f   :  { %1288 = vrot.lane.b32.xlu0 %v1286_v38, %s4429_s1  ;;  %v3557_v45 = vpop.f32.mrb[28].mxu0  ;;  %600 = vst.msk [vmem:[#allocation3 + $0x60] sm:$0xff] %vm587_vm2, %v583_v41  ;;  %v584_v47 = vmax.f32 %v560_v42, 0.0  ;;  %v1001_v28 = vld [vmem:[#allocation3 + $0x20] ss:$2 sm:$0x7] }
 0x190   :  { %v3558_v48 = vpop.f32.mrb[29].mxu0  ;;  %1166 = vst.msk [vmem:[#allocation4 + $0x18] sm:$0x7] %vm605_vm3, %v1165_v26  ;;  %v1003_v30 = vrot.slane %v1001_v28, 5  ;;  %v1212_v35 = vrot.slane %v1210_v25, 2  ;;  %v1054_v36 = vrot.slane %v1052_v27, 7 }
 0x191   :  { %1205 = vrot.lane.b32.xlu1 %v1204_v44, %s4428_s2  ;;  %v3559_v50 = vadd.f32 %v3558_v48, %v3557_v45  ;;  %v3560_v51 = vpop.f32.mrb[30].mxu0  ;;  %601 = vst.msk [vmem:[#allocation3 + $0x68] sm:$0xff] %vm587_vm2, %v584_v47  ;;  %v1167_v31 = vld [vmem:[#allocation3 + $0x28] ss:$2 sm:$0x7]  ;;  %v4399_v26 = vld [vmem:[%s6255_s3 + $0x58] sm:$0xff]  }
 0x192   :  { %v3561_v53 = vpop.f32.mrb[31].mxu0  ;;  %v1255_v32 = vld [vmem:[#allocation3 + $0x3a] ss:$2 sm:$0x7]  ;;  %v1169_v33 = vrot.slane %v1167_v31, 5  ;;  %v4402_v31 = vld [vmem:[%s6255_s3 + $0x20] sm:$0xff]  }
 0x193   :  { %667 = vrot.lane.b32.xlu0 %v666_v49, %s4428_s2  ;;  %v565_v55 = vadd.f32 %v3559_v50, %v4738_v5  ;;  %v3562_v56 = vadd.f32 %v3561_v53, %v3560_v51  ;;  %v615_v34 = vld [vmem:[#allocation3 + $0x20] ss:$2 sm:$0x7]  ;;  %1005 = vst.msk [vmem:[#allocation4 + $0x10] sm:$0x38] %vm612_vm4, %v1003_v30  ;;  %v1257_v47 = vrot.slane %v1255_v32, 2 }
 0x194   :  { %v617_v37 = vrot.slane %v615_v34, 2  ;;  %v624_v38 = vld [vmem:[#allocation3 + $0x40] ss:$2 sm:$0x7]  ;;  %1171 = vst.msk [vmem:[#allocation4 + $0x18] sm:$0x38] %vm612_vm4, %v1169_v33 }
 0x195   :  { %1250 = vrot.lane.b32.xlu1 %v1249_v54, %s4427_s13  ;;  %v585_v59 = vmax.f32 %v565_v55, 0.0  ;;  %v568_v60 = vadd.f32 %v3562_v56, %v4738_v5  ;;  %v870_v5 = vrot.slane %v868_v3, 2  ;;  %v1097_v39 = vld [vmem:[#allocation3 + $0x52] ss:$2 sm:$0x7]  ;;  %v626_v40 = vrot.slane %v624_v38, 7 }
 0x196   :  { %v827_v41 = vld [vmem:[#allocation3 + $0x28] ss:$2 sm:$0x7]  ;;  %620 = vst.msk [vmem:[#allocation4] sm:$0xc0] %vm619_vm5, %v617_v37  ;;  %v1009_v49 = vrot.slane %v1007_v46, 2 }
 0x197   :  { %724 = vrot.lane.b32.xlu0 %v723_v58, %s4427_s13  ;;  %602 = vst.msk [vmem:[#allocation3 + $0x70] sm:$0xff] %vm587_vm2, %v585_v59  ;;  %v586_v0 = vmax.f32 %v568_v60, 0.0  ;;  %v829_v42 = vrot.slane %v827_v41, 2  ;;  %v834_v43 = vld [vmem:[#allocation3 + $0x48] ss:$2 sm:$0x7] }
 0x198   :  { %622 = vst.msk [vmem:[#allocation4 + $0x20] sm:$0x1] %vm621_vm6, %v617_v37  ;;  %v1300_v44 = vld [vmem:[#allocation3 + $0x3b] ss:$2 sm:$0x7]  ;;  %v836_v45 = vrot.slane %v834_v43, 7 }
 0x199   :  { %1295 = vrot.lane.b32.xlu1 %v1294_v63, %s4429_s1  ;;  %603 = vst.msk [vmem:[#allocation3 + $0x78] sm:$0xff] %vm587_vm2, %v586_v0  ;;  %v1218_v48 = vld [vmem:[#allocation3 + $0x59] ss:$2 sm:$0x7]  ;;  %v1099_v53 = vrot.slane %v1097_v39, 7  ;;  %v1302_v59 = vrot.slane %v1300_v44, 2 }
 0x19a   :  { %629 = vst.msk [vmem:[#allocation4 + $0x20] sm:$0xe] %vm628_vm7, %v626_v40  ;;  %v1173_v50 = vld [vmem:[#allocation3 + $0x38] ss:$2 sm:$0x7]  ;;  %v1220_v0 = vrot.slane %v1218_v48, 7 }
 0x19b   :  { %781 = vrot.lane.b32.xlu0 %v780_v1, %s4429_s1  ;;  %831 = vst.msk [vmem:[#allocation4 + $0x8] sm:$0xc0] %vm619_vm5, %v829_v42  ;;  %v1175_v51 = vrot.slane %v1173_v50, 2  ;;  %v1013_v52 = vld [vmem:[#allocation3 + $0x50] ss:$2 sm:$0x7] }
 0x19c   :  { %832 = vst.msk [vmem:[#allocation4 + $0x28] sm:$0x1] %vm621_vm6, %v829_v42  ;;  %v684_v54 = vld [vmem:[#allocation3 + $0x51] ss:$2 sm:$0x7]  ;;  %v1015_v55 = vrot.slane %v1013_v52, 7 }
 0x19d   :  { %678 = vrot.lane.b32.xlu1 %v677_v2, %s4428_s2  ;;  %838 = vst.msk [vmem:[#allocation4 + $0x28] sm:$0xe] %vm628_vm7, %v836_v45  ;;  %v1179_v56 = vld [vmem:[#allocation3 + $0x58] ss:$2 sm:$0x7]  ;;  %v4393_v3 = vld [vmem:[%s6255_s3 + $0x40] sm:$0xff]  }
 0x19e   :  { %1011 = vst.msk [vmem:[#allocation4 + $0x10] sm:$0xc0] %vm619_vm5, %v1009_v49  ;;  %1177 = vst.msk [vmem:[#allocation4 + $0x18] sm:$0xc0] %vm619_vm5, %v1175_v51  ;;  %v1181_v57 = vrot.slane %v1179_v56, 7  ;;  %3563 = vmatprep.subr.bf16.mxu1 %v4393_v3  ;;  %v4400_v27 = vld [vmem:[%s6255_s3 + $0x18] sm:$0xff]  }
 0x19f   :  { %871 = vrot.lane.b32.xlu0 %v870_v5, %s4428_s2  ;;  %1012 = vst.msk [vmem:[#allocation4 + $0x30] sm:$0x1] %vm621_vm6, %v1009_v49  ;;  %1178 = vst.msk [vmem:[#allocation4 + $0x38] sm:$0x1] %vm621_vm6, %v1175_v51  ;;  %v686_v5 = vrot.slane %v684_v54, 4  ;;  %3564 = vmatpush3.bf16.msra.mxu1 %v4394_v6  ;;  %v4401_v30 = vld [vmem:[%s6255_s3 + $0x60] sm:$0xff]  }
 0x1a0   :  { %v631_v58 = vld [vmem:[#allocation3 + $0x50] ss:$2 sm:$0x7]  ;;  %v1263_v60 = vld [vmem:[#allocation3 + $0x5a] ss:$2 sm:$0x7] }
 0x1a1   :  { %735 = vrot.lane.b32.xlu1 %v734_v7, %s4427_s13  ;;  %v741_v61 = vld [vmem:[#allocation3 + $0x52] ss:$2 sm:$0x7]  ;;  %1017 = vst.msk [vmem:[#allocation4 + $0x30] sm:$0xe] %vm628_vm7, %v1015_v55  ;;  %v633_v62 = vrot.slane %v631_v58, 4 }
 0x1a2   :  { %v638_v63 = vld [vmem:[#allocation3 + $0x60] ss:$2 sm:$0x7]  ;;  %1183 = vst.msk [vmem:[#allocation4 + $0x38] sm:$0xe] %vm628_vm7, %v1181_v57  ;;  %v1265_v8 = vrot.slane %v1263_v60, 7 }
 0x1a3   :  { %920 = vrot.lane.b32.xlu0 %v919_v9, %s4427_s13  ;;  %v640_v1 = vrot.slane %v638_v63, 1  ;;  %v840_v2 = vld [vmem:[#allocation3 + $0x58] ss:$2 sm:$0x7]  ;;  %636 = vst.msk [vmem:[#allocation4 + $0x20] sm:$0x70] %vm635_vm8, %v633_v62 }
 0x1a4   :  { %v842_v4 = vrot.slane %v840_v2, 4  ;;  %v1308_v7 = vld [vmem:[#allocation3 + $0x5b] ss:$2 sm:$0x7]  ;;  %v743_v9 = vrot.slane %v741_v61, 4  ;;  %v4403_v41 = vld [vmem:[%s6255_s3 + $0x68] sm:$0xff]  }
 0x1a5   :  { %792 = vrot.lane.b32.xlu1 %v791_v11, %s4429_s1  ;;  %643 = vst.msk [vmem:[#allocation4 + $0x20] sm:$0x80] %vm642_vm9, %v640_v1  ;;  %v798_v10 = vld [vmem:[#allocation3 + $0x53] ss:$2 sm:$0x7]  ;;  %v4395_v11 = vld [vmem:[%s6255_s3 + $0x48] sm:$0xff]  }
 0x1a6   :  { %645 = vst.msk [vmem:[#allocation4 + $0x40] sm:$0x3] %vm644_vm10, %v640_v1  ;;  %3565 = vmatprep.subr.bf16.mxu1 %v4395_v11  ;;  %v885_v14 = vld [vmem:[#allocation3 + $0x59] ss:$2 sm:$0x7]  ;;  %v800_v18 = vrot.slane %v798_v10, 4 }
 0x1a7   :  { %969 = vrot.lane.b32.xlu0 %v968_v13, %s4429_s1  ;;  %844 = vst.msk [vmem:[#allocation4 + $0x28] sm:$0x70] %vm635_vm8, %v842_v4  ;;  %v693_v13 = vld [vmem:[#allocation3 + $0x61] ss:$2 sm:$0x7]  ;;  %3566 = vmatpush3.bf16.msra.mxu1 %v4396_v12  ;;  %v887_v24 = vrot.slane %v885_v14, 4 }
 0x1a8   :  { %3567 = vmatprep.subr.bf16.mxu1 %v4397_v16  ;;  %v1018_v21 = vld [vmem:[#allocation3 + $0x60] ss:$2 sm:$0x7]  ;;  %v934_v28 = vld [vmem:[#allocation3 + $0x5a] ss:$2 sm:$0x7] }
 0x1a9   :  { %880 = vrot.lane.b32.xlu1 %v879_v15, %s4428_s2  ;;  %v1310_v15 = vrot.slane %v1308_v7, 7  ;;  %v750_v25 = vld [vmem:[#allocation3 + $0x62] ss:$2 sm:$0x7]  ;;  %v936_v37 = vrot.slane %v934_v28, 4  ;;  %v4404_v42 = vld [vmem:[%s6255_s3 + $0x28] sm:$0xff]  }
 0x1aa   :  { %v1184_v32 = vld [vmem:[#allocation3 + $0x68] ss:$2 sm:$0x7]  ;;  %v752_v33 = vrot.slane %v750_v25, 1  ;;  %v4405_v49 = vld [vmem:[%s6255_s3 + $0x70] sm:$0xff]   ;;  %v4407_v55 = vld [vmem:[%s6255_s3 + $0x78] sm:$0xff]  }
 0x1ab   :  { %1047 = vrot.lane.b32.xlu0 %v1046_v19, %s4428_s2  ;;  %v846_v19 = vld [vmem:[#allocation3 + $0x68] ss:$2 sm:$0x7]  ;;  %3568 = vmatpush3.bf16.msra.mxu1 %v4398_v17  ;;  %v1186_v34 = vrot.slane %v1184_v32, 4  ;;  %v4406_v50 = vld [vmem:[%s6255_s3 + $0x30] sm:$0xff]   ;;  %v4408_v56 = vld [vmem:[%s6255_s3 + $0x38] sm:$0xff]  }
 0x1ac   :  { %v848_v20 = vrot.slane %v846_v19, 1  ;;  %3569 = vmatprep.subr.bf16.mxu1 %v4399_v26  ;;  %v893_v38 = vld [vmem:[#allocation3 + $0x69] ss:$2 sm:$0x7]  ;;  %vm672_vm2 = vcmask 516352   ;;  %vm727_vm3 = vcmask 785926  }
 0x1ad   :  { %929 = vrot.lane.b32.xlu1 %v928_v22, %s4427_s13  ;;  %v695_v22 = vrot.slane %v693_v13, 1  ;;  %1188 = vst.msk [vmem:[#allocation4 + $0x38] sm:$0x70] %vm635_vm8, %v1186_v34  ;;  %v1190_v43 = vld [vmem:[#allocation3 + $0x78] ss:$2 sm:$0x7] }
 0x1ae   :  { %850 = vst.msk [vmem:[#allocation4 + $0x28] sm:$0x80] %vm642_vm9, %v848_v20  ;;  %v942_v45 = vld [vmem:[#allocation3 + $0x6a] ss:$2 sm:$0x7]  ;;  %v895_v48 = vrot.slane %v893_v38, 1 }
 0x1af   :  { %1092 = vrot.lane.b32.xlu0 %v1091_v23, %s4427_s13  ;;  %v1020_v23 = vrot.slane %v1018_v21, 4  ;;  %851 = vst.msk [vmem:[#allocation4 + $0x48] sm:$0x3] %vm644_vm10, %v848_v20  ;;  %3570 = vmatpush3.bf16.msra.mxu1 %v4400_v27  ;;  %v1059_v46 = vld [vmem:[#allocation3 + $0x61] ss:$2 sm:$0x7] }
 0x1b0   :  { %3571 = vmatprep.subr.bf16.mxu1 %v4401_v30  ;;  %v1120_v51 = vld [vmem:[#allocation3 + $0x13] ss:$2 sm:$0x7]  ;;  %v944_v52 = vrot.slane %v942_v45, 1  ;;  %vm729_vm4 = vcmask 778752   ;;  %vm784_vm5 = vcmask 1048326  }
 0x1b1   :  { %978 = vrot.lane.b32.xlu1 %v977_v29, %s4429_s1  ;;  %1022 = vst.msk [vmem:[#allocation4 + $0x30] sm:$0x70] %vm635_vm8, %v1020_v23  ;;  %v807_v29 = vld [vmem:[#allocation3 + $0x63] ss:$2 sm:$0x7]  ;;  %vm786_vm6 = vcmask 1041152  }
 0x1b2   :  { %v809_v40 = vrot.slane %v807_v29, 1  ;;  %v991_v54 = vld [vmem:[#allocation3 + $0x6b] ss:$2 sm:$0x7]  ;;  %vm681_vm7 = vcmask 519425   ;;  %vm738_vm8 = vcmask 781825  }
 0x1b3   :  { %1213 = vrot.lane.b32.xlu0 %v1212_v35, %s4428_s2  ;;  %v983_v35 = vld [vmem:[#allocation3 + $0x5b] ss:$2 sm:$0x7]  ;;  %3572 = vmatpush3.bf16.msra.mxu1 %v4402_v31  ;;  %v1104_v58 = vld [vmem:[#allocation3 + $0x62] ss:$2 sm:$0x7] }
 0x1b4   :  { %3573 = vmatprep.subr.bf16.mxu1 %v4403_v41  ;;  %v985_v44 = vrot.slane %v983_v35, 4  ;;  %v993_v60 = vrot.slane %v991_v54, 1  ;;  %v1126_v61 = vld [vmem:[#allocation3 + $0x23] ss:$2 sm:$0x7]  ;;  %v1106_v63 = vrot.slane %v1104_v58, 4 }
 0x1b5   :  { %1055 = vrot.lane.b32.xlu1 %v1054_v36, %s4428_s2  ;;  %v1024_v36 = vld [vmem:[#allocation3 + $0x70] ss:$2 sm:$0x7]  ;;  %v1128_v1 = vrot.slane %v1126_v61, 5 }
 0x1b6   :  { %v1026_v39 = vrot.slane %v1024_v36, 1  ;;  %v1142_v2 = vld [vmem:[#allocation3 + $0x53] ss:$2 sm:$0x7] }
 0x1b7   :  { %1258 = vrot.lane.b32.xlu0 %v1257_v47, %s4427_s13  ;;  %v1192_v47 = vrot.slane %v1190_v43, 1  ;;  %3574 = vmatpush3.bf16.msra.mxu1 %v4404_v42  ;;  %v1067_v6 = vld [vmem:[#allocation3 + $0x71] ss:$2 sm:$0x7] }
 0x1b8   :  { %1028 = vst.msk [vmem:[#allocation4 + $0x30] sm:$0x80] %vm642_vm9, %v1026_v39  ;;  %3575 = vmatprep.subr.bf16.mxu1 %v4405_v49  ;;  %v1069_v11 = vrot.slane %v1067_v6, 1  ;;  %v1270_v12 = vld [vmem:[#allocation3 + $0x6a] ss:$2 sm:$0x7] }
 0x1b9   :  { %1100 = vrot.lane.b32.xlu1 %v1099_v53, %s4427_s13  ;;  %1029 = vst.msk [vmem:[#allocation4 + $0x50] sm:$0x3] %vm644_vm10, %v1026_v39  ;;  %1195 = vst.msk [vmem:[#allocation4 + $0x58] sm:$0x3] %vm644_vm10, %v1192_v47  ;;  %v1061_v53 = vrot.slane %v1059_v46, 4  ;;  %v1272_v16 = vrot.slane %v1270_v12, 4 }
 0x1ba   :  { %1194 = vst.msk [vmem:[#allocation4 + $0x38] sm:$0x80] %vm642_vm9, %v1192_v47  ;;  %v1112_v14 = vld [vmem:[#allocation3 + $0x72] ss:$2 sm:$0x7]  ;;  %vm795_vm9 = vcmask 1044225  }
 0x1bb   :  { %1303 = vrot.lane.b32.xlu0 %v1302_v59, %s4429_s1  ;;  %3576 = vmatpush3.bf16.msra.mxu1 %v4406_v50  ;;  %v4409_v59 = vld [vmem:[%s6255_s3 + $0xc0] sm:$0xff]   ;;  %v1315_v17 = vld [vmem:[#allocation3 + $0x6b] ss:$2 sm:$0x7]  ;;  %v1114_v19 = vrot.slane %v1112_v14, 1  ;;  %vm690_vm10 = vcmask 522500  }
 0x1bc   :  { %3577 = vmatprep.subr.bf16.mxu1 %v4407_v55  ;;  %v1233_v20 = vld [vmem:[#allocation3 + $0x79] ss:$2 sm:$0x7]  ;;  %v1149_v23 = vld [vmem:[#allocation3 + $0x63] ss:$2 sm:$0x7] }
 0x1bd   :  { %1221 = vrot.lane.b32.xlu1 %v1220_v0, %s4428_s2  ;;  %v1134_v0 = vld [vmem:[#allocation3 + $0x33] ss:$2 sm:$0x7]  ;;  %v1235_v25 = vrot.slane %v1233_v20, 1  ;;  %v1151_v28 = vrot.slane %v1149_v23, 4 }
 0x1be   :  { %v1136_v4 = vrot.slane %v1134_v0, 2  ;;  %v1278_v26 = vld [vmem:[#allocation3 + $0x7a] ss:$2 sm:$0x7] }
 0x1bf   :  { %687 = vrot.lane.b32.xlu0 %v686_v5, %s4428_s2  ;;  %3578 = vmatpush3.bf16.msra.mxu1 %v4408_v56  ;;  %v1225_v5 = vld [vmem:[#allocation3 + $0x69] ss:$2 sm:$0x7]  ;;  %v1280_v30 = vrot.slane %v1278_v26, 1 }
 0x1c0   :  { %3591 = vmatprep.subr.bf16.mxu1 %v4409_v59  ;;  %v1227_v10 = vrot.slane %v1225_v5, 4  ;;  %v1323_v31 = vld [vmem:[#allocation3 + $0x7b] ss:$2 sm:$0x7] }
 0x1c1   :  { %1266 = vrot.lane.b32.xlu1 %v1265_v8, %s4427_s13  ;;  %v1144_v8 = vrot.slane %v1142_v2, 7  ;;  %v1325_v34 = vrot.slane %v1323_v31, 1  ;;  %v1157_v35 = vld [vmem:[#allocation3 + $0x73] ss:$2 sm:$0x7] }
 0x1c2   :  { %v1159_v38 = vrot.slane %v1157_v35, 1  ;;  %v4413_v35 = vld [vmem:[%s6255_s3 + $0xd0] sm:$0xff]  }
 0x1c3   :  { %744 = vrot.lane.b32.xlu0 %v743_v9, %s4427_s13 }
 0x1c5   :  { %1311 = vrot.lane.b32.xlu1 %v1310_v15, %s4429_s1 }
 0x1c7   :  { %801 = vrot.lane.b32.xlu0 %v800_v18, %s4429_s1 }
 0x1c9   :  { %696 = vrot.lane.b32.xlu1 %v695_v22, %s4428_s2  ;;  %v1317_v22 = vrot.slane %v1315_v17, 4 }
 0x1cb   :  { %888 = vrot.lane.b32.xlu0 %v887_v24, %s4428_s2 }
 0x1cd   :  { %753 = vrot.lane.b32.xlu1 %v752_v33, %s4427_s13 }
 0x1cf   :  { %937 = vrot.lane.b32.xlu0 %v936_v37, %s4427_s13 }
 0x1d1   :  { %810 = vrot.lane.b32.xlu1 %v809_v40, %s4429_s1 }
 0x1d3   :  { %986 = vrot.lane.b32.xlu0 %v985_v44, %s4429_s1 }
 0x1d5   :  { %896 = vrot.lane.b32.xlu1 %v895_v48, %s4428_s2 }
 0x1d7   :  { %1122 = vrot.lane.b32.xlu0 %v1120_v51, %s4429_s1 }
 0x1d9   :  { %945 = vrot.lane.b32.xlu1 %v944_v52, %s4427_s13  ;;  %v650_v57 = vpop.permute.xlu0 %649 }
 0x1da   :  { %653 = vst.msk [vmem:[#allocation4] sm:$0x7] %vm652_vm11, %v650_v57 }
 0x1db   :  { %1062 = vrot.lane.b32.xlu0 %v1061_v53, %s4428_s2 }
 0x1dd   :  { %994 = vrot.lane.b32.xlu1 %v993_v60, %s4429_s1  ;;  %v707_v62 = vpop.permute.xlu0 %706 }
 0x1de   :  { %710 = vst.msk [vmem:[#allocation4] sm:$0x7] %vm709_vm12, %v707_v62 }
 0x1df   :  { %1107 = vrot.lane.b32.xlu0 %v1106_v63, %s4427_s13 }
 0x1e1   :  { %1129 = vrot.lane.b32.xlu1 %v1128_v1, %s4429_s1  ;;  %v764_v3 = vpop.permute.xlu0 %763 }
 0x1e2   :  { %767 = vst.msk [vmem:[#allocation4] sm:$0x7] %vm766_vm13, %v764_v3 }
 0x1e3   :  { %v659_v7 = vpop.permute.xlu1 %658  ;;  %1137 = vrot.lane.b32.xlu0 %v1136_v4, %s4429_s1 }
 0x1e4   :  { %662 = vst.msk [vmem:[#allocation4] sm:$0x38] %vm661_vm14, %v659_v7 }
 0x1e5   :  { %1145 = vrot.lane.b32.xlu1 %v1144_v8, %s4429_s1  ;;  %v856_v9 = vpop.permute.xlu0 %855 }
 0x1e6   :  { %858 = vst.msk [vmem:[#allocation4 + $0x8] sm:$0x7] %vm652_vm11, %v856_v9 }
 0x1e7   :  { %v716_v13 = vpop.permute.xlu1 %715  ;;  %1228 = vrot.lane.b32.xlu0 %v1227_v10, %s4428_s2 }
 0x1e8   :  { %719 = vst.msk [vmem:[#allocation4] sm:$0x38] %vm718_vm15, %v716_v13 }
 0x1e9   :  { %1070 = vrot.lane.b32.xlu1 %v1069_v11, %s4428_s2  ;;  %v905_v15 = vpop.permute.xlu0 %904 }
 0x1ea   :  { %907 = vst.msk [vmem:[#allocation4 + $0x8] sm:$0x7] %vm709_vm12, %v905_v15 }
 0x1eb   :  { %v773_v18 = vpop.permute.xlu1 %772  ;;  %1273 = vrot.lane.b32.xlu0 %v1272_v16, %s4427_s13 }
 0x1ec   :  { %776 = vst.msk [vmem:[#allocation4] sm:$0x38] %vm775_vm0, %v773_v18 }
 0x1ed   :  { %1115 = vrot.lane.b32.xlu1 %v1114_v19, %s4427_s13  ;;  %v954_v21 = vpop.permute.xlu0 %953 }
 0x1ee   :  { %956 = vst.msk [vmem:[#allocation4 + $0x8] sm:$0x7] %vm766_vm13, %v954_v21 }
 0x1ef   :  { %v864_v24 = vpop.permute.xlu1 %863  ;;  %1318 = vrot.lane.b32.xlu0 %v1317_v22, %s4429_s1 }
 0x1f0   :  { %866 = vst.msk [vmem:[#allocation4 + $0x8] sm:$0x38] %vm661_vm14, %v864_v24 }
 0x1f1   :  { %1236 = vrot.lane.b32.xlu1 %v1235_v25, %s4428_s2  ;;  %v1033_v27 = vpop.permute.xlu0 %1032 }
 0x1f2   :  { %1035 = vst.msk [vmem:[#allocation4 + $0x10] sm:$0x7] %vm652_vm11, %v1033_v27  ;;  %v4410_v27 = vld [vmem:[%s6255_s3 + $0x80] sm:$0xff]  }
 0x1f3   :  { %v913_v29 = vpop.permute.xlu1 %912  ;;  %1152 = vrot.lane.b32.xlu0 %v1151_v28, %s4429_s1 }
 0x1f4   :  { %915 = vst.msk [vmem:[#allocation4 + $0x8] sm:$0x38] %vm718_vm15, %v913_v29 }
 0x1f5   :  { %1281 = vrot.lane.b32.xlu1 %v1280_v30, %s4427_s13  ;;  %v1078_v32 = vpop.permute.xlu0 %1077  ;;  %v4411_v30 = vld [vmem:[%s6255_s3 + $0xc8] sm:$0xff]  }
 0x1f6   :  { %1080 = vst.msk [vmem:[#allocation4 + $0x10] sm:$0x7] %vm709_vm12, %v1078_v32 }
 0x1f7   :  { %v962_v33 = vpop.permute.xlu1 %961 }
 0x1f8   :  { %964 = vst.msk [vmem:[#allocation4 + $0x8] sm:$0x38] %vm775_vm0, %v962_v33  ;;  %v4412_v33 = vld [vmem:[%s6255_s3 + $0x88] sm:$0xff]  }
 0x1f9   :  { %1326 = vrot.lane.b32.xlu1 %v1325_v34, %s4429_s1  ;;  %v1199_v36 = vpop.permute.xlu0 %1198 }
 0x1fa   :  { %1201 = vst.msk [vmem:[#allocation4 + $0x18] sm:$0x7] %vm652_vm11, %v1199_v36  ;;  %vm747_vm11 = vcmask 784900  }
 0x1fb   :  { %v1040_v37 = vpop.permute.xlu1 %1039 }
 0x1fc   :  { %1042 = vst.msk [vmem:[#allocation4 + $0x10] sm:$0x38] %vm661_vm14, %v1040_v37 }
 0x1fd   :  { %1160 = vrot.lane.b32.xlu1 %v1159_v38, %s4429_s1  ;;  %v1244_v39 = vpop.permute.xlu0 %1243  ;;  %v4414_v38 = vld [vmem:[%s6255_s3 + $0x90] sm:$0xff]  }
 0x1fe   :  { %1246 = vst.msk [vmem:[#allocation4 + $0x18] sm:$0x7] %vm709_vm12, %v1244_v39  ;;  %vm804_vm12 = vcmask 1047300  }
 0x1ff   :  { %v1085_v40 = vpop.permute.xlu1 %1084 }
 0x200   :  { %1087 = vst.msk [vmem:[#allocation4 + $0x10] sm:$0x38] %vm718_vm15, %v1085_v40 }
 0x201   :  { %v1289_v41 = vpop.permute.xlu0 %1288 }
 0x202   :  { %1291 = vst.msk [vmem:[#allocation4 + $0x18] sm:$0x7] %vm766_vm13, %v1289_v41  ;;  %v4415_v41 = vld [vmem:[%s6255_s3 + $0xd8] sm:$0xff]  }
 0x203   :  { %v1206_v42 = vpop.permute.xlu1 %1205 }
 0x204   :  { %1208 = vst.msk [vmem:[#allocation4 + $0x18] sm:$0x38] %vm661_vm14, %v1206_v42  ;;  %vm699_vm14 = vcmask 523527  }
 0x205   :  { %v668_v43 = vpop.permute.xlu0 %667 }
 0x206   :  { %671 = vst.msk [vmem:[#allocation4] sm:$0xc0] %vm670_vm1, %v668_v43 }
 0x207   :  { %673 = vst.msk [vmem:[#allocation4 + $0x20] sm:$0x1] %vm672_vm2, %v668_v43  ;;  %v1251_v44 = vpop.permute.xlu1 %1250  ;;  %v4416_v43 = vld [vmem:[%s6255_s3 + $0x98] sm:$0xff]  }
 0x208   :  { %1253 = vst.msk [vmem:[#allocation4 + $0x18] sm:$0x38] %vm718_vm15, %v1251_v44  ;;  %vm701_vm15 = vcmask 517376  }
 0x209   :  { %v725_v45 = vpop.permute.xlu0 %724 }
 0x20a   :  { %728 = vst.msk [vmem:[#allocation4] sm:$0xc0] %vm727_vm3, %v725_v45 }
 0x20b   :  { %730 = vst.msk [vmem:[#allocation4 + $0x20] sm:$0x1] %vm729_vm4, %v725_v45  ;;  %v1296_v46 = vpop.permute.xlu1 %1295  ;;  %v4417_v45 = vld [vmem:[%s6255_s3 + $0xe0] sm:$0xff]  }
 0x20c   :  { %1298 = vst.msk [vmem:[#allocation4 + $0x18] sm:$0x38] %vm775_vm0, %v1296_v46 }
 0x20d   :  { %v782_v47 = vpop.permute.xlu0 %781 }
 0x20e   :  { %785 = vst.msk [vmem:[#allocation4] sm:$0xc0] %vm784_vm5, %v782_v47 }
 0x20f   :  { %787 = vst.msk [vmem:[#allocation4 + $0x20] sm:$0x1] %vm786_vm6, %v782_v47  ;;  %v679_v48 = vpop.permute.xlu1 %678  ;;  %v4418_v47 = vld [vmem:[%s6255_s3 + $0xa0] sm:$0xff]  }
 0x210   :  { %682 = vst.msk [vmem:[#allocation4 + $0x20] sm:$0xe] %vm681_vm7, %v679_v48  ;;  %v4419_v48 = vld [vmem:[%s6255_s3 + $0xe8] sm:$0xff]  }
 0x211   :  { %v872_v49 = vpop.permute.xlu0 %871 }
 0x212   :  { %874 = vst.msk [vmem:[#allocation4 + $0x8] sm:$0xc0] %vm670_vm1, %v872_v49 }
 0x213   :  { %875 = vst.msk [vmem:[#allocation4 + $0x28] sm:$0x1] %vm672_vm2, %v872_v49  ;;  %v736_v50 = vpop.permute.xlu1 %735 }
 0x214   :  { %739 = vst.msk [vmem:[#allocation4 + $0x20] sm:$0xe] %vm738_vm8, %v736_v50  ;;  %v4420_v50 = vld [vmem:[%s6255_s3 + $0xa8] sm:$0xff]  }
 0x215   :  { %v921_v51 = vpop.permute.xlu0 %920  ;;  %v1331_v26 = vld [vmem:[#allocation4] sm:$0xff] }
 0x216   :  { %923 = vst.msk [vmem:[#allocation4 + $0x8] sm:$0xc0] %vm727_vm3, %v921_v51 }
 0x217   :  { %924 = vst.msk [vmem:[#allocation4 + $0x28] sm:$0x1] %vm729_vm4, %v921_v51  ;;  %v793_v52 = vpop.permute.xlu1 %792  ;;  %v4421_v51 = vld [vmem:[%s6255_s3 + $0xf0] sm:$0xff]  }
 0x218   :  { %796 = vst.msk [vmem:[#allocation4 + $0x20] sm:$0xe] %vm795_vm9, %v793_v52 }
 0x219   :  { %v970_v53 = vpop.permute.xlu0 %969 }
 0x21a   :  { %972 = vst.msk [vmem:[#allocation4 + $0x8] sm:$0xc0] %vm784_vm5, %v970_v53 }
 0x21b   :  { %973 = vst.msk [vmem:[#allocation4 + $0x28] sm:$0x1] %vm786_vm6, %v970_v53  ;;  %v881_v54 = vpop.permute.xlu1 %880  ;;  %v4422_v53 = vld [vmem:[%s6255_s3 + $0xb0] sm:$0xff]  }
 0x21c   :  { %883 = vst.msk [vmem:[#allocation4 + $0x28] sm:$0xe] %vm681_vm7, %v881_v54  ;;  %v4423_v54 = vld [vmem:[%s6255_s3 + $0xf8] sm:$0xff]  }
 0x21d   :  { %v1048_v55 = vpop.permute.xlu0 %1047 }
 0x21e   :  { %1050 = vst.msk [vmem:[#allocation4 + $0x10] sm:$0xc0] %vm670_vm1, %v1048_v55 }
 0x21f   :  { %1051 = vst.msk [vmem:[#allocation4 + $0x30] sm:$0x1] %vm672_vm2, %v1048_v55  ;;  %v930_v56 = vpop.permute.xlu1 %929 }
 0x220   :  { %932 = vst.msk [vmem:[#allocation4 + $0x28] sm:$0xe] %vm738_vm8, %v930_v56 }
 0x221   :  { %v1093_v57 = vpop.permute.xlu0 %1092  ;;  %v1332_v22 = vld [vmem:[#allocation4 + $0x8] sm:$0xff] }
 0x222   :  { %1095 = vst.msk [vmem:[#allocation4 + $0x10] sm:$0xc0] %vm727_vm3, %v1093_v57 }
 0x223   :  { %1096 = vst.msk [vmem:[#allocation4 + $0x30] sm:$0x1] %vm729_vm4, %v1093_v57  ;;  %v979_v58 = vpop.permute.xlu1 %978 }
 0x224   :  { %981 = vst.msk [vmem:[#allocation4 + $0x28] sm:$0xe] %vm795_vm9, %v979_v58  ;;  %v4424_v58 = vld [vmem:[%s6255_s3 + $0xb8] sm:$0xff]  }
 0x225   :  { %v1214_v59 = vpop.permute.xlu0 %1213 }
 0x226   :  { %1216 = vst.msk [vmem:[#allocation4 + $0x18] sm:$0xc0] %vm670_vm1, %v1214_v59  ;;  %vm756_vm1 = vcmask 785927  }
 0x227   :  { %1217 = vst.msk [vmem:[#allocation4 + $0x38] sm:$0x1] %vm672_vm2, %v1214_v59  ;;  %v1056_v60 = vpop.permute.xlu1 %1055  ;;  %vm758_vm2 = vcmask 779776  }
 0x228   :  { %1058 = vst.msk [vmem:[#allocation4 + $0x30] sm:$0xe] %vm681_vm7, %v1056_v60 }
 0x229   :  { %v1259_v61 = vpop.permute.xlu0 %1258 }
 0x22a   :  { %1261 = vst.msk [vmem:[#allocation4 + $0x18] sm:$0xc0] %vm727_vm3, %v1259_v61  ;;  %vm813_vm3 = vcmask 1048327  }
 0x22b   :  { %1262 = vst.msk [vmem:[#allocation4 + $0x38] sm:$0x1] %vm729_vm4, %v1259_v61  ;;  %v1101_v62 = vpop.permute.xlu1 %1100  ;;  %vm815_vm4 = vcmask 1042176  }
 0x22c   :  { %1103 = vst.msk [vmem:[#allocation4 + $0x30] sm:$0xe] %vm738_vm8, %v1101_v62 }
 0x22d   :  { %v1304_v63 = vpop.permute.xlu0 %1303 }
 0x22e   :  { %1306 = vst.msk [vmem:[#allocation4 + $0x18] sm:$0xc0] %vm784_vm5, %v1304_v63 }
 0x22f   :  { %1307 = vst.msk [vmem:[#allocation4 + $0x38] sm:$0x1] %vm786_vm6, %v1304_v63  ;;  %v1222_v0 = vpop.permute.xlu1 %1221 }
 0x230   :  { %1224 = vst.msk [vmem:[#allocation4 + $0x38] sm:$0xe] %vm681_vm7, %v1222_v0 }
 0x231   :  { %v688_v1 = vpop.permute.xlu0 %687 }
 0x232   :  { %691 = vst.msk [vmem:[#allocation4 + $0x20] sm:$0x70] %vm690_vm10, %v688_v1 }
 0x233   :  { %v1267_v2 = vpop.permute.xlu1 %1266 }
 0x234   :  { %1269 = vst.msk [vmem:[#allocation4 + $0x38] sm:$0xe] %vm738_vm8, %v1267_v2  ;;  %v2039_v2 = vld [vmem:[%s6256_s5 + $0x80] sm:$0xff] }
 0x235   :  { %v745_v3 = vpop.permute.xlu0 %744  ;;  %v1334_v55 = vld [vmem:[#allocation4 + $0x18] sm:$0xff] }
 0x236   :  { %748 = vst.msk [vmem:[#allocation4 + $0x20] sm:$0x70] %vm747_vm11, %v745_v3  ;;  %v2040_v3 = vld [vmem:[%s6256_s5 + $0x88] sm:$0xff] }
 0x237   :  { %v1312_v4 = vpop.permute.xlu1 %1311 }
 0x238   :  { %1314 = vst.msk [vmem:[#allocation4 + $0x38] sm:$0xe] %vm795_vm9, %v1312_v4  ;;  %v2023_v4 = vld [vmem:[%s6256_s5] sm:$0xff] }
 0x239   :  { %v802_v5 = vpop.permute.xlu0 %801 }
 0x23a   :  { %805 = vst.msk [vmem:[#allocation4 + $0x20] sm:$0x70] %vm804_vm12, %v802_v5  ;;  %v4067_v5 = vpack.c.bf16 %v2040_v3, %v2039_v2 }
 0x23b   :  { %v697_v6 = vpop.permute.xlu1 %696 }
 0x23c   :  { %700 = vst.msk [vmem:[#allocation4 + $0x20] sm:$0x80] %vm699_vm14, %v697_v6  ;;  %4068 = vmatprep.subr.bf16.mxu0 %v4067_v5  ;;  %v2080_v5 = vld [vmem:[%s6256_s5 + $0x1c8] sm:$0xff] }
 0x23d   :  { %702 = vst.msk [vmem:[#allocation4 + $0x40] sm:$0x3] %vm701_vm15, %v697_v6  ;;  %v889_v7 = vpop.permute.xlu0 %888  ;;  %v2024_v6 = vld [vmem:[%s6256_s5 + $0x8] sm:$0xff] }
 0x23e   :  { %891 = vst.msk [vmem:[#allocation4 + $0x28] sm:$0x70] %vm690_vm10, %v889_v7  ;;  %v4069_v7 = vpack.c.bf16 %v2024_v6, %v2023_v4  ;;  %v2079_v4 = vld [vmem:[%s6256_s5 + $0x1c0] sm:$0xff] }
 0x23f   :  { %v754_v8 = vpop.permute.xlu1 %753 }
 0x240   :  { %757 = vst.msk [vmem:[#allocation4 + $0x20] sm:$0x80] %vm756_vm1, %v754_v8  ;;  %4070 = vmatpush3.bf16.msra.mxu0 %v4069_v7  ;;  %v2063_v7 = vld [vmem:[%s6256_s5 + $0x140] sm:$0xff] }
 0x241   :  { %759 = vst.msk [vmem:[#allocation4 + $0x40] sm:$0x3] %vm758_vm2, %v754_v8  ;;  %v938_v9 = vpop.permute.xlu0 %937  ;;  %v2041_v8 = vld [vmem:[%s6256_s5 + $0x90] sm:$0xff] }
 0x242   :  { %940 = vst.msk [vmem:[#allocation4 + $0x28] sm:$0x70] %vm747_vm11, %v938_v9  ;;  %v2042_v9 = vld [vmem:[%s6256_s5 + $0x98] sm:$0xff] }
 0x243   :  { %v811_v10 = vpop.permute.xlu1 %810 }
 0x244   :  { %814 = vst.msk [vmem:[#allocation4 + $0x20] sm:$0x80] %vm813_vm3, %v811_v10 }
 0x245   :  { %816 = vst.msk [vmem:[#allocation4 + $0x40] sm:$0x3] %vm815_vm4, %v811_v10  ;;  %v987_v11 = vpop.permute.xlu0 %986  ;;  %v2025_v10 = vld [vmem:[%s6256_s5 + $0x10] sm:$0xff] }
 0x246   :  { %989 = vst.msk [vmem:[#allocation4 + $0x28] sm:$0x70] %vm804_vm12, %v987_v11  ;;  %v4071_v11 = vpack.c.bf16 %v2042_v9, %v2041_v8  ;;  %v2064_v8 = vld [vmem:[%s6256_s5 + $0x148] sm:$0xff]  ;;  %v4115_v9 = vpack.c.bf16 %v2080_v5, %v2079_v4 }
 0x247   :  { %v897_v12 = vpop.permute.xlu1 %896 }
 0x248   :  { %899 = vst.msk [vmem:[#allocation4 + $0x28] sm:$0x80] %vm699_vm14, %v897_v12  ;;  %4072 = vmatprep.subr.bf16.mxu0 %v4071_v11  ;;  %v2082_v11 = vld [vmem:[%s6256_s5 + $0x1d8] sm:$0xff] }
 0x249   :  { %900 = vst.msk [vmem:[#allocation4 + $0x48] sm:$0x3] %vm701_vm15, %v897_v12  ;;  %v1123_v13 = vpop.permute.xlu0 %1122  ;;  %v2026_v12 = vld [vmem:[%s6256_s5 + $0x18] sm:$0xff] }
 0x24a   :  { %1125 = vst.msk [vmem:[#allocation4 + $0x10] sm:$0x7] %vm766_vm13, %v1123_v13  ;;  %v2043_v13 = vld [vmem:[%s6256_s5 + $0xa0] sm:$0xff]  ;;  %vm4432_vm13 = vmmov 0  }
 0x24b   :  { %v946_v14 = vpop.permute.xlu1 %945  ;;  %v1335_v20 = vld [vmem:[#allocation4 + $0x20] sm:$0xff] }
 0x24c   :  { %948 = vst.msk [vmem:[#allocation4 + $0x28] sm:$0x80] %vm756_vm1, %v946_v14  ;;  %v1343_v29 = vpack.c.bf16 %v1335_v20, %v1331_v26  ;;  %v1339_v36 = vld [vmem:[#allocation4 + $0x40] sm:$0x3]  ;;  %v2046_v20 = vld [vmem:[%s6256_s5 + $0xb8] sm:$0xff]  ;;  %v4430_v26 = vmov 0.0  }
 0x24d   :  { %949 = vst.msk [vmem:[#allocation4 + $0x48] sm:$0x3] %vm758_vm2, %v946_v14  ;;  %v1063_v15 = vpop.permute.xlu0 %1062  ;;  %v1347_v40 = vpack.c.bf16 %v1339_v36, %v1339_v36  ;;  %v2044_v14 = vld [vmem:[%s6256_s5 + $0xa8] sm:$0xff]  ;;  %1713 = vst [vmem:[#allocation6] sm:$0xff] %v4430_v26 }
 0x24e   :  { %1065 = vst.msk [vmem:[#allocation4 + $0x30] sm:$0x70] %vm690_vm10, %v1063_v15  ;;  %v4073_v15 = vpack.c.bf16 %v2026_v12, %v2025_v10  ;;  %1714 = vst [vmem:[#allocation6 + $0x8] sm:$0xff] %v4430_v26  ;;  %v2056_v36 = vld [vmem:[%s6256_s5 + $0x108] sm:$0xff]  ;;  %v2081_v10 = vld [vmem:[%s6256_s5 + $0x1d0] sm:$0xff] }
 0x24f   :  { %v995_v16 = vpop.permute.xlu1 %994  ;;  %1715 = vst [vmem:[#allocation6 + $0x10] sm:$0xff] %v4430_v26  ;;  %1716 = vst [vmem:[#allocation6 + $0x18] sm:$0xff] %v4430_v26  ;;  %v2053_v12 = vld [vmem:[%s6256_s5 + $0xf0] sm:$0xff] }
 0x250   :  { %997 = vst.msk [vmem:[#allocation4 + $0x28] sm:$0x80] %vm813_vm3, %v995_v16  ;;  %4074 = vmatpush3.bf16.msra.mxu0 %v4073_v15  ;;  %1717 = vst [vmem:[#allocation6 + $0x20] sm:$0xff] %v4430_v26  ;;  %v2038_v15 = vld [vmem:[%s6256_s5 + $0x78] sm:$0xff] }
 0x251   :  { %998 = vst.msk [vmem:[#allocation4 + $0x48] sm:$0x3] %vm815_vm4, %v995_v16  ;;  %v1108_v17 = vpop.permute.xlu0 %1107  ;;  %v4075_v16 = vpack.c.bf16 %v2044_v14, %v2043_v13  ;;  %1718 = vst [vmem:[#allocation6 + $0x28] sm:$0xff] %v4430_v26  ;;  %v2054_v13 = vld [vmem:[%s6256_s5 + $0xf8] sm:$0xff]  ;;  %v2037_v14 = vld [vmem:[%s6256_s5 + $0x70] sm:$0xff] }
 0x252   :  { %1110 = vst.msk [vmem:[#allocation4 + $0x30] sm:$0x70] %vm747_vm11, %v1108_v17  ;;  %v2027_v17 = vld [vmem:[%s6256_s5 + $0x20] sm:$0xff]  ;;  %1719 = vst [vmem:[#allocation6 + $0x30] sm:$0x3] %v4430_v26 }
 0x253   :  { %v1130_v18 = vpop.permute.xlu1 %1129  ;;  %4076 = vmatprep.subr.bf16.mxu0 %v4075_v16  ;;  %v4095_v16 = vpack.c.bf16 %v2054_v13, %v2053_v12 }
 0x254   :  { %1132 = vst.msk [vmem:[#allocation4 + $0x10] sm:$0x38] %vm775_vm0, %v1130_v18  ;;  %v2028_v18 = vld [vmem:[%s6256_s5 + $0x28] sm:$0xff] }
 0x255   :  { %v1138_v19 = vpop.permute.xlu0 %1137 }
 0x256   :  { %1140 = vst.msk [vmem:[#allocation4 + $0x10] sm:$0xc0] %vm784_vm5, %v1138_v19 }
 0x257   :  { %1141 = vst.msk [vmem:[#allocation4 + $0x30] sm:$0x1] %vm786_vm6, %v1138_v19  ;;  %v1146_v21 = vpop.permute.xlu1 %1145  ;;  %v1336_v23 = vld [vmem:[#allocation4 + $0x28] sm:$0xff]  ;;  %v2045_v19 = vld [vmem:[%s6256_s5 + $0xb0] sm:$0xff] }
 0x258   :  { %v1340_v24 = vld [vmem:[#allocation4 + $0x48] sm:$0x3]  ;;  %1148 = vst.msk [vmem:[#allocation4 + $0x30] sm:$0xe] %vm795_vm9, %v1146_v21  ;;  %v1344_v25 = vpack.c.bf16 %v1336_v23, %v1332_v22  ;;  %v4077_v21 = vpack.c.bf16 %v2028_v18, %v2027_v17  ;;  %v4079_v22 = vpack.c.bf16 %v2046_v20, %v2045_v19  ;;  %v2029_v23 = vld [vmem:[%s6256_s5 + $0x30] sm:$0xff]  ;;  %v4097_v17 = vpack.c.bf16 %v2038_v15, %v2037_v14 }
 0x259   :  { %v1229_v28 = vpop.permute.xlu0 %1228  ;;  %v1348_v31 = vpack.c.bf16 %v1340_v24, %v1340_v24  ;;  %v2030_v24 = vld [vmem:[%s6256_s5 + $0x38] sm:$0xff]  ;;  %v4117_v18 = vpack.c.bf16 %v2064_v8, %v2063_v7  ;;  %v2065_v19 = vld [vmem:[%s6256_s5 + $0x150] sm:$0xff]  ;;  %v4119_v20 = vpack.c.bf16 %v2082_v11, %v2081_v10  ;;  %v3464_v10 = vld [vmem:[%s6257_s4] ss:$0 sm:$0xff] }
 0x25a   :  { %1231 = vst.msk [vmem:[#allocation4 + $0x38] sm:$0x70] %vm690_vm10, %v1229_v28  ;;  %1646 = vmatprep.mubr.bf16.mxu1 %v1344_v25  ;;  %4078 = vmatpush3.bf16.msra.mxu0 %v4077_v21  ;;  %v4081_v25 = vpack.c.bf16 %v2030_v24, %v2029_v23  ;;  %v2048_v28 = vld [vmem:[%s6256_s5 + $0xc8] sm:$0xff]  ;;  %v2066_v21 = vld [vmem:[%s6256_s5 + $0x158] sm:$0xff] }
 0x25b   :  { %v1071_v32 = vpop.permute.xlu1 %1070  ;;  %1647 = vmatmul.mubr.bf16.vlgmr.msra.gmra.mrb[0].mxu1 %v1343_v29  ;;  %4080 = vmatprep.subr.bf16.mxu0 %v4079_v22  ;;  %v2083_v22 = vld [vmem:[%s6256_s5 + $0x1e0] sm:$0xff]  ;;  %v1764_v23 = vld [vmem:[#allocation6 + $0x1] sm:$0x7]  ;;  %v2084_v24 = vld [vmem:[%s6256_s5 + $0x1e8] sm:$0xff] }
 0x25c   :  { %1073 = vst.msk [vmem:[#allocation4 + $0x30] sm:$0x80] %vm699_vm14, %v1071_v32  ;;  %3592 = vmatpush3.bf16.msra.mxu1 %v4410_v27  ;;  %1654 = vmatprep.mubr.bf16.mxu1 %v1348_v31  ;;  %v2047_v27 = vld [vmem:[%s6256_s5 + $0xc0] sm:$0xff]  ;;  %v2032_v31 = vld [vmem:[%s6256_s5 + $0x48] sm:$0xff]  ;;  %1765 = vst [vmem:[#allocation7 + $0x8] sm:$0x7] %v1764_v23 }
 0x25d   :  { %1074 = vst.msk [vmem:[#allocation4 + $0x50] sm:$0x3] %vm701_vm15, %v1071_v32  ;;  %v1274_v34 = vpop.permute.xlu0 %1273  ;;  %3593 = vmatprep.subr.bf16.mxu1 %v4411_v30  ;;  %v1333_v59 = vld [vmem:[#allocation4 + $0x10] sm:$0xff]  ;;  %v4083_v29 = vpack.c.bf16 %v2048_v28, %v2047_v27  ;;  %v2031_v30 = vld [vmem:[%s6256_s5 + $0x40] sm:$0xff]  ;;  %v2104_v27 = vld [vmem:[%s6256_s5 + $0x288] sm:$0xff] }
 0x25e   :  { %1276 = vst.msk [vmem:[#allocation4 + $0x38] sm:$0x70] %vm747_vm11, %v1274_v34  ;;  %4082 = vmatpush3.bf16.msra.mxu0 %v4081_v25  ;;  %v2071_v32 = vld [vmem:[%s6256_s5 + $0x180] sm:$0xff]  ;;  %v2072_v34 = vld [vmem:[%s6256_s5 + $0x188] sm:$0xff] }
 0x25f   :  { %v1116_v37 = vpop.permute.xlu1 %1115  ;;  %4084 = vmatprep.subr.bf16.mxu0 %v4083_v29  ;;  %v2103_v25 = vld [vmem:[%s6256_s5 + $0x280] sm:$0xff]  ;;  %v1735_v29 = vld [vmem:[#allocation6] sm:$0x7] }
 0x260   :  { %1118 = vst.msk [vmem:[#allocation4 + $0x30] sm:$0x80] %vm756_vm1, %v1116_v37  ;;  %3594 = vmatpush3.bf16.msra.mxu1 %v4412_v33  ;;  %v4085_v33 = vpack.c.bf16 %v2032_v31, %v2031_v30  ;;  %v4131_v28 = vpack.c.bf16 %v2104_v27, %v2103_v25  ;;  %v4121_v30 = vpack.c.bf16 %v2066_v21, %v2065_v19  ;;  %1736 = vst [vmem:[#allocation7] sm:$0x7] %v1735_v29  ;;  %v1777_v31 = vld [vmem:[#allocation6 + $0x1a] sm:$0x7] }
 0x261   :  { %1119 = vst.msk [vmem:[#allocation4 + $0x50] sm:$0x3] %vm758_vm2, %v1116_v37  ;;  %v1319_v39 = vpop.permute.xlu0 %1318  ;;  %3595 = vmatprep.subr.bf16.mxu1 %v4413_v35  ;;  %v2055_v35 = vld [vmem:[%s6256_s5 + $0x100] sm:$0xff]  ;;  %v4099_v37 = vpack.c.bf16 %v2072_v34, %v2071_v32  ;;  %v4123_v32 = vpack.c.bf16 %v2084_v24, %v2083_v22  ;;  %v2068_v34 = vld [vmem:[%s6256_s5 + $0x168] sm:$0xff] }
 0x262   :  { %1321 = vst.msk [vmem:[#allocation4 + $0x38] sm:$0x70] %vm804_vm12, %v1319_v39  ;;  %v2073_v39 = vld [vmem:[%s6256_s5 + $0x190] sm:$0xff]  ;;  %4086 = vmatpush3.bf16.msra.mxu0 %v4085_v33  ;;  %v2067_v33 = vld [vmem:[%s6256_s5 + $0x160] sm:$0xff] }
 0x263   :  { %v1237_v42 = vpop.permute.xlu1 %1236  ;;  %1655 = vmatmul.mubr.bf16.gmra.mrb[4].mxu1 %v1347_v40  ;;  %v2074_v40 = vld [vmem:[%s6256_s5 + $0x198] sm:$0xff] }
 0x264   :  { %1239 = vst.msk [vmem:[#allocation4 + $0x38] sm:$0x80] %vm699_vm14, %v1237_v42  ;;  %3596 = vmatpush3.bf16.msra.mxu1 %v4414_v38  ;;  %v4101_v38 = vpack.c.bf16 %v2056_v36, %v2055_v35  ;;  %v1779_v35 = vrot.slane %v1777_v31, 7  ;;  %v1793_v36 = vld [vmem:[#allocation6 + $0x2] sm:$0x7] }
 0x265   :  { %1240 = vst.msk [vmem:[#allocation4 + $0x58] sm:$0x3] %vm701_vm15, %v1237_v42  ;;  %v1153_v44 = vpop.permute.xlu0 %1152  ;;  %3597 = vmatprep.subr.bf16.mxu1 %v4415_v41  ;;  %v4103_v41 = vpack.c.bf16 %v2074_v40, %v2073_v39  ;;  %v2057_v42 = vld [vmem:[%s6256_s5 + $0x110] sm:$0xff]  ;;  %1794 = vst [vmem:[#allocation7 + $0x10] sm:$0x7] %v1793_v36  ;;  %v4125_v40 = vpack.c.bf16 %v2068_v34, %v2067_v33 }
 0x266   :  { %1155 = vst.msk [vmem:[#allocation4 + $0x30] sm:$0x70] %vm804_vm12, %v1153_v44  ;;  %v2049_v44 = vld [vmem:[%s6256_s5 + $0xd0] sm:$0xff]  ;;  %1781 = vst [vmem:[#allocation7 + $0x50] sm:$0xe] %v1779_v35 }
 0x267   :  { %v1282_v46 = vpop.permute.xlu1 %1281  ;;  %v1748_v39 = vld [vmem:[#allocation6 + $0x19] sm:$0x7] }
 0x268   :  { %1284 = vst.msk [vmem:[#allocation4 + $0x38] sm:$0x80] %vm756_vm1, %v1282_v46  ;;  %3598 = vmatpush3.bf16.msra.mxu1 %v4416_v43  ;;  %v2058_v43 = vld [vmem:[%s6256_s5 + $0x118] sm:$0xff] }
 0x269   :  { %1285 = vst.msk [vmem:[#allocation4 + $0x58] sm:$0x3] %vm758_vm2, %v1282_v46  ;;  %3599 = vmatprep.subr.bf16.mxu1 %v4417_v45  ;;  %v4105_v45 = vpack.c.bf16 %v2058_v43, %v2057_v42  ;;  %v2050_v46 = vld [vmem:[%s6256_s5 + $0xd8] sm:$0xff]  ;;  %v2069_v43 = vld [vmem:[%s6256_s5 + $0x170] sm:$0xff] }
 0x26b   :  { %v1327_v49 = vpop.permute.xlu1 %1326 }
 0x26c   :  { %1329 = vst.msk [vmem:[#allocation4 + $0x38] sm:$0x80] %vm813_vm3, %v1327_v49  ;;  %3600 = vmatpush3.bf16.msra.mxu1 %v4418_v47  ;;  %v2033_v47 = vld [vmem:[%s6256_s5 + $0x50] sm:$0xff] }
 0x26d   :  { %1330 = vst.msk [vmem:[#allocation4 + $0x58] sm:$0x3] %vm815_vm4, %v1327_v49  ;;  %3601 = vmatprep.subr.bf16.mxu1 %v4419_v48  ;;  %v2034_v48 = vld [vmem:[%s6256_s5 + $0x58] sm:$0xff]  ;;  %v4087_v49 = vpack.c.bf16 %v2050_v46, %v2049_v44  ;;  %v2136_v46 = vld [vmem:[%s6256_s5 + $0x388] sm:$0xff] }
 0x26e   :  { %v2070_v44 = vld [vmem:[%s6256_s5 + $0x178] sm:$0xff] }
 0x26f   :  { %v1161_v52 = vpop.permute.xlu1 %1160  ;;  %4088 = vmatprep.subr.bf16.mxu0 %v4087_v49 }
 0x270   :  { %1163 = vst.msk [vmem:[#allocation4 + $0x30] sm:$0x80] %vm813_vm3, %v1161_v52  ;;  %3602 = vmatpush3.bf16.msra.mxu1 %v4420_v50  ;;  %v4089_v50 = vpack.c.bf16 %v2034_v48, %v2033_v47  ;;  %v1806_v47 = vld [vmem:[#allocation6 + $0x1b] sm:$0x7]  ;;  %v4129_v48 = vpack.c.bf16 %v2070_v44, %v2069_v43 }
 0x271   :  { %1164 = vst.msk [vmem:[#allocation4 + $0x50] sm:$0x3] %vm815_vm4, %v1161_v52  ;;  %3603 = vmatprep.subr.bf16.mxu1 %v4421_v51  ;;  %v2075_v51 = vld [vmem:[%s6256_s5 + $0x1a0] sm:$0xff]  ;;  %v2076_v52 = vld [vmem:[%s6256_s5 + $0x1a8] sm:$0xff]  ;;  %v1808_v49 = vrot.slane %v1806_v47, 7 }
 0x272   :  { %4090 = vmatpush3.bf16.msra.mxu0 %v4089_v50 }
 0x273   :  { %v1338_v56 = vld [vmem:[#allocation4 + $0x38] sm:$0xff]  ;;  %1810 = vst [vmem:[#allocation7 + $0x58] sm:$0xe] %v1808_v49 }
 0x274   :  { %3604 = vmatpush3.bf16.msra.mxu1 %v4422_v53  ;;  %v1346_v57 = vpack.c.bf16 %v1338_v56, %v1334_v55  ;;  %v1342_v61 = vld [vmem:[#allocation4 + $0x58] sm:$0x3]  ;;  %v2059_v53 = vld [vmem:[%s6256_s5 + $0x120] sm:$0xff]  ;;  %v2060_v55 = vld [vmem:[%s6256_s5 + $0x128] sm:$0xff] }
 0x275   :  { %3605 = vmatprep.subr.bf16.mxu1 %v4423_v54  ;;  %v1350_v63 = vpack.c.bf16 %v1342_v61, %v1342_v61  ;;  %v4107_v54 = vpack.c.bf16 %v2076_v52, %v2075_v51  ;;  %v2077_v56 = vld [vmem:[%s6256_s5 + $0x1b0] sm:$0xff]  ;;  %v2062_v61 = vld [vmem:[%s6256_s5 + $0x138] sm:$0xff]  ;;  %v1945_v51 = vld [vmem:[#allocation6 + $0x15] sm:$0x7] }
 0x276   :  { %1694 = vmatprep.mubr.bf16.mxu1 %v1346_v57  ;;  %v2078_v57 = vld [vmem:[%s6256_s5 + $0x1b8] sm:$0xff]  ;;  %v1947_v52 = vrot.slane %v1945_v51, 2 }
 0x277   :  { %v1337_v60 = vld [vmem:[#allocation4 + $0x30] sm:$0xff] }
 0x278   :  { %3606 = vmatpush3.bf16.msra.mxu1 %v4424_v58  ;;  %v1345_v62 = vpack.c.bf16 %v1337_v60, %v1333_v59  ;;  %v1341_v0 = vld [vmem:[#allocation4 + $0x50] sm:$0x3]  ;;  %v4109_v58 = vpack.c.bf16 %v2060_v55, %v2059_v53  ;;  %v4111_v59 = vpack.c.bf16 %v2078_v57, %v2077_v56  ;;  %1949 = vst [vmem:[#allocation7 + $0x80] ss:$-68 sps:$4 sm:$0xc1] %v1947_v52  }
 0x279   :  { %v1349_v1 = vpack.c.bf16 %v1341_v0, %v1341_v0  ;;  %4100 = vmatprep.subr.bf16.mxu1 %v4099_v37  ;;  %v2061_v60 = vld [vmem:[%s6256_s5 + $0x130] sm:$0xff]  ;;  %v2035_v0 = vld [vmem:[%s6256_s5 + $0x60] sm:$0xff]  ;;  %v1916_v53 = vld [vmem:[#allocation6 + $0x14] sm:$0x7] }
 0x27a   :  { %v4113_v6 = vpack.c.bf16 %v2062_v61, %v2061_v60  ;;  %v2085_v37 = vld [vmem:[%s6256_s5 + $0x1f0] sm:$0xff]  ;;  %v1961_v55 = vld [vmem:[#allocation6 + $0x2e] sm:$0x7] }
 0x27b   :  { %1695 = vmatmul.mubr.bf16.vlgmr.msra.gmra.mrb[8].mxu1 %v1345_v62  ;;  %v2051_v62 = vld [vmem:[%s6256_s5 + $0xe0] sm:$0xff]  ;;  %v1963_v56 = vrot.slane %v1961_v55, 1 }
 0x27c   :  { %1702 = vmatprep.mubr.bf16.mxu1 %v1350_v63  ;;  %4102 = vmatpush3.bf16.msra.mxu1 %v4101_v38  ;;  %v2052_v63 = vld [vmem:[%s6256_s5 + $0xe8] sm:$0xff]  ;;  %v2086_v38 = vld [vmem:[%s6256_s5 + $0x1f8] sm:$0xff]  ;;  %v1932_v57 = vld [vmem:[#allocation6 + $0x2d] sm:$0x7] }
 0x27d   :  { %4104 = vmatprep.subr.bf16.mxu1 %v4103_v41  ;;  %v4091_v2 = vpack.c.bf16 %v2052_v63, %v2051_v62  ;;  %v1750_v41 = vrot.slane %v1748_v39, 7  ;;  %v4127_v42 = vpack.c.bf16 %v2086_v38, %v2085_v37  ;;  %1965 = vst [vmem:[#allocation7 + $0xc8] ss:$-68 sps:$4 sm:$0x83] %v1963_v56   ;;  %v1990_v61 = vld [vmem:[#allocation6 + $0x2f] sm:$0x7] }
 0x27e   :  { %v1992_v62 = vrot.slane %v1990_v61, 1  ;;  %v5287_v37 = vld [vmem:[#allocation6 + $0x1a] sm:$0x7] }
 0x27f   :  { %4092 = vmatprep.subr.bf16.mxu0 %v4091_v2  ;;  %1752 = vst [vmem:[#allocation7 + $0x48] sm:$0xe] %v1750_v41  ;;  %v5289_v38 = vld [vmem:[#allocation6 + $0x19] sm:$0x7]  ;;  %v2639_v39 = vrot.slane %v5287_v37, 7 }
 0x280   :  { %4106 = vmatpush3.bf16.msra.mxu1 %v4105_v45  ;;  %v2135_v45 = vld [vmem:[%s6256_s5 + $0x380] sm:$0xff]  ;;  %1994 = vst [vmem:[#allocation7 + $0xd0] ss:$-68 sps:$4 sm:$0x83] %v1992_v62   ;;  %v5293_v41 = vld [vmem:[#allocation6 + $0x1b] sm:$0x7] }
 0x281   :  { %4108 = vmatprep.subr.bf16.mxu1 %v4107_v54  ;;  %v4163_v50 = vpack.c.bf16 %v2136_v46, %v2135_v45  ;;  %v1918_v54 = vrot.slane %v1916_v53, 2  ;;  %v2668_v62 = vrot.slane %v5293_v41, 7  ;;  %v5467_v41 = vld [vmem:[%s6256_s5 + $0x330] sm:$0xff] }
 0x283   :  { %1703 = vmatmul.mubr.bf16.gmra.mrb[12].mxu1 %v1349_v1  ;;  %v2036_v1 = vld [vmem:[%s6256_s5 + $0x68] sm:$0xff]  ;;  %1920 = vst [vmem:[#allocation7 + $0x78] ss:$-68 sps:$4 sm:$0xc1] %v1918_v54  }
 0x284   :  { %v4093_v3 = vpack.c.bf16 %v2036_v1, %v2035_v0  ;;  %4110 = vmatpush3.bf16.msra.mxu1 %v4109_v58  ;;  %v1934_v58 = vrot.slane %v1932_v57, 1  ;;  %v5298_v57 = vld [vmem:[%s6256_s5 + $0x200] sm:$0xff] }
 0x285   :  { %4112 = vmatprep.subr.bf16.mxu1 %v4111_v59  ;;  %v1974_v59 = vld [vmem:[#allocation6 + $0x16] sm:$0x7] }
 0x286   :  { %4094 = vmatpush3.bf16.msra.mxu0 %v4093_v3  ;;  %1936 = vst [vmem:[#allocation7 + $0xc0] ss:$-68 sps:$4 sm:$0x83] %v1934_v58   ;;  %v1976_v60 = vrot.slane %v1974_v59, 2  ;;  %v5303_v58 = vld [vmem:[%s6256_s5 + $0x208] sm:$0xff] }
 0x287   :  { %4096 = vmatprep.subr.bf16.mxu0 %v4095_v16 }
 0x288   :  { %4114 = vmatpush3.bf16.msra.mxu1 %v4113_v6  ;;  %1978 = vst [vmem:[#allocation7 + $0x88] ss:$-68 sps:$4 sm:$0xc1] %v1976_v60  }
 0x289   :  { %4116 = vmatprep.subr.bf16.mxu1 %v4115_v9 }
 0x28a   :  { %4098 = vmatpush3.bf16.msra.mxu0 %v4097_v17 }
 0x28b   :  { %4132 = vmatprep.subr.bf16.mxu0 %v4131_v28 }
 0x28c   :  { %4118 = vmatpush3.bf16.msra.mxu1 %v4117_v18 }
 0x28d   :  { %4120 = vmatprep.subr.bf16.mxu1 %v4119_v20 }
 0x290   :  { %4122 = vmatpush3.bf16.msra.mxu1 %v4121_v30 }
 0x291   :  { %4124 = vmatprep.subr.bf16.mxu1 %v4123_v32 }
 0x294   :  { %4126 = vmatpush3.bf16.msra.mxu1 %v4125_v40  ;;  %v2610_v40 = vrot.slane %v5289_v38, 7  ;;  %v5444_v38 = vld [vmem:[%s6256_s5 + $0x3b8] sm:$0xff] }
 0x295   :  { %4128 = vmatprep.subr.bf16.mxu1 %v4127_v42 }
 0x298   :  { %4130 = vmatpush3.bf16.msra.mxu1 %v4129_v48 }
 0x299   :  { %4164 = vmatprep.subr.bf16.mxu1 %v4163_v50 }
 0x32e   :  { %v3579_v63 = vpop.f32.mrb[0].mxu1 }
 0x32f   :  { %v3580_v0 = vpop.f32.mrb[1].mxu1 }
 0x330   :  { %v3581_v1 = vadd.f32 %v3580_v0, %v3579_v63  ;;  %v3582_v2 = vpop.f32.mrb[2].mxu1 }
 0x331   :  { %v3583_v3 = vpop.f32.mrb[3].mxu1 }
 0x332   :  { %v3584_v4 = vadd.f32 %v3583_v3, %v3582_v2  ;;  %v1649_v13 = vadd.f32 %v3581_v1, %v3464_v10  ;;  %v5309_v2 = vld [vmem:[%s6256_s5 + $0x290] sm:$0xff]  ;;  %v5314_v3 = vld [vmem:[%s6256_s5 + $0x298] sm:$0xff] }
 0x334   :  { %v1652_v17 = vadd.f32 %v3584_v4, %v3464_v10 }
 0x336   :  { %v3585_v5 = vpop.f32.mrb[4].mxu1 }
 0x337   :  { %v3586_v6 = vpop.f32.mrb[5].mxu1 }
 0x338   :  { %v3587_v7 = vadd.f32 %v3586_v6, %v3585_v5  ;;  %v3588_v8 = vpop.f32.mrb[6].mxu1  ;;  %v2624_v5 = vld [vmem:[#allocation6 + $0x1] sm:$0x7] }
 0x339   :  { %v3589_v9 = vpop.f32.mrb[7].mxu1 }
 0x33a   :  { %v1657_v25 = vadd.f32 %v3587_v7, %v3464_v10  ;;  %v2595_v10 = vld [vmem:[#allocation6] sm:$0x7] }
 0x34e   :  { %v3607_v11 = vpop.f32.mrb[8].mxu1 }
 0x34f   :  { %v3608_v12 = vpop.f32.mrb[9].mxu1 }
 0x350   :  { %v3609_v14 = vadd.f32 %v3608_v12, %v3607_v11  ;;  %v3610_v15 = vpop.f32.mrb[10].mxu1 }
 0x351   :  { %v3611_v16 = vpop.f32.mrb[11].mxu1 }
 0x352   :  { %v1697_v18 = vadd.f32 %v3609_v14, %v1649_v13  ;;  %v3612_v19 = vadd.f32 %v3611_v16, %v3610_v15  ;;  %v5319_v15 = vld [vmem:[%s6256_s5 + $0x300] sm:$0xff]  ;;  %v5324_v16 = vld [vmem:[%s6256_s5 + $0x308] sm:$0xff] }
 0x354   :  { %v1710_v20 = vmax.f32 %v1697_v18, 0.0  ;;  %v1700_v21 = vadd.f32 %v3612_v19, %v1652_v17 }
 0x356   :  { %1720 = vst [vmem:[#allocation5] sm:$0xff] %v1710_v20  ;;  %v1711_v22 = vmax.f32 %v1700_v21, 0.0  ;;  %v3613_v23 = vpop.f32.mrb[12].mxu1  ;;  %v4133_v21 = vpack.c.bf16 %v5303_v58, %v5298_v57  ;;  %v5379_v57 = vld [vmem:[%s6256_s5 + $0x220] sm:$0xff]  ;;  %v5384_v58 = vld [vmem:[%s6256_s5 + $0x228] sm:$0xff] }
 0x357   :  { %v3614_v24 = vpop.f32.mrb[13].mxu1 }
 0x358   :  { %1721 = vst [vmem:[#allocation5 + $0x8] sm:$0xff] %v1711_v22  ;;  %v3615_v27 = vadd.f32 %v3614_v24, %v3613_v23  ;;  %v3616_v28 = vpop.f32.mrb[14].mxu1  ;;  %v5331_v22 = vld [vmem:[%s6256_s5 + $0x210] sm:$0xff]  ;;  %v5336_v23 = vld [vmem:[%s6256_s5 + $0x218] sm:$0xff] }
 0x359   :  { %v3617_v29 = vpop.f32.mrb[15].mxu1  ;;  %v4137_v37 = vpack.c.bf16 %v5336_v23, %v5331_v22 }
 0x35a   :  { %v5282_v30 = vadd.f32 %v3615_v27, %v1657_v25 }
 0x35c   :  { %v1712_v31 = vmax.f32 %v5282_v30, 0.0 }
 0x35d   :  { %v1723_v32 = vld [vmem:[#allocation5] sm:$0x7]  ;;  %v1725_v33 = vld [vmem:[#allocation5 + $0x3] sm:$0x7] }
 0x35e   :  { %1724 = vst [vmem:[#allocation6 + $0x6] sm:$0x7] %v1723_v32  ;;  %1726 = vst [vmem:[#allocation6 + $0xb] sm:$0x7] %v1725_v33  ;;  %v4135_v32 = vpack.c.bf16 %v5314_v3, %v5309_v2  ;;  %v5343_v33 = vld [vmem:[%s6256_s5 + $0x390] sm:$0xff] }
 0x35f   :  { %1722 = vst [vmem:[#allocation5 + $0x10] sm:$0x3] %v1712_v31  ;;  %v1727_v34 = vld [vmem:[#allocation5 + $0x6] sm:$0x7]  ;;  %v1729_v35 = vld [vmem:[#allocation5 + $0x9] sm:$0x7] }
 0x360   :  { %v1731_v36 = vld [vmem:[#allocation5 + $0xc] sm:$0x7]  ;;  %1728 = vst [vmem:[#allocation6 + $0x10] sm:$0x7] %v1727_v34  ;;  %1730 = vst [vmem:[#allocation6 + $0x1f] sm:$0x7] %v1729_v35 }
 0x361   :  { %1732 = vst [vmem:[#allocation6 + $0x24] sm:$0x7] %v1731_v36  ;;  %v5348_v34 = vld [vmem:[%s6256_s5 + $0x398] sm:$0xff] }
 0x365   :  { %v1766_v43 = vld [vmem:[#allocation6 + $0x6] sm:$0x7]  ;;  %v1771_v44 = vld [vmem:[#allocation6 + $0xb] sm:$0x7] }
 0x366   :  { %v1733_v42 = vld [vmem:[#allocation5 + $0xf] sm:$0x7]  ;;  %v1768_v45 = vrot.slane %v1766_v43, 5  ;;  %v1773_v46 = vrot.slane %v1771_v44, 2  ;;  %v1737_v47 = vld [vmem:[#allocation6 + $0x5] sm:$0x7] }
 0x367   :  { %1734 = vst [vmem:[#allocation6 + $0x29] sm:$0x7] %v1733_v42  ;;  %v1742_v48 = vld [vmem:[#allocation6 + $0xa] sm:$0x7]  ;;  %v1739_v49 = vrot.slane %v1737_v47, 5 }
 0x368   :  { %v1744_v50 = vrot.slane %v1742_v48, 2  ;;  %v1782_v51 = vld [vmem:[#allocation6 + $0x1f] sm:$0x7]  ;;  %v1787_v52 = vld [vmem:[#allocation6 + $0x24] sm:$0x7] }
 0x369   :  { %1770 = vst [vmem:[#allocation7 + $0x8] sm:$0x38] %v1768_v45  ;;  %1775 = vst [vmem:[#allocation7 + $0x50] ss:$-68 sps:$4 sm:$0xc1] %v1773_v46   ;;  %v1784_v53 = vrot.slane %v1782_v51, 4 }
 0x36a   :  { %v1789_v54 = vrot.slane %v1787_v52, 1  ;;  %v1822_v55 = vld [vmem:[#allocation6 + $0x5] sm:$0x7]  ;;  %v1824_v56 = vld [vmem:[#allocation6 + $0xa] sm:$0x7]  ;;  %v5358_v46 = vld [vmem:[%s6256_s5 + $0x2a8] sm:$0xff] }
 0x36b   :  { %1741 = vst [vmem:[#allocation7] sm:$0x38] %v1739_v49  ;;  %1746 = vst [vmem:[#allocation7 + $0x48] ss:$-68 sps:$4 sm:$0xc1] %v1744_v50   ;;  %v1826_v59 = vrot.slane %v1824_v56, 5  ;;  %v4165_v56 = vpack.c.bf16 %v5324_v16, %v5319_v15 }
 0x36c   :  { %1823 = vst [vmem:[#allocation7 + $0x18] sm:$0x7] %v1822_v55  ;;  %v1829_v60 = vld [vmem:[#allocation6 + $0xf] sm:$0x7]  ;;  %v1795_v61 = vld [vmem:[#allocation6 + $0x7] sm:$0x7] }
 0x36d   :  { %1786 = vst [vmem:[#allocation7 + $0x50] sm:$0x70] %v1784_v53  ;;  %1791 = vst [vmem:[#allocation7 + $0x98] ss:$-68 sps:$4 sm:$0x83] %v1789_v54   ;;  %v1831_v63 = vrot.slane %v1829_v60, 2 }
 0x36e   :  { %v1797_v0 = vrot.slane %v1795_v61, 5  ;;  %v1800_v1 = vld [vmem:[#allocation6 + $0xc] sm:$0x7]  ;;  %v1753_v4 = vld [vmem:[#allocation6 + $0x1e] sm:$0x7]  ;;  %v5420_v15 = vld [vmem:[%s6256_s5 + $0x328] sm:$0xff] }
 0x36f   :  { %1828 = vst [vmem:[#allocation7 + $0x18] sm:$0x38] %v1826_v59  ;;  %v1802_v6 = vrot.slane %v1800_v1, 2  ;;  %v1755_v7 = vrot.slane %v1753_v4, 4  ;;  %v1758_v8 = vld [vmem:[#allocation6 + $0x23] sm:$0x7] }
 0x370   :  { %v1835_v9 = vld [vmem:[#allocation6 + $0x1e] sm:$0x7]  ;;  %1833 = vst [vmem:[#allocation7 + $0x60] ss:$-68 sps:$4 sm:$0xc1] %v1831_v63   ;;  %v1760_v11 = vrot.slane %v1758_v8, 1 }
 0x371   :  { %1799 = vst [vmem:[#allocation7 + $0x10] sm:$0x38] %v1797_v0  ;;  %v1837_v12 = vrot.slane %v1835_v9, 7  ;;  %v1840_v13 = vld [vmem:[#allocation6 + $0x23] sm:$0x7]  ;;  %v5353_v45 = vld [vmem:[%s6256_s5 + $0x2a0] sm:$0xff] }
 0x372   :  { %v1811_v14 = vld [vmem:[#allocation6 + $0x20] sm:$0x7]  ;;  %1804 = vst [vmem:[#allocation7 + $0x58] ss:$-68 sps:$4 sm:$0xc1] %v1802_v6   ;;  %v1842_v17 = vrot.slane %v1840_v13, 4  ;;  %v4139_v13 = vpack.c.bf16 %v5358_v46, %v5353_v45 }
 0x373   :  { %1757 = vst [vmem:[#allocation7 + $0x48] sm:$0x70] %v1755_v7  ;;  %v1845_v18 = vld [vmem:[#allocation6 + $0x28] sm:$0x7]  ;;  %v1813_v19 = vrot.slane %v1811_v14, 4  ;;  %v1997_v29 = vld [vmem:[#allocation7 + $0x8] sm:$0xff] }
 0x374   :  { %v1816_v20 = vld [vmem:[#allocation6 + $0x25] sm:$0x7]  ;;  %1762 = vst [vmem:[#allocation7 + $0x90] ss:$-68 sps:$4 sm:$0x83] %v1760_v11   ;;  %v1847_v24 = vrot.slane %v1845_v18, 1  ;;  %2238 = vmatprep.mubr.f32.mxu0 %v1997_v29  ;;  %v4141_v29 = vpack.c.bf16 %v5384_v58, %v5379_v57 }
 0x375   :  { %1839 = vst [vmem:[#allocation7 + $0x60] sm:$0xe] %v1837_v12  ;;  %v1818_v25 = vrot.slane %v1816_v20, 1  ;;  %v1880_v27 = vld [vmem:[#allocation6 + $0x7] sm:$0x7]  ;;  %v1996_v43 = vld [vmem:[#allocation7] sm:$0xff] }
 0x376   :  { %v1882_v28 = vld [vmem:[#allocation6 + $0xc] sm:$0x7]  ;;  %1844 = vst [vmem:[#allocation7 + $0x60] sm:$0x70] %v1842_v17  ;;  %1815 = vst [vmem:[#allocation7 + $0x58] sm:$0x70] %v1813_v19  ;;  %2239 = vmatmul.mubr.f32.vlgmr.msra.gmra.mrb[32].mxu0 %v1996_v43 }
 0x377   :  { %1881 = vst [vmem:[#allocation7 + $0x28] sm:$0x7] %v1880_v27  ;;  %v1884_v35 = vrot.slane %v1882_v28, 5  ;;  %v1887_v36 = vld [vmem:[#allocation6 + $0x11] sm:$0x7]  ;;  %v2006_v50 = vld [vmem:[#allocation7 + $0x50] sm:$0xff]  ;;  %4134 = vmatpush3.bf16.msra.mxu0 %v4133_v21 }
 0x378   :  { %v1938_v42 = vld [vmem:[#allocation6 + $0xb] sm:$0x7]  ;;  %2625 = vst [vmem:[#allocation7 + $0x8] sm:$0x7] %v2624_v5  ;;  %v2653_v44 = vld [vmem:[#allocation6 + $0x2] sm:$0x7]  ;;  %2243 = vmatprep.mubr.f32.mxu0 %v2006_v50  ;;  %4136 = vmatprep.subr.bf16.mxu0 %v4135_v32  ;;  %v4167_v5 = vpack.c.bf16 %v5348_v34, %v5343_v33 }
 0x379   :  { %1849 = vst [vmem:[#allocation7 + $0xa8] ss:$-68 sps:$4 sm:$0x83] %v1847_v24   ;;  %1820 = vst [vmem:[#allocation7 + $0xa0] ss:$-68 sps:$4 sm:$0x83] %v1818_v25  }
 0x37a   :  { %v1889_v47 = vrot.slane %v1887_v36, 2  ;;  %1939 = vst [vmem:[#allocation7 + $0x38] sm:$0x7] %v1938_v42  ;;  %v1940_v48 = vld [vmem:[#allocation6 + $0x10] sm:$0x7]  ;;  %v5363_v51 = vld [vmem:[%s6256_s5 + $0x310] sm:$0xff] }
 0x37b   :  { %v1851_v49 = vld [vmem:[#allocation6 + $0x6] sm:$0x7]  ;;  %2596 = vst [vmem:[#allocation7] sm:$0x7] %v2595_v10  ;;  %1886 = vst [vmem:[#allocation7 + $0x28] sm:$0x38] %v1884_v35  ;;  %4138 = vmatpush3.bf16.msra.mxu0 %v4137_v37 }
 0x37c   :  { %v5368_v52 = vld [vmem:[%s6256_s5 + $0x318] sm:$0xff]  ;;  %v1942_v53 = vrot.slane %v1940_v48, 5  ;;  %v5370_v54 = vld [vmem:[#allocation6 + $0x15] sm:$0x7]  ;;  %1852 = vst [vmem:[#allocation7 + $0x20] sm:$0x7] %v1851_v49  ;;  %4140 = vmatprep.subr.bf16.mxu0 %v4139_v13 }
 0x37d   :  { %v1853_v55 = vld [vmem:[#allocation6 + $0xb] sm:$0x7]  ;;  %2641 = vst [vmem:[#allocation7 + $0x50] sm:$0xe] %v2639_v39  ;;  %v1858_v60 = vld [vmem:[#allocation6 + $0x10] sm:$0x7]  ;;  %v4169_v18 = vpack.c.bf16 %v5368_v52, %v5363_v51 }
 0x37e   :  { %1891 = vst [vmem:[#allocation7 + $0x70] ss:$-68 sps:$4 sm:$0xc1] %v1889_v47   ;;  %v1855_v59 = vrot.slane %v1853_v55, 5  ;;  %v1893_v61 = vld [vmem:[#allocation6 + $0x20] sm:$0x7] }
 0x37f   :  { %v1999_v63 = vld [vmem:[#allocation7 + $0x18] sm:$0xff]  ;;  %v5391_v39 = vld [vmem:[%s6256_s5 + $0x3a0] sm:$0xff]  ;;  %1944 = vst [vmem:[#allocation7 + $0x38] sm:$0x38] %v1942_v53  ;;  %v1860_v1 = vrot.slane %v1858_v60, 2  ;;  %v1895_v2 = vrot.slane %v1893_v61, 7  ;;  %4142 = vmatpush3.bf16.msra.mxu0 %v4141_v29 }
 0x380   :  { %v5396_v0 = vld [vmem:[%s6256_s5 + $0x3a8] sm:$0xff]  ;;  %v1898_v3 = vld [vmem:[#allocation6 + $0x25] sm:$0x7]  ;;  %2318 = vmatprep.mubr.f32.mxu1 %v1999_v63  ;;  %v1998_v4 = vld [vmem:[#allocation7 + $0x10] sm:$0xff]  ;;  %1857 = vst [vmem:[#allocation7 + $0x20] sm:$0x38] %v1855_v59 }
 0x381   :  { %v5403_v6 = vld [vmem:[%s6256_s5 + $0x2b0] sm:$0xff]  ;;  %v5408_v7 = vld [vmem:[%s6256_s5 + $0x2b8] sm:$0xff]  ;;  %v1900_v8 = vrot.slane %v1898_v3, 4  ;;  %v1903_v9 = vld [vmem:[#allocation6 + $0x2a] sm:$0x7]  ;;  %2319 = vmatmul.mubr.f32.vlgmr.msra.gmra.mrb[16].mxu1 %v1998_v4  ;;  %v4171_v42 = vpack.c.bf16 %v5396_v0, %v5391_v39 }
 0x382   :  { %v1909_v10 = vld [vmem:[#allocation6 + $0xa] sm:$0x7]  ;;  %2654 = vst [vmem:[#allocation7 + $0x10] sm:$0x7] %v2653_v44  ;;  %v2005_v11 = vld [vmem:[#allocation7 + $0x48] sm:$0xff]  ;;  %v1905_v16 = vrot.slane %v1903_v9, 1  ;;  %4166 = vmatpush3.bf16.msra.mxu1 %v4165_v56  ;;  %v4143_v47 = vpack.c.bf16 %v5408_v7, %v5403_v6 }
 0x383   :  { %v2015_v12 = vld [vmem:[#allocation7 + $0x98] sm:$0x3]  ;;  %v5415_v14 = vld [vmem:[%s6256_s5 + $0x320] sm:$0xff]  ;;  %1862 = vst [vmem:[#allocation7 + $0x68] ss:$-68 sps:$4 sm:$0xc1] %v1860_v1   ;;  %2244 = vmatmul.mubr.f32.gmra.mrb[34].mxu0 %v2005_v11  ;;  %4168 = vmatprep.subr.bf16.mxu1 %v4167_v5 }
 0x384   :  { %1897 = vst [vmem:[#allocation7 + $0x70] sm:$0xe] %v1895_v2  ;;  %1910 = vst [vmem:[#allocation7 + $0x30] sm:$0x7] %v1909_v10  ;;  %v1911_v17 = vld [vmem:[#allocation6 + $0xf] sm:$0x7]  ;;  %2248 = vmatprep.mubr.f32.mxu0 %v2015_v12  ;;  %v4173_v52 = vpack.c.bf16 %v5420_v15, %v5415_v14  ;;  %4144 = vmatprep.subr.bf16.mxu0 %v4143_v47 }
 0x385   :  { %2612 = vst [vmem:[#allocation7 + $0x48] sm:$0xe] %v2610_v40  ;;  %v5429_v19 = vld [vmem:[%s6256_s5 + $0x230] sm:$0xff]  ;;  %v5434_v20 = vld [vmem:[%s6256_s5 + $0x238] sm:$0xff]  ;;  %v2807_v40 = vrot.slane %v5370_v54, 2  ;;  %v1913_v22 = vrot.slane %v1911_v17, 5 }
 0x386   :  { %v5439_v21 = vld [vmem:[%s6256_s5 + $0x3b0] sm:$0xff]  ;;  %1902 = vst [vmem:[#allocation7 + $0x70] sm:$0x70] %v1900_v8  ;;  %v1951_v23 = vld [vmem:[#allocation6 + $0x24] sm:$0x7]  ;;  %v2007_v28 = vld [vmem:[#allocation7 + $0x58] sm:$0xff]  ;;  %4170 = vmatpush3.bf16.msra.mxu1 %v4169_v18  ;;  %v4145_v37 = vpack.c.bf16 %v5434_v20, %v5429_v19 }
 0x387   :  { %v1956_v24 = vld [vmem:[#allocation6 + $0x29] sm:$0x7]  ;;  %v2008_v25 = vld [vmem:[#allocation7 + $0x60] sm:$0xff]  ;;  %1907 = vst [vmem:[#allocation7 + $0xb8] ss:$-68 sps:$4 sm:$0x83] %v1905_v16   ;;  %v4175_v39 = vpack.c.bf16 %v5444_v38, %v5439_v21  ;;  %4172 = vmatprep.subr.bf16.mxu1 %v4171_v42 }
 0x388   :  { %v2014_v27 = vld [vmem:[#allocation7 + $0x90] sm:$0x3]  ;;  %v5454_v33 = vld [vmem:[#allocation6 + $0x14] sm:$0x7]  ;;  %v1953_v34 = vrot.slane %v1951_v23, 7  ;;  %v1958_v35 = vrot.slane %v1956_v24, 4  ;;  %2323 = vmatprep.mubr.f32.mxu1 %v2008_v25  ;;  %4146 = vmatpush3.bf16.msra.mxu0 %v4145_v37 }
 0x389   :  { %v5452_v32 = vld [vmem:[%s6256_s5 + $0x2c0] sm:$0xff]  ;;  %2670 = vst [vmem:[#allocation7 + $0x58] sm:$0xe] %v2668_v62  ;;  %v2017_v36 = vld [vmem:[#allocation7 + $0xa8] sm:$0x3]  ;;  %2324 = vmatmul.mubr.f32.gmra.mrb[18].mxu1 %v2007_v28  ;;  %v5477_v48 = vld [vmem:[%s6256_s5 + $0x2c8] sm:$0xff]  ;;  %2249 = vmatmul.mubr.f32.gmra.mrb[36].mxu0 %v2014_v27 }
 0x38a   :  { %1915 = vst [vmem:[#allocation7 + $0x30] sm:$0x38] %v1913_v22  ;;  %v1864_v43 = vld [vmem:[#allocation6 + $0x1f] sm:$0x7]  ;;  %v1869_v44 = vld [vmem:[#allocation6 + $0x24] sm:$0x7]  ;;  %2328 = vmatprep.mubr.f32.mxu1 %v2017_v36  ;;  %v4147_v4 = vpack.c.bf16 %v5477_v48, %v5452_v32  ;;  %4174 = vmatpush3.bf16.msra.mxu1 %v4173_v52 }
 0x38b   :  { %v5460_v45 = vld [vmem:[#allocation6 + $0x2e] sm:$0x7]  ;;  %v2001_v46 = vld [vmem:[#allocation7 + $0x28] sm:$0xff]  ;;  %1955 = vst [vmem:[#allocation7 + $0x80] sm:$0xe] %v1953_v34  ;;  %v1866_v49 = vrot.slane %v1864_v43, 7  ;;  %4176 = vmatprep.subr.bf16.mxu1 %v4175_v39 }
 0x38c   :  { %v5472_v62 = vld [vmem:[%s6256_s5 + $0x338] sm:$0xff]  ;;  %1960 = vst [vmem:[#allocation7 + $0x80] sm:$0x70] %v1958_v35  ;;  %v1871_v50 = vrot.slane %v1869_v44, 4  ;;  %v1874_v51 = vld [vmem:[#allocation6 + $0x29] sm:$0x7]  ;;  %2398 = vmatprep.mubr.f32.mxu0 %v2001_v46  ;;  %4148 = vmatprep.subr.bf16.mxu0 %v4147_v4 }
 0x38d   :  { %v2016_v53 = vld [vmem:[#allocation7 + $0xa0] sm:$0x3]  ;;  %v2003_v55 = vld [vmem:[#allocation7 + $0x38] sm:$0xff]  ;;  %v5484_v56 = vld [vmem:[%s6256_s5 + $0x240] sm:$0xff]  ;;  %v1876_v60 = vrot.slane %v1874_v51, 1  ;;  %v2778_v5 = vrot.slane %v5454_v33, 2  ;;  %v4177_v16 = vpack.c.bf16 %v5472_v62, %v5467_v41 }
 0x38e   :  { %v5489_v57 = vld [vmem:[%s6256_s5 + $0x248] sm:$0xff]  ;;  %v5494_v58 = vld [vmem:[%s6256_s5 + $0x3c0] sm:$0xff]  ;;  %v1922_v61 = vld [vmem:[#allocation6 + $0x23] sm:$0x7]  ;;  %2809 = vst [vmem:[#allocation7 + $0x38] sm:$0xc0] %v2807_v40  ;;  %2329 = vmatmul.mubr.f32.gmra.mrb[20].mxu1 %v2016_v53 }
 0x38f   :  { %v5499_v59 = vld [vmem:[%s6256_s5 + $0x3c8] sm:$0xff]  ;;  %v1927_v63 = vld [vmem:[#allocation6 + $0x28] sm:$0x7]  ;;  %1868 = vst [vmem:[#allocation7 + $0x68] sm:$0xe] %v1866_v49  ;;  %v1924_v0 = vrot.slane %v1922_v61, 7  ;;  %2478 = vmatprep.mubr.f32.mxu1 %v2003_v55  ;;  %v4149_v21 = vpack.c.bf16 %v5489_v57, %v5484_v56  ;;  %4178 = vmatpush3.bf16.msra.mxu1 %v4177_v16 }
 0x390   :  { %1873 = vst [vmem:[#allocation7 + $0x68] sm:$0x70] %v1871_v50  ;;  %v1929_v1 = vrot.slane %v1927_v63, 4  ;;  %v1967_v2 = vld [vmem:[#allocation6 + $0xc] sm:$0x7]  ;;  %v2128_v10 = vld [vmem:[%s6256_s5 + $0x348] sm:$0xff]  ;;  %v4179_v38 = vpack.c.bf16 %v5499_v59, %v5494_v58 }
 0x391   :  { %v1969_v3 = vld [vmem:[#allocation6 + $0x11] sm:$0x7]  ;;  %1878 = vst [vmem:[#allocation7 + $0xb0] ss:$-68 sps:$4 sm:$0x83] %v1876_v60   ;;  %v2127_v9 = vld [vmem:[%s6256_s5 + $0x340] sm:$0xff]  ;;  %4150 = vmatpush3.bf16.msra.mxu0 %v4149_v21 }
 0x392   :  { %1968 = vst [vmem:[#allocation7 + $0x40] sm:$0x7] %v1967_v2  ;;  %v1971_v6 = vrot.slane %v1969_v3, 5  ;;  %v1980_v7 = vld [vmem:[#allocation6 + $0x25] sm:$0x7]  ;;  %v2113_v11 = vld [vmem:[%s6256_s5 + $0x2d0] sm:$0xff]  ;;  %v4181_v36 = vpack.c.bf16 %v2128_v10, %v2127_v9  ;;  %4180 = vmatprep.subr.bf16.mxu1 %v4179_v38 }
 0x393   :  { %v1985_v8 = vld [vmem:[#allocation6 + $0x2a] sm:$0x7]  ;;  %v2114_v12 = vld [vmem:[%s6256_s5 + $0x2d8] sm:$0xff]  ;;  %1926 = vst [vmem:[#allocation7 + $0x78] sm:$0xe] %v1924_v0  ;;  %v2823_v13 = vrot.slane %v5460_v45, 1 }
 0x394   :  { %1931 = vst [vmem:[#allocation7 + $0x78] sm:$0x70] %v1929_v1  ;;  %v1982_v14 = vrot.slane %v1980_v7, 7  ;;  %v1987_v15 = vrot.slane %v1985_v8, 4  ;;  %v2097_v17 = vld [vmem:[%s6256_s5 + $0x250] sm:$0xff]  ;;  %v2098_v18 = vld [vmem:[%s6256_s5 + $0x258] sm:$0xff]  ;;  %v4151_v25 = vpack.c.bf16 %v2114_v12, %v2113_v11  ;;  %4182 = vmatpush3.bf16.msra.mxu1 %v4181_v36 }
 0x395   :  { %v2145_v19 = vld [vmem:[%s6256_s5 + $0x3d0] sm:$0xff]  ;;  %v2792_v20 = vld [vmem:[#allocation6 + $0x2d] sm:$0x7]  ;;  %1973 = vst [vmem:[#allocation7 + $0x40] sm:$0x38] %v1971_v6  ;;  %v2146_v22 = vld [vmem:[%s6256_s5 + $0x3d8] sm:$0xff]  ;;  %v4153_v45 = vpack.c.bf16 %v2098_v18, %v2097_v17 }
 0x396   :  { %v5541_v23 = vld [vmem:[#allocation7 + $0x30] sm:$0xff]  ;;  %v2834_v24 = vld [vmem:[#allocation6 + $0x16] sm:$0x7]  ;;  %1984 = vst [vmem:[#allocation7 + $0x88] sm:$0xe] %v1982_v14  ;;  %v2794_v35 = vrot.slane %v2792_v20, 1  ;;  %v4183_v46 = vpack.c.bf16 %v2146_v22, %v2145_v19  ;;  %4152 = vmatprep.subr.bf16.mxu0 %v4151_v25 }
 0x397   :  { %1989 = vst [vmem:[#allocation7 + $0x88] sm:$0x70] %v1987_v15  ;;  %2780 = vst [vmem:[#allocation7 + $0x30] sm:$0xc0] %v2778_v5  ;;  %v5545_v27 = vld [vmem:[#allocation7 + $0x80] sm:$0xff]  ;;  %v2115_v32 = vld [vmem:[%s6256_s5 + $0x2e0] sm:$0xff]  ;;  %4154 = vmatpush3.bf16.msra.mxu0 %v4153_v45 }
 0x398   :  { %v5547_v28 = vld [vmem:[#allocation7 + $0xc8] sm:$0x3]  ;;  %v2850_v29 = vld [vmem:[#allocation6 + $0x2f] sm:$0x7]  ;;  %2810 = vst [vmem:[#allocation7 + $0x80] sm:$0x1] %v2807_v40  ;;  %4184 = vmatprep.subr.bf16.mxu1 %v4183_v46 }
 0x399   :  { %v2116_v34 = vld [vmem:[%s6256_s5 + $0x2e8] sm:$0xff]  ;;  %2825 = vst [vmem:[#allocation7 + $0xc8] ss:$-68 sps:$4 sm:$0x83] %v2823_v13   ;;  %v2129_v42 = vld [vmem:[%s6256_s5 + $0x350] sm:$0xff]  ;;  %v2130_v43 = vld [vmem:[%s6256_s5 + $0x358] sm:$0xff] }
 0x39a   :  { %v2836_v44 = vrot.slane %v2834_v24, 2  ;;  %v2099_v54 = vld [vmem:[%s6256_s5 + $0x260] sm:$0xff]  ;;  %v2100_v40 = vld [vmem:[%s6256_s5 + $0x268] sm:$0xff]  ;;  %v2852_v41 = vrot.slane %v2850_v29, 1  ;;  %v4155_v62 = vpack.c.bf16 %v2116_v34, %v2115_v32  ;;  %v5577_v50 = vld [vmem:[#allocation7 + $0xc0] sm:$0x3]  ;;  %v4185_v55 = vpack.c.bf16 %v2130_v43, %v2129_v42 }
 0x39b   :  { %v2147_v47 = vld [vmem:[%s6256_s5 + $0x3e0] sm:$0xff]  ;;  %v2148_v48 = vld [vmem:[%s6256_s5 + $0x3e8] sm:$0xff]  ;;  %v2117_v51 = vld [vmem:[%s6256_s5 + $0x2f0] sm:$0xff]  ;;  %v4157_v58 = vpack.c.bf16 %v2100_v40, %v2099_v54  ;;  %v4431_v10 = vmov 0.0|0.0  }
 0x39c   :  { %v5575_v49 = vld [vmem:[#allocation7 + $0x78] sm:$0xff]  ;;  %v2118_v52 = vld [vmem:[%s6256_s5 + $0x2f8] sm:$0xff]  ;;  %v5587_v53 = vld [vmem:[#allocation7 + $0x40] sm:$0xff]  ;;  %v4187_v59 = vpack.c.bf16 %v2148_v48, %v2147_v47  ;;  %4156 = vmatprep.subr.bf16.mxu0 %v4155_v62  ;;  %4186 = vmatpush3.bf16.msra.mxu1 %v4185_v55 }
 0x39d   :  { %2781 = vst [vmem:[#allocation7 + $0x78] sm:$0x1] %v2778_v5  ;;  %2796 = vst [vmem:[#allocation7 + $0xc0] ss:$-68 sps:$4 sm:$0x83] %v2794_v35   ;;  %v2131_v60 = vld [vmem:[%s6256_s5 + $0x360] sm:$0xff]  ;;  %v4159_v63 = vpack.c.bf16 %v2118_v52, %v2117_v51  ;;  %4158 = vmatpush3.bf16.msra.mxu0 %v4157_v58 }
 0x39e   :  { %2838 = vst [vmem:[#allocation7 + $0x40] sm:$0xc0] %v2836_v44  ;;  %v5589_v56 = vld [vmem:[#allocation7 + $0x88] sm:$0xff]  ;;  %v5591_v57 = vld [vmem:[#allocation7 + $0xd0] sm:$0x3]  ;;  %v2132_v33 = vld [vmem:[%s6256_s5 + $0x368] sm:$0xff]  ;;  %4188 = vmatprep.subr.bf16.mxu1 %v4187_v59 }
 0x39f   :  { %v2101_v61 = vld [vmem:[%s6256_s5 + $0x270] sm:$0xff]  ;;  %2839 = vst [vmem:[#allocation7 + $0x88] sm:$0x1] %v2836_v44  ;;  %2854 = vst [vmem:[#allocation7 + $0xd0] ss:$-68 sps:$4 sm:$0x83] %v2852_v41   ;;  %v4189_v1 = vpack.c.bf16 %v2132_v33, %v2131_v60  ;;  %4160 = vmatprep.subr.bf16.mxu0 %v4159_v63 }
 0x3a0   :  { %v2102_v37 = vld [vmem:[%s6256_s5 + $0x278] sm:$0xff]  ;;  %v2149_v39 = vld [vmem:[%s6256_s5 + $0x3f0] sm:$0xff]  ;;  %v2151_v6 = vld [vmem:[%s6256_s5 + $0x400] sm:$0xff] }
 0x3a1   :  { %v2150_v0 = vld [vmem:[%s6256_s5 + $0x3f8] sm:$0xff]  ;;  %v4161_v2 = vpack.c.bf16 %v2102_v37, %v2101_v61  ;;  %v2133_v4 = vld [vmem:[%s6256_s5 + $0x370] sm:$0xff]  ;;  %v2152_v7 = vld [vmem:[%s6256_s5 + $0x408] sm:$0xff]  ;;  %4190 = vmatpush3.bf16.msra.mxu1 %v4189_v1 }
 0x3a2   :  { %v4191_v3 = vpack.c.bf16 %v2150_v0, %v2149_v39  ;;  %v2134_v5 = vld [vmem:[%s6256_s5 + $0x378] sm:$0xff]  ;;  %v4196_v9 = vpack.c.bf16 %v2152_v7, %v2151_v6  ;;  %v2153_v11 = vld [vmem:[%s6256_s5 + $0x410] sm:$0xff]  ;;  %v2010_v14 = vld [vmem:[#allocation7 + $0x70] sm:$0xff] }
 0x3a3   :  { %v4193_v8 = vpack.c.bf16 %v2134_v5, %v2133_v4  ;;  %4162 = vmatpush3.bf16.msra.mxu0 %v4161_v2  ;;  %v2154_v12 = vld [vmem:[%s6256_s5 + $0x418] sm:$0xff]  ;;  %v2000_v13 = vld [vmem:[#allocation7 + $0x20] sm:$0xff]  ;;  %v2155_v16 = vld [vmem:[%s6256_s5 + $0x420] sm:$0xff] }
 0x3a4   :  { %4192 = vmatprep.subr.bf16.mxu1 %v4191_v3  ;;  %4195 = vmatprep.subr.bf16.mxu0 %v4431_v10  ;;  %v4199_v15 = vpack.c.bf16 %v2154_v12, %v2153_v11  ;;  %v2156_v17 = vld [vmem:[%s6256_s5 + $0x428] sm:$0xff]  ;;  %v2009_v18 = vld [vmem:[#allocation7 + $0x68] sm:$0xff]  ;;  %v2157_v21 = vld [vmem:[%s6256_s5 + $0x430] sm:$0xff] }
 0x3a5   :  { %4194 = vmatpush3.bf16.msra.mxu1 %v4193_v8  ;;  %v2019_v19 = vld [vmem:[#allocation7 + $0xb8] sm:$0x3]  ;;  %v4202_v20 = vpack.c.bf16 %v2156_v17, %v2155_v16  ;;  %v2158_v38 = vld [vmem:[%s6256_s5 + $0x438] sm:$0xff]  ;;  %v2018_v22 = vld [vmem:[#allocation7 + $0xb0] sm:$0x3] }
 0x3a6   :  { %2399 = vmatmul.mubr.f32.vlgmr.msra.gmra.mrb[38].mxu0 %v2000_v13  ;;  %v2159_v24 = vld [vmem:[%s6256_s5 + $0x440] sm:$0xff]  ;;  %v2160_v25 = vld [vmem:[%s6256_s5 + $0x448] sm:$0xff]  ;;  %v2162_v29 = vld [vmem:[%s6256_s5 + $0x458] sm:$0xff] }
 0x3a7   :  { %2403 = vmatprep.mubr.f32.mxu0 %v2010_v14  ;;  %4197 = vmatpush3.bf16.msra.mxu0 %v4196_v9  ;;  %v2163_v34 = vld [vmem:[%s6256_s5 + $0x460] sm:$0xff]  ;;  %v2164_v35 = vld [vmem:[%s6256_s5 + $0x468] sm:$0xff]  ;;  %v2165_v42 = vld [vmem:[%s6256_s5 + $0x470] sm:$0xff] }
 0x3a8   :  { %4198 = vmatprep.subr.bf16.mxu0 %v4431_v10  ;;  %2479 = vmatmul.mubr.f32.vlgmr.msra.gmra.mrb[22].mxu1 %v5541_v23  ;;  %v4205_v23 = vpack.c.bf16 %v2158_v38, %v2157_v21  ;;  %v4214_v36 = vpack.c.bf16 %v2164_v35, %v2163_v34  ;;  %v2166_v43 = vld [vmem:[%s6256_s5 + $0x478] sm:$0xff]  ;;  %v2899_v45 = vld [vmem:[%s6258_s7 + $0x80] sm:$0xff]  ;;  %v2900_v46 = vld [vmem:[%s6258_s7 + $0x88] sm:$0xff] }
 0x3a9   :  { %2483 = vmatprep.mubr.f32.mxu1 %v5545_v27  ;;  %v4208_v27 = vpack.c.bf16 %v2160_v25, %v2159_v24  ;;  %v4217_v44 = vpack.c.bf16 %v2166_v43, %v2165_v42  ;;  %v2883_v54 = vld [vmem:[%s6258_s7] sm:$0xff]  ;;  %v4219_v40 = vpack.c.bf16 %v2900_v46, %v2899_v45  ;;  %v2884_v47 = vld [vmem:[%s6258_s7 + $0x8] sm:$0xff]  ;;  %v2901_v62 = vld [vmem:[%s6258_s7 + $0x90] sm:$0xff] }
 0x3aa   :  { %2404 = vmatmul.mubr.f32.gmra.mrb[40].mxu0 %v2009_v18  ;;  %v4221_v41 = vpack.c.bf16 %v2884_v47, %v2883_v54  ;;  %v2902_v48 = vld [vmem:[%s6258_s7 + $0x98] sm:$0xff]  ;;  %v2932_v51 = vld [vmem:[%s6258_s7 + $0x188] sm:$0xff]  ;;  %v2885_v52 = vld [vmem:[%s6258_s7 + $0x10] sm:$0xff] }
 0x3ab   :  { %2408 = vmatprep.mubr.f32.mxu0 %v2019_v19  ;;  %4200 = vmatpush3.bf16.msra.mxu0 %v4199_v15  ;;  %v2916_v58 = vld [vmem:[%s6258_s7 + $0x108] sm:$0xff]  ;;  %v2903_v60 = vld [vmem:[%s6258_s7 + $0xa0] sm:$0xff]  ;;  %v2933_v61 = vld [vmem:[%s6258_s7 + $0x190] sm:$0xff] }
 0x3ac   :  { %4201 = vmatprep.subr.bf16.mxu0 %v4431_v10  ;;  %2484 = vmatmul.mubr.f32.gmra.mrb[24].mxu1 %v5575_v49  ;;  %v2931_v49 = vld [vmem:[%s6258_s7 + $0x180] sm:$0xff]  ;;  %v2904_v33 = vld [vmem:[%s6258_s7 + $0xa8] sm:$0xff]  ;;  %v2934_v37 = vld [vmem:[%s6258_s7 + $0x198] sm:$0xff] }
 0x3ad   :  { %2488 = vmatprep.mubr.f32.mxu1 %v5547_v28  ;;  %v2161_v28 = vld [vmem:[%s6256_s5 + $0x450] sm:$0xff]  ;;  %4220 = vmatprep.subr.bf16.mxu1 %v4219_v40  ;;  %v4251_v55 = vpack.c.bf16 %v2932_v51, %v2931_v49  ;;  %v4227_v63 = vpack.c.bf16 %v2904_v33, %v2903_v60  ;;  %v2887_v39 = vld [vmem:[%s6258_s7 + $0x20] sm:$0xff]  ;;  %v2888_v0 = vld [vmem:[%s6258_s7 + $0x28] sm:$0xff]  ;;  %v4255_v1 = vpack.c.bf16 %v2934_v37, %v2933_v61 }
 0x3ae   :  { %2409 = vmatmul.mubr.f32.gmra.mrb[42].mxu0 %v2018_v22  ;;  %v4211_v32 = vpack.c.bf16 %v2162_v29, %v2161_v28  ;;  %4222 = vmatpush3.bf16.msra.mxu1 %v4221_v41  ;;  %v4229_v2 = vpack.c.bf16 %v2888_v0, %v2887_v39  ;;  %v2917_v3 = vld [vmem:[%s6258_s7 + $0x110] sm:$0xff]  ;;  %v2918_v4 = vld [vmem:[%s6258_s7 + $0x118] sm:$0xff]  ;;  %v2935_v8 = vld [vmem:[%s6258_s7 + $0x1a0] sm:$0xff] }
 0x3af   :  { %4203 = vmatpush3.bf16.msra.mxu0 %v4202_v20  ;;  %4017 = vmatprep.mubr.msk.f32.mxu0 %vm4432_vm13, %v4430_v26  ;;  %v2905_v5 = vld [vmem:[%s6258_s7 + $0xb0] sm:$0xff]  ;;  %v4257_v6 = vpack.c.bf16 %v2918_v4, %v2917_v3  ;;  %v2906_v7 = vld [vmem:[%s6258_s7 + $0xb8] sm:$0xff]  ;;  %v2936_v9 = vld [vmem:[%s6258_s7 + $0x1a8] sm:$0xff] }
 0x3b0   :  { %4204 = vmatprep.subr.bf16.mxu0 %v4431_v10  ;;  %2489 = vmatmul.mubr.f32.gmra.mrb[26].mxu1 %v5577_v50  ;;  %v4223_v50 = vpack.c.bf16 %v2902_v48, %v2901_v62  ;;  %v4231_v11 = vpack.c.bf16 %v2906_v7, %v2905_v5  ;;  %v4259_v12 = vpack.c.bf16 %v2936_v9, %v2935_v8  ;;  %v2889_v13 = vld [vmem:[%s6258_s7 + $0x30] sm:$0xff]  ;;  %v2890_v14 = vld [vmem:[%s6258_s7 + $0x38] sm:$0xff]  ;;  %v2919_v15 = vld [vmem:[%s6258_s7 + $0x120] sm:$0xff] }
 0x3b1   :  { %v4233_v16 = vpack.c.bf16 %v2890_v14, %v2889_v13  ;;  %v2920_v17 = vld [vmem:[%s6258_s7 + $0x128] sm:$0xff]  ;;  %v2907_v18 = vld [vmem:[%s6258_s7 + $0xc0] sm:$0xff]  ;;  %v2937_v38 = vld [vmem:[%s6258_s7 + $0x1b0] sm:$0xff] }
 0x3b2   :  { %4224 = vmatprep.subr.bf16.mxu1 %v4223_v50  ;;  %v2908_v19 = vld [vmem:[%s6258_s7 + $0xc8] sm:$0xff]  ;;  %v4261_v20 = vpack.c.bf16 %v2920_v17, %v2919_v15  ;;  %v2938_v22 = vld [vmem:[%s6258_s7 + $0x1b8] sm:$0xff]  ;;  %v2909_v29 = vld [vmem:[%s6258_s7 + $0xd0] sm:$0xff] }
 0x3b3   :  { %4206 = vmatpush3.bf16.msra.mxu0 %v4205_v23  ;;  %v4235_v21 = vpack.c.bf16 %v2908_v19, %v2907_v18  ;;  %v2891_v23 = vld [vmem:[%s6258_s7 + $0x40] sm:$0xff]  ;;  %v4263_v24 = vpack.c.bf16 %v2938_v22, %v2937_v38  ;;  %v2892_v25 = vld [vmem:[%s6258_s7 + $0x48] sm:$0xff]  ;;  %v2922_v28 = vld [vmem:[%s6258_s7 + $0x138] sm:$0xff] }
 0x3b4   :  { %4207 = vmatprep.subr.bf16.mxu0 %v4431_v10  ;;  %v2939_v34 = vld [vmem:[%s6258_s7 + $0x1c0] sm:$0xff]  ;;  %v4237_v35 = vpack.c.bf16 %v2892_v25, %v2891_v23  ;;  %v2940_v42 = vld [vmem:[%s6258_s7 + $0x1c8] sm:$0xff]  ;;  %v2893_v43 = vld [vmem:[%s6258_s7 + $0x50] sm:$0xff] }
 0x3b5   :  { %v4267_v46 = vpack.c.bf16 %v2940_v42, %v2939_v34  ;;  %v2923_v54 = vld [vmem:[%s6258_s7 + $0x140] sm:$0xff]  ;;  %v2924_v40 = vld [vmem:[%s6258_s7 + $0x148] sm:$0xff]  ;;  %v2941_v62 = vld [vmem:[%s6258_s7 + $0x1d0] sm:$0xff] }
 0x3b6   :  { %v2911_v47 = vld [vmem:[%s6258_s7 + $0xe0] sm:$0xff]  ;;  %v2912_v41 = vld [vmem:[%s6258_s7 + $0xe8] sm:$0xff]  ;;  %v2942_v48 = vld [vmem:[%s6258_s7 + $0x1d8] sm:$0xff]  ;;  %v4269_v50 = vpack.c.bf16 %v2924_v40, %v2923_v54 }
 0x3b7   :  { %4209 = vmatpush3.bf16.msra.mxu0 %v4208_v27  ;;  %v2921_v27 = vld [vmem:[%s6258_s7 + $0x130] sm:$0xff]  ;;  %v2895_v51 = vld [vmem:[%s6258_s7 + $0x60] sm:$0xff]  ;;  %v2944_v33 = vld [vmem:[%s6258_s7 + $0x1e8] sm:$0xff] }
 0x3b8   :  { %4210 = vmatprep.subr.bf16.mxu0 %v4431_v10  ;;  %v2943_v60 = vld [vmem:[%s6258_s7 + $0x1e0] sm:$0xff]  ;;  %v2897_v37 = vld [vmem:[%s6258_s7 + $0x70] sm:$0xff]  ;;  %v2898_v39 = vld [vmem:[%s6258_s7 + $0x78] sm:$0xff] }
 0x3b9   :  { %v2928_v3 = vld [vmem:[%s6258_s7 + $0x168] sm:$0xff]  ;;  %v2945_v4 = vld [vmem:[%s6258_s7 + $0x1f0] sm:$0xff]  ;;  %v2946_v5 = vld [vmem:[%s6258_s7 + $0x1f8] sm:$0xff]  ;;  %v4249_v8 = vpack.c.bf16 %v2898_v39, %v2897_v37 }
 0x3ba   :  { %v2964_v7 = vld [vmem:[%s6258_s7 + $0x288] sm:$0xff]  ;;  %v2929_v13 = vld [vmem:[%s6258_s7 + $0x170] sm:$0xff]  ;;  %v2930_v14 = vld [vmem:[%s6258_s7 + $0x178] sm:$0xff] }
 0x3bb   :  { %4212 = vmatpush3.bf16.msra.mxu0 %v4211_v32  ;;  %v2910_v32 = vld [vmem:[%s6258_s7 + $0xd8] sm:$0xff]  ;;  %v2995_v15 = vld [vmem:[%s6258_s7 + $0x380] sm:$0xff]  ;;  %v4281_v17 = vpack.c.bf16 %v2930_v14, %v2929_v13 }
 0x3bc   :  { %4213 = vmatprep.subr.bf16.mxu0 %v4431_v10  ;;  %v4239_v45 = vpack.c.bf16 %v2910_v32, %v2909_v29 }
 0x3bf   :  { %4215 = vmatpush3.bf16.msra.mxu0 %v4214_v36  ;;  %v4265_v36 = vpack.c.bf16 %v2922_v28, %v2921_v27 }
 0x3c0   :  { %4216 = vmatprep.subr.bf16.mxu0 %v4431_v10 }
 0x3c3   :  { %4218 = vmatpush3.bf16.msra.mxu0 %v4217_v44  ;;  %v2894_v44 = vld [vmem:[%s6258_s7 + $0x58] sm:$0xff] }
 0x3c4   :  { %4252 = vmatprep.subr.bf16.mxu0 %v4251_v55  ;;  %v4241_v49 = vpack.c.bf16 %v2894_v44, %v2893_v43  ;;  %v4271_v55 = vpack.c.bf16 %v2942_v48, %v2941_v62 }
 0x3c6   :  { %4018 = vmatmul.mubr.f32.vlgmr.msra.gmra.mrb[44].mxu0 %v5587_v53  ;;  %v2886_v53 = vld [vmem:[%s6258_s7 + $0x18] sm:$0xff] }
 0x3c7   :  { %4020 = vmatprep.mubr.msk.f32.mxu0 %vm4432_vm13, %v4430_v26 }
 0x3ca   :  { %4021 = vmatmul.mubr.f32.gmra.mrb[46].mxu0 %v5589_v56  ;;  %v4225_v56 = vpack.c.bf16 %v2886_v53, %v2885_v52  ;;  %v2896_v52 = vld [vmem:[%s6258_s7 + $0x68] sm:$0xff]  ;;  %v4243_v53 = vpack.c.bf16 %v2912_v41, %v2911_v47 }
 0x3cb   :  { %4023 = vmatprep.mubr.msk.f32.mxu0 %vm4432_vm13, %v4430_v26  ;;  %v4245_v61 = vpack.c.bf16 %v2896_v52, %v2895_v51 }
 0x3cc   :  { %4226 = vmatpush3.bf16.msra.mxu1 %v4225_v56  ;;  %v2925_v56 = vld [vmem:[%s6258_s7 + $0x150] sm:$0xff] }
 0x3cd   :  { %4228 = vmatprep.subr.bf16.mxu1 %v4227_v63 }
 0x3ce   :  { %4024 = vmatmul.mubr.f32.gmra.mrb[48].mxu0 %v5591_v57  ;;  %v2915_v57 = vld [vmem:[%s6258_s7 + $0x100] sm:$0xff] }
 0x3cf   :  { %v4253_v59 = vpack.c.bf16 %v2916_v58, %v2915_v57  ;;  %v2926_v57 = vld [vmem:[%s6258_s7 + $0x158] sm:$0xff]  ;;  %v2913_v58 = vld [vmem:[%s6258_s7 + $0xf0] sm:$0xff] }
 0x3d0   :  { %4230 = vmatpush3.bf16.msra.mxu1 %v4229_v2  ;;  %v4273_v63 = vpack.c.bf16 %v2926_v57, %v2925_v56  ;;  %v2927_v2 = vld [vmem:[%s6258_s7 + $0x160] sm:$0xff] }
 0x3d1   :  { %4254 = vmatpush3.bf16.msra.mxu0 %v4253_v59  ;;  %4232 = vmatprep.subr.bf16.mxu1 %v4231_v11  ;;  %v2914_v59 = vld [vmem:[%s6258_s7 + $0xf8] sm:$0xff]  ;;  %v4277_v9 = vpack.c.bf16 %v2928_v3, %v2927_v2  ;;  %v4279_v11 = vpack.c.bf16 %v2946_v5, %v2945_v4 }
 0x3d2   :  { %4256 = vmatprep.subr.bf16.mxu0 %v4255_v1  ;;  %v4247_v0 = vpack.c.bf16 %v2914_v59, %v2913_v58  ;;  %v4275_v1 = vpack.c.bf16 %v2944_v33, %v2943_v60 }
 0x3d4   :  { %4234 = vmatpush3.bf16.msra.mxu1 %v4233_v16  ;;  %v2996_v16 = vld [vmem:[%s6258_s7 + $0x388] sm:$0xff] }
 0x3d5   :  { %4258 = vmatpush3.bf16.msra.mxu0 %v4257_v6  ;;  %4236 = vmatprep.subr.bf16.mxu1 %v4235_v21  ;;  %v2963_v6 = vld [vmem:[%s6258_s7 + $0x280] sm:$0xff]  ;;  %v4315_v18 = vpack.c.bf16 %v2996_v16, %v2995_v15 }
 0x3d6   :  { %4260 = vmatprep.subr.bf16.mxu0 %v4259_v12  ;;  %v4283_v12 = vpack.c.bf16 %v2964_v7, %v2963_v6 }
 0x3d8   :  { %4238 = vmatpush3.bf16.msra.mxu1 %v4237_v35 }
 0x3d9   :  { %4262 = vmatpush3.bf16.msra.mxu0 %v4261_v20  ;;  %4240 = vmatprep.subr.bf16.mxu1 %v4239_v45  ;;  %v3497_v20 = vld [vmem:[%s6259_s6] ss:$0 sm:$0xff] }
 0x3da   :  { %4264 = vmatprep.subr.bf16.mxu0 %v4263_v24 }
 0x3dc   :  { %4242 = vmatpush3.bf16.msra.mxu1 %v4241_v49 }
 0x3dd   :  { %4266 = vmatpush3.bf16.msra.mxu0 %v4265_v36  ;;  %4244 = vmatprep.subr.bf16.mxu1 %v4243_v53 }
 0x3de   :  { %4268 = vmatprep.subr.bf16.mxu0 %v4267_v46 }
 0x3e0   :  { %4246 = vmatpush3.bf16.msra.mxu1 %v4245_v61 }
 0x3e1   :  { %4270 = vmatpush3.bf16.msra.mxu0 %v4269_v50  ;;  %4248 = vmatprep.subr.bf16.mxu1 %v4247_v0 }
 0x3e2   :  { %4272 = vmatprep.subr.bf16.mxu0 %v4271_v55 }
 0x3e4   :  { %4250 = vmatpush3.bf16.msra.mxu1 %v4249_v8 }
 0x3e5   :  { %4274 = vmatpush3.bf16.msra.mxu0 %v4273_v63  ;;  %4284 = vmatprep.subr.bf16.mxu1 %v4283_v12 }
 0x3e6   :  { %4276 = vmatprep.subr.bf16.mxu0 %v4275_v1 }
 0x3e9   :  { %4278 = vmatpush3.bf16.msra.mxu0 %v4277_v9 }
 0x3ea   :  { %4280 = vmatprep.subr.bf16.mxu0 %v4279_v11  ;;  %v4425_v11 = vld [vmem:[#allocation5] sm:$0xff] }
 0x3ed   :  { %4282 = vmatpush3.bf16.msra.mxu0 %v4281_v17  ;;  %v4426_v17 = vld [vmem:[#allocation5 + $0x8] sm:$0xff] }
 0x3ee   :  { %4316 = vmatprep.subr.bf16.mxu0 %v4315_v18 }
 0x449   :  { %v3651_v19 = vpop.f32.mrb[32].mxu0 }
 0x44a   :  { %v3652_v21 = vpop.f32.mrb[33].mxu0 }
 0x44b   :  { %v3653_v38 = vadd.f32 %v3652_v21, %v3651_v19 }
 0x44d   :  { %v2241_v22 = vadd.f32 %v3653_v38, %v3497_v20 }
 0x454   :  { %v3692_v23 = vpop.f32.mrb[16].mxu1 }
 0x455   :  { %v3693_v24 = vpop.f32.mrb[17].mxu1 }
 0x456   :  { %v3654_v25 = vpop.f32.mrb[34].mxu0  ;;  %v3694_v27 = vadd.f32 %v3693_v24, %v3692_v23 }
 0x457   :  { %v3655_v28 = vpop.f32.mrb[35].mxu0 }
 0x458   :  { %v3656_v29 = vadd.f32 %v3655_v28, %v3654_v25  ;;  %v2321_v32 = vadd.f32 %v3694_v27, %v2241_v22 }
 0x45a   :  { %v2246_v42 = vadd.f32 %v3656_v29, %v3497_v20 }
 0x45c   :  { %v3695_v34 = vpop.f32.mrb[18].mxu1  ;;  %v3657_v35 = vpop.f32.mrb[36].mxu0 }
 0x45d   :  { %v3696_v36 = vpop.f32.mrb[19].mxu1  ;;  %v3658_v43 = vpop.f32.mrb[37].mxu0 }
 0x45e   :  { %v3697_v44 = vadd.f32 %v3696_v36, %v3695_v34  ;;  %v3659_v45 = vadd.f32 %v3658_v43, %v3657_v35 }
 0x460   :  { %v2326_v46 = vadd.f32 %v3697_v44, %v2246_v42  ;;  %v2251_v47 = vadd.f32 %v3659_v45, %v3497_v20 }
 0x461   :  { %v3698_v54 = vpop.f32.mrb[20].mxu1 }
 0x462   :  { %v3699_v40 = vpop.f32.mrb[21].mxu1 }
 0x463   :  { %v3700_v41 = vadd.f32 %v3699_v40, %v3698_v54 }
 0x465   :  { %v2331_v62 = vadd.f32 %v3700_v41, %v2251_v47  ;;  %v5908_v41 = vld [vmem:[%s6258_s7 + $0x200] sm:$0xff] }
 0x479   :  { %v3733_v48 = vpop.f32.mrb[38].mxu0 }
 0x47a   :  { %v3734_v49 = vpop.f32.mrb[39].mxu0 }
 0x47b   :  { %v3735_v50 = vadd.f32 %v3734_v49, %v3733_v48  ;;  %v3774_v51 = vpop.f32.mrb[22].mxu1 }
 0x47c   :  { %v3775_v53 = vpop.f32.mrb[23].mxu1 }
 0x47d   :  { %v2401_v52 = vadd.f32 %v3735_v50, %v2321_v32  ;;  %v3736_v55 = vpop.f32.mrb[40].mxu0  ;;  %v3776_v56 = vadd.f32 %v3775_v53, %v3774_v51 }
 0x47e   :  { %v3737_v57 = vpop.f32.mrb[41].mxu0 }
 0x47f   :  { %v3738_v58 = vadd.f32 %v3737_v57, %v3736_v55  ;;  %v3777_v59 = vpop.f32.mrb[24].mxu1  ;;  %v2481_v60 = vadd.f32 %v3776_v56, %v2401_v52  ;;  %v5918_v55 = vld [vmem:[%s6258_s7 + $0x290] sm:$0xff]  ;;  %v5923_v56 = vld [vmem:[%s6258_s7 + $0x298] sm:$0xff] }
 0x480   :  { %v3778_v61 = vpop.f32.mrb[25].mxu1 }
 0x481   :  { %v2406_v33 = vadd.f32 %v3738_v58, %v2326_v46  ;;  %v3739_v63 = vpop.f32.mrb[42].mxu0  ;;  %v3779_v37 = vadd.f32 %v3778_v61, %v3777_v59 }
 0x482   :  { %v3740_v39 = vpop.f32.mrb[43].mxu0 }
 0x483   :  { %v3741_v0 = vadd.f32 %v3740_v39, %v3739_v63  ;;  %v3780_v1 = vpop.f32.mrb[26].mxu1  ;;  %v2486_v2 = vadd.f32 %v3779_v37, %v2406_v33 }
 0x484   :  { %v3781_v4 = vpop.f32.mrb[27].mxu1 }
 0x485   :  { %v2411_v3 = vadd.f32 %v3741_v0, %v2331_v62  ;;  %v3782_v5 = vadd.f32 %v3781_v4, %v3780_v1  ;;  %v5913_v62 = vld [vmem:[%s6258_s7 + $0x208] sm:$0xff]  ;;  %v5928_v1 = vld [vmem:[%s6258_s7 + $0x300] sm:$0xff] }
 0x487   :  { %v2491_v6 = vadd.f32 %v3782_v5, %v2411_v3 }
 0x499   :  { %v2560_v7 = vpop.f32.mrb[44].mxu0 }
 0x49a   :  { %v2561_v8 = vadd.f32 %v2560_v7, %v2481_v60  ;;  %v4019_v9 = vpop.f32.mrb[45].mxu0  ;;  %v4285_v7 = vpack.c.bf16 %v5913_v62, %v5908_v41 }
 0x49b   :  { %v5945_v9 = vld [vmem:[%s6258_s7 + $0x218] sm:$0xff] }
 0x49c   :  { %v5894_v12 = vadd.f32 %v4425_v11, %v2561_v8  ;;  %v5940_v8 = vld [vmem:[%s6258_s7 + $0x210] sm:$0xff] }
 0x49d   :  { %v2565_v13 = vpop.f32.mrb[46].mxu0  ;;  %v4289_v62 = vpack.c.bf16 %v5945_v9, %v5940_v8 }
 0x49e   :  { %v2577_v14 = vmax.f32 %v5894_v12, 0.0  ;;  %v2566_v15 = vadd.f32 %v2565_v13, %v2486_v2  ;;  %v4022_v16 = vpop.f32.mrb[47].mxu0  ;;  %v5933_v2 = vld [vmem:[%s6258_s7 + $0x308] sm:$0xff] }
 0x4a0   :  { %2580 = vst [vmem:[#allocation5] sm:$0xff] %v2577_v14  ;;  %v5897_v18 = vadd.f32 %v4426_v17, %v2566_v15  ;;  %v4287_v17 = vpack.c.bf16 %v5923_v56, %v5918_v55  ;;  %v6008_v55 = vld [vmem:[%s6258_s7 + $0x3a0] sm:$0xff]  ;;  %v6013_v56 = vld [vmem:[%s6258_s7 + $0x3a8] sm:$0xff] }
 0x4a1   :  { %v2570_v19 = vpop.f32.mrb[48].mxu0 }
 0x4a2   :  { %v2578_v20 = vmax.f32 %v5897_v18, 0.0  ;;  %v2571_v21 = vadd.f32 %v2570_v19, %v2491_v6  ;;  %v4025_v38 = vpop.f32.mrb[49].mxu0  ;;  %v5952_v19 = vld [vmem:[%s6258_s7 + $0x2a0] sm:$0xff] }
 0x4a4   :  { %2581 = vst [vmem:[#allocation5 + $0x8] sm:$0xff] %v2578_v20  ;;  %v5902_v22 = vadd.f32 %v2571_v21, %v1712_v31  ;;  %v5957_v20 = vld [vmem:[%s6258_s7 + $0x2a8] sm:$0xff] }
 0x4a6   :  { %v2579_v23 = vmax.f32 %v5902_v22, 0.0 }
 0x4a7   :  { %v2583_v24 = vld [vmem:[#allocation5] sm:$0x7]  ;;  %v2585_v25 = vld [vmem:[#allocation5 + $0x3] sm:$0x7] }
 0x4a8   :  { %2584 = vst [vmem:[#allocation6 + $0x6] sm:$0x7] %v2583_v24  ;;  %2586 = vst [vmem:[#allocation6 + $0xb] sm:$0x7] %v2585_v25  ;;  %v5962_v25 = vld [vmem:[%s6258_s7 + $0x390] sm:$0xff] }
 0x4a9   :  { %2582 = vst [vmem:[#allocation5 + $0x10] sm:$0x3] %v2579_v23 }
 0x4ab   :  { %v2587_v27 = vld [vmem:[#allocation5 + $0x6] sm:$0x7]  ;;  %v2589_v28 = vld [vmem:[#allocation5 + $0x9] sm:$0x7]  ;;  %v2591_v29 = vld [vmem:[#allocation5 + $0xc] sm:$0x7] }
 0x4ac   :  { %2588 = vst [vmem:[#allocation6 + $0x10] sm:$0x7] %v2587_v27  ;;  %2590 = vst [vmem:[#allocation6 + $0x1f] sm:$0x7] %v2589_v28  ;;  %v5967_v27 = vld [vmem:[%s6258_s7 + $0x398] sm:$0xff] }
 0x4ad   :  { %2592 = vst [vmem:[#allocation6 + $0x24] sm:$0x7] %v2591_v29 }
 0x4af   :  { %v2626_v34 = vld [vmem:[#allocation6 + $0x6] sm:$0x7]  ;;  %v2631_v35 = vld [vmem:[#allocation6 + $0xb] sm:$0x7] }
 0x4b0   :  { %v2593_v32 = vld [vmem:[#allocation5 + $0xf] sm:$0x7]  ;;  %v2628_v30 = vrot.slane %v2626_v34, 5  ;;  %v2633_v31 = vrot.slane %v2631_v35, 2  ;;  %v2597_v36 = vld [vmem:[#allocation6 + $0x5] sm:$0x7] }
 0x4b1   :  { %2594 = vst [vmem:[#allocation6 + $0x29] sm:$0x7] %v2593_v32  ;;  %v2602_v42 = vld [vmem:[#allocation6 + $0xa] sm:$0x7]  ;;  %v2599_v43 = vrot.slane %v2597_v36, 5  ;;  %v5972_v34 = vld [vmem:[%s6258_s7 + $0x310] sm:$0xff] }
 0x4b2   :  { %v2604_v44 = vrot.slane %v2602_v42, 2  ;;  %v2682_v45 = vld [vmem:[#allocation6 + $0x5] sm:$0x7]  ;;  %v2684_v46 = vld [vmem:[#allocation6 + $0xa] sm:$0x7]  ;;  %v4317_v42 = vpack.c.bf16 %v5933_v2, %v5928_v1  ;;  %v6032_v1 = vld [vmem:[%s6258_s7 + $0x230] sm:$0xff] }
 0x4b3   :  { %2630 = vst [vmem:[#allocation7 + $0x8] sm:$0x38] %v2628_v30  ;;  %2635 = vst [vmem:[#allocation7 + $0x50] ss:$-68 sps:$4 sm:$0xc1] %v2633_v31   ;;  %v2686_v54 = vrot.slane %v2684_v46, 5 }
 0x4b4   :  { %2683 = vst [vmem:[#allocation7 + $0x18] sm:$0x7] %v2682_v45  ;;  %v2655_v40 = vld [vmem:[#allocation6 + $0x7] sm:$0x7]  ;;  %v2660_v47 = vld [vmem:[#allocation6 + $0xc] sm:$0x7] }
 0x4b5   :  { %2601 = vst [vmem:[#allocation7] sm:$0x38] %v2599_v43  ;;  %2606 = vst [vmem:[#allocation7 + $0x48] ss:$-68 sps:$4 sm:$0xc1] %v2604_v44   ;;  %v2657_v58 = vrot.slane %v2655_v40, 5 }
 0x4b6   :  { %v2642_v48 = vld [vmem:[#allocation6 + $0x1f] sm:$0x7]  ;;  %v2647_v49 = vld [vmem:[#allocation6 + $0x24] sm:$0x7]  ;;  %v2689_v50 = vld [vmem:[#allocation6 + $0xf] sm:$0x7] }
 0x4b7   :  { %v2644_v51 = vrot.slane %v2642_v48, 4  ;;  %v2649_v52 = vrot.slane %v2647_v49, 1  ;;  %2688 = vst [vmem:[#allocation7 + $0x18] sm:$0x38] %v2686_v54  ;;  %v2691_v53 = vrot.slane %v2689_v50, 2  ;;  %v2662_v33 = vrot.slane %v2660_v47, 2 }
 0x4b8   :  { %v2613_v57 = vld [vmem:[#allocation6 + $0x1e] sm:$0x7]  ;;  %v2618_v60 = vld [vmem:[#allocation6 + $0x23] sm:$0x7]  ;;  %2659 = vst [vmem:[#allocation7 + $0x10] sm:$0x38] %v2657_v58 }
 0x4b9   :  { %v2615_v59 = vrot.slane %v2613_v57, 4  ;;  %v2695_v61 = vld [vmem:[#allocation6 + $0x1e] sm:$0x7]  ;;  %2646 = vst [vmem:[#allocation7 + $0x50] sm:$0x70] %v2644_v51  ;;  %v2620_v63 = vrot.slane %v2618_v60, 1 }
 0x4ba   :  { %2651 = vst [vmem:[#allocation7 + $0x98] ss:$-68 sps:$4 sm:$0x83] %v2649_v52   ;;  %2693 = vst [vmem:[#allocation7 + $0x60] ss:$-68 sps:$4 sm:$0xc1] %v2691_v53   ;;  %v4291_v53 = vpack.c.bf16 %v5957_v20, %v5952_v19 }
 0x4bb   :  { %v2697_v37 = vrot.slane %v2695_v61, 7  ;;  %v2700_v39 = vld [vmem:[#allocation6 + $0x23] sm:$0x7]  ;;  %v2671_v0 = vld [vmem:[#allocation6 + $0x20] sm:$0x7]  ;;  %v5984_v43 = vld [vmem:[%s6258_s7 + $0x220] sm:$0xff] }
 0x4bc   :  { %2617 = vst [vmem:[#allocation7 + $0x48] sm:$0x70] %v2615_v59  ;;  %2664 = vst [vmem:[#allocation7 + $0x58] ss:$-68 sps:$4 sm:$0xc1] %v2662_v33   ;;  %v2702_v3 = vrot.slane %v2700_v39, 4  ;;  %v4319_v33 = vpack.c.bf16 %v5967_v27, %v5962_v25 }
 0x4bd   :  { %v2705_v4 = vld [vmem:[#allocation6 + $0x28] sm:$0x7]  ;;  %v2673_v5 = vrot.slane %v2671_v0, 4  ;;  %v2676_v6 = vld [vmem:[#allocation6 + $0x25] sm:$0x7]  ;;  %v2856_v24 = vld [vmem:[#allocation7] sm:$0xff] }
 0x4be   :  { %2622 = vst [vmem:[#allocation7 + $0x90] ss:$-68 sps:$4 sm:$0x83] %v2620_v63   ;;  %2699 = vst [vmem:[#allocation7 + $0x60] sm:$0xe] %v2697_v37  ;;  %v2707_v11 = vrot.slane %v2705_v4, 1 }
 0x4bf   :  { %v2678_v13 = vrot.slane %v2676_v6, 1  ;;  %v2740_v14 = vld [vmem:[#allocation6 + $0x7] sm:$0x7]  ;;  %v2742_v15 = vld [vmem:[#allocation6 + $0xc] sm:$0x7]  ;;  %v5989_v44 = vld [vmem:[%s6258_s7 + $0x228] sm:$0xff] }
 0x4c0   :  { %v2857_v16 = vld [vmem:[#allocation7 + $0x8] sm:$0xff]  ;;  %2704 = vst [vmem:[#allocation7 + $0x60] sm:$0x70] %v2702_v3  ;;  %2675 = vst [vmem:[#allocation7 + $0x58] sm:$0x70] %v2673_v5  ;;  %v2744_v21 = vrot.slane %v2742_v15, 5  ;;  %v4293_v9 = vpack.c.bf16 %v5989_v44, %v5984_v43 }
 0x4c1   :  { %2741 = vst [vmem:[#allocation7 + $0x28] sm:$0x7] %v2740_v14  ;;  %v2747_v38 = vld [vmem:[#allocation6 + $0x11] sm:$0x7]  ;;  %v2798_v23 = vld [vmem:[#allocation6 + $0xb] sm:$0x7]  ;;  %3098 = vmatprep.mubr.f32.mxu1 %v2857_v16 }
 0x4c2   :  { %2709 = vst [vmem:[#allocation7 + $0xa8] ss:$-68 sps:$4 sm:$0x83] %v2707_v11   ;;  %2680 = vst [vmem:[#allocation7 + $0xa0] ss:$-68 sps:$4 sm:$0x83] %v2678_v13   ;;  %3099 = vmatmul.mubr.f32.vlgmr.msra.gmra.mrb[28].mxu1 %v2856_v24 }
 0x4c3   :  { %v2749_v28 = vrot.slane %v2747_v38, 2  ;;  %2799 = vst [vmem:[#allocation7 + $0x38] sm:$0x7] %v2798_v23  ;;  %v2800_v29 = vld [vmem:[#allocation6 + $0x10] sm:$0x7]  ;;  %v5977_v35 = vld [vmem:[%s6258_s7 + $0x318] sm:$0xff]  ;;  %4286 = vmatpush3.bf16.msra.mxu1 %v4285_v7  ;;  %v4323_v23 = vpack.c.bf16 %v6013_v56, %v6008_v55 }
 0x4c4   :  { %v2711_v32 = vld [vmem:[#allocation6 + $0x6] sm:$0x7]  ;;  %2746 = vst [vmem:[#allocation7 + $0x28] sm:$0x38] %v2744_v21  ;;  %v2802_v30 = vrot.slane %v2800_v29, 5  ;;  %v2859_v41 = vld [vmem:[#allocation7 + $0x18] sm:$0xff]  ;;  %4288 = vmatprep.subr.bf16.mxu1 %v4287_v17  ;;  %v4321_v0 = vpack.c.bf16 %v5977_v35, %v5972_v34 }
 0x4c5   :  { %2712 = vst [vmem:[#allocation7 + $0x20] sm:$0x7] %v2711_v32  ;;  %v2713_v31 = vld [vmem:[#allocation6 + $0xb] sm:$0x7]  ;;  %v2718_v36 = vld [vmem:[#allocation6 + $0x10] sm:$0x7]  ;;  %3178 = vmatprep.mubr.f32.mxu0 %v2859_v41 }
 0x4c6   :  { %2751 = vst [vmem:[#allocation7 + $0x70] ss:$-68 sps:$4 sm:$0xc1] %v2749_v28   ;;  %v2715_v45 = vrot.slane %v2713_v31, 5  ;;  %v2720_v46 = vrot.slane %v2718_v36, 2  ;;  %v2866_v47 = vld [vmem:[#allocation7 + $0x50] sm:$0xff] }
 0x4c7   :  { %v2753_v54 = vld [vmem:[#allocation6 + $0x20] sm:$0x7]  ;;  %v2758_v40 = vld [vmem:[#allocation6 + $0x25] sm:$0x7]  ;;  %v5996_v48 = vld [vmem:[%s6258_s7 + $0x2b0] sm:$0xff]  ;;  %3103 = vmatprep.mubr.f32.mxu1 %v2866_v47  ;;  %4290 = vmatpush3.bf16.msra.mxu1 %v4289_v62 }
 0x4c8   :  { %v6001_v49 = vld [vmem:[%s6258_s7 + $0x2b8] sm:$0xff]  ;;  %2804 = vst [vmem:[#allocation7 + $0x38] sm:$0x38] %v2802_v30  ;;  %v2755_v50 = vrot.slane %v2753_v54, 7  ;;  %v2760_v51 = vrot.slane %v2758_v40, 4  ;;  %v2858_v52 = vld [vmem:[#allocation7 + $0x10] sm:$0xff]  ;;  %4292 = vmatprep.subr.bf16.mxu1 %v4291_v53 }
 0x4c9   :  { %2717 = vst [vmem:[#allocation7 + $0x20] sm:$0x38] %v2715_v45  ;;  %2722 = vst [vmem:[#allocation7 + $0x68] ss:$-68 sps:$4 sm:$0xc1] %v2720_v46   ;;  %v2865_v59 = vld [vmem:[#allocation7 + $0x48] sm:$0xff]  ;;  %3179 = vmatmul.mubr.f32.vlgmr.msra.gmra.mrb[50].mxu0 %v2858_v52  ;;  %v4295_v19 = vpack.c.bf16 %v6001_v49, %v5996_v48 }
 0x4ca   :  { %v2763_v57 = vld [vmem:[#allocation6 + $0x2a] sm:$0x7]  ;;  %v2724_v58 = vld [vmem:[#allocation6 + $0x1f] sm:$0x7]  ;;  %v2875_v60 = vld [vmem:[#allocation7 + $0x98] sm:$0x3]  ;;  %3104 = vmatmul.mubr.f32.gmra.mrb[30].mxu1 %v2865_v59  ;;  %4318 = vmatpush3.bf16.msra.mxu0 %v4317_v42 }
 0x4cb   :  { %v6020_v61 = vld [vmem:[%s6258_s7 + $0x320] sm:$0xff]  ;;  %v6025_v63 = vld [vmem:[%s6258_s7 + $0x328] sm:$0xff]  ;;  %2757 = vst [vmem:[#allocation7 + $0x70] sm:$0xe] %v2755_v50  ;;  %2762 = vst [vmem:[#allocation7 + $0x70] sm:$0x70] %v2760_v51  ;;  %3108 = vmatprep.mubr.f32.mxu1 %v2875_v60  ;;  %4320 = vmatprep.subr.bf16.mxu0 %v4319_v33 }
 0x4cc   :  { %v2765_v37 = vrot.slane %v2763_v57, 1  ;;  %v2726_v39 = vrot.slane %v2724_v58, 7  ;;  %v6037_v2 = vld [vmem:[%s6258_s7 + $0x238] sm:$0xff]  ;;  %v6042_v3 = vld [vmem:[%s6258_s7 + $0x3b0] sm:$0xff]  ;;  %v2734_v5 = vld [vmem:[#allocation6 + $0x29] sm:$0x7]  ;;  %v4325_v34 = vpack.c.bf16 %v6025_v63, %v6020_v61  ;;  %4294 = vmatpush3.bf16.msra.mxu1 %v4293_v9 }
 0x4cd   :  { %v2729_v4 = vld [vmem:[#allocation6 + $0x24] sm:$0x7]  ;;  %v2769_v6 = vld [vmem:[#allocation6 + $0xa] sm:$0x7]  ;;  %v2868_v7 = vld [vmem:[#allocation7 + $0x60] sm:$0xff]  ;;  %v2736_v16 = vrot.slane %v2734_v5, 1  ;;  %v4297_v45 = vpack.c.bf16 %v6037_v2, %v6032_v1  ;;  %4296 = vmatprep.subr.bf16.mxu1 %v4295_v19 }
 0x4ce   :  { %v2874_v8 = vld [vmem:[#allocation7 + $0x90] sm:$0x3]  ;;  %v6054_v13 = vld [vmem:[%s6258_s7 + $0x2c8] sm:$0xff]  ;;  %v6059_v14 = vld [vmem:[%s6258_s7 + $0x3b8] sm:$0xff]  ;;  %2728 = vst [vmem:[#allocation7 + $0x68] sm:$0xe] %v2726_v39  ;;  %3183 = vmatprep.mubr.f32.mxu0 %v2868_v7  ;;  %4322 = vmatpush3.bf16.msra.mxu0 %v4321_v0 }
 0x4cf   :  { %v6049_v11 = vld [vmem:[%s6258_s7 + $0x2c0] sm:$0xff]  ;;  %2767 = vst [vmem:[#allocation7 + $0xb8] ss:$-68 sps:$4 sm:$0x83] %v2765_v37   ;;  %v2731_v15 = vrot.slane %v2729_v4, 4  ;;  %v2867_v17 = vld [vmem:[#allocation7 + $0x58] sm:$0xff]  ;;  %3109 = vmatmul.mubr.f32.gmra.mrb[32].mxu1 %v2874_v8  ;;  %v4327_v46 = vpack.c.bf16 %v6059_v14, %v6042_v3  ;;  %4324 = vmatprep.subr.bf16.mxu0 %v4323_v23 }
 0x4d0   :  { %2770 = vst [vmem:[#allocation7 + $0x30] sm:$0x7] %v2769_v6  ;;  %v2771_v20 = vld [vmem:[#allocation6 + $0xf] sm:$0x7]  ;;  %v2811_v21 = vld [vmem:[#allocation6 + $0x24] sm:$0x7]  ;;  %3184 = vmatmul.mubr.f32.gmra.mrb[52].mxu0 %v2867_v17  ;;  %v4299_v62 = vpack.c.bf16 %v6054_v13, %v6049_v11  ;;  %4298 = vmatpush3.bf16.msra.mxu1 %v4297_v45 }
 0x4d1   :  { %v2877_v38 = vld [vmem:[#allocation7 + $0xa8] sm:$0x3]  ;;  %v6068_v24 = vld [vmem:[%s6258_s7 + $0x330] sm:$0xff]  ;;  %2733 = vst [vmem:[#allocation7 + $0x68] sm:$0x70] %v2731_v15  ;;  %v2773_v27 = vrot.slane %v2771_v20, 5 }
 0x4d2   :  { %v6073_v25 = vld [vmem:[%s6258_s7 + $0x338] sm:$0xff]  ;;  %2738 = vst [vmem:[#allocation7 + $0xb0] ss:$-68 sps:$4 sm:$0x83] %v2736_v16   ;;  %v2813_v28 = vrot.slane %v2811_v21, 7  ;;  %v2955_v35 = vld [vmem:[%s6258_s7 + $0x240] sm:$0xff]  ;;  %3188 = vmatprep.mubr.f32.mxu0 %v2877_v38  ;;  %4326 = vmatpush3.bf16.msra.mxu0 %v4325_v34 }
 0x4d3   :  { %v2816_v29 = vld [vmem:[#allocation6 + $0x29] sm:$0x7]  ;;  %v2876_v32 = vld [vmem:[#allocation7 + $0xa0] sm:$0x3]  ;;  %v2956_v30 = vld [vmem:[%s6258_s7 + $0x248] sm:$0xff]  ;;  %v4329_v58 = vpack.c.bf16 %v6073_v25, %v6068_v24  ;;  %4328 = vmatprep.subr.bf16.mxu0 %v4327_v46  ;;  %4300 = vmatprep.subr.bf16.mxu1 %v4299_v62 }
 0x4d4   :  { %v3003_v31 = vld [vmem:[%s6258_s7 + $0x3c0] sm:$0xff]  ;;  %v2818_v36 = vrot.slane %v2816_v29, 4  ;;  %v2782_v42 = vld [vmem:[#allocation6 + $0x23] sm:$0x7]  ;;  %v3004_v54 = vld [vmem:[%s6258_s7 + $0x3c8] sm:$0xff]  ;;  %3189 = vmatmul.mubr.f32.gmra.mrb[54].mxu0 %v2876_v32  ;;  %v4301_v59 = vpack.c.bf16 %v2956_v30, %v2955_v35 }
 0x4d5   :  { %v2787_v43 = vld [vmem:[#allocation6 + $0x28] sm:$0x7]  ;;  %v2861_v44 = vld [vmem:[#allocation7 + $0x28] sm:$0xff]  ;;  %2775 = vst [vmem:[#allocation7 + $0x30] sm:$0x38] %v2773_v27  ;;  %v2784_v40 = vrot.slane %v2782_v42, 7  ;;  %v4331_v60 = vpack.c.bf16 %v3004_v54, %v3003_v31 }
 0x4d6   :  { %2815 = vst [vmem:[#allocation7 + $0x80] sm:$0xe] %v2813_v28  ;;  %v2789_v47 = vrot.slane %v2787_v43, 4  ;;  %v2827_v41 = vld [vmem:[#allocation6 + $0xc] sm:$0x7]  ;;  %3258 = vmatprep.mubr.f32.mxu1 %v2861_v44  ;;  %v2863_v51 = vld [vmem:[#allocation7 + $0x38] sm:$0xff]  ;;  %4330 = vmatpush3.bf16.msra.mxu0 %v4329_v58 }
 0x4d7   :  { %2820 = vst [vmem:[#allocation7 + $0x80] sm:$0x70] %v2818_v36  ;;  %2828 = vst [vmem:[#allocation7 + $0x40] sm:$0x7] %v2827_v41  ;;  %v2829_v48 = vld [vmem:[#allocation6 + $0x11] sm:$0x7]  ;;  %3338 = vmatprep.mubr.f32.mxu0 %v2863_v51  ;;  %4302 = vmatpush3.bf16.msra.mxu1 %v4301_v59 }
 0x4d8   :  { %v2840_v49 = vld [vmem:[#allocation6 + $0x25] sm:$0x7]  ;;  %v2845_v50 = vld [vmem:[#allocation6 + $0x2a] sm:$0x7]  ;;  %v2973_v52 = vld [vmem:[%s6258_s7 + $0x2d0] sm:$0xff]  ;;  %v2831_v55 = vrot.slane %v2829_v48, 5  ;;  %4332 = vmatprep.subr.bf16.mxu0 %v4331_v60 }
 0x4d9   :  { %v2974_v53 = vld [vmem:[%s6258_s7 + $0x2d8] sm:$0xff]  ;;  %2786 = vst [vmem:[#allocation7 + $0x78] sm:$0xe] %v2784_v40  ;;  %2791 = vst [vmem:[#allocation7 + $0x78] sm:$0x70] %v2789_v47  ;;  %v2842_v56 = vrot.slane %v2840_v49, 7 }
 0x4da   :  { %v2847_v57 = vrot.slane %v2845_v50, 4  ;;  %v2957_v33 = vld [vmem:[%s6258_s7 + $0x250] sm:$0xff]  ;;  %v2987_v61 = vld [vmem:[%s6258_s7 + $0x340] sm:$0xff]  ;;  %v2988_v63 = vld [vmem:[%s6258_s7 + $0x348] sm:$0xff]  ;;  %2833 = vst [vmem:[#allocation7 + $0x40] sm:$0x38] %v2831_v55  ;;  %v4303_v37 = vpack.c.bf16 %v2974_v53, %v2973_v52 }
 0x4db   :  { %2844 = vst [vmem:[#allocation7 + $0x88] sm:$0xe] %v2842_v56  ;;  %v2958_v39 = vld [vmem:[%s6258_s7 + $0x258] sm:$0xff]  ;;  %v3005_v0 = vld [vmem:[%s6258_s7 + $0x3d0] sm:$0xff]  ;;  %v2975_v2 = vld [vmem:[%s6258_s7 + $0x2e0] sm:$0xff]  ;;  %v4333_v4 = vpack.c.bf16 %v2988_v63, %v2987_v61 }
 0x4dc   :  { %2849 = vst [vmem:[#allocation7 + $0x88] sm:$0x70] %v2847_v57  ;;  %v3006_v1 = vld [vmem:[%s6258_s7 + $0x3d8] sm:$0xff]  ;;  %v2976_v3 = vld [vmem:[%s6258_s7 + $0x2e8] sm:$0xff]  ;;  %v4305_v5 = vpack.c.bf16 %v2958_v39, %v2957_v33  ;;  %v2959_v7 = vld [vmem:[%s6258_s7 + $0x260] sm:$0xff]  ;;  %4304 = vmatprep.subr.bf16.mxu1 %v4303_v37 }
 0x4dd   :  { %v4335_v6 = vpack.c.bf16 %v3006_v1, %v3005_v0  ;;  %v2989_v8 = vld [vmem:[%s6258_s7 + $0x350] sm:$0xff]  ;;  %v2990_v9 = vld [vmem:[%s6258_s7 + $0x358] sm:$0xff]  ;;  %v4307_v11 = vpack.c.bf16 %v2976_v3, %v2975_v2  ;;  %v2960_v13 = vld [vmem:[%s6258_s7 + $0x268] sm:$0xff]  ;;  %4334 = vmatpush3.bf16.msra.mxu0 %v4333_v4 }
 0x4de   :  { %v3007_v14 = vld [vmem:[%s6258_s7 + $0x3e0] sm:$0xff]  ;;  %v3008_v15 = vld [vmem:[%s6258_s7 + $0x3e8] sm:$0xff]  ;;  %v2977_v16 = vld [vmem:[%s6258_s7 + $0x2f0] sm:$0xff]  ;;  %v4337_v19 = vpack.c.bf16 %v2990_v9, %v2989_v8  ;;  %4306 = vmatpush3.bf16.msra.mxu1 %v4305_v5  ;;  %v4309_v20 = vpack.c.bf16 %v2960_v13, %v2959_v7 }
 0x4df   :  { %v2978_v17 = vld [vmem:[%s6258_s7 + $0x2f8] sm:$0xff]  ;;  %4336 = vmatprep.subr.bf16.mxu0 %v4335_v6  ;;  %v4339_v21 = vpack.c.bf16 %v3008_v15, %v3007_v14  ;;  %v2961_v38 = vld [vmem:[%s6258_s7 + $0x270] sm:$0xff]  ;;  %v2991_v23 = vld [vmem:[%s6258_s7 + $0x360] sm:$0xff]  ;;  %4308 = vmatprep.subr.bf16.mxu1 %v4307_v11 }
 0x4e0   :  { %v2992_v24 = vld [vmem:[%s6258_s7 + $0x368] sm:$0xff]  ;;  %v4311_v25 = vpack.c.bf16 %v2978_v17, %v2977_v16  ;;  %v2962_v27 = vld [vmem:[%s6258_s7 + $0x278] sm:$0xff]  ;;  %v3009_v28 = vld [vmem:[%s6258_s7 + $0x3f0] sm:$0xff] }
 0x4e1   :  { %v3010_v29 = vld [vmem:[%s6258_s7 + $0x3f8] sm:$0xff]  ;;  %4338 = vmatpush3.bf16.msra.mxu0 %v4337_v19  ;;  %v4341_v32 = vpack.c.bf16 %v2992_v24, %v2991_v23  ;;  %v4313_v34 = vpack.c.bf16 %v2962_v27, %v2961_v38  ;;  %v2993_v30 = vld [vmem:[%s6258_s7 + $0x370] sm:$0xff]  ;;  %v3011_v36 = vld [vmem:[%s6258_s7 + $0x400] sm:$0xff] }
 0x4e2   :  { %4310 = vmatpush3.bf16.msra.mxu1 %v4309_v20  ;;  %4340 = vmatprep.subr.bf16.mxu0 %v4339_v21  ;;  %v4343_v35 = vpack.c.bf16 %v3010_v29, %v3009_v28  ;;  %v2994_v31 = vld [vmem:[%s6258_s7 + $0x378] sm:$0xff]  ;;  %v3012_v42 = vld [vmem:[%s6258_s7 + $0x408] sm:$0xff]  ;;  %v3013_v45 = vld [vmem:[%s6258_s7 + $0x410] sm:$0xff] }
 0x4e3   :  { %4312 = vmatprep.subr.bf16.mxu1 %v4311_v25  ;;  %v4345_v43 = vpack.c.bf16 %v2994_v31, %v2993_v30  ;;  %v4348_v44 = vpack.c.bf16 %v3012_v42, %v3011_v36  ;;  %v3014_v46 = vld [vmem:[%s6258_s7 + $0x418] sm:$0xff]  ;;  %v2860_v54 = vld [vmem:[#allocation7 + $0x20] sm:$0xff]  ;;  %v2870_v40 = vld [vmem:[#allocation7 + $0x70] sm:$0xff] }
 0x4e4   :  { %v4351_v47 = vpack.c.bf16 %v3014_v46, %v3013_v45  ;;  %v2862_v41 = vld [vmem:[#allocation7 + $0x30] sm:$0xff]  ;;  %v3016_v48 = vld [vmem:[%s6258_s7 + $0x428] sm:$0xff]  ;;  %v2869_v49 = vld [vmem:[#allocation7 + $0x68] sm:$0xff] }
 0x4e5   :  { %4342 = vmatpush3.bf16.msra.mxu0 %v4341_v32  ;;  %v3015_v62 = vld [vmem:[%s6258_s7 + $0x420] sm:$0xff]  ;;  %v2872_v50 = vld [vmem:[#allocation7 + $0x80] sm:$0xff]  ;;  %v2879_v51 = vld [vmem:[#allocation7 + $0xb8] sm:$0x3] }
 0x4e6   :  { %4314 = vmatpush3.bf16.msra.mxu1 %v4313_v34  ;;  %4344 = vmatprep.subr.bf16.mxu0 %v4343_v35  ;;  %v4354_v52 = vpack.c.bf16 %v3016_v48, %v3015_v62  ;;  %v2881_v53 = vld [vmem:[#allocation7 + $0xc8] sm:$0x3]  ;;  %v2871_v55 = vld [vmem:[#allocation7 + $0x78] sm:$0xff]  ;;  %v3017_v56 = vld [vmem:[%s6258_s7 + $0x430] sm:$0xff] }
 0x4e7   :  { %4347 = vmatprep.subr.bf16.mxu1 %v4431_v10  ;;  %v3018_v57 = vld [vmem:[%s6258_s7 + $0x438] sm:$0xff]  ;;  %v2878_v58 = vld [vmem:[#allocation7 + $0xb0] sm:$0x3]  ;;  %v2880_v59 = vld [vmem:[#allocation7 + $0xc0] sm:$0x3] }
 0x4e8   :  { %v4357_v60 = vpack.c.bf16 %v3018_v57, %v3017_v56  ;;  %v3019_v33 = vld [vmem:[%s6258_s7 + $0x440] sm:$0xff]  ;;  %v3020_v61 = vld [vmem:[%s6258_s7 + $0x448] sm:$0xff]  ;;  %v3021_v37 = vld [vmem:[%s6258_s7 + $0x450] sm:$0xff] }
 0x4e9   :  { %3259 = vmatmul.mubr.f32.vlgmr.msra.gmra.mrb[34].mxu1 %v2860_v54  ;;  %4346 = vmatpush3.bf16.msra.mxu0 %v4345_v43  ;;  %v4360_v63 = vpack.c.bf16 %v3020_v61, %v3019_v33  ;;  %v3022_v39 = vld [vmem:[%s6258_s7 + $0x458] sm:$0xff]  ;;  %v3023_v1 = vld [vmem:[%s6258_s7 + $0x460] sm:$0xff]  ;;  %v3024_v2 = vld [vmem:[%s6258_s7 + $0x468] sm:$0xff] }
 0x4ea   :  { %3263 = vmatprep.mubr.f32.mxu1 %v2870_v40  ;;  %4349 = vmatpush3.bf16.msra.mxu1 %v4348_v44  ;;  %v4363_v0 = vpack.c.bf16 %v3022_v39, %v3021_v37  ;;  %v4366_v3 = vpack.c.bf16 %v3024_v2, %v3023_v1  ;;  %v3025_v4 = vld [vmem:[%s6258_s7 + $0x470] sm:$0xff]  ;;  %v3026_v5 = vld [vmem:[%s6258_s7 + $0x478] sm:$0xff]  ;;  %v2882_v9 = vld [vmem:[#allocation7 + $0xd0] sm:$0x3] }
 0x4eb   :  { %4350 = vmatprep.subr.bf16.mxu1 %v4431_v10  ;;  %v4369_v6 = vpack.c.bf16 %v3026_v5, %v3025_v4  ;;  %v2864_v7 = vld [vmem:[#allocation7 + $0x40] sm:$0xff]  ;;  %v2873_v8 = vld [vmem:[#allocation7 + $0x88] sm:$0xff] }
 0x4ec   :  { %3339 = vmatmul.mubr.f32.vlgmr.msra.gmra.mrb[56].mxu0 %v2862_v41 }
 0x4ed   :  { %3264 = vmatmul.mubr.f32.gmra.mrb[36].mxu1 %v2869_v49  ;;  %3343 = vmatprep.mubr.f32.mxu0 %v2872_v50 }
 0x4ee   :  { %3268 = vmatprep.mubr.f32.mxu1 %v2879_v51  ;;  %4352 = vmatpush3.bf16.msra.mxu1 %v4351_v47 }
 0x4ef   :  { %4353 = vmatprep.subr.bf16.mxu1 %v4431_v10 }
 0x4f0   :  { %3344 = vmatmul.mubr.f32.gmra.mrb[58].mxu0 %v2871_v55 }
 0x4f1   :  { %3269 = vmatmul.mubr.f32.gmra.mrb[38].mxu1 %v2878_v58  ;;  %3348 = vmatprep.mubr.f32.mxu0 %v2881_v53 }
 0x4f2   :  { %4355 = vmatpush3.bf16.msra.mxu1 %v4354_v52  ;;  %4058 = vmatprep.mubr.msk.f32.mxu1 %vm4432_vm13, %v4430_v26 }
 0x4f3   :  { %4356 = vmatprep.subr.bf16.mxu1 %v4431_v10 }
 0x4f4   :  { %3349 = vmatmul.mubr.f32.gmra.mrb[60].mxu0 %v2880_v59 }
 0x4f6   :  { %4358 = vmatpush3.bf16.msra.mxu1 %v4357_v60 }
 0x4f7   :  { %4359 = vmatprep.subr.bf16.mxu1 %v4431_v10 }
 0x4fa   :  { %4361 = vmatpush3.bf16.msra.mxu1 %v4360_v63 }
 0x4fb   :  { %4362 = vmatprep.subr.bf16.mxu1 %v4431_v10 }
 0x4fe   :  { %4364 = vmatpush3.bf16.msra.mxu1 %v4363_v0 }
 0x4ff   :  { %4365 = vmatprep.subr.bf16.mxu1 %v4431_v10 }
 0x502   :  { %4367 = vmatpush3.bf16.msra.mxu1 %v4366_v3 }
 0x503   :  { %4368 = vmatprep.subr.bf16.mxu1 %v4431_v10  ;;  %v3498_v10 = vld [vmem:[%s6260_s8] ss:$0 sm:$0xff] }
 0x506   :  { %4370 = vmatpush3.bf16.msra.mxu1 %v4369_v6 }
 0x509   :  { %4059 = vmatmul.mubr.f32.vlgmr.msra.gmra.mrb[40].mxu1 %v2864_v7 }
 0x50a   :  { %4061 = vmatprep.mubr.msk.f32.mxu1 %vm4432_vm13, %v4430_v26 }
 0x50d   :  { %4062 = vmatmul.mubr.f32.gmra.mrb[42].mxu1 %v2873_v8 }
 0x50e   :  { %4064 = vmatprep.mubr.msk.f32.mxu1 %vm4432_vm13, %v4430_v26 }
 0x511   :  { %4065 = vmatmul.mubr.f32.gmra.mrb[44].mxu1 %v2882_v9 }
 0x595   :  { %v3834_v11 = vpop.f32.mrb[28].mxu1 }
 0x596   :  { %v3835_v13 = vpop.f32.mrb[29].mxu1 }
 0x597   :  { %v3836_v14 = vadd.f32 %v3835_v13, %v3834_v11 }
 0x599   :  { %v3101_v19 = vadd.f32 %v3836_v14, %v3498_v10 }
 0x59c   :  { %v3875_v15 = vpop.f32.mrb[50].mxu0 }
 0x59d   :  { %v3837_v16 = vpop.f32.mrb[30].mxu1  ;;  %v3876_v17 = vpop.f32.mrb[51].mxu0 }
 0x59e   :  { %v3838_v20 = vpop.f32.mrb[31].mxu1  ;;  %v3877_v21 = vadd.f32 %v3876_v17, %v3875_v15 }
 0x59f   :  { %v3839_v38 = vadd.f32 %v3838_v20, %v3837_v16 }
 0x5a0   :  { %v3181_v23 = vadd.f32 %v3877_v21, %v3101_v19 }
 0x5a1   :  { %v3106_v27 = vadd.f32 %v3839_v38, %v3498_v10 }
 0x5a2   :  { %v3840_v25 = vpop.f32.mrb[32].mxu1 }
 0x5a3   :  { %v3878_v24 = vpop.f32.mrb[52].mxu0  ;;  %v3841_v28 = vpop.f32.mrb[33].mxu1 }
 0x5a4   :  { %v3879_v26 = vpop.f32.mrb[53].mxu0  ;;  %v3842_v32 = vadd.f32 %v3841_v28, %v3840_v25 }
 0x5a5   :  { %v3880_v29 = vadd.f32 %v3879_v26, %v3878_v24 }
 0x5a6   :  { %v3111_v31 = vadd.f32 %v3842_v32, %v3498_v10 }
 0x5a7   :  { %v3186_v34 = vadd.f32 %v3880_v29, %v3106_v27  ;;  %v3881_v35 = vpop.f32.mrb[54].mxu0 }
 0x5a8   :  { %v3882_v30 = vpop.f32.mrb[55].mxu0 }
 0x5a9   :  { %v3883_v36 = vadd.f32 %v3882_v30, %v3881_v35 }
 0x5ab   :  { %v3191_v42 = vadd.f32 %v3883_v36, %v3111_v31 }
 0x5bc   :  { %v3916_v43 = vpop.f32.mrb[34].mxu1 }
 0x5bd   :  { %v3917_v44 = vpop.f32.mrb[35].mxu1 }
 0x5be   :  { %v3918_v45 = vadd.f32 %v3917_v44, %v3916_v43 }
 0x5bf   :  { %v3957_v46 = vpop.f32.mrb[56].mxu0 }
 0x5c0   :  { %v3261_v54 = vadd.f32 %v3918_v45, %v3181_v23  ;;  %v3919_v40 = vpop.f32.mrb[36].mxu1  ;;  %v3958_v47 = vpop.f32.mrb[57].mxu0 }
 0x5c1   :  { %v3920_v41 = vpop.f32.mrb[37].mxu1  ;;  %v3959_v62 = vadd.f32 %v3958_v47, %v3957_v46 }
 0x5c2   :  { %v3921_v48 = vadd.f32 %v3920_v41, %v3919_v40 }
 0x5c3   :  { %v3960_v49 = vpop.f32.mrb[58].mxu0  ;;  %v3341_v50 = vadd.f32 %v3959_v62, %v3261_v54 }
 0x5c4   :  { %v3266_v51 = vadd.f32 %v3921_v48, %v3186_v34  ;;  %v3922_v52 = vpop.f32.mrb[38].mxu1  ;;  %v3961_v53 = vpop.f32.mrb[59].mxu0 }
 0x5c5   :  { %v3923_v55 = vpop.f32.mrb[39].mxu1  ;;  %v3962_v56 = vadd.f32 %v3961_v53, %v3960_v49 }
 0x5c6   :  { %v3924_v57 = vadd.f32 %v3923_v55, %v3922_v52 }
 0x5c7   :  { %v3963_v58 = vpop.f32.mrb[60].mxu0  ;;  %v3346_v59 = vadd.f32 %v3962_v56, %v3266_v51 }
 0x5c8   :  { %v3271_v60 = vadd.f32 %v3924_v57, %v3191_v42  ;;  %v3964_v33 = vpop.f32.mrb[61].mxu0 }
 0x5c9   :  { %v3965_v61 = vadd.f32 %v3964_v33, %v3963_v58 }
 0x5cb   :  { %v3351_v63 = vadd.f32 %v3965_v61, %v3271_v60 }
 0x5dc   :  { %v3420_v37 = vpop.f32.mrb[40].mxu1 }
 0x5dd   :  { %v3421_v39 = vadd.f32 %v3420_v37, %v3341_v50  ;;  %v4060_v0 = vpop.f32.mrb[41].mxu1 }
 0x5df   :  { %v3434_v1 = vadd.f32 %v3421_v39, %v5894_v12 }
 0x5e0   :  { %v3425_v2 = vpop.f32.mrb[42].mxu1 }
 0x5e1   :  { %v3437_v3 = vmax.f32 %v3434_v1, 0.0  ;;  %v3426_v4 = vadd.f32 %v3425_v2, %v3346_v59  ;;  %v4063_v5 = vpop.f32.mrb[43].mxu1 }
 0x5e3   :  { %3440 = vst [vmem:[%s6261_s9] sm:$0xff] %v3437_v3  ;;  %v3435_v6 = vadd.f32 %v3426_v4, %v5897_v18 }
 0x5e4   :  { %v3430_v7 = vpop.f32.mrb[44].mxu1 }
 0x5e5   :  { %v3438_v8 = vmax.f32 %v3435_v6, 0.0  ;;  %v3431_v9 = vadd.f32 %v3430_v7, %v3351_v63  ;;  %v4066_v11 = vpop.f32.mrb[45].mxu1 }
 0x5e7   :  { %3441 = vst [vmem:[%s6261_s9 + $0x8] sm:$0xff] %v3438_v8  ;;  %v3436_v12 = vadd.f32 %v3431_v9, %v5902_v22 }
 0x5e9   :  { %v3439_v13 = vmax.f32 %v3436_v12, 0.0 }
 0x5eb   :  { %3442 = vst [vmem:[%s6261_s9 + $0x10] sm:$0x3] %v3439_v13 }

</bundles_post_ra>
